<compile_context>
chip_gen: v7x
topology: tpu7x:2x2x1
jax: 0.10.0
libtpu: 0.0.40
codegen_flags: <defaults>
</compile_context>

<pallas_src>
import functools

import jax
import jax.numpy as jnp
from jax.experimental import pallas as pl
from jax.experimental.pallas import tpu as pltpu


# ----------------------------------------------------------------------------
# Model configuration (scaled-down demo of the torch VAE; SCALE=1/IMG=64 exact)
# ----------------------------------------------------------------------------
SCALE = 8                  # channel-width divisor vs. the torch module
C1 = C2 = 128 // SCALE
C3 = C4 = 256 // SCALE
C5 = C6 = 512 // SCALE
NZ = 128                   # latent size (same as torch num_z)
IMG = 16                   # input spatial size (torch uses 64; 3 maxpools -> IMG//8)
FEAT = (IMG // 8) ** 2 * C6


def _round_up(x, m):
    return (x + m - 1) // m * m


def _div_tile(p, cap):
    """Largest multiple of 128 that divides p (p is a 128-multiple) and is <= cap."""
    t = min(p, cap)
    while p % t:
        t -= 128
    return t


# ----------------------------------------------------------------------------
# Pallas kernels
# ----------------------------------------------------------------------------
def _matmul_bias_act_kernel(x_ref, w_ref, b_ref, o_ref, acc_ref, *, activation):
    """One (TM,TN) output tile; grid axis 2 sweeps K with a resident f32 acc."""
    @pl.when(pl.program_id(2) == 0)
    def _():
        acc_ref[...] = jnp.zeros_like(acc_ref)

    acc_ref[...] += jnp.dot(x_ref[...], w_ref[...],
                            preferred_element_type=jnp.float32)

    @pl.when(pl.program_id(2) == pl.num_programs(2) - 1)
    def _():
        y = acc_ref[...] + b_ref[...]
        if activation == "relu":
            y = jnp.maximum(y, 0.0)
        elif activation == "sigmoid":
            y = jax.nn.sigmoid(y)
        o_ref[...] = y.astype(o_ref.dtype)


def _maxpool_kernel(x_ref, o_ref):
    """x_ref: (2*tr, Wo, 2, C) -> o_ref: (tr, Wo, C): 2x2 max pool."""
    v = jnp.maximum(x_ref[:, :, 0, :], x_ref[:, :, 1, :])     # pool W pairs
    tr, wo, c = o_ref.shape
    o_ref[...] = jnp.max(v.reshape(tr, 2, wo, c), axis=1)     # pool H pairs


# ----------------------------------------------------------------------------
# Wrappers
# ----------------------------------------------------------------------------
def matmul_packed(x, w_packed, b_packed, n_out, activation="none",
                  out_dtype=jnp.bfloat16):
    """act(x @ W + b) with pre-packed bf16 weight (Kp, Np) and f32 bias (1, Np).

    x: (M, K) with K <= Kp; cast to bf16 and zero-padded to (Mp, Kp) if needed.
    Returns (M, n_out) in out_dtype.  bf16 operands on the MXU, f32 accumulator.
    """
    M, K = x.shape
    Kp, Np = w_packed.shape
    assert K <= Kp and n_out <= Np

    TM = 256 if M >= 256 else _round_up(max(M, 8), 8)
    Mp = _round_up(M, TM)
    TK = _div_tile(Kp, 2048)
    tn_cap = 2048 if (Kp <= 512 and Np >= 1024) else 256   # small-K / large-N (fc_dec)
    TN = _div_tile(Np, tn_cap)

    xp = x.astype(jnp.bfloat16)
    if (Mp, Kp) != (M, K):
        xp = jnp.pad(xp, ((0, Mp - M), (0, Kp - K)))

    grid = (Mp // TM, Np // TN, Kp // TK)
    out = pl.pallas_call(
        functools.partial(_matmul_bias_act_kernel, activation=activation),
        out_shape=jax.ShapeDtypeStruct((Mp, Np), out_dtype),
        grid_spec=pltpu.PrefetchScalarGridSpec(
            num_scalar_prefetch=0,
            grid=grid,
            in_specs=[
                pl.BlockSpec((TM, TK), lambda i, j, k: (i, k)),
                pl.BlockSpec((TK, TN), lambda i, j, k: (k, j)),
                pl.BlockSpec((1, TN), lambda i, j, k: (0, j)),
            ],
            out_specs=pl.BlockSpec((TM, TN), lambda i, j, k: (i, j)),
            scratch_shapes=[pltpu.VMEM((TM, TN), jnp.float32)],
        ),
        compiler_params=pltpu.CompilerParams(
            dimension_semantics=("parallel", "parallel", "arbitrary"),
            vmem_limit_bytes=32 * 1024 * 1024,
        ),
    )(xp, w_packed, b_packed)
    return out[:M, :n_out]


def maxpool2x2(x):
    """MaxPool2d(2, stride=2, padding=0) on NHWC input, single Pallas kernel."""
    B, H, W, C = x.shape
    Ho, Wo = H // 2, W // 2
    rows = B * H                       # H even => consecutive row pairs share b
    xr = x.reshape(rows, Wo, 2, C)     # contiguous view, no copy
    itemsize = x.dtype.itemsize
    cap = 2 << 20                      # 2 MiB blocks: safe under v5e's 16 MiB scoped VMEM
    rb = 2
    for cand in (512, 256, 128, 64, 32, 16, 8, 4, 2):
        if rows % cand == 0 and cand * Wo * 2 * C * itemsize <= cap:
            rb = cand
            break
    out = pl.pallas_call(
        _maxpool_kernel,
        out_shape=jax.ShapeDtypeStruct((rows // 2, Wo, C), x.dtype),
        grid=(rows // rb,),
        in_specs=[pl.BlockSpec((rb, Wo, 2, C), lambda i: (i, 0, 0, 0))],
        out_specs=pl.BlockSpec((rb // 2, Wo, C), lambda i: (i, 0, 0)),
    )(xr)
    return out.reshape(B, Ho, Wo, C)


def conv2d(x, layer, kh, kw, padding, oc, activation):
    """Stride-1 conv on NHWC bf16 input; layer = pre-packed {"w": (Kp,Np), "b": (1,Np)}."""
    B, H, W, C = x.shape
    Ho = H + 2 * padding - kh + 1
    Wo = W + 2 * padding - kw + 1
    xp = jnp.pad(x, ((0, 0), (padding, padding), (padding, padding), (0, 0)))
    K = kh * kw * C
    Kp = layer["w"].shape[0]
    # bf16 NHWC im2col by slicing; column order = (di, dj, ic). Zero-fill to Kp
    # inside the same concatenate so no separate pad pass is needed.
    taps = [xp[:, di:di + Ho, dj:dj + Wo, :]
            for di in range(kh) for dj in range(kw)]
    if Kp > K:
        taps.append(jnp.zeros((B, Ho, Wo, Kp - K), x.dtype))
    cols = jnp.concatenate(taps, axis=-1).reshape(B * Ho * Wo, Kp)
    y = matmul_packed(cols, layer["w"], layer["b"], oc, activation, jnp.bfloat16)
    return y.reshape(B, Ho, Wo, oc)


# Sub-pixel taps for ConvTranspose2d(kernel=4, stride=2, padding=1):
# output row 2m+r gets contributions from input row m+dy through kernel tap ky.
_DECONV_TAPS = {0: ((-1, 3), (0, 1)), 1: ((0, 2), (1, 0))}


def conv_transpose2d(x, layer, oc, activation, out_dtype=jnp.bfloat16):
    """ConvTranspose2d(k=4, s=2, p=1) as 4 sub-pixel 2x2 convs, NHWC bf16 input."""
    B, H, W, C = x.shape
    K = 4 * C
    xp = jnp.pad(x, ((0, 0), (1, 1), (1, 1), (0, 0)))   # single bf16 padded copy
    subs = []
    for r in (0, 1):
        for s in (0, 1):
            w_packed = layer["w"][r * 2 + s]
            Kp = w_packed.shape[0]
            cols = [xp[:, 1 + dy:1 + dy + H, 1 + dx:1 + dx + W, :]
                    for dy, _ in _DECONV_TAPS[r] for dx, _ in _DECONV_TAPS[s]]
            if Kp > K:
                cols.append(jnp.zeros((B, H, W, Kp - K), x.dtype))
            cmat = jnp.concatenate(cols, axis=-1).reshape(B * H * W, Kp)
            subs.append(matmul_packed(cmat, w_packed, layer["b"], oc,
                                      activation, out_dtype).reshape(B, H, W, oc))
    # Interleave (b,h,w,.) -> (b,2h+r,2w+s,.) with stacks + a free reshape only.
    top = jnp.stack([subs[0], subs[1]], axis=3)          # (B,H,W,2,OC)
    bot = jnp.stack([subs[2], subs[3]], axis=3)
    y = jnp.stack([top, bot], axis=2)                    # (B,H,2,W,2,OC)
    return y.reshape(B, 2 * H, 2 * W, oc)


# ----------------------------------------------------------------------------
# Parameter initialization with matmul-ready pre-packing (done once, off-path)
# ----------------------------------------------------------------------------
def _pack_w(w_kn):
    K, N = w_kn.shape
    Kp, Np = _round_up(K, 128), _round_up(N, 128)
    return jnp.pad(w_kn, ((0, Kp - K), (0, Np - N))).astype(jnp.bfloat16)


def _pack_b(b):
    Np = _round_up(b.shape[0], 128)
    return jnp.pad(b.astype(jnp.float32), (0, Np - b.shape[0])).reshape(1, Np)


def _pack_conv(w_oihw, b):
    oc, ic, kh, kw = w_oihw.shape
    wm = jnp.transpose(w_oihw, (2, 3, 1, 0)).reshape(kh * kw * ic, oc)
    return {"w": _pack_w(wm), "b": _pack_b(b)}


def _pack_deconv(w_iohw, b):
    mats = []
    for r in (0, 1):
        for s in (0, 1):
            rows = [w_iohw[:, :, ky, kx]
                    for _, ky in _DECONV_TAPS[r] for _, kx in _DECONV_TAPS[s]]
            mats.append(_pack_w(jnp.concatenate(rows, axis=0)))     # (4*Cin, OC)
    return {"w": mats, "b": _pack_b(b)}


def _pack_fc(w_kn, b):
    return {"w": _pack_w(w_kn), "b": _pack_b(b)}


def init_params(key):
    def he(k, shape, fan_in):
        return jax.random.normal(k, shape, jnp.float32) * (2.0 / fan_in) ** 0.5

    keys = jax.random.split(key, 12)
    p = {}
    conv_defs = [("conv1", 3, C1, 3), ("conv2", C1, C2, 3),
                 ("conv3", C2, C3, 5), ("conv4", C3, C4, 5),
                 ("conv5", C4, C5, 5), ("conv6", C5, C6, 5)]
    for (name, ic, oc_, k_), kk in zip(conv_defs, keys[:6]):
        p[name] = _pack_conv(he(kk, (oc_, ic, k_, k_), ic * k_ * k_),
                             jnp.zeros((oc_,), jnp.float32))
    # fc_encode1 + fc_encode2 merged along N (they share the same input).
    w1 = he(keys[6], (FEAT, NZ), FEAT)
    w2 = he(keys[7], (FEAT, NZ), FEAT)
    p["fc_enc"] = _pack_fc(jnp.concatenate([w1, w2], axis=1),
                           jnp.zeros((2 * NZ,), jnp.float32))
    p["fc_dec"] = _pack_fc(he(keys[8], (NZ, FEAT), NZ),
                           jnp.zeros((FEAT,), jnp.float32))
    deconv_defs = [("deconv1", C6, C6), ("deconv2", C6, C6), ("deconv3", C6, 3)]
    for (name, ic, oc_), kk in zip(deconv_defs, keys[9:12]):
        p[name] = _pack_deconv(he(kk, (ic, oc_, 4, 4), ic * 16),
                               jnp.zeros((oc_,), jnp.float32))
    return p


# ----------------------------------------------------------------------------
# Forward pass
# ----------------------------------------------------------------------------
def vae_forward(params, x, noise):
    """x: (B, 3, H, W) f32 NCHW like the torch module. Returns (out, mu, var)."""
    B = x.shape[0]
    h = jnp.transpose(x, (0, 2, 3, 1)).astype(jnp.bfloat16)   # NCHW->NHWC, bf16 (entry)
    # ---- encoder ----
    h = conv2d(h, params["conv1"], 3, 3, 1, C1, "relu")
    h = conv2d(h, params["conv2"], 3, 3, 1, C2, "relu")
    h = maxpool2x2(h)
    h = conv2d(h, params["conv3"], 5, 5, 2, C3, "relu")
    h = conv2d(h, params["conv4"], 5, 5, 2, C4, "relu")
    h = maxpool2x2(h)
    h = conv2d(h, params["conv5"], 5, 5, 2, C5, "relu")
    h = conv2d(h, params["conv6"], 5, 5, 2, C6, "relu")
    h = maxpool2x2(h)                                   # (B, s, s, C6) bf16
    s = h.shape[1]
    # torch flattens an NCHW tensor with .view -> channel-major order; the
    # bottleneck tensor is tiny so this transpose is negligible.
    flat = jnp.transpose(h, (0, 3, 1, 2)).reshape(B, -1)
    mv = matmul_packed(flat, params["fc_enc"]["w"], params["fc_enc"]["b"],
                       2 * NZ, "none", jnp.float32)
    mu, var = mv[:, :NZ], mv[:, NZ:]
    # ---- reparameterize (training path: z = mu + var * e, exactly as torch) ----
    # Plain XLA: (B,128) elementwise is cheaper than a kernel launch.
    # TODO(synk): torch draws e with numpy RNG + .cuda(); here e is an explicit input.
    z = mu + var * noise
    # ---- decoder ----
    dec = matmul_packed(z, params["fc_dec"]["w"], params["fc_dec"]["b"],
                        FEAT, "none", jnp.bfloat16)
    dec = dec.reshape(B, C6, s, s)                      # torch .view(B, 512, 8, 8)
    dec = jnp.transpose(dec, (0, 2, 3, 1))              # -> NHWC
    dec = conv_transpose2d(dec, params["deconv1"], C6, "relu")
    dec = conv_transpose2d(dec, params["deconv2"], C6, "relu")
    dec = conv_transpose2d(dec, params["deconv3"], 3, "sigmoid", jnp.float32)
    return jnp.transpose(dec, (0, 3, 1, 2)), mu, var    # NHWC -> NCHW (exit only)


if __name__ == "__main__":
    key = jax.random.PRNGKey(0)
    kx, kn, kp = jax.random.split(key, 3)
    B = 2
    x = jax.random.uniform(kx, (B, 3, IMG, IMG), jnp.float32)
    noise = jax.random.normal(kn, (B, NZ), jnp.float32)
    params = init_params(kp)

    out, mu, var = jax.jit(vae_forward)(params, x, noise)
    jax.block_until_ready((out, mu, var))

    assert out.shape == (B, 3, IMG, IMG) and out.dtype == jnp.float32
    assert mu.shape == (B, NZ) and var.shape == (B, NZ)
    assert bool(jnp.all(jnp.isfinite(out)))
    assert bool(jnp.all((out >= 0) & (out <= 1)))
    print("KERNEL_OK")
</pallas_src>

<mosaic_0001>
module attributes {stable_mosaic.version = 11 : i64} {
  func.func @_matmul_bias_act_kernel(%arg0: i32, %arg1: i32, %arg2: i32, %arg3: memref<256x128xbf16, #tpu.memory_space<vmem>>, %arg4: memref<128x128xbf16, #tpu.memory_space<vmem>>, %arg5: memref<1x128xf32, #tpu.memory_space<vmem>>, %arg6: memref<256x128xbf16, #tpu.memory_space<vmem>>, %arg7: memref<256x128xf32, #tpu.memory_space<vmem>>) attributes {dimension_semantics = [#tpu.dimension_semantics<parallel>, #tpu.dimension_semantics<parallel>, #tpu.dimension_semantics<arbitrary>], iteration_bounds = array<i64: 2, 1, 1>, scalar_prefetch = 0 : i64, scratch_operands = 1 : i64, tpu.core_type = #tpu.core_type<tc>, window_params = [{transform_indices = @transform_0, window_bounds = array<i64: 256, 128>}, {transform_indices = @transform_1, window_bounds = array<i64: 128, 128>}, {transform_indices = @transform_2, window_bounds = array<i64: 1, 128>}, {transform_indices = @transform_3, window_bounds = array<i64: 256, 128>}]} {
    %c0_i32 = arith.constant 0 : i32
    %0 = arith.cmpi eq, %arg2, %c0_i32 : i32
    %1 = arith.extui %0 : i1 to i32
    %c0_i32_0 = arith.constant 0 : i32
    %2 = arith.cmpi ne, %1, %c0_i32_0 : i32
    scf.if %2 {
      %cst_10 = arith.constant 0.000000e+00 : f32
      %12 = vector.broadcast %cst_10 : f32 to vector<256x128xf32>
      %c0_11 = arith.constant 0 : index
      %c0_12 = arith.constant 0 : index
      %13 = vector.load %arg7[%c0_11, %c0_12] : memref<256x128xf32, #tpu.memory_space<vmem>>, vector<256x128xf32>
      tpu.vector_store %arg7[%c0_11, %c0_12], %12 {strides = array<i32>} : memref<256x128xf32, #tpu.memory_space<vmem>>, vector<256x128xf32>,
    } else {
    }
    %c0 = arith.constant 0 : index
    %c0_1 = arith.constant 0 : index
    %3 = vector.load %arg7[%c0, %c0_1] : memref<256x128xf32, #tpu.memory_space<vmem>>, vector<256x128xf32>
    %c0_2 = arith.constant 0 : index
    %c0_3 = arith.constant 0 : index
    %4 = vector.load %arg3[%c0_2, %c0_3] : memref<256x128xbf16, #tpu.memory_space<vmem>>, vector<256x128xbf16>
    %c0_4 = arith.constant 0 : index
    %c0_5 = arith.constant 0 : index
    %5 = vector.load %arg4[%c0_4, %c0_5] : memref<128x128xbf16, #tpu.memory_space<vmem>>, vector<128x128xbf16>
    %cst = arith.constant dense<0.000000e+00> : vector<256x128xf32>
    %6 = tpu.matmul %4, %5, %cst {dimension_numbers = #tpu.dot_dimension_numbers<[1], [0], [0], [1], [0, 0, 1, 1], [], []>} : vector<256x128xbf16>, vector<128x128xbf16>, vector<256x128xf32> -> vector<256x128xf32>
    %7 = arith.addf %3, %6 : vector<256x128xf32>
    %c0_6 = arith.constant 0 : index
    %c0_7 = arith.constant 0 : index
    %8 = vector.load %arg7[%c0_6, %c0_7] : memref<256x128xf32, #tpu.memory_space<vmem>>, vector<256x128xf32>
    tpu.vector_store %arg7[%c0_6, %c0_7], %7 {strides = array<i32>} : memref<256x128xf32, #tpu.memory_space<vmem>>, vector<256x128xf32>,
    %c0_i32_8 = arith.constant 0 : i32
    %9 = arith.cmpi eq, %arg2, %c0_i32_8 : i32
    %10 = arith.extui %9 : i1 to i32
    %c0_i32_9 = arith.constant 0 : i32
    %11 = arith.cmpi ne, %10, %c0_i32_9 : i32
    scf.if %11 {
      %c0_10 = arith.constant 0 : index
      %c0_11 = arith.constant 0 : index
      %12 = vector.load %arg7[%c0_10, %c0_11] : memref<256x128xf32, #tpu.memory_space<vmem>>, vector<256x128xf32>
      %c0_12 = arith.constant 0 : index
      %c0_13 = arith.constant 0 : index
      %13 = vector.load %arg5[%c0_12, %c0_13] : memref<1x128xf32, #tpu.memory_space<vmem>>, vector<1x128xf32>
      %14 = vector.broadcast %13 : vector<1x128xf32> to vector<256x128xf32>
      %15 = arith.addf %12, %14 : vector<256x128xf32>
      %cst_14 = arith.constant 0.000000e+00 : f32
      %16 = vector.broadcast %cst_14 : f32 to vector<256x128xf32>
      %17 = arith.maximumf %15, %16 : vector<256x128xf32>
      %18 = arith.truncf %17 : vector<256x128xf32> to vector<256x128xbf16>
      %c0_15 = arith.constant 0 : index
      %c0_16 = arith.constant 0 : index
      %19 = vector.load %arg6[%c0_15, %c0_16] : memref<256x128xbf16, #tpu.memory_space<vmem>>, vector<256x128xbf16>
      tpu.vector_store %arg6[%c0_15, %c0_16], %18 {strides = array<i32>} : memref<256x128xbf16, #tpu.memory_space<vmem>>, vector<256x128xbf16>,
    } else {
    }
    return
  }
  func.func @transform_0(%arg0: i32, %arg1: i32, %arg2: i32) -> (i32, i32) {
    %c0_i32 = arith.constant 0 : i32
    return %arg0, %arg2 : i32, i32
  }
  func.func @transform_1(%arg0: i32, %arg1: i32, %arg2: i32) -> (i32, i32) {
    %c0_i32 = arith.constant 0 : i32
    return %arg2, %arg1 : i32, i32
  }
  func.func @transform_2(%arg0: i32, %arg1: i32, %arg2: i32) -> (i32, i32) {
    %c0_i32 = arith.constant 0 : i32
    %c0_i32_0 = arith.constant 0 : i32
    return %c0_i32, %arg1 : i32, i32
  }
  func.func @transform_3(%arg0: i32, %arg1: i32, %arg2: i32) -> (i32, i32) {
    %c0_i32 = arith.constant 0 : i32
    return %arg0, %arg1 : i32, i32
  }
}

module attributes {stable_mosaic.version = 11 : i64} {
  func.func @_matmul_bias_act_kernel(%arg0: i32, %arg1: i32, %arg2: i32, %arg3: memref<256x256xbf16, #tpu.memory_space<vmem>>, %arg4: memref<256x128xbf16, #tpu.memory_space<vmem>>, %arg5: memref<1x128xf32, #tpu.memory_space<vmem>>, %arg6: memref<256x128xbf16, #tpu.memory_space<vmem>>, %arg7: memref<256x128xf32, #tpu.memory_space<vmem>>) attributes {dimension_semantics = [#tpu.dimension_semantics<parallel>, #tpu.dimension_semantics<parallel>, #tpu.dimension_semantics<arbitrary>], iteration_bounds = array<i64: 2, 1, 1>, scalar_prefetch = 0 : i64, scratch_operands = 1 : i64, tpu.core_type = #tpu.core_type<tc>, window_params = [{transform_indices = @transform_0, window_bounds = array<i64: 256, 256>}, {transform_indices = @transform_1, window_bounds = array<i64: 256, 128>}, {transform_indices = @transform_2, window_bounds = array<i64: 1, 128>}, {transform_indices = @transform_3, window_bounds = array<i64: 256, 128>}]} {
    %c0_i32 = arith.constant 0 : i32
    %0 = arith.cmpi eq, %arg2, %c0_i32 : i32
    %1 = arith.extui %0 : i1 to i32
    %c0_i32_0 = arith.constant 0 : i32
    %2 = arith.cmpi ne, %1, %c0_i32_0 : i32
    scf.if %2 {
      %cst_10 = arith.constant 0.000000e+00 : f32
      %12 = vector.broadcast %cst_10 : f32 to vector<256x128xf32>
      %c0_11 = arith.constant 0 : index
      %c0_12 = arith.constant 0 : index
      %13 = vector.load %arg7[%c0_11, %c0_12] : memref<256x128xf32, #tpu.memory_space<vmem>>, vector<256x128xf32>
      tpu.vector_store %arg7[%c0_11, %c0_12], %12 {strides = array<i32>} : memref<256x128xf32, #tpu.memory_space<vmem>>, vector<256x128xf32>,
    } else {
    }
    %c0 = arith.constant 0 : index
    %c0_1 = arith.constant 0 : index
    %3 = vector.load %arg7[%c0, %c0_1] : memref<256x128xf32, #tpu.memory_space<vmem>>, vector<256x128xf32>
    %c0_2 = arith.constant 0 : index
    %c0_3 = arith.constant 0 : index
    %4 = vector.load %arg3[%c0_2, %c0_3] : memref<256x256xbf16, #tpu.memory_space<vmem>>, vector<256x256xbf16>
    %c0_4 = arith.constant 0 : index
    %c0_5 = arith.constant 0 : index
    %5 = vector.load %arg4[%c0_4, %c0_5] : memref<256x128xbf16, #tpu.memory_space<vmem>>, vector<256x128xbf16>
    %cst = arith.constant dense<0.000000e+00> : vector<256x128xf32>
    %6 = tpu.matmul %4, %5, %cst {dimension_numbers = #tpu.dot_dimension_numbers<[1], [0], [0], [1], [0, 0, 1, 1], [], []>} : vector<256x256xbf16>, vector<256x128xbf16>, vector<256x128xf32> -> vector<256x128xf32>
    %7 = arith.addf %3, %6 : vector<256x128xf32>
    %c0_6 = arith.constant 0 : index
    %c0_7 = arith.constant 0 : index
    %8 = vector.load %arg7[%c0_6, %c0_7] : memref<256x128xf32, #tpu.memory_space<vmem>>, vector<256x128xf32>
    tpu.vector_store %arg7[%c0_6, %c0_7], %7 {strides = array<i32>} : memref<256x128xf32, #tpu.memory_space<vmem>>, vector<256x128xf32>,
    %c0_i32_8 = arith.constant 0 : i32
    %9 = arith.cmpi eq, %arg2, %c0_i32_8 : i32
    %10 = arith.extui %9 : i1 to i32
    %c0_i32_9 = arith.constant 0 : i32
    %11 = arith.cmpi ne, %10, %c0_i32_9 : i32
    scf.if %11 {
      %c0_10 = arith.constant 0 : index
      %c0_11 = arith.constant 0 : index
      %12 = vector.load %arg7[%c0_10, %c0_11] : memref<256x128xf32, #tpu.memory_space<vmem>>, vector<256x128xf32>
      %c0_12 = arith.constant 0 : index
      %c0_13 = arith.constant 0 : index
      %13 = vector.load %arg5[%c0_12, %c0_13] : memref<1x128xf32, #tpu.memory_space<vmem>>, vector<1x128xf32>
      %14 = vector.broadcast %13 : vector<1x128xf32> to vector<256x128xf32>
      %15 = arith.addf %12, %14 : vector<256x128xf32>
      %cst_14 = arith.constant 0.000000e+00 : f32
      %16 = vector.broadcast %cst_14 : f32 to vector<256x128xf32>
      %17 = arith.maximumf %15, %16 : vector<256x128xf32>
      %18 = arith.truncf %17 : vector<256x128xf32> to vector<256x128xbf16>
      %c0_15 = arith.constant 0 : index
      %c0_16 = arith.constant 0 : index
      %19 = vector.load %arg6[%c0_15, %c0_16] : memref<256x128xbf16, #tpu.memory_space<vmem>>, vector<256x128xbf16>
      tpu.vector_store %arg6[%c0_15, %c0_16], %18 {strides = array<i32>} : memref<256x128xbf16, #tpu.memory_space<vmem>>, vector<256x128xbf16>,
    } else {
    }
    return
  }
  func.func @transform_0(%arg0: i32, %arg1: i32, %arg2: i32) -> (i32, i32) {
    %c0_i32 = arith.constant 0 : i32
    return %arg0, %arg2 : i32, i32
  }
  func.func @transform_1(%arg0: i32, %arg1: i32, %arg2: i32) -> (i32, i32) {
    %c0_i32 = arith.constant 0 : i32
    return %arg2, %arg1 : i32, i32
  }
  func.func @transform_2(%arg0: i32, %arg1: i32, %arg2: i32) -> (i32, i32) {
    %c0_i32 = arith.constant 0 : i32
    %c0_i32_0 = arith.constant 0 : i32
    return %c0_i32, %arg1 : i32, i32
  }
  func.func @transform_3(%arg0: i32, %arg1: i32, %arg2: i32) -> (i32, i32) {
    %c0_i32 = arith.constant 0 : i32
    return %arg0, %arg1 : i32, i32
  }
}

module attributes {stable_mosaic.version = 11 : i64} {
  func.func @_maxpool_kernel(%arg0: i32, %arg1: memref<32x8x2x16xbf16, #tpu.memory_space<vmem>>, %arg2: memref<16x8x16xbf16, #tpu.memory_space<vmem>>) attributes {dimension_semantics = [#tpu.dimension_semantics<arbitrary>], iteration_bounds = array<i64: 1>, scalar_prefetch = 0 : i64, scratch_operands = 0 : i64, tpu.core_type = #tpu.core_type<tc>, window_params = [{transform_indices = @transform_0, window_bounds = array<i64: 32, 8, 2, 16>}, {transform_indices = @transform_1, window_bounds = array<i64: 16, 8, 16>}]} {
    %c0 = arith.constant 0 : index
    %c0_0 = arith.constant 0 : index
    %c0_1 = arith.constant 0 : index
    %c0_2 = arith.constant 0 : index
    %0 = vector.load %arg1[%c0, %c0_0, %c0_1, %c0_2] : memref<32x8x2x16xbf16, #tpu.memory_space<vmem>>, vector<32x8x1x16xbf16>
    %1 = vector.shape_cast %0 : vector<32x8x1x16xbf16> to vector<32x8x16xbf16>
    %c0_3 = arith.constant 0 : index
    %c0_4 = arith.constant 0 : index
    %c1 = arith.constant 1 : index
    %c0_5 = arith.constant 0 : index
    %2 = vector.load %arg1[%c0_3, %c0_4, %c1, %c0_5] : memref<32x8x2x16xbf16, #tpu.memory_space<vmem>>, vector<32x8x1x16xbf16>
    %3 = vector.shape_cast %2 : vector<32x8x1x16xbf16> to vector<32x8x16xbf16>
    %4 = arith.maximumf %1, %3 : vector<32x8x16xbf16>
    %5 = vector.shape_cast %4 : vector<32x8x16xbf16> to vector<16x2x8x16xbf16>
    %cst = arith.constant dense<0xFF80> : vector<16x8x16xbf16>
    %6 = vector.multi_reduction <maximumf>, %5, %cst [1] : vector<16x2x8x16xbf16> to vector<16x8x16xbf16>
    %c0_6 = arith.constant 0 : index
    %c0_7 = arith.constant 0 : index
    %c0_8 = arith.constant 0 : index
    %7 = vector.load %arg2[%c0_6, %c0_7, %c0_8] : memref<16x8x16xbf16, #tpu.memory_space<vmem>>, vector<16x8x16xbf16>
    tpu.vector_store %arg2[%c0_6, %c0_7, %c0_8], %6 {strides = array<i32>} : memref<16x8x16xbf16, #tpu.memory_space<vmem>>, vector<16x8x16xbf16>,
    return
  }
  func.func @transform_0(%arg0: i32) -> (i32, i32, i32, i32) {
    %c0_i32 = arith.constant 0 : i32
    %c0_i32_0 = arith.constant 0 : i32
    %c0_i32_1 = arith.constant 0 : i32
    %c0_i32_2 = arith.constant 0 : i32
    return %arg0, %c0_i32, %c0_i32_0, %c0_i32_1 : i32, i32, i32, i32
  }
  func.func @transform_1(%arg0: i32) -> (i32, i32, i32) {
    %c0_i32 = arith.constant 0 : i32
    %c0_i32_0 = arith.constant 0 : i32
    %c0_i32_1 = arith.constant 0 : i32
    return %arg0, %c0_i32, %c0_i32_0 : i32, i32, i32
  }
}

module attributes {stable_mosaic.version = 11 : i64} {
  func.func @_matmul_bias_act_kernel(%arg0: i32, %arg1: i32, %arg2: i32, %arg3: memref<128x512xbf16, #tpu.memory_space<vmem>>, %arg4: memref<512x128xbf16, #tpu.memory_space<vmem>>, %arg5: memref<1x128xf32, #tpu.memory_space<vmem>>, %arg6: memref<128x128xbf16, #tpu.memory_space<vmem>>, %arg7: memref<128x128xf32, #tpu.memory_space<vmem>>) attributes {dimension_semantics = [#tpu.dimension_semantics<parallel>, #tpu.dimension_semantics<parallel>, #tpu.dimension_semantics<arbitrary>], iteration_bounds = array<i64: 1, 1, 1>, scalar_prefetch = 0 : i64, scratch_operands = 1 : i64, tpu.core_type = #tpu.core_type<tc>, window_params = [{transform_indices = @transform_0, window_bounds = array<i64: 128, 512>}, {transform_indices = @transform_1, window_bounds = array<i64: 512, 128>}, {transform_indices = @transform_2, window_bounds = array<i64: 1, 128>}, {transform_indices = @transform_3, window_bounds = array<i64: 128, 128>}]} {
    %c0_i32 = arith.constant 0 : i32
    %0 = arith.cmpi eq, %arg2, %c0_i32 : i32
    %1 = arith.extui %0 : i1 to i32
    %c0_i32_0 = arith.constant 0 : i32
    %2 = arith.cmpi ne, %1, %c0_i32_0 : i32
    scf.if %2 {
      %cst_10 = arith.constant 0.000000e+00 : f32
      %12 = vector.broadcast %cst_10 : f32 to vector<128x128xf32>
      %c0_11 = arith.constant 0 : index
      %c0_12 = arith.constant 0 : index
      %13 = vector.load %arg7[%c0_11, %c0_12] : memref<128x128xf32, #tpu.memory_space<vmem>>, vector<128x128xf32>
      tpu.vector_store %arg7[%c0_11, %c0_12], %12 {strides = array<i32>} : memref<128x128xf32, #tpu.memory_space<vmem>>, vector<128x128xf32>,
    } else {
    }
    %c0 = arith.constant 0 : index
    %c0_1 = arith.constant 0 : index
    %3 = vector.load %arg7[%c0, %c0_1] : memref<128x128xf32, #tpu.memory_space<vmem>>, vector<128x128xf32>
    %c0_2 = arith.constant 0 : index
    %c0_3 = arith.constant 0 : index
    %4 = vector.load %arg3[%c0_2, %c0_3] : memref<128x512xbf16, #tpu.memory_space<vmem>>, vector<128x512xbf16>
    %c0_4 = arith.constant 0 : index
    %c0_5 = arith.constant 0 : index
    %5 = vector.load %arg4[%c0_4, %c0_5] : memref<512x128xbf16, #tpu.memory_space<vmem>>, vector<512x128xbf16>
    %cst = arith.constant dense<0.000000e+00> : vector<128x128xf32>
    %6 = tpu.matmul %4, %5, %cst {dimension_numbers = #tpu.dot_dimension_numbers<[1], [0], [0], [1], [0, 0, 1, 1], [], []>} : vector<128x512xbf16>, vector<512x128xbf16>, vector<128x128xf32> -> vector<128x128xf32>
    %7 = arith.addf %3, %6 : vector<128x128xf32>
    %c0_6 = arith.constant 0 : index
    %c0_7 = arith.constant 0 : index
    %8 = vector.load %arg7[%c0_6, %c0_7] : memref<128x128xf32, #tpu.memory_space<vmem>>, vector<128x128xf32>
    tpu.vector_store %arg7[%c0_6, %c0_7], %7 {strides = array<i32>} : memref<128x128xf32, #tpu.memory_space<vmem>>, vector<128x128xf32>,
    %c0_i32_8 = arith.constant 0 : i32
    %9 = arith.cmpi eq, %arg2, %c0_i32_8 : i32
    %10 = arith.extui %9 : i1 to i32
    %c0_i32_9 = arith.constant 0 : i32
    %11 = arith.cmpi ne, %10, %c0_i32_9 : i32
    scf.if %11 {
      %c0_10 = arith.constant 0 : index
      %c0_11 = arith.constant 0 : index
      %12 = vector.load %arg7[%c0_10, %c0_11] : memref<128x128xf32, #tpu.memory_space<vmem>>, vector<128x128xf32>
      %c0_12 = arith.constant 0 : index
      %c0_13 = arith.constant 0 : index
      %13 = vector.load %arg5[%c0_12, %c0_13] : memref<1x128xf32, #tpu.memory_space<vmem>>, vector<1x128xf32>
      %14 = vector.broadcast %13 : vector<1x128xf32> to vector<128x128xf32>
      %15 = arith.addf %12, %14 : vector<128x128xf32>
      %cst_14 = arith.constant 0.000000e+00 : f32
      %16 = vector.broadcast %cst_14 : f32 to vector<128x128xf32>
      %17 = arith.maximumf %15, %16 : vector<128x128xf32>
      %18 = arith.truncf %17 : vector<128x128xf32> to vector<128x128xbf16>
      %c0_15 = arith.constant 0 : index
      %c0_16 = arith.constant 0 : index
      %19 = vector.load %arg6[%c0_15, %c0_16] : memref<128x128xbf16, #tpu.memory_space<vmem>>, vector<128x128xbf16>
      tpu.vector_store %arg6[%c0_15, %c0_16], %18 {strides = array<i32>} : memref<128x128xbf16, #tpu.memory_space<vmem>>, vector<128x128xbf16>,
    } else {
    }
    return
  }
  func.func @transform_0(%arg0: i32, %arg1: i32, %arg2: i32) -> (i32, i32) {
    %c0_i32 = arith.constant 0 : i32
    return %arg0, %arg2 : i32, i32
  }
  func.func @transform_1(%arg0: i32, %arg1: i32, %arg2: i32) -> (i32, i32) {
    %c0_i32 = arith.constant 0 : i32
    return %arg2, %arg1 : i32, i32
  }
  func.func @transform_2(%arg0: i32, %arg1: i32, %arg2: i32) -> (i32, i32) {
    %c0_i32 = arith.constant 0 : i32
    %c0_i32_0 = arith.constant 0 : i32
    return %c0_i32, %arg1 : i32, i32
  }
  func.func @transform_3(%arg0: i32, %arg1: i32, %arg2: i32) -> (i32, i32) {
    %c0_i32 = arith.constant 0 : i32
    return %arg0, %arg1 : i32, i32
  }
}

module attributes {stable_mosaic.version = 11 : i64} {
  func.func @_matmul_bias_act_kernel(%arg0: i32, %arg1: i32, %arg2: i32, %arg3: memref<128x896xbf16, #tpu.memory_space<vmem>>, %arg4: memref<896x128xbf16, #tpu.memory_space<vmem>>, %arg5: memref<1x128xf32, #tpu.memory_space<vmem>>, %arg6: memref<128x128xbf16, #tpu.memory_space<vmem>>, %arg7: memref<128x128xf32, #tpu.memory_space<vmem>>) attributes {dimension_semantics = [#tpu.dimension_semantics<parallel>, #tpu.dimension_semantics<parallel>, #tpu.dimension_semantics<arbitrary>], iteration_bounds = array<i64: 1, 1, 1>, scalar_prefetch = 0 : i64, scratch_operands = 1 : i64, tpu.core_type = #tpu.core_type<tc>, window_params = [{transform_indices = @transform_0, window_bounds = array<i64: 128, 896>}, {transform_indices = @transform_1, window_bounds = array<i64: 896, 128>}, {transform_indices = @transform_2, window_bounds = array<i64: 1, 128>}, {transform_indices = @transform_3, window_bounds = array<i64: 128, 128>}]} {
    %c0_i32 = arith.constant 0 : i32
    %0 = arith.cmpi eq, %arg2, %c0_i32 : i32
    %1 = arith.extui %0 : i1 to i32
    %c0_i32_0 = arith.constant 0 : i32
    %2 = arith.cmpi ne, %1, %c0_i32_0 : i32
    scf.if %2 {
      %cst_10 = arith.constant 0.000000e+00 : f32
      %12 = vector.broadcast %cst_10 : f32 to vector<128x128xf32>
      %c0_11 = arith.constant 0 : index
      %c0_12 = arith.constant 0 : index
      %13 = vector.load %arg7[%c0_11, %c0_12] : memref<128x128xf32, #tpu.memory_space<vmem>>, vector<128x128xf32>
      tpu.vector_store %arg7[%c0_11, %c0_12], %12 {strides = array<i32>} : memref<128x128xf32, #tpu.memory_space<vmem>>, vector<128x128xf32>,
    } else {
    }
    %c0 = arith.constant 0 : index
    %c0_1 = arith.constant 0 : index
    %3 = vector.load %arg7[%c0, %c0_1] : memref<128x128xf32, #tpu.memory_space<vmem>>, vector<128x128xf32>
    %c0_2 = arith.constant 0 : index
    %c0_3 = arith.constant 0 : index
    %4 = vector.load %arg3[%c0_2, %c0_3] : memref<128x896xbf16, #tpu.memory_space<vmem>>, vector<128x896xbf16>
    %c0_4 = arith.constant 0 : index
    %c0_5 = arith.constant 0 : index
    %5 = vector.load %arg4[%c0_4, %c0_5] : memref<896x128xbf16, #tpu.memory_space<vmem>>, vector<896x128xbf16>
    %cst = arith.constant dense<0.000000e+00> : vector<128x128xf32>
    %6 = tpu.matmul %4, %5, %cst {dimension_numbers = #tpu.dot_dimension_numbers<[1], [0], [0], [1], [0, 0, 1, 1], [], []>} : vector<128x896xbf16>, vector<896x128xbf16>, vector<128x128xf32> -> vector<128x128xf32>
    %7 = arith.addf %3, %6 : vector<128x128xf32>
    %c0_6 = arith.constant 0 : index
    %c0_7 = arith.constant 0 : index
    %8 = vector.load %arg7[%c0_6, %c0_7] : memref<128x128xf32, #tpu.memory_space<vmem>>, vector<128x128xf32>
    tpu.vector_store %arg7[%c0_6, %c0_7], %7 {strides = array<i32>} : memref<128x128xf32, #tpu.memory_space<vmem>>, vector<128x128xf32>,
    %c0_i32_8 = arith.constant 0 : i32
    %9 = arith.cmpi eq, %arg2, %c0_i32_8 : i32
    %10 = arith.extui %9 : i1 to i32
    %c0_i32_9 = arith.constant 0 : i32
    %11 = arith.cmpi ne, %10, %c0_i32_9 : i32
    scf.if %11 {
      %c0_10 = arith.constant 0 : index
      %c0_11 = arith.constant 0 : index
      %12 = vector.load %arg7[%c0_10, %c0_11] : memref<128x128xf32, #tpu.memory_space<vmem>>, vector<128x128xf32>
      %c0_12 = arith.constant 0 : index
      %c0_13 = arith.constant 0 : index
      %13 = vector.load %arg5[%c0_12, %c0_13] : memref<1x128xf32, #tpu.memory_space<vmem>>, vector<1x128xf32>
      %14 = vector.broadcast %13 : vector<1x128xf32> to vector<128x128xf32>
      %15 = arith.addf %12, %14 : vector<128x128xf32>
      %cst_14 = arith.constant 0.000000e+00 : f32
      %16 = vector.broadcast %cst_14 : f32 to vector<128x128xf32>
      %17 = arith.maximumf %15, %16 : vector<128x128xf32>
      %18 = arith.truncf %17 : vector<128x128xf32> to vector<128x128xbf16>
      %c0_15 = arith.constant 0 : index
      %c0_16 = arith.constant 0 : index
      %19 = vector.load %arg6[%c0_15, %c0_16] : memref<128x128xbf16, #tpu.memory_space<vmem>>, vector<128x128xbf16>
      tpu.vector_store %arg6[%c0_15, %c0_16], %18 {strides = array<i32>} : memref<128x128xbf16, #tpu.memory_space<vmem>>, vector<128x128xbf16>,
    } else {
    }
    return
  }
  func.func @transform_0(%arg0: i32, %arg1: i32, %arg2: i32) -> (i32, i32) {
    %c0_i32 = arith.constant 0 : i32
    return %arg0, %arg2 : i32, i32
  }
  func.func @transform_1(%arg0: i32, %arg1: i32, %arg2: i32) -> (i32, i32) {
    %c0_i32 = arith.constant 0 : i32
    return %arg2, %arg1 : i32, i32
  }
  func.func @transform_2(%arg0: i32, %arg1: i32, %arg2: i32) -> (i32, i32) {
    %c0_i32 = arith.constant 0 : i32
    %c0_i32_0 = arith.constant 0 : i32
    return %c0_i32, %arg1 : i32, i32
  }
  func.func @transform_3(%arg0: i32, %arg1: i32, %arg2: i32) -> (i32, i32) {
    %c0_i32 = arith.constant 0 : i32
    return %arg0, %arg1 : i32, i32
  }
}

module attributes {stable_mosaic.version = 11 : i64} {
  func.func @_maxpool_kernel(%arg0: i32, %arg1: memref<16x4x2x32xbf16, #tpu.memory_space<vmem>>, %arg2: memref<8x4x32xbf16, #tpu.memory_space<vmem>>) attributes {dimension_semantics = [#tpu.dimension_semantics<arbitrary>], iteration_bounds = array<i64: 1>, scalar_prefetch = 0 : i64, scratch_operands = 0 : i64, tpu.core_type = #tpu.core_type<tc>, window_params = [{transform_indices = @transform_0, window_bounds = array<i64: 16, 4, 2, 32>}, {transform_indices = @transform_1, window_bounds = array<i64: 8, 4, 32>}]} {
    %c0 = arith.constant 0 : index
    %c0_0 = arith.constant 0 : index
    %c0_1 = arith.constant 0 : index
    %c0_2 = arith.constant 0 : index
    %0 = vector.load %arg1[%c0, %c0_0, %c0_1, %c0_2] : memref<16x4x2x32xbf16, #tpu.memory_space<vmem>>, vector<16x4x1x32xbf16>
    %1 = vector.shape_cast %0 : vector<16x4x1x32xbf16> to vector<16x4x32xbf16>
    %c0_3 = arith.constant 0 : index
    %c0_4 = arith.constant 0 : index
    %c1 = arith.constant 1 : index
    %c0_5 = arith.constant 0 : index
    %2 = vector.load %arg1[%c0_3, %c0_4, %c1, %c0_5] : memref<16x4x2x32xbf16, #tpu.memory_space<vmem>>, vector<16x4x1x32xbf16>
    %3 = vector.shape_cast %2 : vector<16x4x1x32xbf16> to vector<16x4x32xbf16>
    %4 = arith.maximumf %1, %3 : vector<16x4x32xbf16>
    %5 = vector.shape_cast %4 : vector<16x4x32xbf16> to vector<8x2x4x32xbf16>
    %cst = arith.constant dense<0xFF80> : vector<8x4x32xbf16>
    %6 = vector.multi_reduction <maximumf>, %5, %cst [1] : vector<8x2x4x32xbf16> to vector<8x4x32xbf16>
    %c0_6 = arith.constant 0 : index
    %c0_7 = arith.constant 0 : index
    %c0_8 = arith.constant 0 : index
    %7 = vector.load %arg2[%c0_6, %c0_7, %c0_8] : memref<8x4x32xbf16, #tpu.memory_space<vmem>>, vector<8x4x32xbf16>
    tpu.vector_store %arg2[%c0_6, %c0_7, %c0_8], %6 {strides = array<i32>} : memref<8x4x32xbf16, #tpu.memory_space<vmem>>, vector<8x4x32xbf16>,
    return
  }
  func.func @transform_0(%arg0: i32) -> (i32, i32, i32, i32) {
    %c0_i32 = arith.constant 0 : i32
    %c0_i32_0 = arith.constant 0 : i32
    %c0_i32_1 = arith.constant 0 : i32
    %c0_i32_2 = arith.constant 0 : i32
    return %arg0, %c0_i32, %c0_i32_0, %c0_i32_1 : i32, i32, i32, i32
  }
  func.func @transform_1(%arg0: i32) -> (i32, i32, i32) {
    %c0_i32 = arith.constant 0 : i32
    %c0_i32_0 = arith.constant 0 : i32
    %c0_i32_1 = arith.constant 0 : i32
    return %arg0, %c0_i32, %c0_i32_0 : i32, i32, i32
  }
}

module attributes {stable_mosaic.version = 11 : i64} {
  func.func @_matmul_bias_act_kernel(%arg0: i32, %arg1: i32, %arg2: i32, %arg3: memref<32x896xbf16, #tpu.memory_space<vmem>>, %arg4: memref<896x128xbf16, #tpu.memory_space<vmem>>, %arg5: memref<1x128xf32, #tpu.memory_space<vmem>>, %arg6: memref<32x128xbf16, #tpu.memory_space<vmem>>, %arg7: memref<32x128xf32, #tpu.memory_space<vmem>>) attributes {dimension_semantics = [#tpu.dimension_semantics<parallel>, #tpu.dimension_semantics<parallel>, #tpu.dimension_semantics<arbitrary>], iteration_bounds = array<i64: 1, 1, 1>, scalar_prefetch = 0 : i64, scratch_operands = 1 : i64, tpu.core_type = #tpu.core_type<tc>, window_params = [{transform_indices = @transform_0, window_bounds = array<i64: 32, 896>}, {transform_indices = @transform_1, window_bounds = array<i64: 896, 128>}, {transform_indices = @transform_2, window_bounds = array<i64: 1, 128>}, {transform_indices = @transform_3, window_bounds = array<i64: 32, 128>}]} {
    %c0_i32 = arith.constant 0 : i32
    %0 = arith.cmpi eq, %arg2, %c0_i32 : i32
    %1 = arith.extui %0 : i1 to i32
    %c0_i32_0 = arith.constant 0 : i32
    %2 = arith.cmpi ne, %1, %c0_i32_0 : i32
    scf.if %2 {
      %cst_10 = arith.constant 0.000000e+00 : f32
      %12 = vector.broadcast %cst_10 : f32 to vector<32x128xf32>
      %c0_11 = arith.constant 0 : index
      %c0_12 = arith.constant 0 : index
      %13 = vector.load %arg7[%c0_11, %c0_12] : memref<32x128xf32, #tpu.memory_space<vmem>>, vector<32x128xf32>
      tpu.vector_store %arg7[%c0_11, %c0_12], %12 {strides = array<i32>} : memref<32x128xf32, #tpu.memory_space<vmem>>, vector<32x128xf32>,
    } else {
    }
    %c0 = arith.constant 0 : index
    %c0_1 = arith.constant 0 : index
    %3 = vector.load %arg7[%c0, %c0_1] : memref<32x128xf32, #tpu.memory_space<vmem>>, vector<32x128xf32>
    %c0_2 = arith.constant 0 : index
    %c0_3 = arith.constant 0 : index
    %4 = vector.load %arg3[%c0_2, %c0_3] : memref<32x896xbf16, #tpu.memory_space<vmem>>, vector<32x896xbf16>
    %c0_4 = arith.constant 0 : index
    %c0_5 = arith.constant 0 : index
    %5 = vector.load %arg4[%c0_4, %c0_5] : memref<896x128xbf16, #tpu.memory_space<vmem>>, vector<896x128xbf16>
    %cst = arith.constant dense<0.000000e+00> : vector<32x128xf32>
    %6 = tpu.matmul %4, %5, %cst {dimension_numbers = #tpu.dot_dimension_numbers<[1], [0], [0], [1], [0, 0, 1, 1], [], []>} : vector<32x896xbf16>, vector<896x128xbf16>, vector<32x128xf32> -> vector<32x128xf32>
    %7 = arith.addf %3, %6 : vector<32x128xf32>
    %c0_6 = arith.constant 0 : index
    %c0_7 = arith.constant 0 : index
    %8 = vector.load %arg7[%c0_6, %c0_7] : memref<32x128xf32, #tpu.memory_space<vmem>>, vector<32x128xf32>
    tpu.vector_store %arg7[%c0_6, %c0_7], %7 {strides = array<i32>} : memref<32x128xf32, #tpu.memory_space<vmem>>, vector<32x128xf32>,
    %c0_i32_8 = arith.constant 0 : i32
    %9 = arith.cmpi eq, %arg2, %c0_i32_8 : i32
    %10 = arith.extui %9 : i1 to i32
    %c0_i32_9 = arith.constant 0 : i32
    %11 = arith.cmpi ne, %10, %c0_i32_9 : i32
    scf.if %11 {
      %c0_10 = arith.constant 0 : index
      %c0_11 = arith.constant 0 : index
      %12 = vector.load %arg7[%c0_10, %c0_11] : memref<32x128xf32, #tpu.memory_space<vmem>>, vector<32x128xf32>
      %c0_12 = arith.constant 0 : index
      %c0_13 = arith.constant 0 : index
      %13 = vector.load %arg5[%c0_12, %c0_13] : memref<1x128xf32, #tpu.memory_space<vmem>>, vector<1x128xf32>
      %14 = vector.broadcast %13 : vector<1x128xf32> to vector<32x128xf32>
      %15 = arith.addf %12, %14 : vector<32x128xf32>
      %cst_14 = arith.constant 0.000000e+00 : f32
      %16 = vector.broadcast %cst_14 : f32 to vector<32x128xf32>
      %17 = arith.maximumf %15, %16 : vector<32x128xf32>
      %18 = arith.truncf %17 : vector<32x128xf32> to vector<32x128xbf16>
      %c0_15 = arith.constant 0 : index
      %c0_16 = arith.constant 0 : index
      %19 = vector.load %arg6[%c0_15, %c0_16] : memref<32x128xbf16, #tpu.memory_space<vmem>>, vector<32x128xbf16>
      tpu.vector_store %arg6[%c0_15, %c0_16], %18 {strides = array<i32>} : memref<32x128xbf16, #tpu.memory_space<vmem>>, vector<32x128xbf16>,
    } else {
    }
    return
  }
  func.func @transform_0(%arg0: i32, %arg1: i32, %arg2: i32) -> (i32, i32) {
    %c0_i32 = arith.constant 0 : i32
    return %arg0, %arg2 : i32, i32
  }
  func.func @transform_1(%arg0: i32, %arg1: i32, %arg2: i32) -> (i32, i32) {
    %c0_i32 = arith.constant 0 : i32
    return %arg2, %arg1 : i32, i32
  }
  func.func @transform_2(%arg0: i32, %arg1: i32, %arg2: i32) -> (i32, i32) {
    %c0_i32 = arith.constant 0 : i32
    %c0_i32_0 = arith.constant 0 : i32
    return %c0_i32, %arg1 : i32, i32
  }
  func.func @transform_3(%arg0: i32, %arg1: i32, %arg2: i32) -> (i32, i32) {
    %c0_i32 = arith.constant 0 : i32
    return %arg0, %arg1 : i32, i32
  }
}

module attributes {stable_mosaic.version = 11 : i64} {
  func.func @_matmul_bias_act_kernel(%arg0: i32, %arg1: i32, %arg2: i32, %arg3: memref<32x1664xbf16, #tpu.memory_space<vmem>>, %arg4: memref<1664x128xbf16, #tpu.memory_space<vmem>>, %arg5: memref<1x128xf32, #tpu.memory_space<vmem>>, %arg6: memref<32x128xbf16, #tpu.memory_space<vmem>>, %arg7: memref<32x128xf32, #tpu.memory_space<vmem>>) attributes {dimension_semantics = [#tpu.dimension_semantics<parallel>, #tpu.dimension_semantics<parallel>, #tpu.dimension_semantics<arbitrary>], iteration_bounds = array<i64: 1, 1, 1>, scalar_prefetch = 0 : i64, scratch_operands = 1 : i64, tpu.core_type = #tpu.core_type<tc>, window_params = [{transform_indices = @transform_0, window_bounds = array<i64: 32, 1664>}, {transform_indices = @transform_1, window_bounds = array<i64: 1664, 128>}, {transform_indices = @transform_2, window_bounds = array<i64: 1, 128>}, {transform_indices = @transform_3, window_bounds = array<i64: 32, 128>}]} {
    %c0_i32 = arith.constant 0 : i32
    %0 = arith.cmpi eq, %arg2, %c0_i32 : i32
    %1 = arith.extui %0 : i1 to i32
    %c0_i32_0 = arith.constant 0 : i32
    %2 = arith.cmpi ne, %1, %c0_i32_0 : i32
    scf.if %2 {
      %cst_10 = arith.constant 0.000000e+00 : f32
      %12 = vector.broadcast %cst_10 : f32 to vector<32x128xf32>
      %c0_11 = arith.constant 0 : index
      %c0_12 = arith.constant 0 : index
      %13 = vector.load %arg7[%c0_11, %c0_12] : memref<32x128xf32, #tpu.memory_space<vmem>>, vector<32x128xf32>
      tpu.vector_store %arg7[%c0_11, %c0_12], %12 {strides = array<i32>} : memref<32x128xf32, #tpu.memory_space<vmem>>, vector<32x128xf32>,
    } else {
    }
    %c0 = arith.constant 0 : index
    %c0_1 = arith.constant 0 : index
    %3 = vector.load %arg7[%c0, %c0_1] : memref<32x128xf32, #tpu.memory_space<vmem>>, vector<32x128xf32>
    %c0_2 = arith.constant 0 : index
    %c0_3 = arith.constant 0 : index
    %4 = vector.load %arg3[%c0_2, %c0_3] : memref<32x1664xbf16, #tpu.memory_space<vmem>>, vector<32x1664xbf16>
    %c0_4 = arith.constant 0 : index
    %c0_5 = arith.constant 0 : index
    %5 = vector.load %arg4[%c0_4, %c0_5] : memref<1664x128xbf16, #tpu.memory_space<vmem>>, vector<1664x128xbf16>
    %cst = arith.constant dense<0.000000e+00> : vector<32x128xf32>
    %6 = tpu.matmul %4, %5, %cst {dimension_numbers = #tpu.dot_dimension_numbers<[1], [0], [0], [1], [0, 0, 1, 1], [], []>} : vector<32x1664xbf16>, vector<1664x128xbf16>, vector<32x128xf32> -> vector<32x128xf32>
    %7 = arith.addf %3, %6 : vector<32x128xf32>
    %c0_6 = arith.constant 0 : index
    %c0_7 = arith.constant 0 : index
    %8 = vector.load %arg7[%c0_6, %c0_7] : memref<32x128xf32, #tpu.memory_space<vmem>>, vector<32x128xf32>
    tpu.vector_store %arg7[%c0_6, %c0_7], %7 {strides = array<i32>} : memref<32x128xf32, #tpu.memory_space<vmem>>, vector<32x128xf32>,
    %c0_i32_8 = arith.constant 0 : i32
    %9 = arith.cmpi eq, %arg2, %c0_i32_8 : i32
    %10 = arith.extui %9 : i1 to i32
    %c0_i32_9 = arith.constant 0 : i32
    %11 = arith.cmpi ne, %10, %c0_i32_9 : i32
    scf.if %11 {
      %c0_10 = arith.constant 0 : index
      %c0_11 = arith.constant 0 : index
      %12 = vector.load %arg7[%c0_10, %c0_11] : memref<32x128xf32, #tpu.memory_space<vmem>>, vector<32x128xf32>
      %c0_12 = arith.constant 0 : index
      %c0_13 = arith.constant 0 : index
      %13 = vector.load %arg5[%c0_12, %c0_13] : memref<1x128xf32, #tpu.memory_space<vmem>>, vector<1x128xf32>
      %14 = vector.broadcast %13 : vector<1x128xf32> to vector<32x128xf32>
      %15 = arith.addf %12, %14 : vector<32x128xf32>
      %cst_14 = arith.constant 0.000000e+00 : f32
      %16 = vector.broadcast %cst_14 : f32 to vector<32x128xf32>
      %17 = arith.maximumf %15, %16 : vector<32x128xf32>
      %18 = arith.truncf %17 : vector<32x128xf32> to vector<32x128xbf16>
      %c0_15 = arith.constant 0 : index
      %c0_16 = arith.constant 0 : index
      %19 = vector.load %arg6[%c0_15, %c0_16] : memref<32x128xbf16, #tpu.memory_space<vmem>>, vector<32x128xbf16>
      tpu.vector_store %arg6[%c0_15, %c0_16], %18 {strides = array<i32>} : memref<32x128xbf16, #tpu.memory_space<vmem>>, vector<32x128xbf16>,
    } else {
    }
    return
  }
  func.func @transform_0(%arg0: i32, %arg1: i32, %arg2: i32) -> (i32, i32) {
    %c0_i32 = arith.constant 0 : i32
    return %arg0, %arg2 : i32, i32
  }
  func.func @transform_1(%arg0: i32, %arg1: i32, %arg2: i32) -> (i32, i32) {
    %c0_i32 = arith.constant 0 : i32
    return %arg2, %arg1 : i32, i32
  }
  func.func @transform_2(%arg0: i32, %arg1: i32, %arg2: i32) -> (i32, i32) {
    %c0_i32 = arith.constant 0 : i32
    %c0_i32_0 = arith.constant 0 : i32
    return %c0_i32, %arg1 : i32, i32
  }
  func.func @transform_3(%arg0: i32, %arg1: i32, %arg2: i32) -> (i32, i32) {
    %c0_i32 = arith.constant 0 : i32
    return %arg0, %arg1 : i32, i32
  }
}

module attributes {stable_mosaic.version = 11 : i64} {
  func.func @_maxpool_kernel(%arg0: i32, %arg1: memref<8x2x2x64xbf16, #tpu.memory_space<vmem>>, %arg2: memref<4x2x64xbf16, #tpu.memory_space<vmem>>) attributes {dimension_semantics = [#tpu.dimension_semantics<arbitrary>], iteration_bounds = array<i64: 1>, scalar_prefetch = 0 : i64, scratch_operands = 0 : i64, tpu.core_type = #tpu.core_type<tc>, window_params = [{transform_indices = @transform_0, window_bounds = array<i64: 8, 2, 2, 64>}, {transform_indices = @transform_1, window_bounds = array<i64: 4, 2, 64>}]} {
    %c0 = arith.constant 0 : index
    %c0_0 = arith.constant 0 : index
    %c0_1 = arith.constant 0 : index
    %c0_2 = arith.constant 0 : index
    %0 = vector.load %arg1[%c0, %c0_0, %c0_1, %c0_2] : memref<8x2x2x64xbf16, #tpu.memory_space<vmem>>, vector<8x2x1x64xbf16>
    %1 = vector.shape_cast %0 : vector<8x2x1x64xbf16> to vector<8x2x64xbf16>
    %c0_3 = arith.constant 0 : index
    %c0_4 = arith.constant 0 : index
    %c1 = arith.constant 1 : index
    %c0_5 = arith.constant 0 : index
    %2 = vector.load %arg1[%c0_3, %c0_4, %c1, %c0_5] : memref<8x2x2x64xbf16, #tpu.memory_space<vmem>>, vector<8x2x1x64xbf16>
    %3 = vector.shape_cast %2 : vector<8x2x1x64xbf16> to vector<8x2x64xbf16>
    %4 = arith.maximumf %1, %3 : vector<8x2x64xbf16>
    %5 = vector.shape_cast %4 : vector<8x2x64xbf16> to vector<4x2x2x64xbf16>
    %cst = arith.constant dense<0xFF80> : vector<4x2x64xbf16>
    %6 = vector.multi_reduction <maximumf>, %5, %cst [1] : vector<4x2x2x64xbf16> to vector<4x2x64xbf16>
    %c0_6 = arith.constant 0 : index
    %c0_7 = arith.constant 0 : index
    %c0_8 = arith.constant 0 : index
    %7 = vector.load %arg2[%c0_6, %c0_7, %c0_8] : memref<4x2x64xbf16, #tpu.memory_space<vmem>>, vector<4x2x64xbf16>
    tpu.vector_store %arg2[%c0_6, %c0_7, %c0_8], %6 {strides = array<i32>} : memref<4x2x64xbf16, #tpu.memory_space<vmem>>, vector<4x2x64xbf16>,
    return
  }
  func.func @transform_0(%arg0: i32) -> (i32, i32, i32, i32) {
    %c0_i32 = arith.constant 0 : i32
    %c0_i32_0 = arith.constant 0 : i32
    %c0_i32_1 = arith.constant 0 : i32
    %c0_i32_2 = arith.constant 0 : i32
    return %arg0, %c0_i32, %c0_i32_0, %c0_i32_1 : i32, i32, i32, i32
  }
  func.func @transform_1(%arg0: i32) -> (i32, i32, i32) {
    %c0_i32 = arith.constant 0 : i32
    %c0_i32_0 = arith.constant 0 : i32
    %c0_i32_1 = arith.constant 0 : i32
    return %arg0, %c0_i32, %c0_i32_0 : i32, i32, i32
  }
}

module attributes {stable_mosaic.version = 11 : i64} {
  func.func @_matmul_bias_act_kernel(%arg0: i32, %arg1: i32, %arg2: i32, %arg3: memref<8x256xbf16, #tpu.memory_space<vmem>>, %arg4: memref<256x256xbf16, #tpu.memory_space<vmem>>, %arg5: memref<1x256xf32, #tpu.memory_space<vmem>>, %arg6: memref<8x256xf32, #tpu.memory_space<vmem>>, %arg7: memref<8x256xf32, #tpu.memory_space<vmem>>) attributes {dimension_semantics = [#tpu.dimension_semantics<parallel>, #tpu.dimension_semantics<parallel>, #tpu.dimension_semantics<arbitrary>], iteration_bounds = array<i64: 1, 1, 1>, scalar_prefetch = 0 : i64, scratch_operands = 1 : i64, tpu.core_type = #tpu.core_type<tc>, window_params = [{transform_indices = @transform_0, window_bounds = array<i64: 8, 256>}, {transform_indices = @transform_1, window_bounds = array<i64: 256, 256>}, {transform_indices = @transform_2, window_bounds = array<i64: 1, 256>}, {transform_indices = @transform_3, window_bounds = array<i64: 8, 256>}]} {
    %c0_i32 = arith.constant 0 : i32
    %0 = arith.cmpi eq, %arg2, %c0_i32 : i32
    %1 = arith.extui %0 : i1 to i32
    %c0_i32_0 = arith.constant 0 : i32
    %2 = arith.cmpi ne, %1, %c0_i32_0 : i32
    scf.if %2 {
      %cst_10 = arith.constant 0.000000e+00 : f32
      %12 = vector.broadcast %cst_10 : f32 to vector<8x256xf32>
      %c0_11 = arith.constant 0 : index
      %c0_12 = arith.constant 0 : index
      %13 = vector.load %arg7[%c0_11, %c0_12] : memref<8x256xf32, #tpu.memory_space<vmem>>, vector<8x256xf32>
      tpu.vector_store %arg7[%c0_11, %c0_12], %12 {strides = array<i32>} : memref<8x256xf32, #tpu.memory_space<vmem>>, vector<8x256xf32>,
    } else {
    }
    %c0 = arith.constant 0 : index
    %c0_1 = arith.constant 0 : index
    %3 = vector.load %arg7[%c0, %c0_1] : memref<8x256xf32, #tpu.memory_space<vmem>>, vector<8x256xf32>
    %c0_2 = arith.constant 0 : index
    %c0_3 = arith.constant 0 : index
    %4 = vector.load %arg3[%c0_2, %c0_3] : memref<8x256xbf16, #tpu.memory_space<vmem>>, vector<8x256xbf16>
    %c0_4 = arith.constant 0 : index
    %c0_5 = arith.constant 0 : index
    %5 = vector.load %arg4[%c0_4, %c0_5] : memref<256x256xbf16, #tpu.memory_space<vmem>>, vector<256x256xbf16>
    %cst = arith.constant dense<0.000000e+00> : vector<8x256xf32>
    %6 = tpu.matmul %4, %5, %cst {dimension_numbers = #tpu.dot_dimension_numbers<[1], [0], [0], [1], [0, 0, 1, 1], [], []>} : vector<8x256xbf16>, vector<256x256xbf16>, vector<8x256xf32> -> vector<8x256xf32>
    %7 = arith.addf %3, %6 : vector<8x256xf32>
    %c0_6 = arith.constant 0 : index
    %c0_7 = arith.constant 0 : index
    %8 = vector.load %arg7[%c0_6, %c0_7] : memref<8x256xf32, #tpu.memory_space<vmem>>, vector<8x256xf32>
    tpu.vector_store %arg7[%c0_6, %c0_7], %7 {strides = array<i32>} : memref<8x256xf32, #tpu.memory_space<vmem>>, vector<8x256xf32>,
    %c0_i32_8 = arith.constant 0 : i32
    %9 = arith.cmpi eq, %arg2, %c0_i32_8 : i32
    %10 = arith.extui %9 : i1 to i32
    %c0_i32_9 = arith.constant 0 : i32
    %11 = arith.cmpi ne, %10, %c0_i32_9 : i32
    scf.if %11 {
      %c0_10 = arith.constant 0 : index
      %c0_11 = arith.constant 0 : index
      %12 = vector.load %arg7[%c0_10, %c0_11] : memref<8x256xf32, #tpu.memory_space<vmem>>, vector<8x256xf32>
      %c0_12 = arith.constant 0 : index
      %c0_13 = arith.constant 0 : index
      %13 = vector.load %arg5[%c0_12, %c0_13] : memref<1x256xf32, #tpu.memory_space<vmem>>, vector<1x256xf32>
      %14 = vector.broadcast %13 : vector<1x256xf32> to vector<8x256xf32>
      %15 = arith.addf %12, %14 : vector<8x256xf32>
      %c0_14 = arith.constant 0 : index
      %c0_15 = arith.constant 0 : index
      %16 = vector.load %arg6[%c0_14, %c0_15] : memref<8x256xf32, #tpu.memory_space<vmem>>, vector<8x256xf32>
      tpu.vector_store %arg6[%c0_14, %c0_15], %15 {strides = array<i32>} : memref<8x256xf32, #tpu.memory_space<vmem>>, vector<8x256xf32>,
    } else {
    }
    return
  }
  func.func @transform_0(%arg0: i32, %arg1: i32, %arg2: i32) -> (i32, i32) {
    %c0_i32 = arith.constant 0 : i32
    return %arg0, %arg2 : i32, i32
  }
  func.func @transform_1(%arg0: i32, %arg1: i32, %arg2: i32) -> (i32, i32) {
    %c0_i32 = arith.constant 0 : i32
    return %arg2, %arg1 : i32, i32
  }
  func.func @transform_2(%arg0: i32, %arg1: i32, %arg2: i32) -> (i32, i32) {
    %c0_i32 = arith.constant 0 : i32
    %c0_i32_0 = arith.constant 0 : i32
    return %c0_i32, %arg1 : i32, i32
  }
  func.func @transform_3(%arg0: i32, %arg1: i32, %arg2: i32) -> (i32, i32) {
    %c0_i32 = arith.constant 0 : i32
    return %arg0, %arg1 : i32, i32
  }
}

module attributes {stable_mosaic.version = 11 : i64} {
  func.func @_matmul_bias_act_kernel(%arg0: i32, %arg1: i32, %arg2: i32, %arg3: memref<8x128xbf16, #tpu.memory_space<vmem>>, %arg4: memref<128x256xbf16, #tpu.memory_space<vmem>>, %arg5: memref<1x256xf32, #tpu.memory_space<vmem>>, %arg6: memref<8x256xbf16, #tpu.memory_space<vmem>>, %arg7: memref<8x256xf32, #tpu.memory_space<vmem>>) attributes {dimension_semantics = [#tpu.dimension_semantics<parallel>, #tpu.dimension_semantics<parallel>, #tpu.dimension_semantics<arbitrary>], iteration_bounds = array<i64: 1, 1, 1>, scalar_prefetch = 0 : i64, scratch_operands = 1 : i64, tpu.core_type = #tpu.core_type<tc>, window_params = [{transform_indices = @transform_0, window_bounds = array<i64: 8, 128>}, {transform_indices = @transform_1, window_bounds = array<i64: 128, 256>}, {transform_indices = @transform_2, window_bounds = array<i64: 1, 256>}, {transform_indices = @transform_3, window_bounds = array<i64: 8, 256>}]} {
    %c0_i32 = arith.constant 0 : i32
    %0 = arith.cmpi eq, %arg2, %c0_i32 : i32
    %1 = arith.extui %0 : i1 to i32
    %c0_i32_0 = arith.constant 0 : i32
    %2 = arith.cmpi ne, %1, %c0_i32_0 : i32
    scf.if %2 {
      %cst_10 = arith.constant 0.000000e+00 : f32
      %12 = vector.broadcast %cst_10 : f32 to vector<8x256xf32>
      %c0_11 = arith.constant 0 : index
      %c0_12 = arith.constant 0 : index
      %13 = vector.load %arg7[%c0_11, %c0_12] : memref<8x256xf32, #tpu.memory_space<vmem>>, vector<8x256xf32>
      tpu.vector_store %arg7[%c0_11, %c0_12], %12 {strides = array<i32>} : memref<8x256xf32, #tpu.memory_space<vmem>>, vector<8x256xf32>,
    } else {
    }
    %c0 = arith.constant 0 : index
    %c0_1 = arith.constant 0 : index
    %3 = vector.load %arg7[%c0, %c0_1] : memref<8x256xf32, #tpu.memory_space<vmem>>, vector<8x256xf32>
    %c0_2 = arith.constant 0 : index
    %c0_3 = arith.constant 0 : index
    %4 = vector.load %arg3[%c0_2, %c0_3] : memref<8x128xbf16, #tpu.memory_space<vmem>>, vector<8x128xbf16>
    %c0_4 = arith.constant 0 : index
    %c0_5 = arith.constant 0 : index
    %5 = vector.load %arg4[%c0_4, %c0_5] : memref<128x256xbf16, #tpu.memory_space<vmem>>, vector<128x256xbf16>
    %cst = arith.constant dense<0.000000e+00> : vector<8x256xf32>
    %6 = tpu.matmul %4, %5, %cst {dimension_numbers = #tpu.dot_dimension_numbers<[1], [0], [0], [1], [0, 0, 1, 1], [], []>} : vector<8x128xbf16>, vector<128x256xbf16>, vector<8x256xf32> -> vector<8x256xf32>
    %7 = arith.addf %3, %6 : vector<8x256xf32>
    %c0_6 = arith.constant 0 : index
    %c0_7 = arith.constant 0 : index
    %8 = vector.load %arg7[%c0_6, %c0_7] : memref<8x256xf32, #tpu.memory_space<vmem>>, vector<8x256xf32>
    tpu.vector_store %arg7[%c0_6, %c0_7], %7 {strides = array<i32>} : memref<8x256xf32, #tpu.memory_space<vmem>>, vector<8x256xf32>,
    %c0_i32_8 = arith.constant 0 : i32
    %9 = arith.cmpi eq, %arg2, %c0_i32_8 : i32
    %10 = arith.extui %9 : i1 to i32
    %c0_i32_9 = arith.constant 0 : i32
    %11 = arith.cmpi ne, %10, %c0_i32_9 : i32
    scf.if %11 {
      %c0_10 = arith.constant 0 : index
      %c0_11 = arith.constant 0 : index
      %12 = vector.load %arg7[%c0_10, %c0_11] : memref<8x256xf32, #tpu.memory_space<vmem>>, vector<8x256xf32>
      %c0_12 = arith.constant 0 : index
      %c0_13 = arith.constant 0 : index
      %13 = vector.load %arg5[%c0_12, %c0_13] : memref<1x256xf32, #tpu.memory_space<vmem>>, vector<1x256xf32>
      %14 = vector.broadcast %13 : vector<1x256xf32> to vector<8x256xf32>
      %15 = arith.addf %12, %14 : vector<8x256xf32>
      %16 = arith.truncf %15 : vector<8x256xf32> to vector<8x256xbf16>
      %c0_14 = arith.constant 0 : index
      %c0_15 = arith.constant 0 : index
      %17 = vector.load %arg6[%c0_14, %c0_15] : memref<8x256xbf16, #tpu.memory_space<vmem>>, vector<8x256xbf16>
      tpu.vector_store %arg6[%c0_14, %c0_15], %16 {strides = array<i32>} : memref<8x256xbf16, #tpu.memory_space<vmem>>, vector<8x256xbf16>,
    } else {
    }
    return
  }
  func.func @transform_0(%arg0: i32, %arg1: i32, %arg2: i32) -> (i32, i32) {
    %c0_i32 = arith.constant 0 : i32
    return %arg0, %arg2 : i32, i32
  }
  func.func @transform_1(%arg0: i32, %arg1: i32, %arg2: i32) -> (i32, i32) {
    %c0_i32 = arith.constant 0 : i32
    return %arg2, %arg1 : i32, i32
  }
  func.func @transform_2(%arg0: i32, %arg1: i32, %arg2: i32) -> (i32, i32) {
    %c0_i32 = arith.constant 0 : i32
    %c0_i32_0 = arith.constant 0 : i32
    return %c0_i32, %arg1 : i32, i32
  }
  func.func @transform_3(%arg0: i32, %arg1: i32, %arg2: i32) -> (i32, i32) {
    %c0_i32 = arith.constant 0 : i32
    return %arg0, %arg1 : i32, i32
  }
}

module attributes {stable_mosaic.version = 11 : i64} {
  func.func @_matmul_bias_act_kernel(%arg0: i32, %arg1: i32, %arg2: i32, %arg3: memref<8x256xbf16, #tpu.memory_space<vmem>>, %arg4: memref<256x128xbf16, #tpu.memory_space<vmem>>, %arg5: memref<1x128xf32, #tpu.memory_space<vmem>>, %arg6: memref<8x128xbf16, #tpu.memory_space<vmem>>, %arg7: memref<8x128xf32, #tpu.memory_space<vmem>>) attributes {dimension_semantics = [#tpu.dimension_semantics<parallel>, #tpu.dimension_semantics<parallel>, #tpu.dimension_semantics<arbitrary>], iteration_bounds = array<i64: 1, 1, 1>, scalar_prefetch = 0 : i64, scratch_operands = 1 : i64, tpu.core_type = #tpu.core_type<tc>, window_params = [{transform_indices = @transform_0, window_bounds = array<i64: 8, 256>}, {transform_indices = @transform_1, window_bounds = array<i64: 256, 128>}, {transform_indices = @transform_2, window_bounds = array<i64: 1, 128>}, {transform_indices = @transform_3, window_bounds = array<i64: 8, 128>}]} {
    %c0_i32 = arith.constant 0 : i32
    %0 = arith.cmpi eq, %arg2, %c0_i32 : i32
    %1 = arith.extui %0 : i1 to i32
    %c0_i32_0 = arith.constant 0 : i32
    %2 = arith.cmpi ne, %1, %c0_i32_0 : i32
    scf.if %2 {
      %cst_10 = arith.constant 0.000000e+00 : f32
      %12 = vector.broadcast %cst_10 : f32 to vector<8x128xf32>
      %c0_11 = arith.constant 0 : index
      %c0_12 = arith.constant 0 : index
      %13 = vector.load %arg7[%c0_11, %c0_12] : memref<8x128xf32, #tpu.memory_space<vmem>>, vector<8x128xf32>
      tpu.vector_store %arg7[%c0_11, %c0_12], %12 {strides = array<i32>} : memref<8x128xf32, #tpu.memory_space<vmem>>, vector<8x128xf32>,
    } else {
    }
    %c0 = arith.constant 0 : index
    %c0_1 = arith.constant 0 : index
    %3 = vector.load %arg7[%c0, %c0_1] : memref<8x128xf32, #tpu.memory_space<vmem>>, vector<8x128xf32>
    %c0_2 = arith.constant 0 : index
    %c0_3 = arith.constant 0 : index
    %4 = vector.load %arg3[%c0_2, %c0_3] : memref<8x256xbf16, #tpu.memory_space<vmem>>, vector<8x256xbf16>
    %c0_4 = arith.constant 0 : index
    %c0_5 = arith.constant 0 : index
    %5 = vector.load %arg4[%c0_4, %c0_5] : memref<256x128xbf16, #tpu.memory_space<vmem>>, vector<256x128xbf16>
    %cst = arith.constant dense<0.000000e+00> : vector<8x128xf32>
    %6 = tpu.matmul %4, %5, %cst {dimension_numbers = #tpu.dot_dimension_numbers<[1], [0], [0], [1], [0, 0, 1, 1], [], []>} : vector<8x256xbf16>, vector<256x128xbf16>, vector<8x128xf32> -> vector<8x128xf32>
    %7 = arith.addf %3, %6 : vector<8x128xf32>
    %c0_6 = arith.constant 0 : index
    %c0_7 = arith.constant 0 : index
    %8 = vector.load %arg7[%c0_6, %c0_7] : memref<8x128xf32, #tpu.memory_space<vmem>>, vector<8x128xf32>
    tpu.vector_store %arg7[%c0_6, %c0_7], %7 {strides = array<i32>} : memref<8x128xf32, #tpu.memory_space<vmem>>, vector<8x128xf32>,
    %c0_i32_8 = arith.constant 0 : i32
    %9 = arith.cmpi eq, %arg2, %c0_i32_8 : i32
    %10 = arith.extui %9 : i1 to i32
    %c0_i32_9 = arith.constant 0 : i32
    %11 = arith.cmpi ne, %10, %c0_i32_9 : i32
    scf.if %11 {
      %c0_10 = arith.constant 0 : index
      %c0_11 = arith.constant 0 : index
      %12 = vector.load %arg7[%c0_10, %c0_11] : memref<8x128xf32, #tpu.memory_space<vmem>>, vector<8x128xf32>
      %c0_12 = arith.constant 0 : index
      %c0_13 = arith.constant 0 : index
      %13 = vector.load %arg5[%c0_12, %c0_13] : memref<1x128xf32, #tpu.memory_space<vmem>>, vector<1x128xf32>
      %14 = vector.broadcast %13 : vector<1x128xf32> to vector<8x128xf32>
      %15 = arith.addf %12, %14 : vector<8x128xf32>
      %cst_14 = arith.constant 0.000000e+00 : f32
      %16 = vector.broadcast %cst_14 : f32 to vector<8x128xf32>
      %17 = arith.maximumf %15, %16 : vector<8x128xf32>
      %18 = arith.truncf %17 : vector<8x128xf32> to vector<8x128xbf16>
      %c0_15 = arith.constant 0 : index
      %c0_16 = arith.constant 0 : index
      %19 = vector.load %arg6[%c0_15, %c0_16] : memref<8x128xbf16, #tpu.memory_space<vmem>>, vector<8x128xbf16>
      tpu.vector_store %arg6[%c0_15, %c0_16], %18 {strides = array<i32>} : memref<8x128xbf16, #tpu.memory_space<vmem>>, vector<8x128xbf16>,
    } else {
    }
    return
  }
  func.func @transform_0(%arg0: i32, %arg1: i32, %arg2: i32) -> (i32, i32) {
    %c0_i32 = arith.constant 0 : i32
    return %arg0, %arg2 : i32, i32
  }
  func.func @transform_1(%arg0: i32, %arg1: i32, %arg2: i32) -> (i32, i32) {
    %c0_i32 = arith.constant 0 : i32
    return %arg2, %arg1 : i32, i32
  }
  func.func @transform_2(%arg0: i32, %arg1: i32, %arg2: i32) -> (i32, i32) {
    %c0_i32 = arith.constant 0 : i32
    %c0_i32_0 = arith.constant 0 : i32
    return %c0_i32, %arg1 : i32, i32
  }
  func.func @transform_3(%arg0: i32, %arg1: i32, %arg2: i32) -> (i32, i32) {
    %c0_i32 = arith.constant 0 : i32
    return %arg0, %arg1 : i32, i32
  }
}

module attributes {stable_mosaic.version = 11 : i64} {
  func.func @_matmul_bias_act_kernel(%arg0: i32, %arg1: i32, %arg2: i32, %arg3: memref<32x256xbf16, #tpu.memory_space<vmem>>, %arg4: memref<256x128xbf16, #tpu.memory_space<vmem>>, %arg5: memref<1x128xf32, #tpu.memory_space<vmem>>, %arg6: memref<32x128xbf16, #tpu.memory_space<vmem>>, %arg7: memref<32x128xf32, #tpu.memory_space<vmem>>) attributes {dimension_semantics = [#tpu.dimension_semantics<parallel>, #tpu.dimension_semantics<parallel>, #tpu.dimension_semantics<arbitrary>], iteration_bounds = array<i64: 1, 1, 1>, scalar_prefetch = 0 : i64, scratch_operands = 1 : i64, tpu.core_type = #tpu.core_type<tc>, window_params = [{transform_indices = @transform_0, window_bounds = array<i64: 32, 256>}, {transform_indices = @transform_1, window_bounds = array<i64: 256, 128>}, {transform_indices = @transform_2, window_bounds = array<i64: 1, 128>}, {transform_indices = @transform_3, window_bounds = array<i64: 32, 128>}]} {
    %c0_i32 = arith.constant 0 : i32
    %0 = arith.cmpi eq, %arg2, %c0_i32 : i32
    %1 = arith.extui %0 : i1 to i32
    %c0_i32_0 = arith.constant 0 : i32
    %2 = arith.cmpi ne, %1, %c0_i32_0 : i32
    scf.if %2 {
      %cst_10 = arith.constant 0.000000e+00 : f32
      %12 = vector.broadcast %cst_10 : f32 to vector<32x128xf32>
      %c0_11 = arith.constant 0 : index
      %c0_12 = arith.constant 0 : index
      %13 = vector.load %arg7[%c0_11, %c0_12] : memref<32x128xf32, #tpu.memory_space<vmem>>, vector<32x128xf32>
      tpu.vector_store %arg7[%c0_11, %c0_12], %12 {strides = array<i32>} : memref<32x128xf32, #tpu.memory_space<vmem>>, vector<32x128xf32>,
    } else {
    }
    %c0 = arith.constant 0 : index
    %c0_1 = arith.constant 0 : index
    %3 = vector.load %arg7[%c0, %c0_1] : memref<32x128xf32, #tpu.memory_space<vmem>>, vector<32x128xf32>
    %c0_2 = arith.constant 0 : index
    %c0_3 = arith.constant 0 : index
    %4 = vector.load %arg3[%c0_2, %c0_3] : memref<32x256xbf16, #tpu.memory_space<vmem>>, vector<32x256xbf16>
    %c0_4 = arith.constant 0 : index
    %c0_5 = arith.constant 0 : index
    %5 = vector.load %arg4[%c0_4, %c0_5] : memref<256x128xbf16, #tpu.memory_space<vmem>>, vector<256x128xbf16>
    %cst = arith.constant dense<0.000000e+00> : vector<32x128xf32>
    %6 = tpu.matmul %4, %5, %cst {dimension_numbers = #tpu.dot_dimension_numbers<[1], [0], [0], [1], [0, 0, 1, 1], [], []>} : vector<32x256xbf16>, vector<256x128xbf16>, vector<32x128xf32> -> vector<32x128xf32>
    %7 = arith.addf %3, %6 : vector<32x128xf32>
    %c0_6 = arith.constant 0 : index
    %c0_7 = arith.constant 0 : index
    %8 = vector.load %arg7[%c0_6, %c0_7] : memref<32x128xf32, #tpu.memory_space<vmem>>, vector<32x128xf32>
    tpu.vector_store %arg7[%c0_6, %c0_7], %7 {strides = array<i32>} : memref<32x128xf32, #tpu.memory_space<vmem>>, vector<32x128xf32>,
    %c0_i32_8 = arith.constant 0 : i32
    %9 = arith.cmpi eq, %arg2, %c0_i32_8 : i32
    %10 = arith.extui %9 : i1 to i32
    %c0_i32_9 = arith.constant 0 : i32
    %11 = arith.cmpi ne, %10, %c0_i32_9 : i32
    scf.if %11 {
      %c0_10 = arith.constant 0 : index
      %c0_11 = arith.constant 0 : index
      %12 = vector.load %arg7[%c0_10, %c0_11] : memref<32x128xf32, #tpu.memory_space<vmem>>, vector<32x128xf32>
      %c0_12 = arith.constant 0 : index
      %c0_13 = arith.constant 0 : index
      %13 = vector.load %arg5[%c0_12, %c0_13] : memref<1x128xf32, #tpu.memory_space<vmem>>, vector<1x128xf32>
      %14 = vector.broadcast %13 : vector<1x128xf32> to vector<32x128xf32>
      %15 = arith.addf %12, %14 : vector<32x128xf32>
      %cst_14 = arith.constant 0.000000e+00 : f32
      %16 = vector.broadcast %cst_14 : f32 to vector<32x128xf32>
      %17 = arith.maximumf %15, %16 : vector<32x128xf32>
      %18 = arith.truncf %17 : vector<32x128xf32> to vector<32x128xbf16>
      %c0_15 = arith.constant 0 : index
      %c0_16 = arith.constant 0 : index
      %19 = vector.load %arg6[%c0_15, %c0_16] : memref<32x128xbf16, #tpu.memory_space<vmem>>, vector<32x128xbf16>
      tpu.vector_store %arg6[%c0_15, %c0_16], %18 {strides = array<i32>} : memref<32x128xbf16, #tpu.memory_space<vmem>>, vector<32x128xbf16>,
    } else {
    }
    return
  }
  func.func @transform_0(%arg0: i32, %arg1: i32, %arg2: i32) -> (i32, i32) {
    %c0_i32 = arith.constant 0 : i32
    return %arg0, %arg2 : i32, i32
  }
  func.func @transform_1(%arg0: i32, %arg1: i32, %arg2: i32) -> (i32, i32) {
    %c0_i32 = arith.constant 0 : i32
    return %arg2, %arg1 : i32, i32
  }
  func.func @transform_2(%arg0: i32, %arg1: i32, %arg2: i32) -> (i32, i32) {
    %c0_i32 = arith.constant 0 : i32
    %c0_i32_0 = arith.constant 0 : i32
    return %c0_i32, %arg1 : i32, i32
  }
  func.func @transform_3(%arg0: i32, %arg1: i32, %arg2: i32) -> (i32, i32) {
    %c0_i32 = arith.constant 0 : i32
    return %arg0, %arg1 : i32, i32
  }
}

module attributes {stable_mosaic.version = 11 : i64} {
  func.func @_matmul_bias_act_kernel(%arg0: i32, %arg1: i32, %arg2: i32, %arg3: memref<128x256xbf16, #tpu.memory_space<vmem>>, %arg4: memref<256x128xbf16, #tpu.memory_space<vmem>>, %arg5: memref<1x128xf32, #tpu.memory_space<vmem>>, %arg6: memref<128x128xf32, #tpu.memory_space<vmem>>, %arg7: memref<128x128xf32, #tpu.memory_space<vmem>>) attributes {dimension_semantics = [#tpu.dimension_semantics<parallel>, #tpu.dimension_semantics<parallel>, #tpu.dimension_semantics<arbitrary>], iteration_bounds = array<i64: 1, 1, 1>, scalar_prefetch = 0 : i64, scratch_operands = 1 : i64, tpu.core_type = #tpu.core_type<tc>, window_params = [{transform_indices = @transform_0, window_bounds = array<i64: 128, 256>}, {transform_indices = @transform_1, window_bounds = array<i64: 256, 128>}, {transform_indices = @transform_2, window_bounds = array<i64: 1, 128>}, {transform_indices = @transform_3, window_bounds = array<i64: 128, 128>}]} {
    %c0_i32 = arith.constant 0 : i32
    %0 = arith.cmpi eq, %arg2, %c0_i32 : i32
    %1 = arith.extui %0 : i1 to i32
    %c0_i32_0 = arith.constant 0 : i32
    %2 = arith.cmpi ne, %1, %c0_i32_0 : i32
    scf.if %2 {
      %cst_10 = arith.constant 0.000000e+00 : f32
      %12 = vector.broadcast %cst_10 : f32 to vector<128x128xf32>
      %c0_11 = arith.constant 0 : index
      %c0_12 = arith.constant 0 : index
      %13 = vector.load %arg7[%c0_11, %c0_12] : memref<128x128xf32, #tpu.memory_space<vmem>>, vector<128x128xf32>
      tpu.vector_store %arg7[%c0_11, %c0_12], %12 {strides = array<i32>} : memref<128x128xf32, #tpu.memory_space<vmem>>, vector<128x128xf32>,
    } else {
    }
    %c0 = arith.constant 0 : index
    %c0_1 = arith.constant 0 : index
    %3 = vector.load %arg7[%c0, %c0_1] : memref<128x128xf32, #tpu.memory_space<vmem>>, vector<128x128xf32>
    %c0_2 = arith.constant 0 : index
    %c0_3 = arith.constant 0 : index
    %4 = vector.load %arg3[%c0_2, %c0_3] : memref<128x256xbf16, #tpu.memory_space<vmem>>, vector<128x256xbf16>
    %c0_4 = arith.constant 0 : index
    %c0_5 = arith.constant 0 : index
    %5 = vector.load %arg4[%c0_4, %c0_5] : memref<256x128xbf16, #tpu.memory_space<vmem>>, vector<256x128xbf16>
    %cst = arith.constant dense<0.000000e+00> : vector<128x128xf32>
    %6 = tpu.matmul %4, %5, %cst {dimension_numbers = #tpu.dot_dimension_numbers<[1], [0], [0], [1], [0, 0, 1, 1], [], []>} : vector<128x256xbf16>, vector<256x128xbf16>, vector<128x128xf32> -> vector<128x128xf32>
    %7 = arith.addf %3, %6 : vector<128x128xf32>
    %c0_6 = arith.constant 0 : index
    %c0_7 = arith.constant 0 : index
    %8 = vector.load %arg7[%c0_6, %c0_7] : memref<128x128xf32, #tpu.memory_space<vmem>>, vector<128x128xf32>
    tpu.vector_store %arg7[%c0_6, %c0_7], %7 {strides = array<i32>} : memref<128x128xf32, #tpu.memory_space<vmem>>, vector<128x128xf32>,
    %c0_i32_8 = arith.constant 0 : i32
    %9 = arith.cmpi eq, %arg2, %c0_i32_8 : i32
    %10 = arith.extui %9 : i1 to i32
    %c0_i32_9 = arith.constant 0 : i32
    %11 = arith.cmpi ne, %10, %c0_i32_9 : i32
    scf.if %11 {
      %c0_10 = arith.constant 0 : index
      %c0_11 = arith.constant 0 : index
      %12 = vector.load %arg7[%c0_10, %c0_11] : memref<128x128xf32, #tpu.memory_space<vmem>>, vector<128x128xf32>
      %c0_12 = arith.constant 0 : index
      %c0_13 = arith.constant 0 : index
      %13 = vector.load %arg5[%c0_12, %c0_13] : memref<1x128xf32, #tpu.memory_space<vmem>>, vector<1x128xf32>
      %14 = vector.broadcast %13 : vector<1x128xf32> to vector<128x128xf32>
      %15 = arith.addf %12, %14 : vector<128x128xf32>
      %16 = arith.negf %15 : vector<128x128xf32>
      %17 = math.exp %16 : vector<128x128xf32>
      %cst_14 = arith.constant 1.000000e+00 : f32
      %18 = vector.broadcast %cst_14 : f32 to vector<128x128xf32>
      %19 = arith.addf %18, %17 : vector<128x128xf32>
      %20 = arith.divf %18, %19 : vector<128x128xf32>
      %c0_15 = arith.constant 0 : index
      %c0_16 = arith.constant 0 : index
      %21 = vector.load %arg6[%c0_15, %c0_16] : memref<128x128xf32, #tpu.memory_space<vmem>>, vector<128x128xf32>
      tpu.vector_store %arg6[%c0_15, %c0_16], %20 {strides = array<i32>} : memref<128x128xf32, #tpu.memory_space<vmem>>, vector<128x128xf32>,
    } else {
    }
    return
  }
  func.func @transform_0(%arg0: i32, %arg1: i32, %arg2: i32) -> (i32, i32) {
    %c0_i32 = arith.constant 0 : i32
    return %arg0, %arg2 : i32, i32
  }
  func.func @transform_1(%arg0: i32, %arg1: i32, %arg2: i32) -> (i32, i32) {
    %c0_i32 = arith.constant 0 : i32
    return %arg2, %arg1 : i32, i32
  }
  func.func @transform_2(%arg0: i32, %arg1: i32, %arg2: i32) -> (i32, i32) {
    %c0_i32 = arith.constant 0 : i32
    %c0_i32_0 = arith.constant 0 : i32
    return %c0_i32, %arg1 : i32, i32
  }
  func.func @transform_3(%arg0: i32, %arg1: i32, %arg2: i32) -> (i32, i32) {
    %c0_i32 = arith.constant 0 : i32
    return %arg0, %arg1 : i32, i32
  }
}

</mosaic_0001>

<bundles_post_ra>
// kernel: vae_forward.23
= control target key start
LH: loop header
LB: loop body
LE: loop exit
PB: predicated region body
PF: predicated region fallthrough
CT: control target
= control target key end

     0   :  { %s1499_s12 = smov 0   ;;  %s1501_s13 = smov 0   ;;  %s1636_s0 = inlined_call_operand.vmem [shape: bf16[512,128], index: 0, kind: input, shape index: {}]   ;;  %s1637_s1 = inlined_call_operand.vmem [shape: bf16[128,128], index: 1, kind: input, shape index: {}]   ;;  %s1638_s2 = inlined_call_operand.vmem [shape: f32[1,128], index: 2, kind: input, shape index: {}]   ;;  %s1639_s3 = inlined_call_operand.vmem [shape: bf16[512,128], index: 3, kind: output, shape index: {}]  }
   0x1   :  { %s1503_s14 = smov 0  }
   0x2 LB: > { %s32_s15 = sadd.s32 1, %s1473_s13  ;;  %p1128_p0 = scmp.ge.s32.totalorder %s1477_s14, 1  ;;  %s1477_s14 = sphi %s1503_s14, %s13_s14   ;;  %s1473_s13 = sphi %s1501_s13, %s1641_s13   ;;  %s1469_s12 = sphi %s1499_s12, %s1640_s12  }
   0x3   : > { %p34_p1 = scmp.ge.s32.totalorder %s32_s15, 2  ;;  %p188_p2 = scmp.lt.s32.totalorder %s1477_s14, 3 }
   0x5   : > { %s1643_s15 = smov (%p34_p1, %s32_s15), 0  ;;  %p189_p3 = pnand %p1128_p0, %p188_p2 }
   0x6   : > { %v1431_v0 = vld [vmem:[%s1637_s1] sm:$0xff] (!%p189_p3)   ;;  %s1129_s18 = sshll.u32 (!%p189_p3), %s1469_s12, 5  ;;  %v1432_v1 = vld [vmem:[%s1637_s1 + $0x8] sm:$0xff] (!%p189_p3)   ;;  %v1433_v2 = vld [vmem:[%s1637_s1 + $0x10] sm:$0xff] (!%p189_p3)  }
   0x7   : > { %192 = sbr.rel (%p189_p3) target bundleno = 285 (0x11d), region = 32  ;;  %p230_p4 = scmp.lt.s32.totalorder (!%p189_p3), %s1129_s18, 63  ;;  %1343 = vmatprep.subr.bf16.mxu0 (!%p189_p3), %v1431_v0  ;;  %1391 = vmatprep.subr.bf16.mxu1 (!%p189_p3), %v1431_v0  ;;  %v1434_v3 = vld [vmem:[%s1637_s1 + $0x18] sm:$0xff] (!%p189_p3)   ;;  %v1435_v6 = vld [vmem:[%s1637_s1 + $0x20] sm:$0xff] (!%p189_p3)   ;;  %v1436_v7 = vld [vmem:[%s1637_s1 + $0x28] sm:$0xff] (!%p189_p3)  }
   0x8   : > { %1344 = vmatpush3.bf16.msra.mxu0 (!%p189_p3), %v1431_v0  ;;  %1399 = vmatpush3.bf16.msra.mxu1 (!%p189_p3), %v1431_v0  ;;  %v1437_v8 = vld [vmem:[%s1637_s1 + $0x30] sm:$0xff] (!%p189_p3)   ;;  %v1438_v9 = vld [vmem:[%s1637_s1 + $0x38] sm:$0xff] (!%p189_p3)   ;;  %v1570_v24 = vld [vmem:[%s1638_s2] ss:$0 sm:$0xff] (!%p189_p3) }
   0x9   : > { %1345 = vmatprep.subr.bf16.mxu0 (!%p189_p3), %v1432_v1  ;;  %1392 = vmatprep.subr.bf16.mxu1 (!%p189_p3), %v1432_v1 }
   0xc   : > { %1346 = vmatpush3.bf16.msra.mxu0 (!%p189_p3), %v1432_v1  ;;  %1400 = vmatpush3.bf16.msra.mxu1 (!%p189_p3), %v1432_v1 }
   0xd   : > { %1347 = vmatprep.subr.bf16.mxu0 (!%p189_p3), %v1433_v2  ;;  %1393 = vmatprep.subr.bf16.mxu1 (!%p189_p3), %v1433_v2 }
   0xe   : > { %s1645_s18 = smov (!%p230_p4, %s1129_s18), 63 }
   0xf   : > { %s1130_s23 = sshll.u32 %s1645_s18, 2 }
  0x10   : > { %s1534_s26 = scalar_lea.vmem %s1636_s0, %s1130_s23  ;;  %1348 = vmatpush3.bf16.msra.mxu0 %v1433_v2  ;;  %1401 = vmatpush3.bf16.msra.mxu1 %v1433_v2  ;;  %s1585_s17 = scalar_lea.vmem %s1639_s3, %s1130_s23 }
  0x11   : > { %v1439_v4 = vld [vmem:[%s1534_s26] sm:$0xff]   ;;  %1349 = vmatprep.subr.bf16.mxu0 %v1434_v3  ;;  %1394 = vmatprep.subr.bf16.mxu1 %v1434_v3  ;;  %v1441_v10 = vld [vmem:[%s1534_s26 + $0x8] sm:$0xff]   ;;  %v1443_v12 = vld [vmem:[%s1534_s26 + $0x10] sm:$0xff]  }
  0x12   : > { %v1440_v5 = vld [vmem:[%s1534_s26 + $0x40] sm:$0xff]   ;;  %1359 = vmatprep.mubr.bf16.mxu0 %v1439_v4  ;;  %v1442_v11 = vld [vmem:[%s1534_s26 + $0x48] sm:$0xff]   ;;  %v1444_v13 = vld [vmem:[%s1534_s26 + $0x50] sm:$0xff]  }
  0x13   : > { %1375 = vmatprep.mubr.bf16.mxu1 %v1440_v5  ;;  %v1445_v14 = vld [vmem:[%s1534_s26 + $0x18] sm:$0xff]   ;;  %v1447_v16 = vld [vmem:[%s1534_s26 + $0x20] sm:$0xff]   ;;  %v1449_v18 = vld [vmem:[%s1534_s26 + $0x28] sm:$0xff]  }
  0x14   : > { %1350 = vmatpush3.bf16.msra.mxu0 %v1434_v3  ;;  %1402 = vmatpush3.bf16.msra.mxu1 %v1434_v3  ;;  %v1446_v15 = vld [vmem:[%s1534_s26 + $0x58] sm:$0xff]   ;;  %v1448_v17 = vld [vmem:[%s1534_s26 + $0x60] sm:$0xff]   ;;  %v1450_v19 = vld [vmem:[%s1534_s26 + $0x68] sm:$0xff]  }
  0x15   : > { %1351 = vmatprep.subr.bf16.mxu0 %v1435_v6  ;;  %1395 = vmatprep.subr.bf16.mxu1 %v1435_v6  ;;  %v1451_v20 = vld [vmem:[%s1534_s26 + $0x30] sm:$0xff]   ;;  %v1453_v22 = vld [vmem:[%s1534_s26 + $0x38] sm:$0xff]  }
  0x16   : > { %v1452_v21 = vld [vmem:[%s1534_s26 + $0x70] sm:$0xff]   ;;  %v1454_v23 = vld [vmem:[%s1534_s26 + $0x78] sm:$0xff]  }
  0x18   : > { %1352 = vmatpush3.bf16.msra.mxu0 %v1435_v6  ;;  %1403 = vmatpush3.bf16.msra.mxu1 %v1435_v6 }
  0x19   : > { %1353 = vmatprep.subr.bf16.mxu0 %v1436_v7  ;;  %1396 = vmatprep.subr.bf16.mxu1 %v1436_v7 }
  0x1c   : > { %1354 = vmatpush3.bf16.msra.mxu0 %v1436_v7  ;;  %1404 = vmatpush3.bf16.msra.mxu1 %v1436_v7 }
  0x1d   : > { %1355 = vmatprep.subr.bf16.mxu0 %v1437_v8  ;;  %1397 = vmatprep.subr.bf16.mxu1 %v1437_v8 }
  0x20   : > { %1356 = vmatpush3.bf16.msra.mxu0 %v1437_v8  ;;  %1405 = vmatpush3.bf16.msra.mxu1 %v1437_v8 }
  0x21   : > { %1357 = vmatprep.subr.bf16.mxu0 %v1438_v9  ;;  %1398 = vmatprep.subr.bf16.mxu1 %v1438_v9 }
  0x24   : > { %1358 = vmatpush3.bf16.msra.mxu0 %v1438_v9  ;;  %1406 = vmatpush3.bf16.msra.mxu1 %v1438_v9 }
  0x27   : > { %1360 = vmatmul.mubr.bf16.vlgmr.msra.gmra.mrb[0].mxu0 %v1441_v10  ;;  %1376 = vmatmul.mubr.bf16.vlgmr.msra.gmra.mrb[0].mxu1 %v1442_v11 }
  0x28   : > { %1363 = vmatprep.mubr.bf16.mxu0 %v1443_v12  ;;  %1379 = vmatprep.mubr.bf16.mxu1 %v1444_v13 }
  0x2f   : > { %1364 = vmatmul.mubr.bf16.gmra.mrb[4].mxu0 %v1445_v14  ;;  %1380 = vmatmul.mubr.bf16.gmra.mrb[4].mxu1 %v1446_v15 }
  0x30   : > { %1367 = vmatprep.mubr.bf16.mxu0 %v1447_v16  ;;  %1383 = vmatprep.mubr.bf16.mxu1 %v1448_v17 }
  0x37   : > { %1368 = vmatmul.mubr.bf16.gmra.mrb[8].mxu0 %v1449_v18  ;;  %1384 = vmatmul.mubr.bf16.gmra.mrb[8].mxu1 %v1450_v19 }
  0x38   : > { %1371 = vmatprep.mubr.bf16.mxu0 %v1451_v20  ;;  %1387 = vmatprep.mubr.bf16.mxu1 %v1452_v21 }
  0x3f   : > { %1372 = vmatmul.mubr.bf16.gmra.mrb[12].mxu0 %v1453_v22  ;;  %1388 = vmatmul.mubr.bf16.gmra.mrb[12].mxu1 %v1454_v23 }
  0xfa   : > { %v1361_v25 = vpop.f32.mrb[0].mxu0  ;;  %v1377_v26 = vpop.f32.mrb[0].mxu1 }
  0xfb   : > { %v789_v27 = vadd.f32 %v1361_v25, %v1570_v24  ;;  %v805_v28 = vadd.f32 %v1377_v26, %v1570_v24  ;;  %v554_v29 = vpop.f32.mrb[1].mxu0  ;;  %v618_v30 = vpop.f32.mrb[1].mxu1 }
  0xfc   : > { %v787_v31 = vadd.f32 %v1570_v24, %v554_v29  ;;  %v803_v32 = vadd.f32 %v1570_v24, %v618_v30  ;;  %v1362_v33 = vpop.f32.mrb[2].mxu0  ;;  %v1378_v34 = vpop.f32.mrb[2].mxu1 }
  0xfd   : > { %v790_v35 = vadd.f32 %v1362_v33, %v1570_v24  ;;  %v806_v36 = vadd.f32 %v1378_v34, %v1570_v24  ;;  %v557_v37 = vpop.f32.mrb[3].mxu0  ;;  %v621_v38 = vpop.f32.mrb[3].mxu1  ;;  %v821_v41 = vmax.f32 %v789_v27, 0.0  ;;  %v837_v42 = vmax.f32 %v805_v28, 0.0 }
  0xfe   : > { %v788_v39 = vadd.f32 %v1570_v24, %v557_v37  ;;  %v804_v40 = vadd.f32 %v1570_v24, %v621_v38  ;;  %v819_v45 = vmax.f32 %v787_v31, 0.0  ;;  %v835_v46 = vmax.f32 %v803_v32, 0.0 }
  0xff   : > { %v822_v43 = vmax.f32 %v790_v35, 0.0  ;;  %v838_v44 = vmax.f32 %v806_v36, 0.0 }
 0x100   : > { %v820_v47 = vmax.f32 %v788_v39, 0.0  ;;  %v836_v48 = vmax.f32 %v804_v40, 0.0 }
 0x101   : > { %v1232_v49 = vpack.c.bf16 %v822_v43, %v821_v41  ;;  %v1272_v50 = vpack.c.bf16 %v838_v44, %v837_v42 }
 0x102   : > { %v1227_v51 = vpack.c.bf16 %v820_v47, %v819_v45  ;;  %v1267_v52 = vpack.c.bf16 %v836_v48, %v835_v46  ;;  %v1365_v53 = vpop.f32.mrb[4].mxu0  ;;  %v1381_v54 = vpop.f32.mrb[4].mxu1 }
 0x103   : > { %1304 = vst [vmem:[%s1585_s17 + $0x8] sm:$0xff] %v1232_v49   ;;  %1312 = vst [vmem:[%s1585_s17 + $0x48] sm:$0xff] %v1272_v50   ;;  %v793_v55 = vadd.f32 %v1365_v53, %v1570_v24  ;;  %v809_v56 = vadd.f32 %v1381_v54, %v1570_v24  ;;  %v570_v57 = vpop.f32.mrb[5].mxu0  ;;  %v634_v58 = vpop.f32.mrb[5].mxu1 }
 0x104   : > { %1228 = vst [vmem:[%s1585_s17] sm:$0xff] %v1227_v51   ;;  %1311 = vst [vmem:[%s1585_s17 + $0x40] sm:$0xff] %v1267_v52   ;;  %v791_v59 = vadd.f32 %v1570_v24, %v570_v57  ;;  %v807_v60 = vadd.f32 %v1570_v24, %v634_v58  ;;  %v1366_v61 = vpop.f32.mrb[6].mxu0  ;;  %v1382_v62 = vpop.f32.mrb[6].mxu1 }
 0x105   : > { %v794_v63 = vadd.f32 %v1366_v61, %v1570_v24  ;;  %v810_v0 = vadd.f32 %v1382_v62, %v1570_v24  ;;  %v573_v1 = vpop.f32.mrb[7].mxu0  ;;  %v637_v2 = vpop.f32.mrb[7].mxu1  ;;  %v825_v5 = vmax.f32 %v793_v55, 0.0  ;;  %v841_v6 = vmax.f32 %v809_v56, 0.0 }
 0x106   : > { %v792_v3 = vadd.f32 %v1570_v24, %v573_v1  ;;  %v808_v4 = vadd.f32 %v1570_v24, %v637_v2  ;;  %v823_v9 = vmax.f32 %v791_v59, 0.0  ;;  %v839_v10 = vmax.f32 %v807_v60, 0.0 }
 0x107   : > { %v826_v7 = vmax.f32 %v794_v63, 0.0  ;;  %v842_v8 = vmax.f32 %v810_v0, 0.0 }
 0x108   : > { %v824_v11 = vmax.f32 %v792_v3, 0.0  ;;  %v840_v12 = vmax.f32 %v808_v4, 0.0 }
 0x109   : > { %v1242_v13 = vpack.c.bf16 %v826_v7, %v825_v5  ;;  %v1282_v14 = vpack.c.bf16 %v842_v8, %v841_v6 }
 0x10a   : > { %v1237_v15 = vpack.c.bf16 %v824_v11, %v823_v9  ;;  %v1277_v16 = vpack.c.bf16 %v840_v12, %v839_v10  ;;  %v1369_v17 = vpop.f32.mrb[8].mxu0  ;;  %v1385_v18 = vpop.f32.mrb[8].mxu1 }
 0x10b   : > { %1306 = vst [vmem:[%s1585_s17 + $0x18] sm:$0xff] %v1242_v13   ;;  %1314 = vst [vmem:[%s1585_s17 + $0x58] sm:$0xff] %v1282_v14   ;;  %v797_v19 = vadd.f32 %v1369_v17, %v1570_v24  ;;  %v813_v20 = vadd.f32 %v1385_v18, %v1570_v24  ;;  %v586_v21 = vpop.f32.mrb[9].mxu0  ;;  %v650_v22 = vpop.f32.mrb[9].mxu1 }
 0x10c   : > { %1305 = vst [vmem:[%s1585_s17 + $0x10] sm:$0xff] %v1237_v15   ;;  %1313 = vst [vmem:[%s1585_s17 + $0x50] sm:$0xff] %v1277_v16   ;;  %v795_v23 = vadd.f32 %v1570_v24, %v586_v21  ;;  %v811_v25 = vadd.f32 %v1570_v24, %v650_v22  ;;  %v1370_v26 = vpop.f32.mrb[10].mxu0  ;;  %v1386_v27 = vpop.f32.mrb[10].mxu1 }
 0x10d   : > { %v798_v28 = vadd.f32 %v1370_v26, %v1570_v24  ;;  %v814_v29 = vadd.f32 %v1386_v27, %v1570_v24  ;;  %v589_v30 = vpop.f32.mrb[11].mxu0  ;;  %v653_v31 = vpop.f32.mrb[11].mxu1  ;;  %v829_v34 = vmax.f32 %v797_v19, 0.0  ;;  %v845_v35 = vmax.f32 %v813_v20, 0.0 }
 0x10e   : > { %v796_v32 = vadd.f32 %v1570_v24, %v589_v30  ;;  %v812_v33 = vadd.f32 %v1570_v24, %v653_v31  ;;  %v827_v38 = vmax.f32 %v795_v23, 0.0  ;;  %v843_v39 = vmax.f32 %v811_v25, 0.0 }
 0x10f   : > { %v830_v36 = vmax.f32 %v798_v28, 0.0  ;;  %v846_v37 = vmax.f32 %v814_v29, 0.0 }
 0x110   : > { %v828_v40 = vmax.f32 %v796_v32, 0.0  ;;  %v844_v41 = vmax.f32 %v812_v33, 0.0 }
 0x111   : > { %v1252_v42 = vpack.c.bf16 %v830_v36, %v829_v34  ;;  %v1292_v43 = vpack.c.bf16 %v846_v37, %v845_v35 }
 0x112   : > { %v1247_v44 = vpack.c.bf16 %v828_v40, %v827_v38  ;;  %v1287_v45 = vpack.c.bf16 %v844_v41, %v843_v39  ;;  %v1373_v46 = vpop.f32.mrb[12].mxu0  ;;  %v1389_v47 = vpop.f32.mrb[12].mxu1 }
 0x113   : > { %1308 = vst [vmem:[%s1585_s17 + $0x28] sm:$0xff] %v1252_v42   ;;  %1316 = vst [vmem:[%s1585_s17 + $0x68] sm:$0xff] %v1292_v43   ;;  %v801_v48 = vadd.f32 %v1373_v46, %v1570_v24  ;;  %v817_v49 = vadd.f32 %v1389_v47, %v1570_v24  ;;  %v602_v50 = vpop.f32.mrb[13].mxu0  ;;  %v666_v51 = vpop.f32.mrb[13].mxu1 }
 0x114   : > { %1307 = vst [vmem:[%s1585_s17 + $0x20] sm:$0xff] %v1247_v44   ;;  %1315 = vst [vmem:[%s1585_s17 + $0x60] sm:$0xff] %v1287_v45   ;;  %v799_v52 = vadd.f32 %v1570_v24, %v602_v50  ;;  %v815_v53 = vadd.f32 %v1570_v24, %v666_v51  ;;  %v1374_v54 = vpop.f32.mrb[14].mxu0  ;;  %v1390_v55 = vpop.f32.mrb[14].mxu1 }
 0x115   : > { %v802_v56 = vadd.f32 %v1374_v54, %v1570_v24  ;;  %v818_v57 = vadd.f32 %v1390_v55, %v1570_v24  ;;  %v605_v58 = vpop.f32.mrb[15].mxu0  ;;  %v669_v59 = vpop.f32.mrb[15].mxu1  ;;  %v833_v62 = vmax.f32 %v801_v48, 0.0  ;;  %v849_v63 = vmax.f32 %v817_v49, 0.0 }
 0x116   : > { %v800_v60 = vadd.f32 %v1570_v24, %v605_v58  ;;  %v816_v61 = vadd.f32 %v1570_v24, %v669_v59  ;;  %v831_v2 = vmax.f32 %v799_v52, 0.0  ;;  %v847_v3 = vmax.f32 %v815_v53, 0.0 }
 0x117   : > { %v834_v0 = vmax.f32 %v802_v56, 0.0  ;;  %v850_v1 = vmax.f32 %v818_v57, 0.0 }
 0x118   : > { %v832_v4 = vmax.f32 %v800_v60, 0.0  ;;  %v848_v5 = vmax.f32 %v816_v61, 0.0 }
 0x119   : > { %v1262_v6 = vpack.c.bf16 %v834_v0, %v833_v62  ;;  %v1302_v7 = vpack.c.bf16 %v850_v1, %v849_v63 }
 0x11a   : > { %v1257_v8 = vpack.c.bf16 %v832_v4, %v831_v2  ;;  %v1297_v9 = vpack.c.bf16 %v848_v5, %v847_v3 }
 0x11b   : > { %1310 = vst [vmem:[%s1585_s17 + $0x38] sm:$0xff] %v1262_v6   ;;  %1318 = vst [vmem:[%s1585_s17 + $0x78] sm:$0xff] %v1302_v7  }
 0x11c   : > { %1309 = vst [vmem:[%s1585_s17 + $0x30] sm:$0xff] %v1257_v8   ;;  %1317 = vst [vmem:[%s1585_s17 + $0x70] sm:$0xff] %v1297_v9  }
 0x11d PF: > { %s13_s14 = sadd.s32 1, %s1477_s14   ;;  %s1640_s12 = smov %s1473_s13 }
 0x11e   : > { %p10_p5 = scmp.ge.s32.totalorder %s13_s14, 4   ;;  %s1641_s13 = smov %s1643_s15 }
 0x120   :  { %12 = sbr.rel (!%p10_p5) target bundleno = 2 (0x2), region = 76 }

// kernel: vae_forward.24
= control target key start
LH: loop header
LB: loop body
LE: loop exit
PB: predicated region body
PF: predicated region fallthrough
CT: control target
= control target key end

     0   :  { %s1744_s12 = smov 0   ;;  %s1746_s13 = smov 0   ;;  %s1918_s0 = inlined_call_operand.vmem [shape: bf16[512,256], index: 0, kind: input, shape index: {}]   ;;  %s1919_s1 = inlined_call_operand.vmem [shape: bf16[256,128], index: 1, kind: input, shape index: {}]   ;;  %s1920_s2 = inlined_call_operand.vmem [shape: f32[1,128], index: 2, kind: input, shape index: {}]   ;;  %s1921_s3 = inlined_call_operand.vmem [shape: bf16[512,128], index: 3, kind: output, shape index: {}]  }
   0x1   :  { %s1748_s14 = smov 0  }
   0x2 LB: > { %s32_s15 = sadd.s32 1, %s1718_s13  ;;  %p1267_p0 = scmp.ge.s32.totalorder %s1722_s14, 1  ;;  %s1722_s14 = sphi %s1748_s14, %s13_s14   ;;  %s1718_s13 = sphi %s1746_s13, %s1923_s13   ;;  %s1714_s12 = sphi %s1744_s12, %s1922_s12  }
   0x3   : > { %p34_p1 = scmp.ge.s32.totalorder %s32_s15, 2  ;;  %p191_p2 = scmp.lt.s32.totalorder %s1722_s14, 3 }
   0x5   : > { %s1925_s15 = smov (%p34_p1, %s32_s15), 0  ;;  %p192_p3 = pnand %p1267_p0, %p191_p2 }
   0x6   : > { %v1636_v0 = vld [vmem:[%s1919_s1 + $0x40] sm:$0xff] (!%p192_p3)   ;;  %s1268_s18 = sshll.u32 (!%p192_p3), %s1714_s12, 5  ;;  %v1638_v2 = vld [vmem:[%s1919_s1 + $0x48] sm:$0xff] (!%p192_p3)   ;;  %v1640_v4 = vld [vmem:[%s1919_s1 + $0x50] sm:$0xff] (!%p192_p3)  }
   0x7   : > { %195 = sbr.rel (%p192_p3) target bundleno = 320 (0x140), region = 32  ;;  %v1637_v1 = vld [vmem:[%s1919_s1] sm:$0xff] (!%p192_p3)   ;;  %1484 = vmatprep.subr.bf16.mxu0 (!%p192_p3), %v1636_v0  ;;  %1596 = vmatprep.subr.bf16.mxu1 (!%p192_p3), %v1636_v0  ;;  %v1639_v3 = vld [vmem:[%s1919_s1 + $0x8] sm:$0xff] (!%p192_p3)   ;;  %p236_p4 = scmp.lt.s32.totalorder (!%p192_p3), %s1268_s18, 63  ;;  %v1641_v5 = vld [vmem:[%s1919_s1 + $0x10] sm:$0xff] (!%p192_p3)  }
   0x8   : > { %1485 = vmatpush3.bf16.msra.mxu0 (!%p192_p3), %v1637_v1  ;;  %1604 = vmatpush3.bf16.msra.mxu1 (!%p192_p3), %v1637_v1  ;;  %v1642_v6 = vld [vmem:[%s1919_s1 + $0x58] sm:$0xff] (!%p192_p3)   ;;  %v1644_v8 = vld [vmem:[%s1919_s1 + $0x60] sm:$0xff] (!%p192_p3)   ;;  %v1646_v10 = vld [vmem:[%s1919_s1 + $0x68] sm:$0xff] (!%p192_p3)  }
   0x9   : > { %1486 = vmatprep.subr.bf16.mxu0 (!%p192_p3), %v1638_v2  ;;  %1597 = vmatprep.subr.bf16.mxu1 (!%p192_p3), %v1638_v2  ;;  %v1643_v7 = vld [vmem:[%s1919_s1 + $0x18] sm:$0xff] (!%p192_p3)   ;;  %v1645_v9 = vld [vmem:[%s1919_s1 + $0x20] sm:$0xff] (!%p192_p3)   ;;  %v1647_v13 = vld [vmem:[%s1919_s1 + $0x28] sm:$0xff] (!%p192_p3)  }
   0xa   : > { %v1648_v14 = vld [vmem:[%s1919_s1 + $0x70] sm:$0xff] (!%p192_p3)   ;;  %v1650_v16 = vld [vmem:[%s1919_s1 + $0x78] sm:$0xff] (!%p192_p3)   ;;  %v1853_v51 = vld [vmem:[%s1920_s2] ss:$0 sm:$0xff] (!%p192_p3) }
   0xb   : > { %v1649_v15 = vld [vmem:[%s1919_s1 + $0x30] sm:$0xff] (!%p192_p3)   ;;  %v1651_v17 = vld [vmem:[%s1919_s1 + $0x38] sm:$0xff] (!%p192_p3)  }
   0xc   : > { %1487 = vmatpush3.bf16.msra.mxu0 (!%p192_p3), %v1639_v3  ;;  %1605 = vmatpush3.bf16.msra.mxu1 (!%p192_p3), %v1639_v3 }
   0xd   : > { %1488 = vmatprep.subr.bf16.mxu0 (!%p192_p3), %v1640_v4  ;;  %1598 = vmatprep.subr.bf16.mxu1 (!%p192_p3), %v1640_v4 }
   0xe   : > { %s1927_s18 = smov (!%p236_p4, %s1268_s18), 63 }
   0xf   : > { %s1356_s6 = sshll.u32 %s1927_s18, 3  ;;  %s1272_s5 = sshll.u32 %s1927_s18, 2 }
  0x10   : > { %1489 = vmatpush3.bf16.msra.mxu0 %v1641_v5  ;;  %1606 = vmatpush3.bf16.msra.mxu1 %v1641_v5  ;;  %s1795_s11 = scalar_lea.vmem %s1918_s0, %s1356_s6  ;;  %s1863_s8 = scalar_lea.vmem %s1921_s3, %s1272_s5 }
  0x11   : > { %1490 = vmatprep.subr.bf16.mxu0 %v1642_v6  ;;  %1599 = vmatprep.subr.bf16.mxu1 %v1642_v6  ;;  %v1654_v11 = vld [vmem:[%s1795_s11 + $0x4] ss:$8 sps:$4 sm:$0xff]   ;;  %v1652_v18 = vld [vmem:[%s1795_s11] ss:$8 sps:$4 sm:$0xff]   ;;  %v1658_v20 = vld [vmem:[%s1795_s11 + $0x14] ss:$8 sps:$4 sm:$0xff]  }
  0x12   : > { %v1657_v12 = vld [vmem:[%s1795_s11 + $0x84] ss:$8 sps:$4 sm:$0xff]   ;;  %688 = vmatprep.mubr.bf16.mxu0 %v1654_v11  ;;  %v1655_v19 = vld [vmem:[%s1795_s11 + $0x80] ss:$8 sps:$4 sm:$0xff]   ;;  %v1660_v21 = vld [vmem:[%s1795_s11 + $0x94] ss:$8 sps:$4 sm:$0xff]  }
  0x13   : > { %752 = vmatprep.mubr.bf16.mxu1 %v1657_v12  ;;  %v1662_v22 = vld [vmem:[%s1795_s11 + $0x10] ss:$8 sps:$4 sm:$0xff]   ;;  %v1664_v24 = vld [vmem:[%s1795_s11 + $0x24] ss:$8 sps:$4 sm:$0xff]   ;;  %v1668_v26 = vld [vmem:[%s1795_s11 + $0x20] ss:$8 sps:$4 sm:$0xff]  }
  0x14   : > { %1491 = vmatpush3.bf16.msra.mxu0 %v1643_v7  ;;  %1607 = vmatpush3.bf16.msra.mxu1 %v1643_v7  ;;  %v1663_v23 = vld [vmem:[%s1795_s11 + $0x90] ss:$8 sps:$4 sm:$0xff]   ;;  %v1666_v25 = vld [vmem:[%s1795_s11 + $0xa4] ss:$8 sps:$4 sm:$0xff]   ;;  %v1669_v27 = vld [vmem:[%s1795_s11 + $0xa0] ss:$8 sps:$4 sm:$0xff]  }
  0x15   : > { %1492 = vmatprep.subr.bf16.mxu0 %v1644_v8  ;;  %1600 = vmatprep.subr.bf16.mxu1 %v1644_v8  ;;  %v1670_v28 = vld [vmem:[%s1795_s11 + $0x34] ss:$8 sps:$4 sm:$0xff]   ;;  %v1674_v30 = vld [vmem:[%s1795_s11 + $0x30] ss:$8 sps:$4 sm:$0xff]   ;;  %v1676_v32 = vld [vmem:[%s1795_s11 + $0x44] ss:$8 sps:$4 sm:$0xff]  }
  0x16   : > { %v1672_v29 = vld [vmem:[%s1795_s11 + $0xb4] ss:$8 sps:$4 sm:$0xff]   ;;  %v1675_v31 = vld [vmem:[%s1795_s11 + $0xb0] ss:$8 sps:$4 sm:$0xff]   ;;  %v1678_v33 = vld [vmem:[%s1795_s11 + $0xc4] ss:$8 sps:$4 sm:$0xff]  }
  0x17   : > { %v1680_v34 = vld [vmem:[%s1795_s11 + $0x40] ss:$8 sps:$4 sm:$0xff]   ;;  %v1682_v36 = vld [vmem:[%s1795_s11 + $0x54] ss:$8 sps:$4 sm:$0xff]   ;;  %v1686_v38 = vld [vmem:[%s1795_s11 + $0x50] ss:$8 sps:$4 sm:$0xff]  }
  0x18   : > { %1493 = vmatpush3.bf16.msra.mxu0 %v1645_v9  ;;  %1608 = vmatpush3.bf16.msra.mxu1 %v1645_v9  ;;  %v1681_v35 = vld [vmem:[%s1795_s11 + $0xc0] ss:$8 sps:$4 sm:$0xff]   ;;  %v1684_v37 = vld [vmem:[%s1795_s11 + $0xd4] ss:$8 sps:$4 sm:$0xff]   ;;  %v1687_v39 = vld [vmem:[%s1795_s11 + $0xd0] ss:$8 sps:$4 sm:$0xff]  }
  0x19   : > { %1494 = vmatprep.subr.bf16.mxu0 %v1646_v10  ;;  %1601 = vmatprep.subr.bf16.mxu1 %v1646_v10  ;;  %v1688_v40 = vld [vmem:[%s1795_s11 + $0x64] ss:$8 sps:$4 sm:$0xff]   ;;  %v1692_v42 = vld [vmem:[%s1795_s11 + $0x60] ss:$8 sps:$4 sm:$0xff]   ;;  %v1694_v44 = vld [vmem:[%s1795_s11 + $0x74] ss:$8 sps:$4 sm:$0xff]  }
  0x1a   : > { %v1690_v41 = vld [vmem:[%s1795_s11 + $0xe4] ss:$8 sps:$4 sm:$0xff]   ;;  %v1693_v43 = vld [vmem:[%s1795_s11 + $0xe0] ss:$8 sps:$4 sm:$0xff]   ;;  %v1696_v45 = vld [vmem:[%s1795_s11 + $0xf4] ss:$8 sps:$4 sm:$0xff]  }
  0x1b   : > { %v1698_v46 = vld [vmem:[%s1795_s11 + $0x70] ss:$8 sps:$4 sm:$0xff]  }
  0x1c   : > { %1495 = vmatpush3.bf16.msra.mxu0 %v1647_v13  ;;  %1609 = vmatpush3.bf16.msra.mxu1 %v1647_v13  ;;  %v1699_v47 = vld [vmem:[%s1795_s11 + $0xf0] ss:$8 sps:$4 sm:$0xff]  }
  0x1d   : > { %1496 = vmatprep.subr.bf16.mxu0 %v1648_v14  ;;  %1602 = vmatprep.subr.bf16.mxu1 %v1648_v14 }
  0x20   : > { %1497 = vmatpush3.bf16.msra.mxu0 %v1649_v15  ;;  %1610 = vmatpush3.bf16.msra.mxu1 %v1649_v15 }
  0x21   : > { %1498 = vmatprep.subr.bf16.mxu0 %v1650_v16  ;;  %1603 = vmatprep.subr.bf16.mxu1 %v1650_v16 }
  0x24   : > { %1499 = vmatpush3.bf16.msra.mxu0 %v1651_v17  ;;  %1611 = vmatpush3.bf16.msra.mxu1 %v1651_v17 }
  0x27   : > { %689 = vmatmul.mubr.bf16.vlgmr.msra.gmra.mrb[0].mxu0 %v1652_v18  ;;  %753 = vmatmul.mubr.bf16.vlgmr.msra.gmra.mrb[0].mxu1 %v1655_v19 }
  0x28   : > { %696 = vmatprep.mubr.bf16.mxu0 %v1658_v20  ;;  %760 = vmatprep.mubr.bf16.mxu1 %v1660_v21 }
  0x2f   : > { %697 = vmatmul.mubr.bf16.gmra.mrb[4].mxu0 %v1662_v22  ;;  %761 = vmatmul.mubr.bf16.gmra.mrb[4].mxu1 %v1663_v23 }
  0x30   : > { %704 = vmatprep.mubr.bf16.mxu0 %v1664_v24  ;;  %768 = vmatprep.mubr.bf16.mxu1 %v1666_v25 }
  0x37   : > { %705 = vmatmul.mubr.bf16.gmra.mrb[8].mxu0 %v1668_v26  ;;  %769 = vmatmul.mubr.bf16.gmra.mrb[8].mxu1 %v1669_v27 }
  0x38   : > { %712 = vmatprep.mubr.bf16.mxu0 %v1670_v28  ;;  %776 = vmatprep.mubr.bf16.mxu1 %v1672_v29 }
  0x3f   : > { %713 = vmatmul.mubr.bf16.gmra.mrb[12].mxu0 %v1674_v30  ;;  %777 = vmatmul.mubr.bf16.gmra.mrb[12].mxu1 %v1675_v31 }
  0x40   : > { %720 = vmatprep.mubr.bf16.mxu0 %v1676_v32  ;;  %784 = vmatprep.mubr.bf16.mxu1 %v1678_v33 }
  0x47   : > { %721 = vmatmul.mubr.bf16.gmra.mrb[16].mxu0 %v1680_v34  ;;  %785 = vmatmul.mubr.bf16.gmra.mrb[16].mxu1 %v1681_v35 }
  0x48   : > { %728 = vmatprep.mubr.bf16.mxu0 %v1682_v36  ;;  %792 = vmatprep.mubr.bf16.mxu1 %v1684_v37 }
  0x4f   : > { %729 = vmatmul.mubr.bf16.gmra.mrb[20].mxu0 %v1686_v38  ;;  %793 = vmatmul.mubr.bf16.gmra.mrb[20].mxu1 %v1687_v39 }
  0x50   : > { %736 = vmatprep.mubr.bf16.mxu0 %v1688_v40  ;;  %800 = vmatprep.mubr.bf16.mxu1 %v1690_v41 }
  0x57   : > { %737 = vmatmul.mubr.bf16.gmra.mrb[24].mxu0 %v1692_v42  ;;  %801 = vmatmul.mubr.bf16.gmra.mrb[24].mxu1 %v1693_v43 }
  0x58   : > { %744 = vmatprep.mubr.bf16.mxu0 %v1694_v44  ;;  %808 = vmatprep.mubr.bf16.mxu1 %v1696_v45 }
  0x5f   : > { %745 = vmatmul.mubr.bf16.gmra.mrb[28].mxu0 %v1698_v46  ;;  %809 = vmatmul.mubr.bf16.gmra.mrb[28].mxu1 %v1699_v47 }
  0xfa   : > { %v1500_v48 = vpop.f32.mrb[0].mxu0  ;;  %v1548_v49 = vpop.f32.mrb[0].mxu1 }
  0xfb   : > { %v1501_v50 = vpop.f32.mrb[1].mxu0  ;;  %v1549_v52 = vpop.f32.mrb[1].mxu1 }
  0xfc   : > { %v1502_v53 = vadd.f32 %v1501_v50, %v1500_v48  ;;  %v1550_v54 = vadd.f32 %v1549_v52, %v1548_v49  ;;  %v1503_v55 = vpop.f32.mrb[2].mxu0  ;;  %v1551_v56 = vpop.f32.mrb[2].mxu1 }
  0xfd   : > { %v1504_v57 = vpop.f32.mrb[3].mxu0  ;;  %v1552_v58 = vpop.f32.mrb[3].mxu1 }
  0xfe   : > { %v923_v59 = vadd.f32 %v1502_v53, %v1853_v51  ;;  %v939_v60 = vadd.f32 %v1550_v54, %v1853_v51  ;;  %v1505_v61 = vadd.f32 %v1504_v57, %v1503_v55  ;;  %v1553_v62 = vadd.f32 %v1552_v58, %v1551_v56 }
 0x100   : > { %v924_v63 = vadd.f32 %v1505_v61, %v1853_v51  ;;  %v940_v0 = vadd.f32 %v1553_v62, %v1853_v51  ;;  %v955_v1 = vmax.f32 %v923_v59, 0.0  ;;  %v971_v2 = vmax.f32 %v939_v60, 0.0 }
 0x102   : > { %v956_v3 = vmax.f32 %v924_v63, 0.0  ;;  %v972_v4 = vmax.f32 %v940_v0, 0.0  ;;  %v1506_v5 = vpop.f32.mrb[4].mxu0  ;;  %v1554_v6 = vpop.f32.mrb[4].mxu1 }
 0x103   : > { %v1507_v7 = vpop.f32.mrb[5].mxu0  ;;  %v1555_v8 = vpop.f32.mrb[5].mxu1 }
 0x104   : > { %v1392_v9 = vpack.c.bf16 %v956_v3, %v955_v1  ;;  %v1432_v10 = vpack.c.bf16 %v972_v4, %v971_v2  ;;  %v1508_v11 = vadd.f32 %v1507_v7, %v1506_v5  ;;  %v1556_v12 = vadd.f32 %v1555_v8, %v1554_v6  ;;  %v1509_v13 = vpop.f32.mrb[6].mxu0  ;;  %v1557_v14 = vpop.f32.mrb[6].mxu1 }
 0x105   : > { %v1510_v15 = vpop.f32.mrb[7].mxu0  ;;  %v1558_v16 = vpop.f32.mrb[7].mxu1 }
 0x106   : > { %1393 = vst [vmem:[%s1863_s8] sm:$0xff] %v1392_v9   ;;  %1476 = vst [vmem:[%s1863_s8 + $0x40] sm:$0xff] %v1432_v10   ;;  %v925_v17 = vadd.f32 %v1508_v11, %v1853_v51  ;;  %v941_v18 = vadd.f32 %v1556_v12, %v1853_v51  ;;  %v1511_v19 = vadd.f32 %v1510_v15, %v1509_v13 }
 0x107   : > { %v1559_v20 = vadd.f32 %v1558_v16, %v1557_v14 }
 0x108   : > { %v926_v21 = vadd.f32 %v1511_v19, %v1853_v51  ;;  %v957_v23 = vmax.f32 %v925_v17, 0.0  ;;  %v973_v24 = vmax.f32 %v941_v18, 0.0 }
 0x109   : > { %v942_v22 = vadd.f32 %v1559_v20, %v1853_v51 }
 0x10a   : > { %v958_v25 = vmax.f32 %v926_v21, 0.0  ;;  %v1512_v27 = vpop.f32.mrb[8].mxu0  ;;  %v1560_v28 = vpop.f32.mrb[8].mxu1 }
 0x10b   : > { %v974_v26 = vmax.f32 %v942_v22, 0.0  ;;  %v1513_v29 = vpop.f32.mrb[9].mxu0  ;;  %v1561_v30 = vpop.f32.mrb[9].mxu1 }
 0x10c   : > { %v1397_v31 = vpack.c.bf16 %v958_v25, %v957_v23  ;;  %v1514_v33 = vadd.f32 %v1513_v29, %v1512_v27  ;;  %v1562_v34 = vadd.f32 %v1561_v30, %v1560_v28  ;;  %v1515_v35 = vpop.f32.mrb[10].mxu0  ;;  %v1563_v36 = vpop.f32.mrb[10].mxu1 }
 0x10d   : > { %v1437_v32 = vpack.c.bf16 %v974_v26, %v973_v24  ;;  %v1516_v37 = vpop.f32.mrb[11].mxu0  ;;  %v1564_v38 = vpop.f32.mrb[11].mxu1 }
 0x10e   : > { %1469 = vst [vmem:[%s1863_s8 + $0x8] sm:$0xff] %v1397_v31   ;;  %v927_v39 = vadd.f32 %v1514_v33, %v1853_v51  ;;  %v943_v40 = vadd.f32 %v1562_v34, %v1853_v51  ;;  %v1517_v41 = vadd.f32 %v1516_v37, %v1515_v35  ;;  %v1565_v42 = vadd.f32 %v1564_v38, %v1563_v36 }
 0x10f   : > { %1477 = vst [vmem:[%s1863_s8 + $0x48] sm:$0xff] %v1437_v32  }
 0x110   : > { %v928_v43 = vadd.f32 %v1517_v41, %v1853_v51  ;;  %v944_v44 = vadd.f32 %v1565_v42, %v1853_v51  ;;  %v959_v45 = vmax.f32 %v927_v39, 0.0  ;;  %v975_v46 = vmax.f32 %v943_v40, 0.0 }
 0x112   : > { %v960_v47 = vmax.f32 %v928_v43, 0.0  ;;  %v976_v48 = vmax.f32 %v944_v44, 0.0  ;;  %v1518_v49 = vpop.f32.mrb[12].mxu0  ;;  %v1566_v50 = vpop.f32.mrb[12].mxu1 }
 0x113   : > { %v1519_v52 = vpop.f32.mrb[13].mxu0  ;;  %v1567_v53 = vpop.f32.mrb[13].mxu1 }
 0x114   : > { %v1402_v54 = vpack.c.bf16 %v960_v47, %v959_v45  ;;  %v1442_v55 = vpack.c.bf16 %v976_v48, %v975_v46  ;;  %v1520_v56 = vadd.f32 %v1519_v52, %v1518_v49  ;;  %v1568_v57 = vadd.f32 %v1567_v53, %v1566_v50  ;;  %v1521_v58 = vpop.f32.mrb[14].mxu0  ;;  %v1569_v59 = vpop.f32.mrb[14].mxu1 }
 0x115   : > { %v1522_v60 = vpop.f32.mrb[15].mxu0  ;;  %v1570_v61 = vpop.f32.mrb[15].mxu1 }
 0x116   : > { %1470 = vst [vmem:[%s1863_s8 + $0x10] sm:$0xff] %v1402_v54   ;;  %1478 = vst [vmem:[%s1863_s8 + $0x50] sm:$0xff] %v1442_v55   ;;  %v929_v62 = vadd.f32 %v1520_v56, %v1853_v51  ;;  %v945_v63 = vadd.f32 %v1568_v57, %v1853_v51  ;;  %v1523_v0 = vadd.f32 %v1522_v60, %v1521_v58 }
 0x117   : > { %v1571_v1 = vadd.f32 %v1570_v61, %v1569_v59 }
 0x118   : > { %v930_v2 = vadd.f32 %v1523_v0, %v1853_v51  ;;  %v961_v4 = vmax.f32 %v929_v62, 0.0  ;;  %v977_v5 = vmax.f32 %v945_v63, 0.0 }
 0x119   : > { %v946_v3 = vadd.f32 %v1571_v1, %v1853_v51 }
 0x11a   : > { %v962_v6 = vmax.f32 %v930_v2, 0.0  ;;  %v1524_v8 = vpop.f32.mrb[16].mxu0  ;;  %v1572_v9 = vpop.f32.mrb[16].mxu1 }
 0x11b   : > { %v978_v7 = vmax.f32 %v946_v3, 0.0  ;;  %v1525_v10 = vpop.f32.mrb[17].mxu0  ;;  %v1573_v11 = vpop.f32.mrb[17].mxu1 }
 0x11c   : > { %v1407_v12 = vpack.c.bf16 %v962_v6, %v961_v4  ;;  %v1526_v14 = vadd.f32 %v1525_v10, %v1524_v8  ;;  %v1574_v15 = vadd.f32 %v1573_v11, %v1572_v9  ;;  %v1527_v16 = vpop.f32.mrb[18].mxu0  ;;  %v1575_v17 = vpop.f32.mrb[18].mxu1 }
 0x11d   : > { %v1447_v13 = vpack.c.bf16 %v978_v7, %v977_v5  ;;  %v1528_v18 = vpop.f32.mrb[19].mxu0  ;;  %v1576_v19 = vpop.f32.mrb[19].mxu1 }
 0x11e   : > { %1471 = vst [vmem:[%s1863_s8 + $0x18] sm:$0xff] %v1407_v12   ;;  %v931_v20 = vadd.f32 %v1526_v14, %v1853_v51  ;;  %v947_v21 = vadd.f32 %v1574_v15, %v1853_v51  ;;  %v1529_v22 = vadd.f32 %v1528_v18, %v1527_v16  ;;  %v1577_v23 = vadd.f32 %v1576_v19, %v1575_v17 }
 0x11f   : > { %1479 = vst [vmem:[%s1863_s8 + $0x58] sm:$0xff] %v1447_v13  }
 0x120   : > { %v932_v24 = vadd.f32 %v1529_v22, %v1853_v51  ;;  %v948_v25 = vadd.f32 %v1577_v23, %v1853_v51  ;;  %v963_v26 = vmax.f32 %v931_v20, 0.0  ;;  %v979_v27 = vmax.f32 %v947_v21, 0.0 }
 0x122   : > { %v964_v28 = vmax.f32 %v932_v24, 0.0  ;;  %v980_v29 = vmax.f32 %v948_v25, 0.0  ;;  %v1530_v30 = vpop.f32.mrb[20].mxu0  ;;  %v1578_v31 = vpop.f32.mrb[20].mxu1 }
 0x123   : > { %v1531_v32 = vpop.f32.mrb[21].mxu0  ;;  %v1579_v33 = vpop.f32.mrb[21].mxu1 }
 0x124   : > { %v1412_v34 = vpack.c.bf16 %v964_v28, %v963_v26  ;;  %v1452_v35 = vpack.c.bf16 %v980_v29, %v979_v27  ;;  %v1532_v36 = vadd.f32 %v1531_v32, %v1530_v30  ;;  %v1580_v37 = vadd.f32 %v1579_v33, %v1578_v31  ;;  %v1533_v38 = vpop.f32.mrb[22].mxu0  ;;  %v1581_v39 = vpop.f32.mrb[22].mxu1 }
 0x125   : > { %v1534_v40 = vpop.f32.mrb[23].mxu0  ;;  %v1582_v41 = vpop.f32.mrb[23].mxu1 }
 0x126   : > { %1472 = vst [vmem:[%s1863_s8 + $0x20] sm:$0xff] %v1412_v34   ;;  %1480 = vst [vmem:[%s1863_s8 + $0x60] sm:$0xff] %v1452_v35   ;;  %v933_v42 = vadd.f32 %v1532_v36, %v1853_v51  ;;  %v949_v43 = vadd.f32 %v1580_v37, %v1853_v51  ;;  %v1535_v44 = vadd.f32 %v1534_v40, %v1533_v38 }
 0x127   : > { %v1583_v45 = vadd.f32 %v1582_v41, %v1581_v39 }
 0x128   : > { %v934_v46 = vadd.f32 %v1535_v44, %v1853_v51  ;;  %v965_v48 = vmax.f32 %v933_v42, 0.0  ;;  %v981_v49 = vmax.f32 %v949_v43, 0.0 }
 0x129   : > { %v950_v47 = vadd.f32 %v1583_v45, %v1853_v51 }
 0x12a   : > { %v966_v50 = vmax.f32 %v934_v46, 0.0  ;;  %v1536_v53 = vpop.f32.mrb[24].mxu0  ;;  %v1584_v54 = vpop.f32.mrb[24].mxu1 }
 0x12b   : > { %v982_v52 = vmax.f32 %v950_v47, 0.0  ;;  %v1537_v55 = vpop.f32.mrb[25].mxu0  ;;  %v1585_v56 = vpop.f32.mrb[25].mxu1 }
 0x12c   : > { %v1417_v57 = vpack.c.bf16 %v966_v50, %v965_v48  ;;  %v1538_v59 = vadd.f32 %v1537_v55, %v1536_v53  ;;  %v1586_v60 = vadd.f32 %v1585_v56, %v1584_v54  ;;  %v1539_v61 = vpop.f32.mrb[26].mxu0  ;;  %v1587_v62 = vpop.f32.mrb[26].mxu1 }
 0x12d   : > { %v1457_v58 = vpack.c.bf16 %v982_v52, %v981_v49  ;;  %v1540_v63 = vpop.f32.mrb[27].mxu0  ;;  %v1588_v0 = vpop.f32.mrb[27].mxu1 }
 0x12e   : > { %1473 = vst [vmem:[%s1863_s8 + $0x28] sm:$0xff] %v1417_v57   ;;  %v935_v1 = vadd.f32 %v1538_v59, %v1853_v51  ;;  %v951_v2 = vadd.f32 %v1586_v60, %v1853_v51  ;;  %v1541_v3 = vadd.f32 %v1540_v63, %v1539_v61  ;;  %v1589_v4 = vadd.f32 %v1588_v0, %v1587_v62 }
 0x12f   : > { %1481 = vst [vmem:[%s1863_s8 + $0x68] sm:$0xff] %v1457_v58  }
 0x130   : > { %v936_v5 = vadd.f32 %v1541_v3, %v1853_v51  ;;  %v952_v6 = vadd.f32 %v1589_v4, %v1853_v51  ;;  %v967_v7 = vmax.f32 %v935_v1, 0.0  ;;  %v983_v8 = vmax.f32 %v951_v2, 0.0 }
 0x132   : > { %v968_v9 = vmax.f32 %v936_v5, 0.0  ;;  %v984_v10 = vmax.f32 %v952_v6, 0.0  ;;  %v1542_v11 = vpop.f32.mrb[28].mxu0  ;;  %v1590_v12 = vpop.f32.mrb[28].mxu1 }
 0x133   : > { %v1543_v13 = vpop.f32.mrb[29].mxu0  ;;  %v1591_v14 = vpop.f32.mrb[29].mxu1 }
 0x134   : > { %v1422_v15 = vpack.c.bf16 %v968_v9, %v967_v7  ;;  %v1462_v16 = vpack.c.bf16 %v984_v10, %v983_v8  ;;  %v1544_v17 = vadd.f32 %v1543_v13, %v1542_v11  ;;  %v1592_v18 = vadd.f32 %v1591_v14, %v1590_v12  ;;  %v1545_v19 = vpop.f32.mrb[30].mxu0  ;;  %v1593_v20 = vpop.f32.mrb[30].mxu1 }
 0x135   : > { %v1546_v21 = vpop.f32.mrb[31].mxu0  ;;  %v1594_v22 = vpop.f32.mrb[31].mxu1 }
 0x136   : > { %1474 = vst [vmem:[%s1863_s8 + $0x30] sm:$0xff] %v1422_v15   ;;  %1482 = vst [vmem:[%s1863_s8 + $0x70] sm:$0xff] %v1462_v16   ;;  %v937_v23 = vadd.f32 %v1544_v17, %v1853_v51  ;;  %v953_v24 = vadd.f32 %v1592_v18, %v1853_v51  ;;  %v1547_v25 = vadd.f32 %v1546_v21, %v1545_v19 }
 0x137   : > { %v1595_v26 = vadd.f32 %v1594_v22, %v1593_v20 }
 0x138   : > { %v938_v27 = vadd.f32 %v1547_v25, %v1853_v51  ;;  %v969_v29 = vmax.f32 %v937_v23, 0.0  ;;  %v985_v30 = vmax.f32 %v953_v24, 0.0 }
 0x139   : > { %v954_v28 = vadd.f32 %v1595_v26, %v1853_v51 }
 0x13a   : > { %v970_v31 = vmax.f32 %v938_v27, 0.0 }
 0x13b   : > { %v986_v32 = vmax.f32 %v954_v28, 0.0 }
 0x13c   : > { %v1427_v33 = vpack.c.bf16 %v970_v31, %v969_v29 }
 0x13d   : > { %v1467_v34 = vpack.c.bf16 %v986_v32, %v985_v30 }
 0x13e   : > { %1475 = vst [vmem:[%s1863_s8 + $0x38] sm:$0xff] %v1427_v33  }
 0x13f   : > { %1483 = vst [vmem:[%s1863_s8 + $0x78] sm:$0xff] %v1467_v34  }
 0x140 PF: > { %s13_s14 = sadd.s32 1, %s1722_s14   ;;  %s1922_s12 = smov %s1718_s13 }
 0x141   : > { %p10_p5 = scmp.ge.s32.totalorder %s13_s14, 4   ;;  %s1923_s13 = smov %s1925_s15 }
 0x143   :  { %12 = sbr.rel (!%p10_p5) target bundleno = 2 (0x2), region = 76 }

// kernel: vae_forward.26
= control target key start
LH: loop header
LB: loop body
LE: loop exit
PB: predicated region body
PF: predicated region fallthrough
CT: control target
= control target key end

     0   :  { %s1476_s1 = inlined_call_operand.vmem [shape: bf16[512,128], index: 1, kind: input, shape index: {}]   ;;  %s1477_s0 = inlined_call_operand.vmem [shape: bf16[128,512], index: 0, kind: input, shape index: {}]   ;;  %s1478_s2 = inlined_call_operand.vmem [shape: f32[1,128], index: 2, kind: input, shape index: {}]   ;;  %s1479_s3 = inlined_call_operand.vmem [shape: bf16[128,128], index: 3, kind: output, shape index: {}]  }
   0x1   :  { %v1139_v0 = vld [vmem:[%s1476_s1 + $0x40] sm:$0xff]   ;;  %v1143_v4 = vld [vmem:[%s1476_s1 + $0x48] sm:$0xff]   ;;  %v1147_v8 = vld [vmem:[%s1476_s1 + $0x50] sm:$0xff]  }
   0x2   :  { %v1140_v1 = vld [vmem:[%s1476_s1 + $0xc0] sm:$0xff]   ;;  %1011 = vmatprep.subr.bf16.mxu0 %v1139_v0  ;;  %v1144_v5 = vld [vmem:[%s1476_s1 + $0xc8] sm:$0xff]   ;;  %v1148_v9 = vld [vmem:[%s1476_s1 + $0xd0] sm:$0xff]  }
   0x3   :  { %v1141_v2 = vld [vmem:[%s1476_s1] sm:$0xff]   ;;  %1075 = vmatprep.subr.bf16.mxu1 %v1140_v1  ;;  %v1145_v6 = vld [vmem:[%s1476_s1 + $0x8] sm:$0xff]   ;;  %v1149_v10 = vld [vmem:[%s1476_s1 + $0x10] sm:$0xff]  }
   0x4   :  { %v1142_v3 = vld [vmem:[%s1476_s1 + $0x80] sm:$0xff]   ;;  %1012 = vmatpush3.bf16.msra.mxu0 %v1141_v2  ;;  %v1146_v7 = vld [vmem:[%s1476_s1 + $0x88] sm:$0xff]   ;;  %v1150_v11 = vld [vmem:[%s1476_s1 + $0x90] sm:$0xff]  }
   0x5   :  { %1076 = vmatpush3.bf16.msra.mxu1 %v1142_v3  ;;  %1013 = vmatprep.subr.bf16.mxu0 %v1143_v4  ;;  %v1151_v12 = vld [vmem:[%s1476_s1 + $0x58] sm:$0xff]   ;;  %v1155_v16 = vld [vmem:[%s1476_s1 + $0x60] sm:$0xff]   ;;  %v1159_v20 = vld [vmem:[%s1476_s1 + $0x68] sm:$0xff]  }
   0x6   :  { %1077 = vmatprep.subr.bf16.mxu1 %v1144_v5  ;;  %v1152_v13 = vld [vmem:[%s1476_s1 + $0xd8] sm:$0xff]   ;;  %v1156_v17 = vld [vmem:[%s1476_s1 + $0xe0] sm:$0xff]   ;;  %v1160_v21 = vld [vmem:[%s1476_s1 + $0xe8] sm:$0xff]  }
   0x7   :  { %v1153_v14 = vld [vmem:[%s1476_s1 + $0x18] sm:$0xff]   ;;  %v1157_v18 = vld [vmem:[%s1476_s1 + $0x20] sm:$0xff]   ;;  %v1161_v22 = vld [vmem:[%s1476_s1 + $0x28] sm:$0xff]  }
   0x8   :  { %1014 = vmatpush3.bf16.msra.mxu0 %v1145_v6  ;;  %v1154_v15 = vld [vmem:[%s1476_s1 + $0x98] sm:$0xff]   ;;  %v1158_v19 = vld [vmem:[%s1476_s1 + $0xa0] sm:$0xff]   ;;  %v1162_v23 = vld [vmem:[%s1476_s1 + $0xa8] sm:$0xff]  }
   0x9   :  { %1078 = vmatpush3.bf16.msra.mxu1 %v1146_v7  ;;  %1015 = vmatprep.subr.bf16.mxu0 %v1147_v8  ;;  %v1163_v24 = vld [vmem:[%s1476_s1 + $0x70] sm:$0xff]   ;;  %v1167_v28 = vld [vmem:[%s1476_s1 + $0x78] sm:$0xff]  }
   0xa   :  { %1079 = vmatprep.subr.bf16.mxu1 %v1148_v9  ;;  %v1164_v25 = vld [vmem:[%s1476_s1 + $0xf0] sm:$0xff]   ;;  %v1168_v29 = vld [vmem:[%s1476_s1 + $0xf8] sm:$0xff]   ;;  %v1434_v9 = vld [vmem:[%s1478_s2] ss:$0 sm:$0xff] }
   0xb   :  { %v1165_v26 = vld [vmem:[%s1476_s1 + $0x30] sm:$0xff]   ;;  %v1169_v30 = vld [vmem:[%s1476_s1 + $0x38] sm:$0xff]  }
   0xc   :  { %1016 = vmatpush3.bf16.msra.mxu0 %v1149_v10  ;;  %v1166_v27 = vld [vmem:[%s1476_s1 + $0xb0] sm:$0xff]   ;;  %v1170_v31 = vld [vmem:[%s1476_s1 + $0xb8] sm:$0xff]  }
   0xd   :  { %1080 = vmatpush3.bf16.msra.mxu1 %v1150_v11  ;;  %1017 = vmatprep.subr.bf16.mxu0 %v1151_v12  ;;  %v1171_v32 = vld [vmem:[%s1477_s0] ss:$16 sps:$4 sm:$0xff]   ;;  %v1173_v33 = vld [vmem:[%s1477_s0 + $0x4] ss:$16 sps:$4 sm:$0xff]   ;;  %v1174_v34 = vld [vmem:[%s1477_s0 + $0x8] ss:$16 sps:$4 sm:$0xff]  }
   0xe   :  { %1081 = vmatprep.subr.bf16.mxu1 %v1152_v13  ;;  %v1176_v35 = vld [vmem:[%s1477_s0 + $0xc] ss:$16 sps:$4 sm:$0xff]   ;;  %531 = vmatprep.mubr.bf16.mxu0 %v1173_v33  ;;  %v1177_v36 = vld [vmem:[%s1477_s0 + $0x24] ss:$16 sps:$4 sm:$0xff]   ;;  %v1181_v38 = vld [vmem:[%s1477_s0 + $0x20] ss:$16 sps:$4 sm:$0xff]  }
   0xf   :  { %628 = vmatprep.mubr.bf16.mxu1 %v1176_v35  ;;  %v1179_v37 = vld [vmem:[%s1477_s0 + $0x2c] ss:$16 sps:$4 sm:$0xff]   ;;  %v1182_v39 = vld [vmem:[%s1477_s0 + $0x28] ss:$16 sps:$4 sm:$0xff]   ;;  %v1183_v40 = vld [vmem:[%s1477_s0 + $0x44] ss:$16 sps:$4 sm:$0xff]  }
  0x10   :  { %1018 = vmatpush3.bf16.msra.mxu0 %v1153_v14  ;;  %v1185_v41 = vld [vmem:[%s1477_s0 + $0x4c] ss:$16 sps:$4 sm:$0xff]   ;;  %v1187_v42 = vld [vmem:[%s1477_s0 + $0x40] ss:$16 sps:$4 sm:$0xff]   ;;  %v1188_v43 = vld [vmem:[%s1477_s0 + $0x48] ss:$16 sps:$4 sm:$0xff]  }
  0x11   :  { %1082 = vmatpush3.bf16.msra.mxu1 %v1154_v15  ;;  %1019 = vmatprep.subr.bf16.mxu0 %v1155_v16  ;;  %v1189_v44 = vld [vmem:[%s1477_s0 + $0x64] ss:$16 sps:$4 sm:$0xff]   ;;  %v1191_v45 = vld [vmem:[%s1477_s0 + $0x6c] ss:$16 sps:$4 sm:$0xff]   ;;  %v1193_v46 = vld [vmem:[%s1477_s0 + $0x60] ss:$16 sps:$4 sm:$0xff]  }
  0x12   :  { %1083 = vmatprep.subr.bf16.mxu1 %v1156_v17  ;;  %v1194_v47 = vld [vmem:[%s1477_s0 + $0x68] ss:$16 sps:$4 sm:$0xff]   ;;  %v1195_v48 = vld [vmem:[%s1477_s0 + $0x84] ss:$16 sps:$4 sm:$0xff]   ;;  %v1197_v49 = vld [vmem:[%s1477_s0 + $0x8c] ss:$16 sps:$4 sm:$0xff]  }
  0x13   :  { %v1199_v50 = vld [vmem:[%s1477_s0 + $0x80] ss:$16 sps:$4 sm:$0xff]   ;;  %v1200_v51 = vld [vmem:[%s1477_s0 + $0x88] ss:$16 sps:$4 sm:$0xff]   ;;  %v1201_v52 = vld [vmem:[%s1477_s0 + $0xa4] ss:$16 sps:$4 sm:$0xff]  }
  0x14   :  { %1020 = vmatpush3.bf16.msra.mxu0 %v1157_v18  ;;  %v1203_v53 = vld [vmem:[%s1477_s0 + $0xac] ss:$16 sps:$4 sm:$0xff]   ;;  %v1205_v54 = vld [vmem:[%s1477_s0 + $0xa0] ss:$16 sps:$4 sm:$0xff]   ;;  %v1206_v55 = vld [vmem:[%s1477_s0 + $0xa8] ss:$16 sps:$4 sm:$0xff]  }
  0x15   :  { %1084 = vmatpush3.bf16.msra.mxu1 %v1158_v19  ;;  %1021 = vmatprep.subr.bf16.mxu0 %v1159_v20  ;;  %v1207_v56 = vld [vmem:[%s1477_s0 + $0xc4] ss:$16 sps:$4 sm:$0xff]   ;;  %v1209_v57 = vld [vmem:[%s1477_s0 + $0xcc] ss:$16 sps:$4 sm:$0xff]   ;;  %v1211_v58 = vld [vmem:[%s1477_s0 + $0xc0] ss:$16 sps:$4 sm:$0xff]  }
  0x16   :  { %1085 = vmatprep.subr.bf16.mxu1 %v1160_v21  ;;  %v1212_v59 = vld [vmem:[%s1477_s0 + $0xc8] ss:$16 sps:$4 sm:$0xff]   ;;  %v1213_v60 = vld [vmem:[%s1477_s0 + $0xe4] ss:$16 sps:$4 sm:$0xff]   ;;  %v1215_v61 = vld [vmem:[%s1477_s0 + $0xec] ss:$16 sps:$4 sm:$0xff]  }
  0x17   :  { %v1217_v62 = vld [vmem:[%s1477_s0 + $0xe0] ss:$16 sps:$4 sm:$0xff]   ;;  %v1218_v63 = vld [vmem:[%s1477_s0 + $0xe8] ss:$16 sps:$4 sm:$0xff]  }
  0x18   :  { %1022 = vmatpush3.bf16.msra.mxu0 %v1161_v22 }
  0x19   :  { %1086 = vmatpush3.bf16.msra.mxu1 %v1162_v23  ;;  %1023 = vmatprep.subr.bf16.mxu0 %v1163_v24 }
  0x1a   :  { %1087 = vmatprep.subr.bf16.mxu1 %v1164_v25 }
  0x1c   :  { %1024 = vmatpush3.bf16.msra.mxu0 %v1165_v26 }
  0x1d   :  { %1088 = vmatpush3.bf16.msra.mxu1 %v1166_v27  ;;  %1025 = vmatprep.subr.bf16.mxu0 %v1167_v28 }
  0x1e   :  { %1089 = vmatprep.subr.bf16.mxu1 %v1168_v29 }
  0x20   :  { %1026 = vmatpush3.bf16.msra.mxu0 %v1169_v30 }
  0x21   :  { %1090 = vmatpush3.bf16.msra.mxu1 %v1170_v31 }
  0x23   :  { %532 = vmatmul.mubr.bf16.vlgmr.msra.gmra.mrb[0].mxu0 %v1171_v32 }
  0x24   :  { %629 = vmatmul.mubr.bf16.vlgmr.msra.gmra.mrb[0].mxu1 %v1174_v34  ;;  %539 = vmatprep.mubr.bf16.mxu0 %v1177_v36 }
  0x25   :  { %636 = vmatprep.mubr.bf16.mxu1 %v1179_v37 }
  0x2b   :  { %540 = vmatmul.mubr.bf16.gmra.mrb[4].mxu0 %v1181_v38 }
  0x2c   :  { %637 = vmatmul.mubr.bf16.gmra.mrb[4].mxu1 %v1182_v39  ;;  %547 = vmatprep.mubr.bf16.mxu0 %v1183_v40 }
  0x2d   :  { %644 = vmatprep.mubr.bf16.mxu1 %v1185_v41 }
  0x33   :  { %548 = vmatmul.mubr.bf16.gmra.mrb[8].mxu0 %v1187_v42 }
  0x34   :  { %645 = vmatmul.mubr.bf16.gmra.mrb[8].mxu1 %v1188_v43  ;;  %555 = vmatprep.mubr.bf16.mxu0 %v1189_v44 }
  0x35   :  { %652 = vmatprep.mubr.bf16.mxu1 %v1191_v45 }
  0x3b   :  { %556 = vmatmul.mubr.bf16.gmra.mrb[12].mxu0 %v1193_v46 }
  0x3c   :  { %653 = vmatmul.mubr.bf16.gmra.mrb[12].mxu1 %v1194_v47  ;;  %563 = vmatprep.mubr.bf16.mxu0 %v1195_v48 }
  0x3d   :  { %660 = vmatprep.mubr.bf16.mxu1 %v1197_v49 }
  0x43   :  { %564 = vmatmul.mubr.bf16.gmra.mrb[16].mxu0 %v1199_v50 }
  0x44   :  { %661 = vmatmul.mubr.bf16.gmra.mrb[16].mxu1 %v1200_v51  ;;  %571 = vmatprep.mubr.bf16.mxu0 %v1201_v52 }
  0x45   :  { %668 = vmatprep.mubr.bf16.mxu1 %v1203_v53 }
  0x4b   :  { %572 = vmatmul.mubr.bf16.gmra.mrb[20].mxu0 %v1205_v54 }
  0x4c   :  { %669 = vmatmul.mubr.bf16.gmra.mrb[20].mxu1 %v1206_v55  ;;  %579 = vmatprep.mubr.bf16.mxu0 %v1207_v56 }
  0x4d   :  { %676 = vmatprep.mubr.bf16.mxu1 %v1209_v57 }
  0x53   :  { %580 = vmatmul.mubr.bf16.gmra.mrb[24].mxu0 %v1211_v58 }
  0x54   :  { %677 = vmatmul.mubr.bf16.gmra.mrb[24].mxu1 %v1212_v59  ;;  %587 = vmatprep.mubr.bf16.mxu0 %v1213_v60 }
  0x55   :  { %684 = vmatprep.mubr.bf16.mxu1 %v1215_v61 }
  0x5b   :  { %588 = vmatmul.mubr.bf16.gmra.mrb[28].mxu0 %v1217_v62 }
  0x5c   :  { %685 = vmatmul.mubr.bf16.gmra.mrb[28].mxu1 %v1218_v63 }
  0xf6   :  { %v1027_v0 = vpop.f32.mrb[0].mxu0 }
  0xf7   :  { %v1091_v1 = vpop.f32.mrb[0].mxu1  ;;  %v1028_v2 = vpop.f32.mrb[1].mxu0 }
  0xf8   :  { %v1029_v3 = vadd.f32 %v1028_v2, %v1027_v0  ;;  %v1092_v4 = vpop.f32.mrb[1].mxu1  ;;  %v1030_v5 = vpop.f32.mrb[2].mxu0 }
  0xf9   :  { %v1093_v6 = vadd.f32 %v1092_v4, %v1091_v1  ;;  %v1094_v7 = vpop.f32.mrb[2].mxu1  ;;  %v1031_v8 = vpop.f32.mrb[3].mxu0 }
  0xfa   :  { %v1032_v10 = vadd.f32 %v1031_v8, %v1030_v5  ;;  %v1095_v11 = vpop.f32.mrb[3].mxu1 }
  0xfb   :  { %v631_v12 = vadd.f32 %v1093_v6, %v1029_v3  ;;  %v1096_v13 = vadd.f32 %v1095_v11, %v1094_v7 }
  0xfd   :  { %v751_v14 = vadd.f32 %v1434_v9, %v631_v12  ;;  %v634_v15 = vadd.f32 %v1096_v13, %v1032_v10 }
  0xfe   :  { %v1033_v16 = vpop.f32.mrb[4].mxu0 }
  0xff   :  { %v752_v17 = vadd.f32 %v1434_v9, %v634_v15  ;;  %v1097_v18 = vpop.f32.mrb[4].mxu1  ;;  %v1034_v19 = vpop.f32.mrb[5].mxu0  ;;  %v767_v23 = vmax.f32 %v751_v14, 0.0 }
 0x100   :  { %v1035_v20 = vadd.f32 %v1034_v19, %v1033_v16  ;;  %v1098_v21 = vpop.f32.mrb[5].mxu1  ;;  %v1036_v22 = vpop.f32.mrb[6].mxu0 }
 0x101   :  { %v768_v24 = vmax.f32 %v752_v17, 0.0  ;;  %v1099_v25 = vadd.f32 %v1098_v21, %v1097_v18  ;;  %v1100_v26 = vpop.f32.mrb[6].mxu1  ;;  %v1037_v27 = vpop.f32.mrb[7].mxu0 }
 0x102   :  { %v1038_v28 = vadd.f32 %v1037_v27, %v1036_v22  ;;  %v1101_v29 = vpop.f32.mrb[7].mxu1 }
 0x103   :  { %v967_v30 = vpack.c.bf16 %v768_v24, %v767_v23  ;;  %v639_v31 = vadd.f32 %v1099_v25, %v1035_v20  ;;  %v1102_v32 = vadd.f32 %v1101_v29, %v1100_v26 }
 0x105   :  { %968 = vst [vmem:[%s1479_s3] sm:$0xff] %v967_v30   ;;  %v753_v33 = vadd.f32 %v1434_v9, %v639_v31  ;;  %v642_v34 = vadd.f32 %v1102_v32, %v1038_v28 }
 0x106   :  { %v1039_v35 = vpop.f32.mrb[8].mxu0 }
 0x107   :  { %v754_v36 = vadd.f32 %v1434_v9, %v642_v34  ;;  %v1103_v37 = vpop.f32.mrb[8].mxu1  ;;  %v1040_v38 = vpop.f32.mrb[9].mxu0  ;;  %v769_v42 = vmax.f32 %v753_v33, 0.0 }
 0x108   :  { %v1041_v39 = vadd.f32 %v1040_v38, %v1039_v35  ;;  %v1104_v40 = vpop.f32.mrb[9].mxu1  ;;  %v1042_v41 = vpop.f32.mrb[10].mxu0 }
 0x109   :  { %v770_v43 = vmax.f32 %v754_v36, 0.0  ;;  %v1105_v44 = vadd.f32 %v1104_v40, %v1103_v37  ;;  %v1106_v45 = vpop.f32.mrb[10].mxu1  ;;  %v1043_v46 = vpop.f32.mrb[11].mxu0 }
 0x10a   :  { %v1044_v47 = vadd.f32 %v1043_v46, %v1042_v41  ;;  %v1107_v48 = vpop.f32.mrb[11].mxu1 }
 0x10b   :  { %v972_v49 = vpack.c.bf16 %v770_v43, %v769_v42  ;;  %v647_v50 = vadd.f32 %v1105_v44, %v1041_v39  ;;  %v1108_v51 = vadd.f32 %v1107_v48, %v1106_v45 }
 0x10d   :  { %1004 = vst [vmem:[%s1479_s3 + $0x8] sm:$0xff] %v972_v49   ;;  %v755_v52 = vadd.f32 %v1434_v9, %v647_v50  ;;  %v650_v53 = vadd.f32 %v1108_v51, %v1044_v47 }
 0x10e   :  { %v1045_v54 = vpop.f32.mrb[12].mxu0 }
 0x10f   :  { %v756_v55 = vadd.f32 %v1434_v9, %v650_v53  ;;  %v1109_v56 = vpop.f32.mrb[12].mxu1  ;;  %v1046_v57 = vpop.f32.mrb[13].mxu0  ;;  %v771_v61 = vmax.f32 %v755_v52, 0.0 }
 0x110   :  { %v1047_v58 = vadd.f32 %v1046_v57, %v1045_v54  ;;  %v1110_v59 = vpop.f32.mrb[13].mxu1  ;;  %v1048_v60 = vpop.f32.mrb[14].mxu0 }
 0x111   :  { %v772_v62 = vmax.f32 %v756_v55, 0.0  ;;  %v1111_v63 = vadd.f32 %v1110_v59, %v1109_v56  ;;  %v1112_v0 = vpop.f32.mrb[14].mxu1  ;;  %v1049_v1 = vpop.f32.mrb[15].mxu0 }
 0x112   :  { %v1050_v2 = vadd.f32 %v1049_v1, %v1048_v60  ;;  %v1113_v3 = vpop.f32.mrb[15].mxu1 }
 0x113   :  { %v977_v4 = vpack.c.bf16 %v772_v62, %v771_v61  ;;  %v655_v5 = vadd.f32 %v1111_v63, %v1047_v58  ;;  %v1114_v6 = vadd.f32 %v1113_v3, %v1112_v0 }
 0x115   :  { %1005 = vst [vmem:[%s1479_s3 + $0x10] sm:$0xff] %v977_v4   ;;  %v757_v7 = vadd.f32 %v1434_v9, %v655_v5  ;;  %v658_v8 = vadd.f32 %v1114_v6, %v1050_v2 }
 0x116   :  { %v1051_v10 = vpop.f32.mrb[16].mxu0 }
 0x117   :  { %v758_v11 = vadd.f32 %v1434_v9, %v658_v8  ;;  %v1115_v12 = vpop.f32.mrb[16].mxu1  ;;  %v1052_v13 = vpop.f32.mrb[17].mxu0  ;;  %v773_v17 = vmax.f32 %v757_v7, 0.0 }
 0x118   :  { %v1053_v14 = vadd.f32 %v1052_v13, %v1051_v10  ;;  %v1116_v15 = vpop.f32.mrb[17].mxu1  ;;  %v1054_v16 = vpop.f32.mrb[18].mxu0 }
 0x119   :  { %v774_v18 = vmax.f32 %v758_v11, 0.0  ;;  %v1117_v19 = vadd.f32 %v1116_v15, %v1115_v12  ;;  %v1118_v20 = vpop.f32.mrb[18].mxu1  ;;  %v1055_v21 = vpop.f32.mrb[19].mxu0 }
 0x11a   :  { %v1056_v22 = vadd.f32 %v1055_v21, %v1054_v16  ;;  %v1119_v23 = vpop.f32.mrb[19].mxu1 }
 0x11b   :  { %v982_v24 = vpack.c.bf16 %v774_v18, %v773_v17  ;;  %v663_v25 = vadd.f32 %v1117_v19, %v1053_v14  ;;  %v1120_v26 = vadd.f32 %v1119_v23, %v1118_v20 }
 0x11d   :  { %1006 = vst [vmem:[%s1479_s3 + $0x18] sm:$0xff] %v982_v24   ;;  %v759_v27 = vadd.f32 %v1434_v9, %v663_v25  ;;  %v666_v28 = vadd.f32 %v1120_v26, %v1056_v22 }
 0x11e   :  { %v1057_v29 = vpop.f32.mrb[20].mxu0 }
 0x11f   :  { %v760_v30 = vadd.f32 %v1434_v9, %v666_v28  ;;  %v1121_v31 = vpop.f32.mrb[20].mxu1  ;;  %v1058_v32 = vpop.f32.mrb[21].mxu0  ;;  %v775_v36 = vmax.f32 %v759_v27, 0.0 }
 0x120   :  { %v1059_v33 = vadd.f32 %v1058_v32, %v1057_v29  ;;  %v1122_v34 = vpop.f32.mrb[21].mxu1  ;;  %v1060_v35 = vpop.f32.mrb[22].mxu0 }
 0x121   :  { %v776_v37 = vmax.f32 %v760_v30, 0.0  ;;  %v1123_v38 = vadd.f32 %v1122_v34, %v1121_v31  ;;  %v1124_v39 = vpop.f32.mrb[22].mxu1  ;;  %v1061_v40 = vpop.f32.mrb[23].mxu0 }
 0x122   :  { %v1062_v41 = vadd.f32 %v1061_v40, %v1060_v35  ;;  %v1125_v42 = vpop.f32.mrb[23].mxu1 }
 0x123   :  { %v987_v43 = vpack.c.bf16 %v776_v37, %v775_v36  ;;  %v671_v44 = vadd.f32 %v1123_v38, %v1059_v33  ;;  %v1126_v45 = vadd.f32 %v1125_v42, %v1124_v39 }
 0x125   :  { %1007 = vst [vmem:[%s1479_s3 + $0x20] sm:$0xff] %v987_v43   ;;  %v761_v46 = vadd.f32 %v1434_v9, %v671_v44  ;;  %v674_v47 = vadd.f32 %v1126_v45, %v1062_v41 }
 0x126   :  { %v1063_v48 = vpop.f32.mrb[24].mxu0 }
 0x127   :  { %v762_v49 = vadd.f32 %v1434_v9, %v674_v47  ;;  %v1127_v50 = vpop.f32.mrb[24].mxu1  ;;  %v1064_v51 = vpop.f32.mrb[25].mxu0  ;;  %v777_v55 = vmax.f32 %v761_v46, 0.0 }
 0x128   :  { %v1065_v52 = vadd.f32 %v1064_v51, %v1063_v48  ;;  %v1128_v53 = vpop.f32.mrb[25].mxu1  ;;  %v1066_v54 = vpop.f32.mrb[26].mxu0 }
 0x129   :  { %v778_v56 = vmax.f32 %v762_v49, 0.0  ;;  %v1129_v57 = vadd.f32 %v1128_v53, %v1127_v50  ;;  %v1130_v58 = vpop.f32.mrb[26].mxu1  ;;  %v1067_v59 = vpop.f32.mrb[27].mxu0 }
 0x12a   :  { %v1068_v60 = vadd.f32 %v1067_v59, %v1066_v54  ;;  %v1131_v61 = vpop.f32.mrb[27].mxu1 }
 0x12b   :  { %v992_v62 = vpack.c.bf16 %v778_v56, %v777_v55  ;;  %v679_v63 = vadd.f32 %v1129_v57, %v1065_v52  ;;  %v1132_v0 = vadd.f32 %v1131_v61, %v1130_v58 }
 0x12d   :  { %1008 = vst [vmem:[%s1479_s3 + $0x28] sm:$0xff] %v992_v62   ;;  %v763_v1 = vadd.f32 %v1434_v9, %v679_v63  ;;  %v682_v2 = vadd.f32 %v1132_v0, %v1068_v60 }
 0x12e   :  { %v1069_v3 = vpop.f32.mrb[28].mxu0 }
 0x12f   :  { %v764_v4 = vadd.f32 %v1434_v9, %v682_v2  ;;  %v1133_v5 = vpop.f32.mrb[28].mxu1  ;;  %v1070_v6 = vpop.f32.mrb[29].mxu0  ;;  %v779_v11 = vmax.f32 %v763_v1, 0.0 }
 0x130   :  { %v1071_v7 = vadd.f32 %v1070_v6, %v1069_v3  ;;  %v1134_v8 = vpop.f32.mrb[29].mxu1  ;;  %v1072_v10 = vpop.f32.mrb[30].mxu0 }
 0x131   :  { %v780_v12 = vmax.f32 %v764_v4, 0.0  ;;  %v1135_v13 = vadd.f32 %v1134_v8, %v1133_v5  ;;  %v1136_v14 = vpop.f32.mrb[30].mxu1  ;;  %v1073_v15 = vpop.f32.mrb[31].mxu0 }
 0x132   :  { %v1074_v16 = vadd.f32 %v1073_v15, %v1072_v10  ;;  %v1137_v17 = vpop.f32.mrb[31].mxu1 }
 0x133   :  { %v997_v18 = vpack.c.bf16 %v780_v12, %v779_v11  ;;  %v687_v19 = vadd.f32 %v1135_v13, %v1071_v7  ;;  %v1138_v20 = vadd.f32 %v1137_v17, %v1136_v14 }
 0x135   :  { %1009 = vst [vmem:[%s1479_s3 + $0x30] sm:$0xff] %v997_v18   ;;  %v765_v21 = vadd.f32 %v1434_v9, %v687_v19  ;;  %v690_v22 = vadd.f32 %v1138_v20, %v1074_v16 }
 0x137   :  { %v766_v23 = vadd.f32 %v1434_v9, %v690_v22  ;;  %v781_v24 = vmax.f32 %v765_v21, 0.0 }
 0x139   :  { %v782_v25 = vmax.f32 %v766_v23, 0.0 }
 0x13b   :  { %v1002_v26 = vpack.c.bf16 %v782_v25, %v781_v24 }
 0x13d   :  { %1010 = vst [vmem:[%s1479_s3 + $0x38] sm:$0xff] %v1002_v26  }

// kernel: vae_forward.25
= control target key start
LH: loop header
LB: loop body
LE: loop exit
PB: predicated region body
PF: predicated region fallthrough
CT: control target
= control target key end

     0   :  { %vm2057_vm0 = vcmask 122880   ;;  %vm2058_vm1 = vsmask.f32 256  ;;  %vm4493_vm3 = vcmask 1041409   ;;  %vm4496_vm4 = vcmask 1042434   ;;  %s10218_s0 = inlined_call_operand.vmem [shape: bf16[32,8,2,16], index: 0, kind: input, shape index: {}]   ;;  %s10219_s1 = inlined_call_operand.vmem [shape: bf16[16,8,16], index: 1, kind: output, shape index: {}]  }
   0x1   :  { %v5071_v0 = vld [vmem:[%s10218_s0] sm:$0x1]  ;;  %v5076_v1 = vld [vmem:[%s10218_s0 + $0x1] sm:$0x1]  ;;  %v5081_v2 = vld [vmem:[%s10218_s0 + $0x2] sm:$0x1] }
   0x2   :  { %v5086_v3 = vld [vmem:[%s10218_s0 + $0x3] sm:$0x1]  ;;  %v5091_v4 = vld [vmem:[%s10218_s0 + $0x4] sm:$0x1]  ;;  %v5096_v5 = vld [vmem:[%s10218_s0 + $0x5] sm:$0x1] }
   0x3   :  { %v5101_v6 = vld [vmem:[%s10218_s0 + $0x6] sm:$0x1]  ;;  %v5106_v7 = vld [vmem:[%s10218_s0 + $0x7] sm:$0x1]  ;;  %v5111_v8 = vld [vmem:[%s10218_s0 + $0x8] sm:$0x1] }
   0x4   :  { %v5116_v9 = vld [vmem:[%s10218_s0 + $0x9] sm:$0x1]  ;;  %v5121_v10 = vld [vmem:[%s10218_s0 + $0xa] sm:$0x1]  ;;  %v5126_v11 = vld [vmem:[%s10218_s0 + $0xb] sm:$0x1] }
   0x5   :  { %v5131_v12 = vld [vmem:[%s10218_s0 + $0xc] sm:$0x1]  ;;  %v5136_v13 = vld [vmem:[%s10218_s0 + $0xd] sm:$0x1]  ;;  %v5141_v14 = vld [vmem:[%s10218_s0 + $0xe] sm:$0x1] }
   0x6   :  { %v5146_v15 = vld [vmem:[%s10218_s0 + $0xf] sm:$0x1]  ;;  %v5151_v16 = vld [vmem:[%s10218_s0 + $0x10] sm:$0x1]  ;;  %v5156_v17 = vld [vmem:[%s10218_s0 + $0x11] sm:$0x1] }
   0x7   :  { %v5161_v18 = vld [vmem:[%s10218_s0 + $0x12] sm:$0x1]  ;;  %v5166_v19 = vld [vmem:[%s10218_s0 + $0x13] sm:$0x1]  ;;  %v5171_v20 = vld [vmem:[%s10218_s0 + $0x14] sm:$0x1] }
   0x8   :  { %v5176_v21 = vld [vmem:[%s10218_s0 + $0x15] sm:$0x1]  ;;  %v5181_v22 = vld [vmem:[%s10218_s0 + $0x16] sm:$0x1]  ;;  %v5186_v23 = vld [vmem:[%s10218_s0 + $0x17] sm:$0x1] }
   0x9   :  { %v5195_v28 = vld [vmem:[%s10218_s0 + $0x18] sm:$0x1]  ;;  %v5200_v29 = vld [vmem:[%s10218_s0 + $0x19] sm:$0x1]  ;;  %v5205_v30 = vld [vmem:[%s10218_s0 + $0x1a] sm:$0x1] }
   0xa   :  { %v5210_v31 = vld [vmem:[%s10218_s0 + $0x1b] sm:$0x1]  ;;  %v5219_v36 = vld [vmem:[%s10218_s0 + $0x1c] sm:$0x1]  ;;  %v5224_v37 = vld [vmem:[%s10218_s0 + $0x1d] sm:$0x1] }
   0xb   :  { %v5229_v38 = vld [vmem:[%s10218_s0 + $0x1e] sm:$0x1]  ;;  %v5234_v39 = vld [vmem:[%s10218_s0 + $0x1f] sm:$0x1]  ;;  %v5243_v44 = vld [vmem:[%s10218_s0 + $0x20] sm:$0x1] }
   0xc   :  { %v5248_v45 = vld [vmem:[%s10218_s0 + $0x21] sm:$0x1]  ;;  %v5253_v46 = vld [vmem:[%s10218_s0 + $0x22] sm:$0x1]  ;;  %v5258_v47 = vld [vmem:[%s10218_s0 + $0x23] sm:$0x1] }
   0xd   :  { %10716 = vst [vmem:[#allocation2_spill] sm:$0xff] %v5248_v45  ;;  %10717 = vst [vmem:[#allocation3_spill] sm:$0xff] %v5253_v46  ;;  %v5267_v52 = vld [vmem:[%s10218_s0 + $0x24] sm:$0x1]  ;;  %v5272_v53 = vld [vmem:[%s10218_s0 + $0x25] sm:$0x1] }
   0xe   :  { %10718 = vst [vmem:[#allocation4_spill] sm:$0xff] %v5258_v47  ;;  %10719 = vst [vmem:[#allocation5_spill] sm:$0xff] %v5267_v52  ;;  %v5277_v54 = vld [vmem:[%s10218_s0 + $0x26] sm:$0x1]  ;;  %v5282_v55 = vld [vmem:[%s10218_s0 + $0x27] sm:$0x1] }
   0xf   :  { %10720 = vst [vmem:[#allocation6_spill] sm:$0xff] %v5272_v53  ;;  %10721 = vst [vmem:[#allocation7_spill] sm:$0xff] %v5277_v54  ;;  %v5291_v60 = vld [vmem:[%s10218_s0 + $0x28] sm:$0x1]  ;;  %v5296_v61 = vld [vmem:[%s10218_s0 + $0x29] sm:$0x1] }
  0x10   :  { %10722 = vst [vmem:[#allocation8_spill] sm:$0xff] %v5282_v55  ;;  %10723 = vst [vmem:[#allocation9_spill] sm:$0xff] %v5291_v60  ;;  %v5301_v62 = vld [vmem:[%s10218_s0 + $0x2a] sm:$0x1]  ;;  %v5306_v63 = vld [vmem:[%s10218_s0 + $0x2b] sm:$0x1] }
  0x11   :  { %10724 = vst [vmem:[#allocation10_spill] sm:$0xff] %v5296_v61  ;;  %10725 = vst [vmem:[#allocation11_spill] sm:$0xff] %v5301_v62  ;;  %v5315_v51 = vld [vmem:[%s10218_s0 + $0x2c] sm:$0x1]  ;;  %v5320_v50 = vld [vmem:[%s10218_s0 + $0x2d] sm:$0x1] }
  0x12   :  { %10726 = vst [vmem:[#allocation12_spill] sm:$0xff] %v5306_v63  ;;  %10727 = vst [vmem:[#allocation13_spill] sm:$0xff] %v5315_v51  ;;  %v5325_v59 = vld [vmem:[%s10218_s0 + $0x2e] sm:$0x1]  ;;  %v5330_v57 = vld [vmem:[%s10218_s0 + $0x2f] sm:$0x1] }
  0x13   :  { %10728 = vst [vmem:[#allocation14_spill] sm:$0xff] %v5320_v50  ;;  %10729 = vst [vmem:[#allocation15_spill] sm:$0xff] %v5325_v59  ;;  %v5339_v43 = vld [vmem:[%s10218_s0 + $0x30] sm:$0x1]  ;;  %v5344_v42 = vld [vmem:[%s10218_s0 + $0x31] sm:$0x1] }
  0x14   :  { %10730 = vst [vmem:[#allocation16_spill] sm:$0xff] %v5330_v57  ;;  %10731 = vst [vmem:[#allocation17_spill] sm:$0xff] %v5339_v43  ;;  %v5349_v56 = vld [vmem:[%s10218_s0 + $0x32] sm:$0x1]  ;;  %v5354_v49 = vld [vmem:[%s10218_s0 + $0x33] sm:$0x1] }
  0x15   :  { %10732 = vst [vmem:[#allocation18_spill] sm:$0xff] %v5344_v42  ;;  %10733 = vst [vmem:[#allocation19_spill] sm:$0xff] %v5349_v56  ;;  %v5363_v35 = vld [vmem:[%s10218_s0 + $0x34] sm:$0x1]  ;;  %v5368_v34 = vld [vmem:[%s10218_s0 + $0x35] sm:$0x1] }
  0x16   :  { %10734 = vst [vmem:[#allocation20_spill] sm:$0xff] %v5354_v49  ;;  %10735 = vst [vmem:[#allocation21_spill] sm:$0xff] %v5363_v35  ;;  %v5373_v48 = vld [vmem:[%s10218_s0 + $0x36] sm:$0x1]  ;;  %v5378_v41 = vld [vmem:[%s10218_s0 + $0x37] sm:$0x1] }
  0x17   :  { %10736 = vst [vmem:[#allocation22_spill] sm:$0xff] %v5368_v34  ;;  %10737 = vst [vmem:[#allocation23_spill] sm:$0xff] %v5373_v48  ;;  %v5387_v27 = vld [vmem:[%s10218_s0 + $0x38] sm:$0x1]  ;;  %v5392_v26 = vld [vmem:[%s10218_s0 + $0x39] sm:$0x1] }
  0x18   :  { %10738 = vst [vmem:[#allocation24_spill] sm:$0xff] %v5378_v41  ;;  %10739 = vst [vmem:[#allocation25_spill] sm:$0xff] %v5387_v27  ;;  %v5397_v40 = vld [vmem:[%s10218_s0 + $0x3a] sm:$0x1]  ;;  %v5402_v33 = vld [vmem:[%s10218_s0 + $0x3b] sm:$0x1] }
  0x19   :  { %10740 = vst [vmem:[#allocation26_spill] sm:$0xff] %v5392_v26  ;;  %10741 = vst [vmem:[#allocation27_spill] sm:$0xff] %v5397_v40  ;;  %v5411_v47 = vld [vmem:[%s10218_s0 + $0x3c] sm:$0x1]  ;;  %v5416_v46 = vld [vmem:[%s10218_s0 + $0x3d] sm:$0x1] }
  0x1a   :  { %10742 = vst [vmem:[#allocation28_spill] sm:$0xff] %v5402_v33  ;;  %10743 = vst [vmem:[#allocation29_spill] sm:$0xff] %v5411_v47  ;;  %v5421_v32 = vld [vmem:[%s10218_s0 + $0x3e] sm:$0x1]  ;;  %v5426_v25 = vld [vmem:[%s10218_s0 + $0x3f] sm:$0x1] }
  0x1b   :  { %10744 = vst [vmem:[#allocation30_spill] sm:$0xff] %v5416_v46  ;;  %10745 = vst [vmem:[#allocation31_spill] sm:$0xff] %v5421_v32  ;;  %v5435_v53 = vld [vmem:[%s10218_s0 + $0x40] sm:$0x1]  ;;  %v5440_v52 = vld [vmem:[%s10218_s0 + $0x41] sm:$0x1] }
  0x1c   :  { %10746 = vst [vmem:[#allocation32_spill] sm:$0xff] %v5426_v25  ;;  %10747 = vst [vmem:[#allocation33_spill] sm:$0xff] %v5435_v53  ;;  %v5445_v24 = vld [vmem:[%s10218_s0 + $0x42] sm:$0x1]  ;;  %v5450_v55 = vld [vmem:[%s10218_s0 + $0x43] sm:$0x1] }
  0x1d   :  { %10748 = vst [vmem:[#allocation34_spill] sm:$0xff] %v5440_v52  ;;  %10749 = vst [vmem:[#allocation35_spill] sm:$0xff] %v5445_v24  ;;  %v5459_v61 = vld [vmem:[%s10218_s0 + $0x44] sm:$0x1]  ;;  %v5464_v60 = vld [vmem:[%s10218_s0 + $0x45] sm:$0x1] }
  0x1e   :  { %10750 = vst [vmem:[#allocation36_spill] sm:$0xff] %v5450_v55  ;;  %10751 = vst [vmem:[#allocation37_spill] sm:$0xff] %v5459_v61  ;;  %v5469_v54 = vld [vmem:[%s10218_s0 + $0x46] sm:$0x1]  ;;  %v5474_v63 = vld [vmem:[%s10218_s0 + $0x47] sm:$0x1] }
  0x1f   :  { %10752 = vst [vmem:[#allocation38_spill] sm:$0xff] %v5464_v60  ;;  %10753 = vst [vmem:[#allocation39_spill] sm:$0xff] %v5469_v54  ;;  %v5483_v50 = vld [vmem:[%s10218_s0 + $0x48] sm:$0x1]  ;;  %v5488_v51 = vld [vmem:[%s10218_s0 + $0x49] sm:$0x1] }
  0x20   :  { %10754 = vst [vmem:[#allocation40_spill] sm:$0xff] %v5474_v63  ;;  %10755 = vst [vmem:[#allocation41_spill] sm:$0xff] %v5483_v50  ;;  %v5493_v62 = vld [vmem:[%s10218_s0 + $0x4a] sm:$0x1]  ;;  %v5498_v57 = vld [vmem:[%s10218_s0 + $0x4b] sm:$0x1] }
  0x21   :  { %10756 = vst [vmem:[#allocation42_spill] sm:$0xff] %v5488_v51  ;;  %10757 = vst [vmem:[#allocation43_spill] sm:$0xff] %v5493_v62  ;;  %v5507_v42 = vld [vmem:[%s10218_s0 + $0x4c] sm:$0x1]  ;;  %v5512_v43 = vld [vmem:[%s10218_s0 + $0x4d] sm:$0x1] }
  0x22   :  { %10758 = vst [vmem:[#allocation44_spill] sm:$0xff] %v5498_v57  ;;  %10759 = vst [vmem:[#allocation45_spill] sm:$0xff] %v5507_v42  ;;  %v5517_v59 = vld [vmem:[%s10218_s0 + $0x4e] sm:$0x1]  ;;  %v5522_v49 = vld [vmem:[%s10218_s0 + $0x4f] sm:$0x1] }
  0x23   :  { %10760 = vst [vmem:[#allocation46_spill] sm:$0xff] %v5512_v43  ;;  %10761 = vst [vmem:[#allocation47_spill] sm:$0xff] %v5517_v59  ;;  %v5531_v34 = vld [vmem:[%s10218_s0 + $0x50] sm:$0x1]  ;;  %v5536_v35 = vld [vmem:[%s10218_s0 + $0x51] sm:$0x1] }
  0x24   :  { %10762 = vst [vmem:[#allocation48_spill] sm:$0xff] %v5522_v49  ;;  %10763 = vst [vmem:[#allocation49_spill] sm:$0xff] %v5531_v34  ;;  %v5541_v56 = vld [vmem:[%s10218_s0 + $0x52] sm:$0x1]  ;;  %v5546_v41 = vld [vmem:[%s10218_s0 + $0x53] sm:$0x1] }
  0x25   :  { %10764 = vst [vmem:[#allocation50_spill] sm:$0xff] %v5536_v35  ;;  %10765 = vst [vmem:[#allocation51_spill] sm:$0xff] %v5541_v56  ;;  %v5555_v26 = vld [vmem:[%s10218_s0 + $0x54] sm:$0x1]  ;;  %v5560_v27 = vld [vmem:[%s10218_s0 + $0x55] sm:$0x1] }
  0x26   :  { %10766 = vst [vmem:[#allocation52_spill] sm:$0xff] %v5546_v41  ;;  %10767 = vst [vmem:[#allocation53_spill] sm:$0xff] %v5555_v26  ;;  %v5565_v48 = vld [vmem:[%s10218_s0 + $0x56] sm:$0x1]  ;;  %v5570_v33 = vld [vmem:[%s10218_s0 + $0x57] sm:$0x1] }
  0x27   :  { %10768 = vst [vmem:[#allocation54_spill] sm:$0xff] %v5560_v27  ;;  %10769 = vst [vmem:[#allocation55_spill] sm:$0xff] %v5565_v48  ;;  %v5579_v46 = vld [vmem:[%s10218_s0 + $0x58] sm:$0x1]  ;;  %v5584_v47 = vld [vmem:[%s10218_s0 + $0x59] sm:$0x1] }
  0x28   :  { %10770 = vst [vmem:[#allocation56_spill] sm:$0xff] %v5570_v33  ;;  %10771 = vst [vmem:[#allocation57_spill] sm:$0xff] %v5579_v46  ;;  %v5589_v40 = vld [vmem:[%s10218_s0 + $0x5a] sm:$0x1]  ;;  %v5594_v25 = vld [vmem:[%s10218_s0 + $0x5b] sm:$0x1] }
  0x29   :  { %10772 = vst [vmem:[#allocation58_spill] sm:$0xff] %v5584_v47  ;;  %10773 = vst [vmem:[#allocation59_spill] sm:$0xff] %v5589_v40  ;;  %v5603_v52 = vld [vmem:[%s10218_s0 + $0x5c] sm:$0x1]  ;;  %v5608_v53 = vld [vmem:[%s10218_s0 + $0x5d] sm:$0x1] }
  0x2a   :  { %10774 = vst [vmem:[#allocation60_spill] sm:$0xff] %v5594_v25  ;;  %10775 = vst [vmem:[#allocation61_spill] sm:$0xff] %v5603_v52  ;;  %v5613_v32 = vld [vmem:[%s10218_s0 + $0x5e] sm:$0x1]  ;;  %v5618_v55 = vld [vmem:[%s10218_s0 + $0x5f] sm:$0x1] }
  0x2b   :  { %10776 = vst [vmem:[#allocation62_spill] sm:$0xff] %v5608_v53  ;;  %10777 = vst [vmem:[#allocation63_spill] sm:$0xff] %v5613_v32  ;;  %v5627_v60 = vld [vmem:[%s10218_s0 + $0x60] sm:$0x1]  ;;  %v5632_v61 = vld [vmem:[%s10218_s0 + $0x61] sm:$0x1] }
  0x2c   :  { %10778 = vst [vmem:[#allocation64_spill] sm:$0xff] %v5618_v55  ;;  %10779 = vst [vmem:[#allocation65_spill] sm:$0xff] %v5627_v60  ;;  %v5637_v24 = vld [vmem:[%s10218_s0 + $0x62] sm:$0x1]  ;;  %v5642_v63 = vld [vmem:[%s10218_s0 + $0x63] sm:$0x1] }
  0x2d   :  { %10780 = vst [vmem:[#allocation66_spill] sm:$0xff] %v5632_v61  ;;  %10781 = vst [vmem:[#allocation67_spill] sm:$0xff] %v5637_v24  ;;  %v5651_v51 = vld [vmem:[%s10218_s0 + $0x64] sm:$0x1]  ;;  %v5656_v50 = vld [vmem:[%s10218_s0 + $0x65] sm:$0x1] }
  0x2e   :  { %10782 = vst [vmem:[#allocation68_spill] sm:$0xff] %v5642_v63  ;;  %10783 = vst [vmem:[#allocation69_spill] sm:$0xff] %v5651_v51  ;;  %v5661_v54 = vld [vmem:[%s10218_s0 + $0x66] sm:$0x1]  ;;  %v5666_v57 = vld [vmem:[%s10218_s0 + $0x67] sm:$0x1] }
  0x2f   :  { %10784 = vst [vmem:[#allocation70_spill] sm:$0xff] %v5656_v50  ;;  %10785 = vst [vmem:[#allocation71_spill] sm:$0xff] %v5661_v54  ;;  %v5675_v43 = vld [vmem:[%s10218_s0 + $0x68] sm:$0x1]  ;;  %v5680_v42 = vld [vmem:[%s10218_s0 + $0x69] sm:$0x1] }
  0x30   :  { %10786 = vst [vmem:[#allocation72_spill] sm:$0xff] %v5666_v57  ;;  %10787 = vst [vmem:[#allocation73_spill] sm:$0xff] %v5675_v43  ;;  %v5685_v62 = vld [vmem:[%s10218_s0 + $0x6a] sm:$0x1]  ;;  %v5690_v49 = vld [vmem:[%s10218_s0 + $0x6b] sm:$0x1] }
  0x31   :  { %10788 = vst [vmem:[#allocation74_spill] sm:$0xff] %v5680_v42  ;;  %10789 = vst [vmem:[#allocation75_spill] sm:$0xff] %v5685_v62  ;;  %v5699_v35 = vld [vmem:[%s10218_s0 + $0x6c] sm:$0x1]  ;;  %v5704_v34 = vld [vmem:[%s10218_s0 + $0x6d] sm:$0x1] }
  0x32   :  { %10790 = vst [vmem:[#allocation76_spill] sm:$0xff] %v5690_v49  ;;  %10791 = vst [vmem:[#allocation77_spill] sm:$0xff] %v5699_v35  ;;  %v5709_v59 = vld [vmem:[%s10218_s0 + $0x6e] sm:$0x1]  ;;  %v5714_v41 = vld [vmem:[%s10218_s0 + $0x6f] sm:$0x1] }
  0x33   :  { %10792 = vst [vmem:[#allocation78_spill] sm:$0xff] %v5704_v34  ;;  %10793 = vst [vmem:[#allocation79_spill] sm:$0xff] %v5709_v59  ;;  %v5723_v27 = vld [vmem:[%s10218_s0 + $0x70] sm:$0x1]  ;;  %v5728_v26 = vld [vmem:[%s10218_s0 + $0x71] sm:$0x1] }
  0x34   :  { %10794 = vst [vmem:[#allocation80_spill] sm:$0xff] %v5714_v41  ;;  %10795 = vst [vmem:[#allocation81_spill] sm:$0xff] %v5723_v27  ;;  %v5733_v56 = vld [vmem:[%s10218_s0 + $0x72] sm:$0x1]  ;;  %v5738_v33 = vld [vmem:[%s10218_s0 + $0x73] sm:$0x1] }
  0x35   :  { %10796 = vst [vmem:[#allocation82_spill] sm:$0xff] %v5728_v26  ;;  %10797 = vst [vmem:[#allocation83_spill] sm:$0xff] %v5733_v56  ;;  %v5747_v47 = vld [vmem:[%s10218_s0 + $0x74] sm:$0x1]  ;;  %v5752_v46 = vld [vmem:[%s10218_s0 + $0x75] sm:$0x1] }
  0x36   :  { %10798 = vst [vmem:[#allocation84_spill] sm:$0xff] %v5738_v33  ;;  %10799 = vst [vmem:[#allocation85_spill] sm:$0xff] %v5747_v47  ;;  %v5757_v48 = vld [vmem:[%s10218_s0 + $0x76] sm:$0x1]  ;;  %v5762_v25 = vld [vmem:[%s10218_s0 + $0x77] sm:$0x1] }
  0x37   :  { %10800 = vst [vmem:[#allocation86_spill] sm:$0xff] %v5752_v46  ;;  %10801 = vst [vmem:[#allocation87_spill] sm:$0xff] %v5757_v48  ;;  %v5771_v53 = vld [vmem:[%s10218_s0 + $0x78] sm:$0x1]  ;;  %v5776_v52 = vld [vmem:[%s10218_s0 + $0x79] sm:$0x1] }
  0x38   :  { %10802 = vst [vmem:[#allocation88_spill] sm:$0xff] %v5762_v25  ;;  %10803 = vst [vmem:[#allocation89_spill] sm:$0xff] %v5771_v53  ;;  %v5781_v40 = vld [vmem:[%s10218_s0 + $0x7a] sm:$0x1]  ;;  %v5786_v55 = vld [vmem:[%s10218_s0 + $0x7b] sm:$0x1] }
  0x39   :  { %10804 = vst [vmem:[#allocation90_spill] sm:$0xff] %v5776_v52  ;;  %10805 = vst [vmem:[#allocation91_spill] sm:$0xff] %v5781_v40  ;;  %v5795_v61 = vld [vmem:[%s10218_s0 + $0x7c] sm:$0x1]  ;;  %v5800_v60 = vld [vmem:[%s10218_s0 + $0x7d] sm:$0x1] }
  0x3a   :  { %10806 = vst [vmem:[#allocation92_spill] sm:$0xff] %v5786_v55  ;;  %10807 = vst [vmem:[#allocation93_spill] sm:$0xff] %v5795_v61  ;;  %v5805_v32 = vld [vmem:[%s10218_s0 + $0x7e] sm:$0x1]  ;;  %v5810_v63 = vld [vmem:[%s10218_s0 + $0x7f] sm:$0x1] }
  0x3b   :  { %10808 = vst [vmem:[#allocation94_spill] sm:$0xff] %v5800_v60  ;;  %10809 = vst [vmem:[#allocation95_spill] sm:$0xff] %v5805_v32  ;;  %v5819_v50 = vld [vmem:[%s10218_s0 + $0x80] sm:$0x1]  ;;  %v5824_v51 = vld [vmem:[%s10218_s0 + $0x81] sm:$0x1] }
  0x3c   :  { %10810 = vst [vmem:[#allocation96_spill] sm:$0xff] %v5810_v63  ;;  %10811 = vst [vmem:[#allocation97_spill] sm:$0xff] %v5819_v50  ;;  %v5829_v24 = vld [vmem:[%s10218_s0 + $0x82] sm:$0x1]  ;;  %v5834_v57 = vld [vmem:[%s10218_s0 + $0x83] sm:$0x1] }
  0x3d   :  { %10812 = vst [vmem:[#allocation98_spill] sm:$0xff] %v5824_v51  ;;  %10813 = vst [vmem:[#allocation99_spill] sm:$0xff] %v5829_v24  ;;  %v5843_v42 = vld [vmem:[%s10218_s0 + $0x84] sm:$0x1]  ;;  %v5848_v43 = vld [vmem:[%s10218_s0 + $0x85] sm:$0x1] }
  0x3e   :  { %10814 = vst [vmem:[#allocation100_spill] sm:$0xff] %v5834_v57  ;;  %10815 = vst [vmem:[#allocation101_spill] sm:$0xff] %v5843_v42  ;;  %v5853_v54 = vld [vmem:[%s10218_s0 + $0x86] sm:$0x1]  ;;  %v5858_v49 = vld [vmem:[%s10218_s0 + $0x87] sm:$0x1] }
  0x3f   :  { %10816 = vst [vmem:[#allocation102_spill] sm:$0xff] %v5848_v43  ;;  %10817 = vst [vmem:[#allocation103_spill] sm:$0xff] %v5853_v54  ;;  %v5867_v34 = vld [vmem:[%s10218_s0 + $0x88] sm:$0x1]  ;;  %v5872_v35 = vld [vmem:[%s10218_s0 + $0x89] sm:$0x1] }
  0x40   :  { %10818 = vst [vmem:[#allocation104_spill] sm:$0xff] %v5858_v49  ;;  %10819 = vst [vmem:[#allocation105_spill] sm:$0xff] %v5867_v34  ;;  %v5877_v62 = vld [vmem:[%s10218_s0 + $0x8a] sm:$0x1]  ;;  %v5882_v41 = vld [vmem:[%s10218_s0 + $0x8b] sm:$0x1] }
  0x41   :  { %10820 = vst [vmem:[#allocation106_spill] sm:$0xff] %v5872_v35  ;;  %10821 = vst [vmem:[#allocation107_spill] sm:$0xff] %v5877_v62  ;;  %v5891_v26 = vld [vmem:[%s10218_s0 + $0x8c] sm:$0x1]  ;;  %v5896_v27 = vld [vmem:[%s10218_s0 + $0x8d] sm:$0x1] }
  0x42   :  { %10822 = vst [vmem:[#allocation108_spill] sm:$0xff] %v5882_v41  ;;  %10823 = vst [vmem:[#allocation109_spill] sm:$0xff] %v5891_v26  ;;  %v5901_v59 = vld [vmem:[%s10218_s0 + $0x8e] sm:$0x1]  ;;  %v5906_v33 = vld [vmem:[%s10218_s0 + $0x8f] sm:$0x1] }
  0x43   :  { %10824 = vst [vmem:[#allocation110_spill] sm:$0xff] %v5896_v27  ;;  %10825 = vst [vmem:[#allocation111_spill] sm:$0xff] %v5901_v59  ;;  %v5915_v46 = vld [vmem:[%s10218_s0 + $0x90] sm:$0x1]  ;;  %v5920_v47 = vld [vmem:[%s10218_s0 + $0x91] sm:$0x1] }
  0x44   :  { %10826 = vst [vmem:[#allocation112_spill] sm:$0xff] %v5906_v33  ;;  %10827 = vst [vmem:[#allocation113_spill] sm:$0xff] %v5915_v46  ;;  %v5925_v56 = vld [vmem:[%s10218_s0 + $0x92] sm:$0x1]  ;;  %v5930_v25 = vld [vmem:[%s10218_s0 + $0x93] sm:$0x1] }
  0x45   :  { %10828 = vst [vmem:[#allocation114_spill] sm:$0xff] %v5920_v47  ;;  %10829 = vst [vmem:[#allocation115_spill] sm:$0xff] %v5925_v56  ;;  %v5939_v52 = vld [vmem:[%s10218_s0 + $0x94] sm:$0x1]  ;;  %v5944_v53 = vld [vmem:[%s10218_s0 + $0x95] sm:$0x1] }
  0x46   :  { %10830 = vst [vmem:[#allocation116_spill] sm:$0xff] %v5930_v25  ;;  %10831 = vst [vmem:[#allocation117_spill] sm:$0xff] %v5939_v52  ;;  %v5949_v48 = vld [vmem:[%s10218_s0 + $0x96] sm:$0x1]  ;;  %v5954_v55 = vld [vmem:[%s10218_s0 + $0x97] sm:$0x1] }
  0x47   :  { %10832 = vst [vmem:[#allocation118_spill] sm:$0xff] %v5944_v53  ;;  %10833 = vst [vmem:[#allocation119_spill] sm:$0xff] %v5949_v48  ;;  %v5963_v60 = vld [vmem:[%s10218_s0 + $0x98] sm:$0x1]  ;;  %v5968_v61 = vld [vmem:[%s10218_s0 + $0x99] sm:$0x1] }
  0x48   :  { %10834 = vst [vmem:[#allocation120_spill] sm:$0xff] %v5954_v55  ;;  %10835 = vst [vmem:[#allocation121_spill] sm:$0xff] %v5963_v60  ;;  %v5973_v40 = vld [vmem:[%s10218_s0 + $0x9a] sm:$0x1]  ;;  %v5978_v63 = vld [vmem:[%s10218_s0 + $0x9b] sm:$0x1] }
  0x49   :  { %10836 = vst [vmem:[#allocation122_spill] sm:$0xff] %v5968_v61  ;;  %10837 = vst [vmem:[#allocation123_spill] sm:$0xff] %v5973_v40  ;;  %v5987_v51 = vld [vmem:[%s10218_s0 + $0x9c] sm:$0x1]  ;;  %v5992_v50 = vld [vmem:[%s10218_s0 + $0x9d] sm:$0x1] }
  0x4a   :  { %10838 = vst [vmem:[#allocation124_spill] sm:$0xff] %v5978_v63  ;;  %10839 = vst [vmem:[#allocation125_spill] sm:$0xff] %v5987_v51  ;;  %v5997_v32 = vld [vmem:[%s10218_s0 + $0x9e] sm:$0x1]  ;;  %v6002_v57 = vld [vmem:[%s10218_s0 + $0x9f] sm:$0x1] }
  0x4b   :  { %10840 = vst [vmem:[#allocation126_spill] sm:$0xff] %v5992_v50  ;;  %10841 = vst [vmem:[#allocation127_spill] sm:$0xff] %v5997_v32  ;;  %v6011_v43 = vld [vmem:[%s10218_s0 + $0xa0] sm:$0x1]  ;;  %v6016_v42 = vld [vmem:[%s10218_s0 + $0xa1] sm:$0x1] }
  0x4c   :  { %10842 = vst [vmem:[#allocation128_spill] sm:$0xff] %v6002_v57  ;;  %10843 = vst [vmem:[#allocation129_spill] sm:$0xff] %v6011_v43  ;;  %v6021_v24 = vld [vmem:[%s10218_s0 + $0xa2] sm:$0x1]  ;;  %v6026_v49 = vld [vmem:[%s10218_s0 + $0xa3] sm:$0x1] }
  0x4d   :  { %10844 = vst [vmem:[#allocation130_spill] sm:$0xff] %v6016_v42  ;;  %10845 = vst [vmem:[#allocation131_spill] sm:$0xff] %v6021_v24  ;;  %v6035_v35 = vld [vmem:[%s10218_s0 + $0xa4] sm:$0x1]  ;;  %v6040_v34 = vld [vmem:[%s10218_s0 + $0xa5] sm:$0x1] }
  0x4e   :  { %10846 = vst [vmem:[#allocation132_spill] sm:$0xff] %v6026_v49  ;;  %10847 = vst [vmem:[#allocation133_spill] sm:$0xff] %v6035_v35  ;;  %v6045_v54 = vld [vmem:[%s10218_s0 + $0xa6] sm:$0x1]  ;;  %v6050_v41 = vld [vmem:[%s10218_s0 + $0xa7] sm:$0x1] }
  0x4f   :  { %10848 = vst [vmem:[#allocation134_spill] sm:$0xff] %v6040_v34  ;;  %10849 = vst [vmem:[#allocation135_spill] sm:$0xff] %v6045_v54  ;;  %v6059_v27 = vld [vmem:[%s10218_s0 + $0xa8] sm:$0x1]  ;;  %v6064_v26 = vld [vmem:[%s10218_s0 + $0xa9] sm:$0x1] }
  0x50   :  { %10850 = vst [vmem:[#allocation136_spill] sm:$0xff] %v6050_v41  ;;  %10851 = vst [vmem:[#allocation137_spill] sm:$0xff] %v6059_v27  ;;  %v6069_v62 = vld [vmem:[%s10218_s0 + $0xaa] sm:$0x1]  ;;  %v6074_v33 = vld [vmem:[%s10218_s0 + $0xab] sm:$0x1] }
  0x51   :  { %10852 = vst [vmem:[#allocation138_spill] sm:$0xff] %v6064_v26  ;;  %10853 = vst [vmem:[#allocation139_spill] sm:$0xff] %v6069_v62  ;;  %v6083_v47 = vld [vmem:[%s10218_s0 + $0xac] sm:$0x1]  ;;  %v6088_v46 = vld [vmem:[%s10218_s0 + $0xad] sm:$0x1] }
  0x52   :  { %10854 = vst [vmem:[#allocation140_spill] sm:$0xff] %v6074_v33  ;;  %10855 = vst [vmem:[#allocation141_spill] sm:$0xff] %v6083_v47  ;;  %v6093_v59 = vld [vmem:[%s10218_s0 + $0xae] sm:$0x1]  ;;  %v6098_v25 = vld [vmem:[%s10218_s0 + $0xaf] sm:$0x1] }
  0x53   :  { %10856 = vst [vmem:[#allocation142_spill] sm:$0xff] %v6088_v46  ;;  %10857 = vst [vmem:[#allocation143_spill] sm:$0xff] %v6093_v59  ;;  %v6107_v53 = vld [vmem:[%s10218_s0 + $0xb0] sm:$0x1]  ;;  %v6112_v52 = vld [vmem:[%s10218_s0 + $0xb1] sm:$0x1] }
  0x54   :  { %10858 = vst [vmem:[#allocation144_spill] sm:$0xff] %v6098_v25  ;;  %10859 = vst [vmem:[#allocation145_spill] sm:$0xff] %v6107_v53  ;;  %v6117_v56 = vld [vmem:[%s10218_s0 + $0xb2] sm:$0x1]  ;;  %v6122_v55 = vld [vmem:[%s10218_s0 + $0xb3] sm:$0x1] }
  0x55   :  { %10860 = vst [vmem:[#allocation146_spill] sm:$0xff] %v6112_v52  ;;  %10861 = vst [vmem:[#allocation147_spill] sm:$0xff] %v6117_v56  ;;  %v6131_v61 = vld [vmem:[%s10218_s0 + $0xb4] sm:$0x1]  ;;  %v6136_v60 = vld [vmem:[%s10218_s0 + $0xb5] sm:$0x1] }
  0x56   :  { %10862 = vst [vmem:[#allocation148_spill] sm:$0xff] %v6122_v55  ;;  %10863 = vst [vmem:[#allocation149_spill] sm:$0xff] %v6131_v61  ;;  %v6141_v48 = vld [vmem:[%s10218_s0 + $0xb6] sm:$0x1]  ;;  %v6146_v63 = vld [vmem:[%s10218_s0 + $0xb7] sm:$0x1] }
  0x57   :  { %10864 = vst [vmem:[#allocation150_spill] sm:$0xff] %v6136_v60  ;;  %10865 = vst [vmem:[#allocation151_spill] sm:$0xff] %v6141_v48  ;;  %v6155_v50 = vld [vmem:[%s10218_s0 + $0xb8] sm:$0x1]  ;;  %v6160_v51 = vld [vmem:[%s10218_s0 + $0xb9] sm:$0x1] }
  0x58   :  { %10866 = vst [vmem:[#allocation152_spill] sm:$0xff] %v6146_v63  ;;  %10867 = vst [vmem:[#allocation153_spill] sm:$0xff] %v6155_v50  ;;  %v6165_v40 = vld [vmem:[%s10218_s0 + $0xba] sm:$0x1]  ;;  %v6170_v57 = vld [vmem:[%s10218_s0 + $0xbb] sm:$0x1] }
  0x59   :  { %10868 = vst [vmem:[#allocation154_spill] sm:$0xff] %v6160_v51  ;;  %10869 = vst [vmem:[#allocation155_spill] sm:$0xff] %v6165_v40  ;;  %v6179_v42 = vld [vmem:[%s10218_s0 + $0xbc] sm:$0x1]  ;;  %v6184_v43 = vld [vmem:[%s10218_s0 + $0xbd] sm:$0x1] }
  0x5a   :  { %10870 = vst [vmem:[#allocation156_spill] sm:$0xff] %v6170_v57  ;;  %10871 = vst [vmem:[#allocation157_spill] sm:$0xff] %v6179_v42  ;;  %v6189_v32 = vld [vmem:[%s10218_s0 + $0xbe] sm:$0x1]  ;;  %v6194_v49 = vld [vmem:[%s10218_s0 + $0xbf] sm:$0x1] }
  0x5b   :  { %10872 = vst [vmem:[#allocation158_spill] sm:$0xff] %v6184_v43  ;;  %10873 = vst [vmem:[#allocation159_spill] sm:$0xff] %v6189_v32  ;;  %v6203_v34 = vld [vmem:[%s10218_s0 + $0xc0] sm:$0x1]  ;;  %v6208_v35 = vld [vmem:[%s10218_s0 + $0xc1] sm:$0x1] }
  0x5c   :  { %10874 = vst [vmem:[#allocation160_spill] sm:$0xff] %v6194_v49  ;;  %10875 = vst [vmem:[#allocation161_spill] sm:$0xff] %v6203_v34  ;;  %v6213_v24 = vld [vmem:[%s10218_s0 + $0xc2] sm:$0x1]  ;;  %v6218_v41 = vld [vmem:[%s10218_s0 + $0xc3] sm:$0x1] }
  0x5d   :  { %10876 = vst [vmem:[#allocation162_spill] sm:$0xff] %v6208_v35  ;;  %10877 = vst [vmem:[#allocation163_spill] sm:$0xff] %v6213_v24  ;;  %v6227_v26 = vld [vmem:[%s10218_s0 + $0xc4] sm:$0x1]  ;;  %v6232_v27 = vld [vmem:[%s10218_s0 + $0xc5] sm:$0x1] }
  0x5e   :  { %10878 = vst [vmem:[#allocation164_spill] sm:$0xff] %v6218_v41  ;;  %10879 = vst [vmem:[#allocation165_spill] sm:$0xff] %v6227_v26  ;;  %v6237_v54 = vld [vmem:[%s10218_s0 + $0xc6] sm:$0x1]  ;;  %v6242_v33 = vld [vmem:[%s10218_s0 + $0xc7] sm:$0x1] }
  0x5f   :  { %10880 = vst [vmem:[#allocation166_spill] sm:$0xff] %v6232_v27  ;;  %10881 = vst [vmem:[#allocation167_spill] sm:$0xff] %v6237_v54  ;;  %v6251_v46 = vld [vmem:[%s10218_s0 + $0xc8] sm:$0x1]  ;;  %v6256_v47 = vld [vmem:[%s10218_s0 + $0xc9] sm:$0x1] }
  0x60   :  { %10882 = vst [vmem:[#allocation168_spill] sm:$0xff] %v6242_v33  ;;  %10883 = vst [vmem:[#allocation169_spill] sm:$0xff] %v6251_v46  ;;  %v6261_v62 = vld [vmem:[%s10218_s0 + $0xca] sm:$0x1]  ;;  %v6266_v25 = vld [vmem:[%s10218_s0 + $0xcb] sm:$0x1] }
  0x61   :  { %10884 = vst [vmem:[#allocation170_spill] sm:$0xff] %v6256_v47  ;;  %10885 = vst [vmem:[#allocation171_spill] sm:$0xff] %v6261_v62  ;;  %v6275_v52 = vld [vmem:[%s10218_s0 + $0xcc] sm:$0x1]  ;;  %v6280_v53 = vld [vmem:[%s10218_s0 + $0xcd] sm:$0x1] }
  0x62   :  { %10886 = vst [vmem:[#allocation172_spill] sm:$0xff] %v6266_v25  ;;  %10887 = vst [vmem:[#allocation173_spill] sm:$0xff] %v6275_v52  ;;  %v6285_v59 = vld [vmem:[%s10218_s0 + $0xce] sm:$0x1]  ;;  %v6290_v55 = vld [vmem:[%s10218_s0 + $0xcf] sm:$0x1] }
  0x63   :  { %10888 = vst [vmem:[#allocation174_spill] sm:$0xff] %v6280_v53  ;;  %10889 = vst [vmem:[#allocation175_spill] sm:$0xff] %v6285_v59  ;;  %v6299_v60 = vld [vmem:[%s10218_s0 + $0xd0] sm:$0x1]  ;;  %v6304_v61 = vld [vmem:[%s10218_s0 + $0xd1] sm:$0x1] }
  0x64   :  { %10890 = vst [vmem:[#allocation176_spill] sm:$0xff] %v6290_v55  ;;  %10891 = vst [vmem:[#allocation177_spill] sm:$0xff] %v6299_v60  ;;  %v6309_v56 = vld [vmem:[%s10218_s0 + $0xd2] sm:$0x1]  ;;  %v6314_v63 = vld [vmem:[%s10218_s0 + $0xd3] sm:$0x1] }
  0x65   :  { %10892 = vst [vmem:[#allocation178_spill] sm:$0xff] %v6304_v61  ;;  %10893 = vst [vmem:[#allocation179_spill] sm:$0xff] %v6309_v56  ;;  %v6323_v51 = vld [vmem:[%s10218_s0 + $0xd4] sm:$0x1]  ;;  %v6328_v50 = vld [vmem:[%s10218_s0 + $0xd5] sm:$0x1] }
  0x66   :  { %10894 = vst [vmem:[#allocation180_spill] sm:$0xff] %v6314_v63  ;;  %10895 = vst [vmem:[#allocation181_spill] sm:$0xff] %v6323_v51  ;;  %v6333_v48 = vld [vmem:[%s10218_s0 + $0xd6] sm:$0x1]  ;;  %v6338_v57 = vld [vmem:[%s10218_s0 + $0xd7] sm:$0x1] }
  0x67   :  { %10896 = vst [vmem:[#allocation182_spill] sm:$0xff] %v6328_v50  ;;  %10897 = vst [vmem:[#allocation183_spill] sm:$0xff] %v6333_v48  ;;  %v6347_v43 = vld [vmem:[%s10218_s0 + $0xd8] sm:$0x1]  ;;  %v6352_v42 = vld [vmem:[%s10218_s0 + $0xd9] sm:$0x1] }
  0x68   :  { %10898 = vst [vmem:[#allocation184_spill] sm:$0xff] %v6338_v57  ;;  %10899 = vst [vmem:[#allocation185_spill] sm:$0xff] %v6347_v43  ;;  %v6357_v40 = vld [vmem:[%s10218_s0 + $0xda] sm:$0x1]  ;;  %v6362_v49 = vld [vmem:[%s10218_s0 + $0xdb] sm:$0x1] }
  0x69   :  { %10900 = vst [vmem:[#allocation186_spill] sm:$0xff] %v6352_v42  ;;  %10901 = vst [vmem:[#allocation187_spill] sm:$0xff] %v6357_v40  ;;  %v6371_v35 = vld [vmem:[%s10218_s0 + $0xdc] sm:$0x1]  ;;  %v6376_v34 = vld [vmem:[%s10218_s0 + $0xdd] sm:$0x1] }
  0x6a   :  { %10902 = vst [vmem:[#allocation188_spill] sm:$0xff] %v6362_v49  ;;  %10903 = vst [vmem:[#allocation189_spill] sm:$0xff] %v6371_v35  ;;  %v6381_v32 = vld [vmem:[%s10218_s0 + $0xde] sm:$0x1]  ;;  %v6386_v41 = vld [vmem:[%s10218_s0 + $0xdf] sm:$0x1] }
  0x6b   :  { %10904 = vst [vmem:[#allocation190_spill] sm:$0xff] %v6376_v34  ;;  %10905 = vst [vmem:[#allocation191_spill] sm:$0xff] %v6381_v32  ;;  %v6395_v27 = vld [vmem:[%s10218_s0 + $0xe0] sm:$0x1]  ;;  %v6400_v26 = vld [vmem:[%s10218_s0 + $0xe1] sm:$0x1] }
  0x6c   :  { %10906 = vst [vmem:[#allocation192_spill] sm:$0xff] %v6386_v41  ;;  %10907 = vst [vmem:[#allocation193_spill] sm:$0xff] %v6395_v27  ;;  %v6405_v24 = vld [vmem:[%s10218_s0 + $0xe2] sm:$0x1]  ;;  %v6410_v33 = vld [vmem:[%s10218_s0 + $0xe3] sm:$0x1] }
  0x6d   :  { %10908 = vst [vmem:[#allocation194_spill] sm:$0xff] %v6400_v26  ;;  %10909 = vst [vmem:[#allocation195_spill] sm:$0xff] %v6405_v24  ;;  %v6419_v47 = vld [vmem:[%s10218_s0 + $0xe4] sm:$0x1]  ;;  %v6424_v46 = vld [vmem:[%s10218_s0 + $0xe5] sm:$0x1] }
  0x6e   :  { %10910 = vst [vmem:[#allocation196_spill] sm:$0xff] %v6410_v33  ;;  %10911 = vst [vmem:[#allocation197_spill] sm:$0xff] %v6419_v47  ;;  %v6429_v54 = vld [vmem:[%s10218_s0 + $0xe6] sm:$0x1]  ;;  %v6434_v25 = vld [vmem:[%s10218_s0 + $0xe7] sm:$0x1] }
  0x6f   :  { %10912 = vst [vmem:[#allocation198_spill] sm:$0xff] %v6424_v46  ;;  %10913 = vst [vmem:[#allocation199_spill] sm:$0xff] %v6429_v54  ;;  %v6443_v53 = vld [vmem:[%s10218_s0 + $0xe8] sm:$0x1]  ;;  %v6448_v52 = vld [vmem:[%s10218_s0 + $0xe9] sm:$0x1] }
  0x70   :  { %10914 = vst [vmem:[#allocation200_spill] sm:$0xff] %v6434_v25  ;;  %v6453_v62 = vld [vmem:[%s10218_s0 + $0xea] sm:$0x1]  ;;  %v6458_v55 = vld [vmem:[%s10218_s0 + $0xeb] sm:$0x1]  ;;  %v10919_v45 = vshrl.u32 %v5076_v1, 16  ;;  %vm7902_vm2 = vmand %vm2057_vm0, %vm2058_vm1 }
  0x71   :  { %10915 = vst [vmem:[#allocation201_spill] sm:$0xff] %v6458_v55  ;;  %v6467_v61 = vld [vmem:[%s10218_s0 + $0xec] sm:$0x1]  ;;  %v6472_v60 = vld [vmem:[%s10218_s0 + $0xed] sm:$0x1]  ;;  %v10920_v25 = vshrl.u32 %v5081_v2, 16 }
  0x72   :  { %v6477_v59 = vld [vmem:[%s10218_s0 + $0xee] sm:$0x1]  ;;  %v6482_v63 = vld [vmem:[%s10218_s0 + $0xef] sm:$0x1]  ;;  %v6491_v50 = vld [vmem:[%s10218_s0 + $0xf0] sm:$0x1] }
  0x73   :  { %10916 = vst [vmem:[#allocation202_spill] sm:$0xff] %v6477_v59  ;;  %10917 = vst [vmem:[#allocation203_spill] sm:$0xff] %v6482_v63  ;;  %v6496_v51 = vld [vmem:[%s10218_s0 + $0xf1] sm:$0x1]  ;;  %v6501_v56 = vld [vmem:[%s10218_s0 + $0xf2] sm:$0x1] }
  0x74   :  { %v6506_v57 = vld [vmem:[%s10218_s0 + $0xf3] sm:$0x1]  ;;  %v6515_v42 = vld [vmem:[%s10218_s0 + $0xf4] sm:$0x1]  ;;  %v6520_v43 = vld [vmem:[%s10218_s0 + $0xf5] sm:$0x1] }
  0x75   :  { %v6525_v48 = vld [vmem:[%s10218_s0 + $0xf6] sm:$0x1]  ;;  %v6530_v49 = vld [vmem:[%s10218_s0 + $0xf7] sm:$0x1]  ;;  %v6539_v34 = vld [vmem:[%s10218_s0 + $0xf8] sm:$0x1] }
  0x76   :  { %v6544_v35 = vld [vmem:[%s10218_s0 + $0xf9] sm:$0x1]  ;;  %v6549_v40 = vld [vmem:[%s10218_s0 + $0xfa] sm:$0x1]  ;;  %v6554_v41 = vld [vmem:[%s10218_s0 + $0xfb] sm:$0x1] }
  0x77   :  { %v6563_v26 = vld [vmem:[%s10218_s0 + $0xfc] sm:$0x1]  ;;  %v6568_v27 = vld [vmem:[%s10218_s0 + $0xfd] sm:$0x1]  ;;  %v6577_v24 = vld [vmem:[%s10218_s0 + $0xfe] sm:$0x1] }
  0x78   :  { %v6586_v32 = vld [vmem:[%s10218_s0 + $0xff] sm:$0x1]  ;;  %v5033_v47 = vld [vmem:[%s10218_s0] sm:$0x1]  ;;  %v10918_v63 = vshrl.u32 %v5071_v0, 16  ;;  %vm4499_vm5 = vcmask 1043459  }
  0x79   :  { %v5034_v58 = vld [vmem:[%s10218_s0 + $0x1] sm:$0x1]  ;;  %v5035_v54 = vld [vmem:[%s10218_s0 + $0x2] sm:$0x1]  ;;  %v5036_v0 = vld [vmem:[%s10218_s0 + $0x3] sm:$0x1] }
  0x7a   :  { %v6609_v46 = vmax.bf16 %v5033_v47, %v10918_v63  ;;  %v6616_v33 = vmax.bf16 %v5034_v58, %v10919_v45  ;;  %v6623_v55 = vmax.bf16 %v5035_v54, %v10920_v25  ;;  %v10921_v47 = vshrl.u32 %v5086_v3, 16  ;;  %v5037_v1 = vld [vmem:[%s10218_s0 + $0x4] sm:$0x1]  ;;  %v5038_v2 = vld [vmem:[%s10218_s0 + $0x5] sm:$0x1] }
  0x7b   :  { %v10922_v45 = vshrl.u32 %v5091_v4, 16  ;;  %v10923_v25 = vshrl.u32 %v5096_v5, 16  ;;  %v5039_v3 = vld [vmem:[%s10218_s0 + $0x6] sm:$0x1]  ;;  %v5040_v4 = vld [vmem:[%s10218_s0 + $0x7] sm:$0x1] }
  0x7c   :  { %v6630_v63 = vmax.bf16 %v5036_v0, %v10921_v47  ;;  %v10924_v0 = vshrl.u32 %v5101_v6, 16  ;;  %v5041_v5 = vld [vmem:[%s10218_s0 + $0x8] sm:$0x1]  ;;  %v5042_v6 = vld [vmem:[%s10218_s0 + $0x9] sm:$0x1]  ;;  %vm4502_vm6 = vcmask 1044484  }
  0x7d   :  { %v6637_v58 = vmax.bf16 %v5037_v1, %v10922_v45  ;;  %v6644_v54 = vmax.bf16 %v5038_v2, %v10923_v25  ;;  %v10925_v1 = vshrl.u32 %v5106_v7, 16  ;;  %v10926_v2 = vshrl.u32 %v5111_v8, 16  ;;  %v5043_v7 = vld [vmem:[%s10218_s0 + $0xa] sm:$0x1]  ;;  %v5044_v8 = vld [vmem:[%s10218_s0 + $0xb] sm:$0x1] }
  0x7e   :  { %v6651_v47 = vmax.bf16 %v5039_v3, %v10924_v0  ;;  %v10927_v3 = vshrl.u32 %v5116_v9, 16  ;;  %v5045_v9 = vld [vmem:[%s10218_s0 + $0xc] sm:$0x1]  ;;  %vm4505_vm7 = vcmask 1045509   ;;  %vm4508_vm8 = vcmask 1046534  }
  0x7f   :  { %v6658_v45 = vmax.bf16 %v5040_v4, %v10925_v1  ;;  %v6665_v25 = vmax.bf16 %v5041_v5, %v10926_v2  ;;  %v10928_v4 = vshrl.u32 %v5121_v10, 16  ;;  %v10929_v5 = vshrl.u32 %v5126_v11, 16  ;;  %v5046_v10 = vld [vmem:[%s10218_s0 + $0xd] sm:$0x1]  ;;  %v5047_v11 = vld [vmem:[%s10218_s0 + $0xe] sm:$0x1] }
  0x80   :  { %v6672_v0 = vmax.bf16 %v5042_v6, %v10927_v3  ;;  %v10930_v6 = vshrl.u32 %v5131_v12, 16  ;;  %v5048_v12 = vld [vmem:[%s10218_s0 + $0xf] sm:$0x1]  ;;  %vm4511_vm9 = vcmask 1047559   ;;  %vm4755_vm10 = vcmask 125952  }
  0x81   :  { %v6679_v1 = vmax.bf16 %v5043_v7, %v10928_v4  ;;  %v6686_v2 = vmax.bf16 %v5044_v8, %v10929_v5  ;;  %v10931_v7 = vshrl.u32 %v5136_v13, 16  ;;  %v10932_v8 = vshrl.u32 %v5141_v14, 16  ;;  %v5049_v13 = vld [vmem:[%s10218_s0 + $0x10] sm:$0x1]  ;;  %v5050_v14 = vld [vmem:[%s10218_s0 + $0x11] sm:$0x1] }
  0x82   :  { %v6693_v3 = vmax.bf16 %v5045_v9, %v10930_v6  ;;  %v10933_v9 = vshrl.u32 %v5146_v15, 16  ;;  %v5051_v15 = vld [vmem:[%s10218_s0 + $0x12] sm:$0x1] }
  0x83   :  { %v6700_v4 = vmax.bf16 %v5046_v10, %v10931_v7  ;;  %v6707_v5 = vmax.bf16 %v5047_v11, %v10932_v8  ;;  %v10934_v10 = vshrl.u32 %v5151_v16, 16  ;;  %v10935_v11 = vshrl.u32 %v5156_v17, 16  ;;  %v5052_v16 = vld [vmem:[%s10218_s0 + $0x13] sm:$0x1]  ;;  %v5053_v17 = vld [vmem:[%s10218_s0 + $0x14] sm:$0x1] }
  0x84   :  { %v6714_v6 = vmax.bf16 %v5048_v12, %v10933_v9  ;;  %v10936_v12 = vshrl.u32 %v5161_v18, 16  ;;  %v5054_v18 = vld [vmem:[%s10218_s0 + $0x15] sm:$0x1] }
  0x85   :  { %v6721_v7 = vmax.bf16 %v5049_v13, %v10934_v10  ;;  %v6728_v8 = vmax.bf16 %v5050_v14, %v10935_v11  ;;  %v10937_v13 = vshrl.u32 %v5166_v19, 16  ;;  %v10938_v14 = vshrl.u32 %v5171_v20, 16  ;;  %v5055_v19 = vld [vmem:[%s10218_s0 + $0x16] sm:$0x1]  ;;  %v5056_v20 = vld [vmem:[%s10218_s0 + $0x17] sm:$0x1] }
  0x86   :  { %v6735_v9 = vmax.bf16 %v5051_v15, %v10936_v12  ;;  %v10939_v15 = vshrl.u32 %v5176_v21, 16  ;;  %v10943_v21 = vshrl.u32 %v5195_v28, 16 }
  0x87   :  { %v6742_v10 = vmax.bf16 %v5052_v16, %v10937_v13  ;;  %v6749_v11 = vmax.bf16 %v5053_v17, %v10938_v14  ;;  %v10940_v16 = vshrl.u32 %v5181_v22, 16  ;;  %v10941_v17 = vshrl.u32 %v5186_v23, 16 }
  0x88   :  { %v6756_v12 = vmax.bf16 %v5054_v18, %v10939_v15  ;;  %v6775_v18 = vmax.bf16 %v10943_v21, %v5195_v28  ;;  %v10944_v15 = vshrl.u32 %v5200_v29, 16  ;;  %v10945_v22 = vshrl.u32 %v5205_v30, 16 }
  0x89   :  { %v6763_v13 = vmax.bf16 %v5055_v19, %v10940_v16  ;;  %v6770_v14 = vmax.bf16 %v5056_v20, %v10941_v17  ;;  %v10946_v23 = vshrl.u32 %v5210_v31, 16  ;;  %v10947_v20 = vshrl.u32 %v5219_v36, 16 }
  0x8a   :  { %v6780_v59 = vmax.bf16 %v10944_v15, %v5200_v29  ;;  %v6785_v19 = vmax.bf16 %v10945_v22, %v5205_v30  ;;  %v10948_v17 = vshrl.u32 %v5224_v37, 16  ;;  %v10949_v21 = vshrl.u32 %v5229_v38, 16 }
  0x8b   :  { %10942 = vst [vmem:[#allocation204_spill] sm:$0xff] %v6770_v14  ;;  %v6790_v16 = vmax.bf16 %v10946_v23, %v5210_v31  ;;  %v6795_v28 = vmax.bf16 %v10947_v20, %v5219_v36  ;;  %v10951_v15 = vshrl.u32 %v5234_v39, 16  ;;  %v10953_v22 = vshrl.u32 %v5243_v44, 16  ;;  %v10955_v23 = vld [vmem:[#allocation2_spill] sm:$0xff] }
  0x8c   :  { %v6800_v29 = vmax.bf16 %v10948_v17, %v5224_v37  ;;  %v6805_v30 = vmax.bf16 %v10949_v21, %v5229_v38  ;;  %v10956_v20 = vshrl.u32 %v10955_v23, 16  ;;  %v10958_v17 = vld [vmem:[#allocation3_spill] sm:$0xff]  ;;  %v10961_v21 = vld [vmem:[#allocation4_spill] sm:$0xff] }
  0x8d   :  { %v6810_v31 = vmax.bf16 %v10951_v15, %v5234_v39  ;;  %v6815_v36 = vmax.bf16 %v10953_v22, %v5243_v44  ;;  %v10959_v14 = vshrl.u32 %v10958_v17, 16  ;;  %v10964_v15 = vld [vmem:[#allocation5_spill] sm:$0xff]  ;;  %v10967_v22 = vld [vmem:[#allocation6_spill] sm:$0xff] }
  0x8e   :  { %10950 = vst [vmem:[#allocation205_spill] sm:$0xff] %v6805_v30  ;;  %v6820_v37 = vmax.bf16 %v10956_v20, %v10955_v23  ;;  %v10962_v30 = vshrl.u32 %v10961_v21, 16  ;;  %v10970_v20 = vld [vmem:[#allocation7_spill] sm:$0xff] }
  0x8f   :  { %10952 = vst [vmem:[#allocation206_spill] sm:$0xff] %v6810_v31  ;;  %10954 = vst [vmem:[#allocation207_spill] sm:$0xff] %v6815_v36  ;;  %v6825_v38 = vmax.bf16 %v10959_v14, %v10958_v17  ;;  %v10965_v31 = vshrl.u32 %v10964_v15, 16  ;;  %v10968_v36 = vshrl.u32 %v10967_v22, 16  ;;  %v10973_v17 = vld [vmem:[#allocation8_spill] sm:$0xff] }
  0x90   :  { %10957 = vst [vmem:[#allocation2_spill] sm:$0xff] %v6820_v37  ;;  %v6830_v39 = vmax.bf16 %v10962_v30, %v10961_v21  ;;  %v10971_v37 = vshrl.u32 %v10970_v20, 16  ;;  %v10976_v21 = vld [vmem:[#allocation9_spill] sm:$0xff] }
  0x91   :  { %10960 = vst [vmem:[#allocation3_spill] sm:$0xff] %v6825_v38  ;;  %v6835_v44 = vmax.bf16 %v10965_v31, %v10964_v15  ;;  %v6840_v23 = vmax.bf16 %v10968_v36, %v10967_v22  ;;  %v10974_v38 = vshrl.u32 %v10973_v17, 16  ;;  %v10979_v15 = vld [vmem:[#allocation10_spill] sm:$0xff]  ;;  %v10982_v22 = vld [vmem:[#allocation11_spill] sm:$0xff] }
  0x92   :  { %10963 = vst [vmem:[#allocation4_spill] sm:$0xff] %v6830_v39  ;;  %v6845_v14 = vmax.bf16 %v10971_v37, %v10970_v20  ;;  %v10977_v39 = vshrl.u32 %v10976_v21, 16  ;;  %v10985_v20 = vld [vmem:[#allocation12_spill] sm:$0xff] }
  0x93   :  { %10966 = vst [vmem:[#allocation5_spill] sm:$0xff] %v6835_v44  ;;  %10969 = vst [vmem:[#allocation6_spill] sm:$0xff] %v6840_v23  ;;  %v6850_v30 = vmax.bf16 %v10974_v38, %v10973_v17  ;;  %v10980_v44 = vshrl.u32 %v10979_v15, 16  ;;  %v10983_v23 = vshrl.u32 %v10982_v22, 16  ;;  %v10988_v17 = vld [vmem:[#allocation13_spill] sm:$0xff] }
  0x94   :  { %10972 = vst [vmem:[#allocation7_spill] sm:$0xff] %v6845_v14  ;;  %v6855_v31 = vmax.bf16 %v10977_v39, %v10976_v21  ;;  %v10986_v14 = vshrl.u32 %v10985_v20, 16  ;;  %v10991_v21 = vld [vmem:[#allocation14_spill] sm:$0xff] }
  0x95   :  { %10975 = vst [vmem:[#allocation8_spill] sm:$0xff] %v6850_v30  ;;  %v6860_v36 = vmax.bf16 %v10980_v44, %v10979_v15  ;;  %v6865_v37 = vmax.bf16 %v10983_v23, %v10982_v22  ;;  %v10989_v30 = vshrl.u32 %v10988_v17, 16  ;;  %v10994_v15 = vld [vmem:[#allocation15_spill] sm:$0xff]  ;;  %v10997_v22 = vld [vmem:[#allocation16_spill] sm:$0xff] }
  0x96   :  { %10978 = vst [vmem:[#allocation9_spill] sm:$0xff] %v6855_v31  ;;  %v6870_v38 = vmax.bf16 %v10986_v14, %v10985_v20  ;;  %v10992_v31 = vshrl.u32 %v10991_v21, 16  ;;  %v11000_v20 = vld [vmem:[#allocation17_spill] sm:$0xff] }
  0x97   :  { %10981 = vst [vmem:[#allocation10_spill] sm:$0xff] %v6860_v36  ;;  %10984 = vst [vmem:[#allocation11_spill] sm:$0xff] %v6865_v37  ;;  %v6875_v39 = vmax.bf16 %v10989_v30, %v10988_v17  ;;  %v10995_v36 = vshrl.u32 %v10994_v15, 16  ;;  %v10998_v37 = vshrl.u32 %v10997_v22, 16  ;;  %v11003_v17 = vld [vmem:[#allocation18_spill] sm:$0xff] }
  0x98   :  { %10987 = vst [vmem:[#allocation12_spill] sm:$0xff] %v6870_v38  ;;  %v6880_v44 = vmax.bf16 %v10992_v31, %v10991_v21  ;;  %v11001_v38 = vshrl.u32 %v11000_v20, 16  ;;  %v11006_v21 = vld [vmem:[#allocation19_spill] sm:$0xff] }
  0x99   :  { %10990 = vst [vmem:[#allocation13_spill] sm:$0xff] %v6875_v39  ;;  %v6885_v23 = vmax.bf16 %v10995_v36, %v10994_v15  ;;  %v6890_v14 = vmax.bf16 %v10998_v37, %v10997_v22  ;;  %v11004_v39 = vshrl.u32 %v11003_v17, 16  ;;  %v11009_v15 = vld [vmem:[#allocation20_spill] sm:$0xff]  ;;  %v11012_v22 = vld [vmem:[#allocation21_spill] sm:$0xff] }
  0x9a   :  { %10993 = vst [vmem:[#allocation14_spill] sm:$0xff] %v6880_v44  ;;  %v6895_v30 = vmax.bf16 %v11001_v38, %v11000_v20  ;;  %v11007_v44 = vshrl.u32 %v11006_v21, 16  ;;  %v11015_v20 = vld [vmem:[#allocation22_spill] sm:$0xff] }
  0x9b   :  { %10996 = vst [vmem:[#allocation15_spill] sm:$0xff] %v6885_v23  ;;  %10999 = vst [vmem:[#allocation16_spill] sm:$0xff] %v6890_v14  ;;  %v6900_v31 = vmax.bf16 %v11004_v39, %v11003_v17  ;;  %v11010_v23 = vshrl.u32 %v11009_v15, 16  ;;  %v11013_v14 = vshrl.u32 %v11012_v22, 16  ;;  %v11018_v17 = vld [vmem:[#allocation23_spill] sm:$0xff] }
  0x9c   :  { %11002 = vst [vmem:[#allocation17_spill] sm:$0xff] %v6895_v30  ;;  %v6905_v36 = vmax.bf16 %v11007_v44, %v11006_v21  ;;  %v11016_v30 = vshrl.u32 %v11015_v20, 16  ;;  %v11021_v21 = vld [vmem:[#allocation24_spill] sm:$0xff] }
  0x9d   :  { %11005 = vst [vmem:[#allocation18_spill] sm:$0xff] %v6900_v31  ;;  %v6910_v37 = vmax.bf16 %v11010_v23, %v11009_v15  ;;  %v6915_v38 = vmax.bf16 %v11013_v14, %v11012_v22  ;;  %v11019_v31 = vshrl.u32 %v11018_v17, 16  ;;  %v11024_v15 = vld [vmem:[#allocation25_spill] sm:$0xff]  ;;  %v11027_v22 = vld [vmem:[#allocation26_spill] sm:$0xff] }
  0x9e   :  { %11008 = vst [vmem:[#allocation19_spill] sm:$0xff] %v6905_v36  ;;  %v6920_v39 = vmax.bf16 %v11016_v30, %v11015_v20  ;;  %v11022_v36 = vshrl.u32 %v11021_v21, 16  ;;  %v11030_v20 = vld [vmem:[#allocation27_spill] sm:$0xff] }
  0x9f   :  { %11011 = vst [vmem:[#allocation20_spill] sm:$0xff] %v6910_v37  ;;  %11014 = vst [vmem:[#allocation21_spill] sm:$0xff] %v6915_v38  ;;  %v6925_v44 = vmax.bf16 %v11019_v31, %v11018_v17  ;;  %v11025_v37 = vshrl.u32 %v11024_v15, 16  ;;  %v11028_v38 = vshrl.u32 %v11027_v22, 16  ;;  %v11033_v17 = vld [vmem:[#allocation28_spill] sm:$0xff] }
  0xa0   :  { %11017 = vst [vmem:[#allocation22_spill] sm:$0xff] %v6920_v39  ;;  %v6930_v23 = vmax.bf16 %v11022_v36, %v11021_v21  ;;  %v11031_v39 = vshrl.u32 %v11030_v20, 16  ;;  %v11036_v21 = vld [vmem:[#allocation29_spill] sm:$0xff] }
  0xa1   :  { %11020 = vst [vmem:[#allocation23_spill] sm:$0xff] %v6925_v44  ;;  %v6935_v14 = vmax.bf16 %v11025_v37, %v11024_v15  ;;  %v6940_v30 = vmax.bf16 %v11028_v38, %v11027_v22  ;;  %v11034_v44 = vshrl.u32 %v11033_v17, 16  ;;  %v11039_v15 = vld [vmem:[#allocation30_spill] sm:$0xff]  ;;  %v11042_v22 = vld [vmem:[#allocation31_spill] sm:$0xff] }
  0xa2   :  { %11023 = vst [vmem:[#allocation24_spill] sm:$0xff] %v6930_v23  ;;  %v6945_v31 = vmax.bf16 %v11031_v39, %v11030_v20  ;;  %v11037_v23 = vshrl.u32 %v11036_v21, 16  ;;  %v11045_v20 = vld [vmem:[#allocation32_spill] sm:$0xff] }
  0xa3   :  { %11026 = vst [vmem:[#allocation25_spill] sm:$0xff] %v6935_v14  ;;  %11029 = vst [vmem:[#allocation26_spill] sm:$0xff] %v6940_v30  ;;  %v6950_v36 = vmax.bf16 %v11034_v44, %v11033_v17  ;;  %v11040_v14 = vshrl.u32 %v11039_v15, 16  ;;  %v11043_v30 = vshrl.u32 %v11042_v22, 16  ;;  %v11048_v17 = vld [vmem:[#allocation33_spill] sm:$0xff] }
  0xa4   :  { %11032 = vst [vmem:[#allocation27_spill] sm:$0xff] %v6945_v31  ;;  %v6955_v37 = vmax.bf16 %v11037_v23, %v11036_v21  ;;  %v11046_v31 = vshrl.u32 %v11045_v20, 16  ;;  %v11051_v21 = vld [vmem:[#allocation34_spill] sm:$0xff] }
  0xa5   :  { %11035 = vst [vmem:[#allocation28_spill] sm:$0xff] %v6950_v36  ;;  %v6960_v38 = vmax.bf16 %v11040_v14, %v11039_v15  ;;  %v6965_v39 = vmax.bf16 %v11043_v30, %v11042_v22  ;;  %v11049_v36 = vshrl.u32 %v11048_v17, 16  ;;  %v11054_v15 = vld [vmem:[#allocation35_spill] sm:$0xff]  ;;  %v11057_v22 = vld [vmem:[#allocation36_spill] sm:$0xff] }
  0xa6   :  { %11038 = vst [vmem:[#allocation29_spill] sm:$0xff] %v6955_v37  ;;  %v6970_v44 = vmax.bf16 %v11046_v31, %v11045_v20  ;;  %v11052_v37 = vshrl.u32 %v11051_v21, 16  ;;  %v11060_v20 = vld [vmem:[#allocation37_spill] sm:$0xff] }
  0xa7   :  { %11041 = vst [vmem:[#allocation30_spill] sm:$0xff] %v6960_v38  ;;  %11044 = vst [vmem:[#allocation31_spill] sm:$0xff] %v6965_v39  ;;  %v6975_v23 = vmax.bf16 %v11049_v36, %v11048_v17  ;;  %v11055_v38 = vshrl.u32 %v11054_v15, 16  ;;  %v11058_v39 = vshrl.u32 %v11057_v22, 16  ;;  %v11063_v17 = vld [vmem:[#allocation38_spill] sm:$0xff] }
  0xa8   :  { %11047 = vst [vmem:[#allocation32_spill] sm:$0xff] %v6970_v44  ;;  %v6980_v14 = vmax.bf16 %v11052_v37, %v11051_v21  ;;  %v11061_v44 = vshrl.u32 %v11060_v20, 16  ;;  %v11066_v21 = vld [vmem:[#allocation39_spill] sm:$0xff] }
  0xa9   :  { %11050 = vst [vmem:[#allocation33_spill] sm:$0xff] %v6975_v23  ;;  %v6985_v30 = vmax.bf16 %v11055_v38, %v11054_v15  ;;  %v6990_v31 = vmax.bf16 %v11058_v39, %v11057_v22  ;;  %v11064_v23 = vshrl.u32 %v11063_v17, 16  ;;  %v11069_v15 = vld [vmem:[#allocation40_spill] sm:$0xff]  ;;  %v11072_v22 = vld [vmem:[#allocation41_spill] sm:$0xff] }
  0xaa   :  { %11053 = vst [vmem:[#allocation34_spill] sm:$0xff] %v6980_v14  ;;  %v6995_v36 = vmax.bf16 %v11061_v44, %v11060_v20  ;;  %v11067_v14 = vshrl.u32 %v11066_v21, 16  ;;  %v11075_v20 = vld [vmem:[#allocation42_spill] sm:$0xff] }
  0xab   :  { %11056 = vst [vmem:[#allocation35_spill] sm:$0xff] %v6985_v30  ;;  %11059 = vst [vmem:[#allocation36_spill] sm:$0xff] %v6990_v31  ;;  %v7000_v37 = vmax.bf16 %v11064_v23, %v11063_v17  ;;  %v11070_v30 = vshrl.u32 %v11069_v15, 16  ;;  %v11073_v31 = vshrl.u32 %v11072_v22, 16  ;;  %v11078_v17 = vld [vmem:[#allocation43_spill] sm:$0xff] }
  0xac   :  { %11062 = vst [vmem:[#allocation37_spill] sm:$0xff] %v6995_v36  ;;  %v7005_v38 = vmax.bf16 %v11067_v14, %v11066_v21  ;;  %v11076_v36 = vshrl.u32 %v11075_v20, 16  ;;  %v11081_v21 = vld [vmem:[#allocation44_spill] sm:$0xff] }
  0xad   :  { %11065 = vst [vmem:[#allocation38_spill] sm:$0xff] %v7000_v37  ;;  %v7010_v39 = vmax.bf16 %v11070_v30, %v11069_v15  ;;  %v7015_v44 = vmax.bf16 %v11073_v31, %v11072_v22  ;;  %v11079_v37 = vshrl.u32 %v11078_v17, 16  ;;  %v11084_v15 = vld [vmem:[#allocation45_spill] sm:$0xff]  ;;  %v11087_v22 = vld [vmem:[#allocation46_spill] sm:$0xff] }
  0xae   :  { %11068 = vst [vmem:[#allocation39_spill] sm:$0xff] %v7005_v38  ;;  %v7020_v23 = vmax.bf16 %v11076_v36, %v11075_v20  ;;  %v11082_v38 = vshrl.u32 %v11081_v21, 16  ;;  %v11090_v20 = vld [vmem:[#allocation47_spill] sm:$0xff] }
  0xaf   :  { %11071 = vst [vmem:[#allocation40_spill] sm:$0xff] %v7010_v39  ;;  %11074 = vst [vmem:[#allocation41_spill] sm:$0xff] %v7015_v44  ;;  %v7025_v14 = vmax.bf16 %v11079_v37, %v11078_v17  ;;  %v11085_v39 = vshrl.u32 %v11084_v15, 16  ;;  %v11088_v44 = vshrl.u32 %v11087_v22, 16  ;;  %v11093_v17 = vld [vmem:[#allocation48_spill] sm:$0xff] }
  0xb0   :  { %11077 = vst [vmem:[#allocation42_spill] sm:$0xff] %v7020_v23  ;;  %v7030_v30 = vmax.bf16 %v11082_v38, %v11081_v21  ;;  %v11091_v23 = vshrl.u32 %v11090_v20, 16  ;;  %v11096_v21 = vld [vmem:[#allocation49_spill] sm:$0xff] }
  0xb1   :  { %11080 = vst [vmem:[#allocation43_spill] sm:$0xff] %v7025_v14  ;;  %v7035_v31 = vmax.bf16 %v11085_v39, %v11084_v15  ;;  %v7040_v36 = vmax.bf16 %v11088_v44, %v11087_v22  ;;  %v11094_v14 = vshrl.u32 %v11093_v17, 16  ;;  %v11099_v15 = vld [vmem:[#allocation50_spill] sm:$0xff]  ;;  %v11102_v22 = vld [vmem:[#allocation51_spill] sm:$0xff] }
  0xb2   :  { %11083 = vst [vmem:[#allocation44_spill] sm:$0xff] %v7030_v30  ;;  %v7045_v37 = vmax.bf16 %v11091_v23, %v11090_v20  ;;  %v11097_v30 = vshrl.u32 %v11096_v21, 16  ;;  %v11105_v20 = vld [vmem:[#allocation52_spill] sm:$0xff] }
  0xb3   :  { %11086 = vst [vmem:[#allocation45_spill] sm:$0xff] %v7035_v31  ;;  %11089 = vst [vmem:[#allocation46_spill] sm:$0xff] %v7040_v36  ;;  %v7050_v38 = vmax.bf16 %v11094_v14, %v11093_v17  ;;  %v11100_v31 = vshrl.u32 %v11099_v15, 16  ;;  %v11103_v36 = vshrl.u32 %v11102_v22, 16  ;;  %v11108_v17 = vld [vmem:[#allocation53_spill] sm:$0xff] }
  0xb4   :  { %11092 = vst [vmem:[#allocation47_spill] sm:$0xff] %v7045_v37  ;;  %v7055_v39 = vmax.bf16 %v11097_v30, %v11096_v21  ;;  %v11106_v37 = vshrl.u32 %v11105_v20, 16  ;;  %v11111_v21 = vld [vmem:[#allocation54_spill] sm:$0xff] }
  0xb5   :  { %11095 = vst [vmem:[#allocation48_spill] sm:$0xff] %v7050_v38  ;;  %v7060_v44 = vmax.bf16 %v11100_v31, %v11099_v15  ;;  %v7065_v23 = vmax.bf16 %v11103_v36, %v11102_v22  ;;  %v11109_v38 = vshrl.u32 %v11108_v17, 16  ;;  %v11114_v15 = vld [vmem:[#allocation55_spill] sm:$0xff]  ;;  %v11117_v22 = vld [vmem:[#allocation56_spill] sm:$0xff] }
  0xb6   :  { %11098 = vst [vmem:[#allocation49_spill] sm:$0xff] %v7055_v39  ;;  %v7070_v14 = vmax.bf16 %v11106_v37, %v11105_v20  ;;  %v11112_v39 = vshrl.u32 %v11111_v21, 16  ;;  %v11120_v20 = vld [vmem:[#allocation57_spill] sm:$0xff] }
  0xb7   :  { %11101 = vst [vmem:[#allocation50_spill] sm:$0xff] %v7060_v44  ;;  %11104 = vst [vmem:[#allocation51_spill] sm:$0xff] %v7065_v23  ;;  %v7075_v30 = vmax.bf16 %v11109_v38, %v11108_v17  ;;  %v11115_v44 = vshrl.u32 %v11114_v15, 16  ;;  %v11118_v23 = vshrl.u32 %v11117_v22, 16  ;;  %v11123_v17 = vld [vmem:[#allocation58_spill] sm:$0xff] }
  0xb8   :  { %11107 = vst [vmem:[#allocation52_spill] sm:$0xff] %v7070_v14  ;;  %v7080_v31 = vmax.bf16 %v11112_v39, %v11111_v21  ;;  %v11121_v14 = vshrl.u32 %v11120_v20, 16  ;;  %v11126_v21 = vld [vmem:[#allocation59_spill] sm:$0xff] }
  0xb9   :  { %11110 = vst [vmem:[#allocation53_spill] sm:$0xff] %v7075_v30  ;;  %v7085_v36 = vmax.bf16 %v11115_v44, %v11114_v15  ;;  %v7090_v37 = vmax.bf16 %v11118_v23, %v11117_v22  ;;  %v11124_v30 = vshrl.u32 %v11123_v17, 16  ;;  %v11129_v15 = vld [vmem:[#allocation60_spill] sm:$0xff]  ;;  %v11132_v22 = vld [vmem:[#allocation61_spill] sm:$0xff] }
  0xba   :  { %11113 = vst [vmem:[#allocation54_spill] sm:$0xff] %v7080_v31  ;;  %v7095_v38 = vmax.bf16 %v11121_v14, %v11120_v20  ;;  %v11127_v31 = vshrl.u32 %v11126_v21, 16  ;;  %v11135_v20 = vld [vmem:[#allocation62_spill] sm:$0xff] }
  0xbb   :  { %11116 = vst [vmem:[#allocation55_spill] sm:$0xff] %v7085_v36  ;;  %11119 = vst [vmem:[#allocation56_spill] sm:$0xff] %v7090_v37  ;;  %v7100_v39 = vmax.bf16 %v11124_v30, %v11123_v17  ;;  %v11130_v36 = vshrl.u32 %v11129_v15, 16  ;;  %v11133_v37 = vshrl.u32 %v11132_v22, 16  ;;  %v11138_v17 = vld [vmem:[#allocation63_spill] sm:$0xff] }
  0xbc   :  { %11122 = vst [vmem:[#allocation57_spill] sm:$0xff] %v7095_v38  ;;  %v7105_v44 = vmax.bf16 %v11127_v31, %v11126_v21  ;;  %v11136_v38 = vshrl.u32 %v11135_v20, 16  ;;  %v11141_v21 = vld [vmem:[#allocation64_spill] sm:$0xff] }
  0xbd   :  { %11125 = vst [vmem:[#allocation58_spill] sm:$0xff] %v7100_v39  ;;  %v7110_v23 = vmax.bf16 %v11130_v36, %v11129_v15  ;;  %v7115_v14 = vmax.bf16 %v11133_v37, %v11132_v22  ;;  %v11139_v39 = vshrl.u32 %v11138_v17, 16  ;;  %v11144_v15 = vld [vmem:[#allocation65_spill] sm:$0xff]  ;;  %v11147_v22 = vld [vmem:[#allocation66_spill] sm:$0xff] }
  0xbe   :  { %11128 = vst [vmem:[#allocation59_spill] sm:$0xff] %v7105_v44  ;;  %v7120_v30 = vmax.bf16 %v11136_v38, %v11135_v20  ;;  %v11142_v44 = vshrl.u32 %v11141_v21, 16  ;;  %v11150_v20 = vld [vmem:[#allocation67_spill] sm:$0xff] }
  0xbf   :  { %11131 = vst [vmem:[#allocation60_spill] sm:$0xff] %v7110_v23  ;;  %11134 = vst [vmem:[#allocation61_spill] sm:$0xff] %v7115_v14  ;;  %v7125_v31 = vmax.bf16 %v11139_v39, %v11138_v17  ;;  %v11145_v23 = vshrl.u32 %v11144_v15, 16  ;;  %v11148_v14 = vshrl.u32 %v11147_v22, 16  ;;  %v11153_v17 = vld [vmem:[#allocation68_spill] sm:$0xff] }
  0xc0   :  { %11137 = vst [vmem:[#allocation62_spill] sm:$0xff] %v7120_v30  ;;  %v7130_v36 = vmax.bf16 %v11142_v44, %v11141_v21  ;;  %v11151_v30 = vshrl.u32 %v11150_v20, 16  ;;  %v11156_v21 = vld [vmem:[#allocation69_spill] sm:$0xff] }
  0xc1   :  { %11140 = vst [vmem:[#allocation63_spill] sm:$0xff] %v7125_v31  ;;  %v7135_v37 = vmax.bf16 %v11145_v23, %v11144_v15  ;;  %v7140_v38 = vmax.bf16 %v11148_v14, %v11147_v22  ;;  %v11154_v31 = vshrl.u32 %v11153_v17, 16  ;;  %v11159_v15 = vld [vmem:[#allocation70_spill] sm:$0xff]  ;;  %v11162_v22 = vld [vmem:[#allocation71_spill] sm:$0xff] }
  0xc2   :  { %11143 = vst [vmem:[#allocation64_spill] sm:$0xff] %v7130_v36  ;;  %v7145_v39 = vmax.bf16 %v11151_v30, %v11150_v20  ;;  %v11157_v36 = vshrl.u32 %v11156_v21, 16  ;;  %v11165_v20 = vld [vmem:[#allocation72_spill] sm:$0xff] }
  0xc3   :  { %11146 = vst [vmem:[#allocation65_spill] sm:$0xff] %v7135_v37  ;;  %11149 = vst [vmem:[#allocation66_spill] sm:$0xff] %v7140_v38  ;;  %v7150_v44 = vmax.bf16 %v11154_v31, %v11153_v17  ;;  %v11160_v37 = vshrl.u32 %v11159_v15, 16  ;;  %v11163_v38 = vshrl.u32 %v11162_v22, 16  ;;  %v11168_v17 = vld [vmem:[#allocation73_spill] sm:$0xff] }
  0xc4   :  { %11152 = vst [vmem:[#allocation67_spill] sm:$0xff] %v7145_v39  ;;  %v7155_v23 = vmax.bf16 %v11157_v36, %v11156_v21  ;;  %v11166_v39 = vshrl.u32 %v11165_v20, 16  ;;  %v11171_v21 = vld [vmem:[#allocation74_spill] sm:$0xff] }
  0xc5   :  { %11155 = vst [vmem:[#allocation68_spill] sm:$0xff] %v7150_v44  ;;  %v7160_v14 = vmax.bf16 %v11160_v37, %v11159_v15  ;;  %v7165_v30 = vmax.bf16 %v11163_v38, %v11162_v22  ;;  %v11169_v44 = vshrl.u32 %v11168_v17, 16  ;;  %v11174_v15 = vld [vmem:[#allocation75_spill] sm:$0xff]  ;;  %v11177_v22 = vld [vmem:[#allocation76_spill] sm:$0xff] }
  0xc6   :  { %11158 = vst [vmem:[#allocation69_spill] sm:$0xff] %v7155_v23  ;;  %v7170_v31 = vmax.bf16 %v11166_v39, %v11165_v20  ;;  %v11172_v23 = vshrl.u32 %v11171_v21, 16  ;;  %v11180_v20 = vld [vmem:[#allocation77_spill] sm:$0xff] }
  0xc7   :  { %11161 = vst [vmem:[#allocation70_spill] sm:$0xff] %v7160_v14  ;;  %11164 = vst [vmem:[#allocation71_spill] sm:$0xff] %v7165_v30  ;;  %v7175_v36 = vmax.bf16 %v11169_v44, %v11168_v17  ;;  %v11175_v14 = vshrl.u32 %v11174_v15, 16  ;;  %v11178_v30 = vshrl.u32 %v11177_v22, 16  ;;  %v11183_v17 = vld [vmem:[#allocation78_spill] sm:$0xff] }
  0xc8   :  { %11167 = vst [vmem:[#allocation72_spill] sm:$0xff] %v7170_v31  ;;  %v7180_v37 = vmax.bf16 %v11172_v23, %v11171_v21  ;;  %v11181_v31 = vshrl.u32 %v11180_v20, 16  ;;  %v11186_v21 = vld [vmem:[#allocation79_spill] sm:$0xff] }
  0xc9   :  { %11170 = vst [vmem:[#allocation73_spill] sm:$0xff] %v7175_v36  ;;  %v7185_v38 = vmax.bf16 %v11175_v14, %v11174_v15  ;;  %v7190_v39 = vmax.bf16 %v11178_v30, %v11177_v22  ;;  %v11184_v36 = vshrl.u32 %v11183_v17, 16  ;;  %v11189_v15 = vld [vmem:[#allocation80_spill] sm:$0xff]  ;;  %v11192_v22 = vld [vmem:[#allocation81_spill] sm:$0xff] }
  0xca   :  { %11173 = vst [vmem:[#allocation74_spill] sm:$0xff] %v7180_v37  ;;  %v7195_v44 = vmax.bf16 %v11181_v31, %v11180_v20  ;;  %v11187_v37 = vshrl.u32 %v11186_v21, 16  ;;  %v11195_v20 = vld [vmem:[#allocation82_spill] sm:$0xff] }
  0xcb   :  { %11176 = vst [vmem:[#allocation75_spill] sm:$0xff] %v7185_v38  ;;  %11179 = vst [vmem:[#allocation76_spill] sm:$0xff] %v7190_v39  ;;  %v7200_v23 = vmax.bf16 %v11184_v36, %v11183_v17  ;;  %v11190_v38 = vshrl.u32 %v11189_v15, 16  ;;  %v11193_v39 = vshrl.u32 %v11192_v22, 16  ;;  %v11198_v17 = vld [vmem:[#allocation83_spill] sm:$0xff] }
  0xcc   :  { %11182 = vst [vmem:[#allocation77_spill] sm:$0xff] %v7195_v44  ;;  %v7205_v14 = vmax.bf16 %v11187_v37, %v11186_v21  ;;  %v11196_v44 = vshrl.u32 %v11195_v20, 16  ;;  %v11201_v21 = vld [vmem:[#allocation84_spill] sm:$0xff] }
  0xcd   :  { %11185 = vst [vmem:[#allocation78_spill] sm:$0xff] %v7200_v23  ;;  %v7210_v30 = vmax.bf16 %v11190_v38, %v11189_v15  ;;  %v7215_v31 = vmax.bf16 %v11193_v39, %v11192_v22  ;;  %v11199_v23 = vshrl.u32 %v11198_v17, 16  ;;  %v11204_v15 = vld [vmem:[#allocation85_spill] sm:$0xff]  ;;  %v11207_v22 = vld [vmem:[#allocation86_spill] sm:$0xff] }
  0xce   :  { %11188 = vst [vmem:[#allocation79_spill] sm:$0xff] %v7205_v14  ;;  %v7220_v36 = vmax.bf16 %v11196_v44, %v11195_v20  ;;  %v11202_v14 = vshrl.u32 %v11201_v21, 16  ;;  %v11210_v20 = vld [vmem:[#allocation87_spill] sm:$0xff] }
  0xcf   :  { %11191 = vst [vmem:[#allocation80_spill] sm:$0xff] %v7210_v30  ;;  %11194 = vst [vmem:[#allocation81_spill] sm:$0xff] %v7215_v31  ;;  %v7225_v37 = vmax.bf16 %v11199_v23, %v11198_v17  ;;  %v11205_v30 = vshrl.u32 %v11204_v15, 16  ;;  %v11208_v31 = vshrl.u32 %v11207_v22, 16  ;;  %v11213_v17 = vld [vmem:[#allocation88_spill] sm:$0xff] }
  0xd0   :  { %11197 = vst [vmem:[#allocation82_spill] sm:$0xff] %v7220_v36  ;;  %v7230_v38 = vmax.bf16 %v11202_v14, %v11201_v21  ;;  %v11211_v36 = vshrl.u32 %v11210_v20, 16  ;;  %v11216_v21 = vld [vmem:[#allocation89_spill] sm:$0xff] }
  0xd1   :  { %11200 = vst [vmem:[#allocation83_spill] sm:$0xff] %v7225_v37  ;;  %v7235_v39 = vmax.bf16 %v11205_v30, %v11204_v15  ;;  %v7240_v44 = vmax.bf16 %v11208_v31, %v11207_v22  ;;  %v11214_v37 = vshrl.u32 %v11213_v17, 16  ;;  %v11219_v15 = vld [vmem:[#allocation90_spill] sm:$0xff]  ;;  %v11222_v22 = vld [vmem:[#allocation91_spill] sm:$0xff] }
  0xd2   :  { %11203 = vst [vmem:[#allocation84_spill] sm:$0xff] %v7230_v38  ;;  %v7245_v23 = vmax.bf16 %v11211_v36, %v11210_v20  ;;  %v11217_v38 = vshrl.u32 %v11216_v21, 16  ;;  %v11225_v20 = vld [vmem:[#allocation92_spill] sm:$0xff] }
  0xd3   :  { %11206 = vst [vmem:[#allocation85_spill] sm:$0xff] %v7235_v39  ;;  %11209 = vst [vmem:[#allocation86_spill] sm:$0xff] %v7240_v44  ;;  %v7250_v14 = vmax.bf16 %v11214_v37, %v11213_v17  ;;  %v11220_v39 = vshrl.u32 %v11219_v15, 16  ;;  %v11223_v44 = vshrl.u32 %v11222_v22, 16  ;;  %v11228_v17 = vld [vmem:[#allocation93_spill] sm:$0xff] }
  0xd4   :  { %11212 = vst [vmem:[#allocation87_spill] sm:$0xff] %v7245_v23  ;;  %v7255_v30 = vmax.bf16 %v11217_v38, %v11216_v21  ;;  %v11226_v23 = vshrl.u32 %v11225_v20, 16  ;;  %v11231_v21 = vld [vmem:[#allocation94_spill] sm:$0xff] }
  0xd5   :  { %11215 = vst [vmem:[#allocation88_spill] sm:$0xff] %v7250_v14  ;;  %v7260_v31 = vmax.bf16 %v11220_v39, %v11219_v15  ;;  %v7265_v36 = vmax.bf16 %v11223_v44, %v11222_v22  ;;  %v11229_v14 = vshrl.u32 %v11228_v17, 16  ;;  %v11234_v15 = vld [vmem:[#allocation95_spill] sm:$0xff]  ;;  %v11237_v22 = vld [vmem:[#allocation96_spill] sm:$0xff] }
  0xd6   :  { %11218 = vst [vmem:[#allocation89_spill] sm:$0xff] %v7255_v30  ;;  %v7270_v37 = vmax.bf16 %v11226_v23, %v11225_v20  ;;  %v11232_v30 = vshrl.u32 %v11231_v21, 16  ;;  %v11240_v20 = vld [vmem:[#allocation97_spill] sm:$0xff] }
  0xd7   :  { %11221 = vst [vmem:[#allocation90_spill] sm:$0xff] %v7260_v31  ;;  %11224 = vst [vmem:[#allocation91_spill] sm:$0xff] %v7265_v36  ;;  %v7275_v38 = vmax.bf16 %v11229_v14, %v11228_v17  ;;  %v11235_v31 = vshrl.u32 %v11234_v15, 16  ;;  %v11238_v36 = vshrl.u32 %v11237_v22, 16  ;;  %v11243_v17 = vld [vmem:[#allocation98_spill] sm:$0xff] }
  0xd8   :  { %11227 = vst [vmem:[#allocation92_spill] sm:$0xff] %v7270_v37  ;;  %v7280_v39 = vmax.bf16 %v11232_v30, %v11231_v21  ;;  %v11241_v37 = vshrl.u32 %v11240_v20, 16  ;;  %v11246_v21 = vld [vmem:[#allocation99_spill] sm:$0xff] }
  0xd9   :  { %11230 = vst [vmem:[#allocation93_spill] sm:$0xff] %v7275_v38  ;;  %v7285_v44 = vmax.bf16 %v11235_v31, %v11234_v15  ;;  %v7290_v23 = vmax.bf16 %v11238_v36, %v11237_v22  ;;  %v11244_v38 = vshrl.u32 %v11243_v17, 16  ;;  %v11249_v15 = vld [vmem:[#allocation100_spill] sm:$0xff]  ;;  %v11252_v22 = vld [vmem:[#allocation101_spill] sm:$0xff] }
  0xda   :  { %11233 = vst [vmem:[#allocation94_spill] sm:$0xff] %v7280_v39  ;;  %v7295_v14 = vmax.bf16 %v11241_v37, %v11240_v20  ;;  %v11247_v39 = vshrl.u32 %v11246_v21, 16  ;;  %v11255_v20 = vld [vmem:[#allocation102_spill] sm:$0xff] }
  0xdb   :  { %11236 = vst [vmem:[#allocation95_spill] sm:$0xff] %v7285_v44  ;;  %11239 = vst [vmem:[#allocation96_spill] sm:$0xff] %v7290_v23  ;;  %v7300_v30 = vmax.bf16 %v11244_v38, %v11243_v17  ;;  %v11250_v44 = vshrl.u32 %v11249_v15, 16  ;;  %v11253_v23 = vshrl.u32 %v11252_v22, 16  ;;  %v11258_v17 = vld [vmem:[#allocation103_spill] sm:$0xff] }
  0xdc   :  { %11242 = vst [vmem:[#allocation97_spill] sm:$0xff] %v7295_v14  ;;  %v7305_v31 = vmax.bf16 %v11247_v39, %v11246_v21  ;;  %v11256_v14 = vshrl.u32 %v11255_v20, 16  ;;  %v11261_v21 = vld [vmem:[#allocation104_spill] sm:$0xff] }
  0xdd   :  { %11245 = vst [vmem:[#allocation98_spill] sm:$0xff] %v7300_v30  ;;  %v7310_v36 = vmax.bf16 %v11250_v44, %v11249_v15  ;;  %v7315_v37 = vmax.bf16 %v11253_v23, %v11252_v22  ;;  %v11259_v30 = vshrl.u32 %v11258_v17, 16  ;;  %v11264_v15 = vld [vmem:[#allocation105_spill] sm:$0xff]  ;;  %v11267_v22 = vld [vmem:[#allocation106_spill] sm:$0xff] }
  0xde   :  { %11248 = vst [vmem:[#allocation99_spill] sm:$0xff] %v7305_v31  ;;  %v7320_v38 = vmax.bf16 %v11256_v14, %v11255_v20  ;;  %v11262_v31 = vshrl.u32 %v11261_v21, 16  ;;  %v11270_v20 = vld [vmem:[#allocation107_spill] sm:$0xff] }
  0xdf   :  { %11251 = vst [vmem:[#allocation100_spill] sm:$0xff] %v7310_v36  ;;  %11254 = vst [vmem:[#allocation101_spill] sm:$0xff] %v7315_v37  ;;  %v7325_v39 = vmax.bf16 %v11259_v30, %v11258_v17  ;;  %v11265_v36 = vshrl.u32 %v11264_v15, 16  ;;  %v11268_v37 = vshrl.u32 %v11267_v22, 16  ;;  %v11273_v17 = vld [vmem:[#allocation108_spill] sm:$0xff] }
  0xe0   :  { %11257 = vst [vmem:[#allocation102_spill] sm:$0xff] %v7320_v38  ;;  %v7330_v44 = vmax.bf16 %v11262_v31, %v11261_v21  ;;  %v11271_v38 = vshrl.u32 %v11270_v20, 16  ;;  %v11276_v21 = vld [vmem:[#allocation109_spill] sm:$0xff] }
  0xe1   :  { %11260 = vst [vmem:[#allocation103_spill] sm:$0xff] %v7325_v39  ;;  %v7335_v23 = vmax.bf16 %v11265_v36, %v11264_v15  ;;  %v7340_v14 = vmax.bf16 %v11268_v37, %v11267_v22  ;;  %v11274_v39 = vshrl.u32 %v11273_v17, 16  ;;  %v11279_v15 = vld [vmem:[#allocation110_spill] sm:$0xff]  ;;  %v11282_v22 = vld [vmem:[#allocation111_spill] sm:$0xff] }
  0xe2   :  { %11263 = vst [vmem:[#allocation104_spill] sm:$0xff] %v7330_v44  ;;  %v7345_v30 = vmax.bf16 %v11271_v38, %v11270_v20  ;;  %v11277_v44 = vshrl.u32 %v11276_v21, 16  ;;  %v11285_v20 = vld [vmem:[#allocation112_spill] sm:$0xff] }
  0xe3   :  { %11266 = vst [vmem:[#allocation105_spill] sm:$0xff] %v7335_v23  ;;  %11269 = vst [vmem:[#allocation106_spill] sm:$0xff] %v7340_v14  ;;  %v7350_v31 = vmax.bf16 %v11274_v39, %v11273_v17  ;;  %v11280_v23 = vshrl.u32 %v11279_v15, 16  ;;  %v11283_v14 = vshrl.u32 %v11282_v22, 16  ;;  %v11288_v17 = vld [vmem:[#allocation113_spill] sm:$0xff] }
  0xe4   :  { %11272 = vst [vmem:[#allocation107_spill] sm:$0xff] %v7345_v30  ;;  %v7355_v36 = vmax.bf16 %v11277_v44, %v11276_v21  ;;  %v11286_v30 = vshrl.u32 %v11285_v20, 16  ;;  %v11291_v21 = vld [vmem:[#allocation114_spill] sm:$0xff] }
  0xe5   :  { %11275 = vst [vmem:[#allocation108_spill] sm:$0xff] %v7350_v31  ;;  %v7360_v37 = vmax.bf16 %v11280_v23, %v11279_v15  ;;  %v7365_v38 = vmax.bf16 %v11283_v14, %v11282_v22  ;;  %v11289_v31 = vshrl.u32 %v11288_v17, 16  ;;  %v11294_v15 = vld [vmem:[#allocation115_spill] sm:$0xff]  ;;  %v11297_v22 = vld [vmem:[#allocation116_spill] sm:$0xff] }
  0xe6   :  { %11278 = vst [vmem:[#allocation109_spill] sm:$0xff] %v7355_v36  ;;  %v7370_v39 = vmax.bf16 %v11286_v30, %v11285_v20  ;;  %v11292_v36 = vshrl.u32 %v11291_v21, 16  ;;  %v11300_v20 = vld [vmem:[#allocation117_spill] sm:$0xff] }
  0xe7   :  { %11281 = vst [vmem:[#allocation110_spill] sm:$0xff] %v7360_v37  ;;  %11284 = vst [vmem:[#allocation111_spill] sm:$0xff] %v7365_v38  ;;  %v7375_v44 = vmax.bf16 %v11289_v31, %v11288_v17  ;;  %v11295_v37 = vshrl.u32 %v11294_v15, 16  ;;  %v11298_v38 = vshrl.u32 %v11297_v22, 16  ;;  %v11303_v17 = vld [vmem:[#allocation118_spill] sm:$0xff] }
  0xe8   :  { %11287 = vst [vmem:[#allocation112_spill] sm:$0xff] %v7370_v39  ;;  %v7380_v23 = vmax.bf16 %v11292_v36, %v11291_v21  ;;  %v11301_v39 = vshrl.u32 %v11300_v20, 16  ;;  %v11306_v21 = vld [vmem:[#allocation119_spill] sm:$0xff] }
  0xe9   :  { %11290 = vst [vmem:[#allocation113_spill] sm:$0xff] %v7375_v44  ;;  %v7385_v14 = vmax.bf16 %v11295_v37, %v11294_v15  ;;  %v7390_v30 = vmax.bf16 %v11298_v38, %v11297_v22  ;;  %v11304_v44 = vshrl.u32 %v11303_v17, 16  ;;  %v11309_v15 = vld [vmem:[#allocation120_spill] sm:$0xff]  ;;  %v11312_v22 = vld [vmem:[#allocation121_spill] sm:$0xff] }
  0xea   :  { %11293 = vst [vmem:[#allocation114_spill] sm:$0xff] %v7380_v23  ;;  %v7395_v31 = vmax.bf16 %v11301_v39, %v11300_v20  ;;  %v11307_v23 = vshrl.u32 %v11306_v21, 16  ;;  %v11315_v20 = vld [vmem:[#allocation122_spill] sm:$0xff] }
  0xeb   :  { %11296 = vst [vmem:[#allocation115_spill] sm:$0xff] %v7385_v14  ;;  %11299 = vst [vmem:[#allocation116_spill] sm:$0xff] %v7390_v30  ;;  %v7400_v36 = vmax.bf16 %v11304_v44, %v11303_v17  ;;  %v11310_v14 = vshrl.u32 %v11309_v15, 16  ;;  %v11313_v30 = vshrl.u32 %v11312_v22, 16  ;;  %v11318_v17 = vld [vmem:[#allocation123_spill] sm:$0xff] }
  0xec   :  { %11302 = vst [vmem:[#allocation117_spill] sm:$0xff] %v7395_v31  ;;  %v7405_v37 = vmax.bf16 %v11307_v23, %v11306_v21  ;;  %v11316_v31 = vshrl.u32 %v11315_v20, 16  ;;  %v11321_v21 = vld [vmem:[#allocation124_spill] sm:$0xff] }
  0xed   :  { %11305 = vst [vmem:[#allocation118_spill] sm:$0xff] %v7400_v36  ;;  %v7410_v38 = vmax.bf16 %v11310_v14, %v11309_v15  ;;  %v7415_v39 = vmax.bf16 %v11313_v30, %v11312_v22  ;;  %v11319_v36 = vshrl.u32 %v11318_v17, 16  ;;  %v11324_v15 = vld [vmem:[#allocation125_spill] sm:$0xff]  ;;  %v11327_v22 = vld [vmem:[#allocation126_spill] sm:$0xff] }
  0xee   :  { %11308 = vst [vmem:[#allocation119_spill] sm:$0xff] %v7405_v37  ;;  %v7420_v44 = vmax.bf16 %v11316_v31, %v11315_v20  ;;  %v11322_v37 = vshrl.u32 %v11321_v21, 16  ;;  %v11330_v20 = vld [vmem:[#allocation127_spill] sm:$0xff] }
  0xef   :  { %11311 = vst [vmem:[#allocation120_spill] sm:$0xff] %v7410_v38  ;;  %11314 = vst [vmem:[#allocation121_spill] sm:$0xff] %v7415_v39  ;;  %v7425_v23 = vmax.bf16 %v11319_v36, %v11318_v17  ;;  %v11325_v38 = vshrl.u32 %v11324_v15, 16  ;;  %v11328_v39 = vshrl.u32 %v11327_v22, 16  ;;  %v11333_v17 = vld [vmem:[#allocation128_spill] sm:$0xff] }
  0xf0   :  { %11317 = vst [vmem:[#allocation122_spill] sm:$0xff] %v7420_v44  ;;  %v7430_v14 = vmax.bf16 %v11322_v37, %v11321_v21  ;;  %v11331_v44 = vshrl.u32 %v11330_v20, 16  ;;  %v11336_v21 = vld [vmem:[#allocation129_spill] sm:$0xff] }
  0xf1   :  { %11320 = vst [vmem:[#allocation123_spill] sm:$0xff] %v7425_v23  ;;  %v7435_v30 = vmax.bf16 %v11325_v38, %v11324_v15  ;;  %v7440_v31 = vmax.bf16 %v11328_v39, %v11327_v22  ;;  %v11334_v23 = vshrl.u32 %v11333_v17, 16  ;;  %v11339_v15 = vld [vmem:[#allocation130_spill] sm:$0xff]  ;;  %v11342_v22 = vld [vmem:[#allocation131_spill] sm:$0xff] }
  0xf2   :  { %11323 = vst [vmem:[#allocation124_spill] sm:$0xff] %v7430_v14  ;;  %v7445_v36 = vmax.bf16 %v11331_v44, %v11330_v20  ;;  %v11337_v14 = vshrl.u32 %v11336_v21, 16  ;;  %v11345_v20 = vld [vmem:[#allocation132_spill] sm:$0xff] }
  0xf3   :  { %11326 = vst [vmem:[#allocation125_spill] sm:$0xff] %v7435_v30  ;;  %11329 = vst [vmem:[#allocation126_spill] sm:$0xff] %v7440_v31  ;;  %v7450_v37 = vmax.bf16 %v11334_v23, %v11333_v17  ;;  %v11340_v30 = vshrl.u32 %v11339_v15, 16  ;;  %v11343_v31 = vshrl.u32 %v11342_v22, 16  ;;  %v11348_v17 = vld [vmem:[#allocation133_spill] sm:$0xff] }
  0xf4   :  { %11332 = vst [vmem:[#allocation127_spill] sm:$0xff] %v7445_v36  ;;  %v7455_v38 = vmax.bf16 %v11337_v14, %v11336_v21  ;;  %v11346_v36 = vshrl.u32 %v11345_v20, 16  ;;  %v11351_v21 = vld [vmem:[#allocation134_spill] sm:$0xff] }
  0xf5   :  { %11335 = vst [vmem:[#allocation128_spill] sm:$0xff] %v7450_v37  ;;  %v7460_v39 = vmax.bf16 %v11340_v30, %v11339_v15  ;;  %v7465_v44 = vmax.bf16 %v11343_v31, %v11342_v22  ;;  %v11349_v37 = vshrl.u32 %v11348_v17, 16  ;;  %v11354_v15 = vld [vmem:[#allocation135_spill] sm:$0xff]  ;;  %v11357_v22 = vld [vmem:[#allocation136_spill] sm:$0xff] }
  0xf6   :  { %11338 = vst [vmem:[#allocation129_spill] sm:$0xff] %v7455_v38  ;;  %v7470_v23 = vmax.bf16 %v11346_v36, %v11345_v20  ;;  %v11352_v38 = vshrl.u32 %v11351_v21, 16  ;;  %v11360_v20 = vld [vmem:[#allocation137_spill] sm:$0xff] }
  0xf7   :  { %11341 = vst [vmem:[#allocation130_spill] sm:$0xff] %v7460_v39  ;;  %11344 = vst [vmem:[#allocation131_spill] sm:$0xff] %v7465_v44  ;;  %v7475_v14 = vmax.bf16 %v11349_v37, %v11348_v17  ;;  %v11355_v39 = vshrl.u32 %v11354_v15, 16  ;;  %v11358_v44 = vshrl.u32 %v11357_v22, 16  ;;  %v11363_v17 = vld [vmem:[#allocation138_spill] sm:$0xff] }
  0xf8   :  { %11347 = vst [vmem:[#allocation132_spill] sm:$0xff] %v7470_v23  ;;  %v7480_v30 = vmax.bf16 %v11352_v38, %v11351_v21  ;;  %v11361_v23 = vshrl.u32 %v11360_v20, 16  ;;  %v11366_v21 = vld [vmem:[#allocation139_spill] sm:$0xff] }
  0xf9   :  { %11350 = vst [vmem:[#allocation133_spill] sm:$0xff] %v7475_v14  ;;  %v7485_v31 = vmax.bf16 %v11355_v39, %v11354_v15  ;;  %v7490_v36 = vmax.bf16 %v11358_v44, %v11357_v22  ;;  %v11364_v14 = vshrl.u32 %v11363_v17, 16  ;;  %v11369_v15 = vld [vmem:[#allocation140_spill] sm:$0xff]  ;;  %v11372_v22 = vld [vmem:[#allocation141_spill] sm:$0xff] }
  0xfa   :  { %11353 = vst [vmem:[#allocation134_spill] sm:$0xff] %v7480_v30  ;;  %v7495_v37 = vmax.bf16 %v11361_v23, %v11360_v20  ;;  %v11367_v30 = vshrl.u32 %v11366_v21, 16  ;;  %v11375_v20 = vld [vmem:[#allocation142_spill] sm:$0xff] }
  0xfb   :  { %11356 = vst [vmem:[#allocation135_spill] sm:$0xff] %v7485_v31  ;;  %11359 = vst [vmem:[#allocation136_spill] sm:$0xff] %v7490_v36  ;;  %v7500_v38 = vmax.bf16 %v11364_v14, %v11363_v17  ;;  %v11370_v31 = vshrl.u32 %v11369_v15, 16  ;;  %v11373_v36 = vshrl.u32 %v11372_v22, 16  ;;  %v11378_v17 = vld [vmem:[#allocation143_spill] sm:$0xff] }
  0xfc   :  { %11362 = vst [vmem:[#allocation137_spill] sm:$0xff] %v7495_v37  ;;  %v7505_v39 = vmax.bf16 %v11367_v30, %v11366_v21  ;;  %v11376_v37 = vshrl.u32 %v11375_v20, 16  ;;  %v11381_v21 = vld [vmem:[#allocation144_spill] sm:$0xff] }
  0xfd   :  { %11365 = vst [vmem:[#allocation138_spill] sm:$0xff] %v7500_v38  ;;  %v7510_v44 = vmax.bf16 %v11370_v31, %v11369_v15  ;;  %v7515_v23 = vmax.bf16 %v11373_v36, %v11372_v22  ;;  %v11379_v38 = vshrl.u32 %v11378_v17, 16  ;;  %v11384_v15 = vld [vmem:[#allocation145_spill] sm:$0xff]  ;;  %v11387_v22 = vld [vmem:[#allocation146_spill] sm:$0xff] }
  0xfe   :  { %11368 = vst [vmem:[#allocation139_spill] sm:$0xff] %v7505_v39  ;;  %v7520_v14 = vmax.bf16 %v11376_v37, %v11375_v20  ;;  %v11382_v39 = vshrl.u32 %v11381_v21, 16  ;;  %v11390_v20 = vld [vmem:[#allocation147_spill] sm:$0xff] }
  0xff   :  { %11371 = vst [vmem:[#allocation140_spill] sm:$0xff] %v7510_v44  ;;  %11374 = vst [vmem:[#allocation141_spill] sm:$0xff] %v7515_v23  ;;  %v7525_v30 = vmax.bf16 %v11379_v38, %v11378_v17  ;;  %v11385_v44 = vshrl.u32 %v11384_v15, 16  ;;  %v11388_v23 = vshrl.u32 %v11387_v22, 16  ;;  %v11393_v17 = vld [vmem:[#allocation148_spill] sm:$0xff] }
 0x100   :  { %11377 = vst [vmem:[#allocation142_spill] sm:$0xff] %v7520_v14  ;;  %v7530_v31 = vmax.bf16 %v11382_v39, %v11381_v21  ;;  %v11391_v14 = vshrl.u32 %v11390_v20, 16  ;;  %v11396_v21 = vld [vmem:[#allocation149_spill] sm:$0xff] }
 0x101   :  { %11380 = vst [vmem:[#allocation143_spill] sm:$0xff] %v7525_v30  ;;  %v7535_v36 = vmax.bf16 %v11385_v44, %v11384_v15  ;;  %v7540_v37 = vmax.bf16 %v11388_v23, %v11387_v22  ;;  %v11394_v30 = vshrl.u32 %v11393_v17, 16  ;;  %v11399_v15 = vld [vmem:[#allocation150_spill] sm:$0xff]  ;;  %v11402_v22 = vld [vmem:[#allocation151_spill] sm:$0xff] }
 0x102   :  { %11383 = vst [vmem:[#allocation144_spill] sm:$0xff] %v7530_v31  ;;  %v7545_v38 = vmax.bf16 %v11391_v14, %v11390_v20  ;;  %v11397_v31 = vshrl.u32 %v11396_v21, 16  ;;  %v11405_v20 = vld [vmem:[#allocation152_spill] sm:$0xff] }
 0x103   :  { %11386 = vst [vmem:[#allocation145_spill] sm:$0xff] %v7535_v36  ;;  %11389 = vst [vmem:[#allocation146_spill] sm:$0xff] %v7540_v37  ;;  %v7550_v39 = vmax.bf16 %v11394_v30, %v11393_v17  ;;  %v11400_v36 = vshrl.u32 %v11399_v15, 16  ;;  %v11403_v37 = vshrl.u32 %v11402_v22, 16  ;;  %v11408_v17 = vld [vmem:[#allocation153_spill] sm:$0xff] }
 0x104   :  { %11392 = vst [vmem:[#allocation147_spill] sm:$0xff] %v7545_v38  ;;  %v7555_v44 = vmax.bf16 %v11397_v31, %v11396_v21  ;;  %v11406_v38 = vshrl.u32 %v11405_v20, 16  ;;  %v11411_v21 = vld [vmem:[#allocation154_spill] sm:$0xff] }
 0x105   :  { %11395 = vst [vmem:[#allocation148_spill] sm:$0xff] %v7550_v39  ;;  %v7560_v23 = vmax.bf16 %v11400_v36, %v11399_v15  ;;  %v7565_v14 = vmax.bf16 %v11403_v37, %v11402_v22  ;;  %v11409_v39 = vshrl.u32 %v11408_v17, 16  ;;  %v11414_v15 = vld [vmem:[#allocation155_spill] sm:$0xff]  ;;  %v11417_v22 = vld [vmem:[#allocation156_spill] sm:$0xff] }
 0x106   :  { %11398 = vst [vmem:[#allocation149_spill] sm:$0xff] %v7555_v44  ;;  %v7570_v30 = vmax.bf16 %v11406_v38, %v11405_v20  ;;  %v11412_v44 = vshrl.u32 %v11411_v21, 16  ;;  %v11420_v20 = vld [vmem:[#allocation157_spill] sm:$0xff] }
 0x107   :  { %11401 = vst [vmem:[#allocation150_spill] sm:$0xff] %v7560_v23  ;;  %11404 = vst [vmem:[#allocation151_spill] sm:$0xff] %v7565_v14  ;;  %v7575_v31 = vmax.bf16 %v11409_v39, %v11408_v17  ;;  %v11415_v23 = vshrl.u32 %v11414_v15, 16  ;;  %v11418_v14 = vshrl.u32 %v11417_v22, 16  ;;  %v11423_v17 = vld [vmem:[#allocation158_spill] sm:$0xff] }
 0x108   :  { %11407 = vst [vmem:[#allocation152_spill] sm:$0xff] %v7570_v30  ;;  %v7580_v36 = vmax.bf16 %v11412_v44, %v11411_v21  ;;  %v11421_v30 = vshrl.u32 %v11420_v20, 16  ;;  %v11426_v21 = vld [vmem:[#allocation159_spill] sm:$0xff] }
 0x109   :  { %11410 = vst [vmem:[#allocation153_spill] sm:$0xff] %v7575_v31  ;;  %v7585_v37 = vmax.bf16 %v11415_v23, %v11414_v15  ;;  %v7590_v38 = vmax.bf16 %v11418_v14, %v11417_v22  ;;  %v11424_v31 = vshrl.u32 %v11423_v17, 16  ;;  %v11429_v15 = vld [vmem:[#allocation160_spill] sm:$0xff]  ;;  %v11432_v22 = vld [vmem:[#allocation161_spill] sm:$0xff] }
 0x10a   :  { %11413 = vst [vmem:[#allocation154_spill] sm:$0xff] %v7580_v36  ;;  %v7595_v39 = vmax.bf16 %v11421_v30, %v11420_v20  ;;  %v11427_v36 = vshrl.u32 %v11426_v21, 16  ;;  %v11435_v20 = vld [vmem:[#allocation162_spill] sm:$0xff] }
 0x10b   :  { %11416 = vst [vmem:[#allocation155_spill] sm:$0xff] %v7585_v37  ;;  %11419 = vst [vmem:[#allocation156_spill] sm:$0xff] %v7590_v38  ;;  %v7600_v44 = vmax.bf16 %v11424_v31, %v11423_v17  ;;  %v11430_v37 = vshrl.u32 %v11429_v15, 16  ;;  %v11433_v38 = vshrl.u32 %v11432_v22, 16  ;;  %v11438_v17 = vld [vmem:[#allocation163_spill] sm:$0xff] }
 0x10c   :  { %11422 = vst [vmem:[#allocation157_spill] sm:$0xff] %v7595_v39  ;;  %v7605_v23 = vmax.bf16 %v11427_v36, %v11426_v21  ;;  %v11436_v39 = vshrl.u32 %v11435_v20, 16  ;;  %v11441_v21 = vld [vmem:[#allocation164_spill] sm:$0xff] }
 0x10d   :  { %11425 = vst [vmem:[#allocation158_spill] sm:$0xff] %v7600_v44  ;;  %v7610_v14 = vmax.bf16 %v11430_v37, %v11429_v15  ;;  %v7615_v30 = vmax.bf16 %v11433_v38, %v11432_v22  ;;  %v11439_v44 = vshrl.u32 %v11438_v17, 16  ;;  %v11444_v15 = vld [vmem:[#allocation165_spill] sm:$0xff]  ;;  %v11447_v22 = vld [vmem:[#allocation166_spill] sm:$0xff] }
 0x10e   :  { %11428 = vst [vmem:[#allocation159_spill] sm:$0xff] %v7605_v23  ;;  %v7620_v31 = vmax.bf16 %v11436_v39, %v11435_v20  ;;  %v11442_v23 = vshrl.u32 %v11441_v21, 16  ;;  %v11450_v20 = vld [vmem:[#allocation167_spill] sm:$0xff] }
 0x10f   :  { %11431 = vst [vmem:[#allocation160_spill] sm:$0xff] %v7610_v14  ;;  %11434 = vst [vmem:[#allocation161_spill] sm:$0xff] %v7615_v30  ;;  %v7625_v36 = vmax.bf16 %v11439_v44, %v11438_v17  ;;  %v11445_v14 = vshrl.u32 %v11444_v15, 16  ;;  %v11448_v30 = vshrl.u32 %v11447_v22, 16  ;;  %v11453_v17 = vld [vmem:[#allocation168_spill] sm:$0xff] }
 0x110   :  { %11437 = vst [vmem:[#allocation162_spill] sm:$0xff] %v7620_v31  ;;  %v7630_v37 = vmax.bf16 %v11442_v23, %v11441_v21  ;;  %v11451_v31 = vshrl.u32 %v11450_v20, 16  ;;  %v11456_v21 = vld [vmem:[#allocation169_spill] sm:$0xff] }
 0x111   :  { %11440 = vst [vmem:[#allocation163_spill] sm:$0xff] %v7625_v36  ;;  %v7635_v38 = vmax.bf16 %v11445_v14, %v11444_v15  ;;  %v7640_v39 = vmax.bf16 %v11448_v30, %v11447_v22  ;;  %v11454_v36 = vshrl.u32 %v11453_v17, 16  ;;  %v11459_v15 = vld [vmem:[#allocation170_spill] sm:$0xff]  ;;  %v11462_v22 = vld [vmem:[#allocation171_spill] sm:$0xff] }
 0x112   :  { %11443 = vst [vmem:[#allocation164_spill] sm:$0xff] %v7630_v37  ;;  %v7645_v44 = vmax.bf16 %v11451_v31, %v11450_v20  ;;  %v11457_v37 = vshrl.u32 %v11456_v21, 16  ;;  %v11465_v20 = vld [vmem:[#allocation172_spill] sm:$0xff] }
 0x113   :  { %11446 = vst [vmem:[#allocation165_spill] sm:$0xff] %v7635_v38  ;;  %11449 = vst [vmem:[#allocation166_spill] sm:$0xff] %v7640_v39  ;;  %v7650_v23 = vmax.bf16 %v11454_v36, %v11453_v17  ;;  %v11460_v38 = vshrl.u32 %v11459_v15, 16  ;;  %v11463_v39 = vshrl.u32 %v11462_v22, 16  ;;  %v11468_v17 = vld [vmem:[#allocation173_spill] sm:$0xff] }
 0x114   :  { %11452 = vst [vmem:[#allocation167_spill] sm:$0xff] %v7645_v44  ;;  %v7655_v14 = vmax.bf16 %v11457_v37, %v11456_v21  ;;  %v11466_v44 = vshrl.u32 %v11465_v20, 16  ;;  %v11471_v21 = vld [vmem:[#allocation174_spill] sm:$0xff] }
 0x115   :  { %11455 = vst [vmem:[#allocation168_spill] sm:$0xff] %v7650_v23  ;;  %v7660_v30 = vmax.bf16 %v11460_v38, %v11459_v15  ;;  %v7665_v31 = vmax.bf16 %v11463_v39, %v11462_v22  ;;  %v11469_v23 = vshrl.u32 %v11468_v17, 16  ;;  %v11474_v15 = vld [vmem:[#allocation175_spill] sm:$0xff]  ;;  %v11477_v22 = vld [vmem:[#allocation176_spill] sm:$0xff] }
 0x116   :  { %11458 = vst [vmem:[#allocation169_spill] sm:$0xff] %v7655_v14  ;;  %v7670_v36 = vmax.bf16 %v11466_v44, %v11465_v20  ;;  %v11472_v14 = vshrl.u32 %v11471_v21, 16  ;;  %v11480_v20 = vld [vmem:[#allocation177_spill] sm:$0xff] }
 0x117   :  { %11461 = vst [vmem:[#allocation170_spill] sm:$0xff] %v7660_v30  ;;  %11464 = vst [vmem:[#allocation171_spill] sm:$0xff] %v7665_v31  ;;  %v7675_v37 = vmax.bf16 %v11469_v23, %v11468_v17  ;;  %v11475_v30 = vshrl.u32 %v11474_v15, 16  ;;  %v11478_v31 = vshrl.u32 %v11477_v22, 16  ;;  %v11483_v17 = vld [vmem:[#allocation178_spill] sm:$0xff] }
 0x118   :  { %11467 = vst [vmem:[#allocation172_spill] sm:$0xff] %v7670_v36  ;;  %v7680_v38 = vmax.bf16 %v11472_v14, %v11471_v21  ;;  %v11481_v36 = vshrl.u32 %v11480_v20, 16  ;;  %v11486_v21 = vld [vmem:[#allocation179_spill] sm:$0xff] }
 0x119   :  { %11470 = vst [vmem:[#allocation173_spill] sm:$0xff] %v7675_v37  ;;  %v7685_v39 = vmax.bf16 %v11475_v30, %v11474_v15  ;;  %v7690_v44 = vmax.bf16 %v11478_v31, %v11477_v22  ;;  %v11484_v37 = vshrl.u32 %v11483_v17, 16  ;;  %v11489_v15 = vld [vmem:[#allocation180_spill] sm:$0xff]  ;;  %v11492_v22 = vld [vmem:[#allocation181_spill] sm:$0xff] }
 0x11a   :  { %11473 = vst [vmem:[#allocation174_spill] sm:$0xff] %v7680_v38  ;;  %v7695_v23 = vmax.bf16 %v11481_v36, %v11480_v20  ;;  %v11487_v38 = vshrl.u32 %v11486_v21, 16  ;;  %v11495_v20 = vld [vmem:[#allocation182_spill] sm:$0xff] }
 0x11b   :  { %11476 = vst [vmem:[#allocation175_spill] sm:$0xff] %v7685_v39  ;;  %11479 = vst [vmem:[#allocation176_spill] sm:$0xff] %v7690_v44  ;;  %v7700_v14 = vmax.bf16 %v11484_v37, %v11483_v17  ;;  %v11490_v39 = vshrl.u32 %v11489_v15, 16  ;;  %v11493_v44 = vshrl.u32 %v11492_v22, 16  ;;  %v11498_v17 = vld [vmem:[#allocation183_spill] sm:$0xff] }
 0x11c   :  { %11482 = vst [vmem:[#allocation177_spill] sm:$0xff] %v7695_v23  ;;  %v7705_v30 = vmax.bf16 %v11487_v38, %v11486_v21  ;;  %v11496_v23 = vshrl.u32 %v11495_v20, 16  ;;  %v11501_v21 = vld [vmem:[#allocation184_spill] sm:$0xff] }
 0x11d   :  { %11485 = vst [vmem:[#allocation178_spill] sm:$0xff] %v7700_v14  ;;  %v7710_v31 = vmax.bf16 %v11490_v39, %v11489_v15  ;;  %v7715_v36 = vmax.bf16 %v11493_v44, %v11492_v22  ;;  %v11499_v14 = vshrl.u32 %v11498_v17, 16  ;;  %v11504_v15 = vld [vmem:[#allocation185_spill] sm:$0xff]  ;;  %v11507_v22 = vld [vmem:[#allocation186_spill] sm:$0xff] }
 0x11e   :  { %11488 = vst [vmem:[#allocation179_spill] sm:$0xff] %v7705_v30  ;;  %v7720_v37 = vmax.bf16 %v11496_v23, %v11495_v20  ;;  %v11502_v30 = vshrl.u32 %v11501_v21, 16  ;;  %v11510_v20 = vld [vmem:[#allocation187_spill] sm:$0xff] }
 0x11f   :  { %11491 = vst [vmem:[#allocation180_spill] sm:$0xff] %v7710_v31  ;;  %11494 = vst [vmem:[#allocation181_spill] sm:$0xff] %v7715_v36  ;;  %v7725_v38 = vmax.bf16 %v11499_v14, %v11498_v17  ;;  %v11505_v31 = vshrl.u32 %v11504_v15, 16  ;;  %v11508_v36 = vshrl.u32 %v11507_v22, 16  ;;  %v11513_v17 = vld [vmem:[#allocation188_spill] sm:$0xff] }
 0x120   :  { %11497 = vst [vmem:[#allocation182_spill] sm:$0xff] %v7720_v37  ;;  %v7730_v39 = vmax.bf16 %v11502_v30, %v11501_v21  ;;  %v11511_v37 = vshrl.u32 %v11510_v20, 16  ;;  %v11516_v21 = vld [vmem:[#allocation189_spill] sm:$0xff] }
 0x121   :  { %11500 = vst [vmem:[#allocation183_spill] sm:$0xff] %v7725_v38  ;;  %v7735_v44 = vmax.bf16 %v11505_v31, %v11504_v15  ;;  %v7740_v23 = vmax.bf16 %v11508_v36, %v11507_v22  ;;  %v11514_v38 = vshrl.u32 %v11513_v17, 16  ;;  %v11519_v15 = vld [vmem:[#allocation190_spill] sm:$0xff]  ;;  %v11522_v22 = vld [vmem:[#allocation191_spill] sm:$0xff] }
 0x122   :  { %11503 = vst [vmem:[#allocation184_spill] sm:$0xff] %v7730_v39  ;;  %v7745_v14 = vmax.bf16 %v11511_v37, %v11510_v20  ;;  %v11517_v39 = vshrl.u32 %v11516_v21, 16  ;;  %v11525_v20 = vld [vmem:[#allocation192_spill] sm:$0xff] }
 0x123   :  { %11506 = vst [vmem:[#allocation185_spill] sm:$0xff] %v7735_v44  ;;  %11509 = vst [vmem:[#allocation186_spill] sm:$0xff] %v7740_v23  ;;  %v7750_v30 = vmax.bf16 %v11514_v38, %v11513_v17  ;;  %v11520_v44 = vshrl.u32 %v11519_v15, 16  ;;  %v11523_v23 = vshrl.u32 %v11522_v22, 16  ;;  %v11528_v17 = vld [vmem:[#allocation193_spill] sm:$0xff] }
 0x124   :  { %11512 = vst [vmem:[#allocation187_spill] sm:$0xff] %v7745_v14  ;;  %v7755_v31 = vmax.bf16 %v11517_v39, %v11516_v21  ;;  %v11526_v14 = vshrl.u32 %v11525_v20, 16  ;;  %v11531_v21 = vld [vmem:[#allocation194_spill] sm:$0xff] }
 0x125   :  { %11515 = vst [vmem:[#allocation188_spill] sm:$0xff] %v7750_v30  ;;  %v7760_v36 = vmax.bf16 %v11520_v44, %v11519_v15  ;;  %v7765_v37 = vmax.bf16 %v11523_v23, %v11522_v22  ;;  %v11529_v30 = vshrl.u32 %v11528_v17, 16  ;;  %v11534_v15 = vld [vmem:[#allocation195_spill] sm:$0xff]  ;;  %v11537_v22 = vld [vmem:[#allocation196_spill] sm:$0xff] }
 0x126   :  { %11518 = vst [vmem:[#allocation189_spill] sm:$0xff] %v7755_v31  ;;  %v7770_v38 = vmax.bf16 %v11526_v14, %v11525_v20  ;;  %v11532_v31 = vshrl.u32 %v11531_v21, 16  ;;  %v11539_v20 = vld [vmem:[#allocation197_spill] sm:$0xff] }
 0x127   :  { %11521 = vst [vmem:[#allocation190_spill] sm:$0xff] %v7760_v36  ;;  %11524 = vst [vmem:[#allocation191_spill] sm:$0xff] %v7765_v37  ;;  %v7775_v39 = vmax.bf16 %v11529_v30, %v11528_v17  ;;  %v11535_v36 = vshrl.u32 %v11534_v15, 16  ;;  %v11538_v37 = vshrl.u32 %v11537_v22, 16  ;;  %v11541_v17 = vld [vmem:[#allocation198_spill] sm:$0xff] }
 0x128   :  { %11527 = vst [vmem:[#allocation192_spill] sm:$0xff] %v7770_v38  ;;  %v7780_v44 = vmax.bf16 %v11532_v31, %v11531_v21  ;;  %v11540_v38 = vshrl.u32 %v11539_v20, 16  ;;  %v11544_v21 = vld [vmem:[#allocation199_spill] sm:$0xff] }
 0x129   :  { %11530 = vst [vmem:[#allocation193_spill] sm:$0xff] %v7775_v39  ;;  %v7785_v23 = vmax.bf16 %v11535_v36, %v11534_v15  ;;  %v7790_v14 = vmax.bf16 %v11538_v37, %v11537_v22  ;;  %v11542_v39 = vshrl.u32 %v11541_v17, 16  ;;  %v11547_v15 = vld [vmem:[#allocation200_spill] sm:$0xff]  ;;  %v11550_v22 = vshrl.u32 %v6443_v53, 16 }
 0x12a   :  { %11533 = vst [vmem:[#allocation194_spill] sm:$0xff] %v7780_v44  ;;  %v7795_v30 = vmax.bf16 %v11540_v38, %v11539_v20  ;;  %v11545_v44 = vshrl.u32 %v11544_v21, 16  ;;  %v11551_v20 = vshrl.u32 %v6448_v52, 16 }
 0x12b   :  { %11536 = vst [vmem:[#allocation195_spill] sm:$0xff] %v7785_v23  ;;  %v7800_v31 = vmax.bf16 %v11542_v39, %v11541_v17  ;;  %v11548_v23 = vshrl.u32 %v11547_v15, 16  ;;  %v7815_v38 = vmax.bf16 %v11550_v22, %v6443_v53  ;;  %v11552_v17 = vshrl.u32 %v6453_v62, 16 }
 0x12c   :  { %v7805_v36 = vmax.bf16 %v11545_v44, %v11544_v21  ;;  %v7820_v39 = vmax.bf16 %v11551_v20, %v6448_v52  ;;  %v11553_v21 = vld [vmem:[#allocation201_spill] sm:$0xff]  ;;  %v11556_v22 = vshrl.u32 %v6472_v60, 16  ;;  %v11557_v20 = vld [vmem:[#allocation202_spill] sm:$0xff] }
 0x12d   :  { %11543 = vst [vmem:[#allocation196_spill] sm:$0xff] %v7800_v31  ;;  %v7810_v37 = vmax.bf16 %v11548_v23, %v11547_v15  ;;  %v7825_v44 = vmax.bf16 %v11552_v17, %v6453_v62  ;;  %v11555_v15 = vshrl.u32 %v6467_v61, 16  ;;  %v11559_v17 = vld [vmem:[#allocation203_spill] sm:$0xff] }
 0x12e   :  { %11546 = vst [vmem:[#allocation197_spill] sm:$0xff] %v7805_v36  ;;  %v11554_v36 = vshrl.u32 %v11553_v21, 16  ;;  %v7840_v52 = vmax.bf16 %v11556_v22, %v6472_v60  ;;  %v11560_v31 = vshrl.u32 %v11559_v17, 16 }
 0x12f   :  { %11549 = vst [vmem:[#allocation198_spill] sm:$0xff] %v7810_v37  ;;  %v7835_v53 = vmax.bf16 %v11555_v15, %v6467_v61  ;;  %v11558_v37 = vshrl.u32 %v11557_v20, 16  ;;  %v11562_v15 = vshrl.u32 %v6496_v51, 16 }
 0x130   :  { %v7830_v23 = vmax.bf16 %v11554_v36, %v11553_v21  ;;  %v7850_v36 = vmax.bf16 %v11560_v31, %v11559_v17  ;;  %v11561_v21 = vshrl.u32 %v6491_v50, 16  ;;  %v11564_v31 = vshrl.u32 %v6506_v57, 16 }
 0x131   :  { %v7845_v62 = vmax.bf16 %v11558_v37, %v11557_v20  ;;  %v7860_v60 = vmax.bf16 %v11562_v15, %v6496_v51  ;;  %v11563_v37 = vshrl.u32 %v6501_v56, 16  ;;  %v11566_v51 = vshrl.u32 %v6520_v43, 16 }
 0x132   :  { %v7855_v61 = vmax.bf16 %v11561_v21, %v6491_v50  ;;  %v7870_v20 = vmax.bf16 %v11564_v31, %v6506_v57  ;;  %v11565_v50 = vshrl.u32 %v6515_v42, 16  ;;  %v11567_v15 = vshrl.u32 %v6525_v48, 16 }
 0x133   :  { %v7865_v22 = vmax.bf16 %v11563_v37, %v6501_v56  ;;  %v7880_v21 = vmax.bf16 %v11566_v51, %v6520_v43  ;;  %v11568_v37 = vshrl.u32 %v6530_v49, 16  ;;  %v11570_v31 = vshrl.u32 %v6539_v34, 16 }
 0x134   :  { %v7875_v17 = vmax.bf16 %v11565_v50, %v6515_v42  ;;  %v7885_v56 = vmax.bf16 %v11567_v15, %v6525_v48  ;;  %v11571_v50 = vshrl.u32 %v6544_v35, 16  ;;  %v11574_v48 = vshrl.u32 %v6549_v40, 16 }
 0x135   :  { %v7890_v57 = vmax.bf16 %v11568_v37, %v6530_v49  ;;  %v7895_v42 = vmax.bf16 %v11570_v31, %v6539_v34  ;;  %v11575_v49 = vshrl.u32 %v6554_v41, 16  ;;  %v11576_v34 = vshrl.u32 %v6563_v26, 16 }
 0x136   :  { %v7900_v43 = vmax.bf16 %v11571_v50, %v6544_v35  ;;  %v7909_v15 = vmax.bf16 %v11574_v48, %v6549_v40  ;;  %v11577_v35 = vshrl.u32 %v6568_v27, 16  ;;  %v2061_v48 = vsel %vm7902_vm2, %v6665_v25, 4286644096 }
 0x137   :  { %11569 = vst [vmem:[#allocation199_spill] sm:$0xff] %v7890_v57  ;;  %v7914_v37 = vmax.bf16 %v11575_v49, %v6554_v41  ;;  %v7919_v31 = vmax.bf16 %v11576_v34, %v6563_v26  ;;  %v11578_v57 = vshrl.u32 %v6577_v24, 16  ;;  %v2060_v41 = vsel %vm7902_vm2, %v6609_v46, 4286644096 }
 0x138   :  { %v7924_v50 = vmax.bf16 %v11577_v35, %v6568_v27  ;;  %v11579_v26 = vshrl.u32 %v6586_v32, 16  ;;  %v2063_v27 = vsel %vm7902_vm2, %v6616_v33, 4286644096  ;;  %v2066_v46 = vsel %vm7902_vm2, %v6623_v55, 4286644096 }
 0x139   :  { %v7929_v40 = vmax.bf16 %v11578_v57, %v6577_v24  ;;  %v2064_v24 = vsel %vm7902_vm2, %v6672_v0, 4286644096  ;;  %v2067_v25 = vsel %vm7902_vm2, %v6679_v1, 4286644096  ;;  %v2070_v33 = vsel %vm7902_vm2, %v6686_v2, 4286644096 }
 0x13a   :  { %v7940_v49 = vmax.bf16 %v11579_v26, %v6586_v32  ;;  %v2069_v32 = vsel %vm7902_vm2, %v6630_v63, 4286644096  ;;  %v2072_v0 = vsel %vm7902_vm2, %v6637_v58, 4286644096  ;;  %v2073_v55 = vsel %vm7902_vm2, %v6693_v3, 4286644096 }
 0x13b   :  { %v2075_v1 = vsel %vm7902_vm2, %v6644_v54, 4286644096  ;;  %v5057_v34 = vmov 1935823168   ;;  %v7971_v63 = vmax.bf16 %v2061_v48, %v2060_v41  ;;  %v2076_v2 = vsel %vm7902_vm2, %v6700_v4, 4286644096 }
 0x13c   :  { %v7969_v35 = vunpack.c.l.s4 %v5057_v34  ;;  %v2078_v58 = vsel %vm7902_vm2, %v6651_v47, 4286644096  ;;  %v2079_v3 = vsel %vm7902_vm2, %v6707_v5, 4286644096  ;;  %v7982_v26 = vmax.bf16 %v2064_v24, %v2063_v27 }
 0x13d   :  { %v7984_v54 = vmax.bf16 %v2067_v25, %v2066_v46  ;;  %v2081_v41 = vsel %vm7902_vm2, %v6658_v45, 4286644096  ;;  %v2082_v4 = vsel %vm7902_vm2, %v6714_v6, 4286644096  ;;  %v7992_v48 = vmax.bf16 %v2070_v33, %v2069_v32 }
 0x13e   :  { %v7994_v34 = vmax.bf16 %v2073_v55, %v2072_v0  ;;  %v2084_v47 = vsel %vm7902_vm2, %v6721_v7, 4286644096  ;;  %v2085_v5 = vsel %vm7902_vm2, %v6775_v18, 4286644096  ;;  %v8002_v27 = vmax.bf16 %v2076_v2, %v2075_v1  ;;  %v11581_v55 = vld [vmem:[#allocation204_spill] sm:$0xff]  ;;  %v11582_v2 = vld [vmem:[#allocation206_spill] sm:$0xff] }
 0x13f   :  { %v8004_v24 = vmax.bf16 %v2079_v3, %v2078_v58  ;;  %v2087_v45 = vsel %vm7902_vm2, %v6728_v8, 4286644096  ;;  %v2088_v6 = vsel %vm7902_vm2, %v6780_v59, 4286644096  ;;  %v8012_v46 = vmax.bf16 %v2082_v4, %v2081_v41  ;;  %v11584_v3 = vld [vmem:[#allocation9_spill] sm:$0xff]  ;;  %v11585_v4 = vld [vmem:[#allocation2_spill] sm:$0xff] }
 0x140   :  { %v2090_v7 = vsel %vm7902_vm2, %v6735_v9, 4286644096  ;;  %v2091_v18 = vsel %vm7902_vm2, %v6785_v19, 4286644096  ;;  %v2093_v25 = vsel %vm7902_vm2, %v6742_v10, 4286644096  ;;  %v8023_v32 = vmax.bf16 %v2085_v5, %v2084_v47 }
 0x141   :  { %v2094_v59 = vsel %vm7902_vm2, %v6790_v16, 4286644096  ;;  %v2096_v8 = vsel %vm7902_vm2, %v6749_v11, 4286644096  ;;  %v2097_v9 = vsel %vm7902_vm2, %v6795_v28, 4286644096  ;;  %v8034_v33 = vmax.bf16 %v2088_v6, %v2087_v45 }
 0x142   :  { %v2099_v10 = vsel %vm7902_vm2, %v6756_v12, 4286644096  ;;  %v2100_v19 = vsel %vm7902_vm2, %v6800_v29, 4286644096  ;;  %v2102_v16 = vsel %vm7902_vm2, %v6763_v13, 4286644096  ;;  %v8045_v0 = vmax.bf16 %v2091_v18, %v2090_v7 }
 0x143   :  { %v11580_v11 = vld [vmem:[#allocation205_spill] sm:$0xff]  ;;  %v2105_v1 = vsel %vm7902_vm2, %v11581_v55, 4286644096  ;;  %v2106_v12 = vsel %vm7902_vm2, %v11582_v2, 4286644096  ;;  %v8056_v58 = vmax.bf16 %v2094_v59, %v2093_v25  ;;  %v11583_v29 = vld [vmem:[#allocation207_spill] sm:$0xff]  ;;  %v8067_v5 = vmax.bf16 %v2097_v9, %v2096_v8 }
 0x144   :  { %v2103_v28 = vsel %vm7902_vm2, %v11580_v11, 4286644096  ;;  %v2108_v13 = vsel %vm7902_vm2, %v11583_v29, 4286644096  ;;  %v2109_v41 = vsel %vm7902_vm2, %v11584_v3, 4286644096  ;;  %v8078_v11 = vmax.bf16 %v2100_v19, %v2099_v10 }
 0x145   :  { %v2111_v47 = vsel %vm7902_vm2, %v11585_v4, 4286644096  ;;  %v11586_v45 = vld [vmem:[#allocation10_spill] sm:$0xff]  ;;  %v11587_v7 = vld [vmem:[#allocation3_spill] sm:$0xff]  ;;  %v8080_v55 = vmax.bf16 %v2103_v28, %v2102_v16  ;;  %v11589_v2 = vld [vmem:[#allocation4_spill] sm:$0xff]  ;;  %v8088_v3 = vmax.bf16 %v2106_v12, %v2105_v1  ;;  %v8090_v4 = vmax.bf16 %v2109_v41, %v2108_v13 }
 0x146   :  { %v2112_v6 = vsel %vm7902_vm2, %v11586_v45, 4286644096  ;;  %v2114_v18 = vsel %vm7902_vm2, %v11587_v7, 4286644096  ;;  %v11588_v25 = vld [vmem:[#allocation11_spill] sm:$0xff]  ;;  %v11590_v9 = vld [vmem:[#allocation12_spill] sm:$0xff] }
 0x147   :  { %v2115_v59 = vsel %vm7902_vm2, %v11588_v25, 4286644096  ;;  %v2117_v8 = vsel %vm7902_vm2, %v11589_v2, 4286644096  ;;  %v2118_v29 = vsel %vm7902_vm2, %v11590_v9, 4286644096  ;;  %v8098_v16 = vmax.bf16 %v2112_v6, %v2111_v47 }
 0x148   :  { %11591 = vst [vmem:[#allocation200_spill] sm:$0xff] %v8088_v3  ;;  %11592 = vst [vmem:[#allocation201_spill] sm:$0xff] %v8090_v4  ;;  %v11593_v45 = vld [vmem:[#allocation5_spill] sm:$0xff]  ;;  %v8100_v28 = vmax.bf16 %v2115_v59, %v2114_v18  ;;  %v11597_v25 = vld [vmem:[#allocation6_spill] sm:$0xff]  ;;  %v8108_v13 = vmax.bf16 %v2118_v29, %v2117_v8 }
 0x149   :  { %v2120_v7 = vsel %vm7902_vm2, %v11593_v45, 4286644096  ;;  %v11594_v10 = vld [vmem:[#allocation13_spill] sm:$0xff]  ;;  %11595 = vst [vmem:[#allocation202_spill] sm:$0xff] %v8098_v16  ;;  %v2123_v2 = vsel %vm7902_vm2, %v11597_v25, 4286644096 }
 0x14a   :  { %v2121_v19 = vsel %vm7902_vm2, %v11594_v10, 4286644096  ;;  %11596 = vst [vmem:[#allocation203_spill] sm:$0xff] %v8100_v28  ;;  %v11598_v1 = vld [vmem:[#allocation14_spill] sm:$0xff]  ;;  %11599 = vst [vmem:[#allocation205_spill] sm:$0xff] %v8108_v13  ;;  %v11600_v41 = vld [vmem:[#allocation7_spill] sm:$0xff] }
 0x14b   :  { %v2124_v12 = vsel %vm7902_vm2, %v11598_v1, 4286644096  ;;  %v2126_v9 = vsel %vm7902_vm2, %v11600_v41, 4286644096  ;;  %v11601_v45 = vld [vmem:[#allocation15_spill] sm:$0xff]  ;;  %v11602_v6 = vld [vmem:[#allocation8_spill] sm:$0xff]  ;;  %v8119_v59 = vmax.bf16 %v2121_v19, %v2120_v7 }
 0x14c   :  { %v2127_v47 = vsel %vm7902_vm2, %v11601_v45, 4286644096  ;;  %v2129_v18 = vsel %vm7902_vm2, %v11602_v6, 4286644096  ;;  %v11604_v10 = vld [vmem:[#allocation16_spill] sm:$0xff]  ;;  %v11605_v8 = vld [vmem:[#allocation17_spill] sm:$0xff]  ;;  %v8130_v57 = vmax.bf16 %v2124_v12, %v2123_v2 }
 0x14d   :  { %11603 = vst [vmem:[#allocation204_spill] sm:$0xff] %v8119_v59  ;;  %v2130_v25 = vsel %vm7902_vm2, %v11604_v10, 4286644096  ;;  %v2132_v29 = vsel %vm7902_vm2, %v11605_v8, 4286644096  ;;  %v11606_v1 = vld [vmem:[#allocation25_spill] sm:$0xff]  ;;  %v8141_v13 = vmax.bf16 %v2127_v47, %v2126_v9 }
 0x14e   :  { %v2133_v41 = vsel %vm7902_vm2, %v11606_v1, 4286644096  ;;  %11607 = vst [vmem:[#allocation206_spill] sm:$0xff] %v8130_v57  ;;  %v11608_v45 = vld [vmem:[#allocation18_spill] sm:$0xff]  ;;  %v11610_v59 = vld [vmem:[#allocation19_spill] sm:$0xff]  ;;  %v11613_v2 = vld [vmem:[#allocation20_spill] sm:$0xff]  ;;  %v8152_v28 = vmax.bf16 %v2130_v25, %v2129_v18 }
 0x14f   :  { %v2135_v6 = vsel %vm7902_vm2, %v11608_v45, 4286644096  ;;  %v11609_v7 = vld [vmem:[#allocation26_spill] sm:$0xff]  ;;  %v2138_v10 = vsel %vm7902_vm2, %v11610_v59, 4286644096  ;;  %11611 = vst [vmem:[#allocation207_spill] sm:$0xff] %v8141_v13  ;;  %v8163_v16 = vmax.bf16 %v2133_v41, %v2132_v29 }
 0x150   :  { %v2136_v19 = vsel %vm7902_vm2, %v11609_v7, 4286644096  ;;  %v11612_v8 = vld [vmem:[#allocation27_spill] sm:$0xff]  ;;  %v2141_v12 = vsel %vm7902_vm2, %v11613_v2, 4286644096  ;;  %v11614_v57 = vld [vmem:[#allocation28_spill] sm:$0xff] }
 0x151   :  { %v2139_v1 = vsel %vm7902_vm2, %v11612_v8, 4286644096  ;;  %v2142_v45 = vsel %vm7902_vm2, %v11614_v57, 4286644096  ;;  %11615 = vst [vmem:[#allocation9_spill] sm:$0xff] %v8152_v28  ;;  %v11616_v7 = vld [vmem:[#allocation21_spill] sm:$0xff]  ;;  %v8174_v4 = vmax.bf16 %v2136_v19, %v2135_v6 }
 0x152   :  { %v2144_v59 = vsel %vm7902_vm2, %v11616_v7, 4286644096  ;;  %v11617_v9 = vld [vmem:[#allocation29_spill] sm:$0xff]  ;;  %v11618_v13 = vld [vmem:[#allocation22_spill] sm:$0xff]  ;;  %11619 = vst [vmem:[#allocation2_spill] sm:$0xff] %v8163_v16  ;;  %v11621_v18 = vld [vmem:[#allocation23_spill] sm:$0xff] }
 0x153   :  { %v2145_v47 = vsel %vm7902_vm2, %v11617_v9, 4286644096  ;;  %v2147_v8 = vsel %vm7902_vm2, %v11618_v13, 4286644096  ;;  %v11620_v2 = vld [vmem:[#allocation30_spill] sm:$0xff]  ;;  %v11622_v28 = vld [vmem:[#allocation31_spill] sm:$0xff]  ;;  %v8176_v9 = vmax.bf16 %v2139_v1, %v2138_v10 }
 0x154   :  { %v2148_v57 = vsel %vm7902_vm2, %v11620_v2, 4286644096  ;;  %v2150_v25 = vsel %vm7902_vm2, %v11621_v18, 4286644096  ;;  %v2151_v7 = vsel %vm7902_vm2, %v11622_v28, 4286644096  ;;  %v8184_v2 = vmax.bf16 %v2142_v45, %v2141_v12 }
 0x155   :  { %11623 = vst [vmem:[#allocation10_spill] sm:$0xff] %v8174_v4  ;;  %11624 = vst [vmem:[#allocation3_spill] sm:$0xff] %v8176_v9  ;;  %v11625_v3 = vld [vmem:[#allocation24_spill] sm:$0xff]  ;;  %v8186_v16 = vmax.bf16 %v2145_v47, %v2144_v59  ;;  %v11629_v18 = vld [vmem:[#allocation33_spill] sm:$0xff]  ;;  %v8194_v10 = vmax.bf16 %v2148_v57, %v2147_v8  ;;  %v8196_v1 = vmax.bf16 %v2151_v7, %v2150_v25 }
 0x156   :  { %v2153_v13 = vsel %vm7902_vm2, %v11625_v3, 4286644096  ;;  %v11626_v29 = vld [vmem:[#allocation32_spill] sm:$0xff]  ;;  %11627 = vst [vmem:[#allocation11_spill] sm:$0xff] %v8184_v2  ;;  %v2156_v28 = vsel %vm7902_vm2, %v11629_v18, 4286644096 }
 0x157   :  { %v2154_v41 = vsel %vm7902_vm2, %v11626_v29, 4286644096  ;;  %11628 = vst [vmem:[#allocation4_spill] sm:$0xff] %v8186_v16  ;;  %v11630_v6 = vld [vmem:[#allocation41_spill] sm:$0xff]  ;;  %11631 = vst [vmem:[#allocation12_spill] sm:$0xff] %v8194_v10  ;;  %v11633_v3 = vld [vmem:[#allocation34_spill] sm:$0xff] }
 0x158   :  { %v2157_v19 = vsel %vm7902_vm2, %v11630_v6, 4286644096  ;;  %11632 = vst [vmem:[#allocation5_spill] sm:$0xff] %v8196_v1  ;;  %v2159_v29 = vsel %vm7902_vm2, %v11633_v3, 4286644096  ;;  %v11634_v12 = vld [vmem:[#allocation42_spill] sm:$0xff]  ;;  %v8204_v59 = vmax.bf16 %v2154_v41, %v2153_v13 }
 0x159   :  { %v2160_v45 = vsel %vm7902_vm2, %v11634_v12, 4286644096  ;;  %v11636_v47 = vld [vmem:[#allocation35_spill] sm:$0xff]  ;;  %v11638_v57 = vld [vmem:[#allocation36_spill] sm:$0xff]  ;;  %v8215_v7 = vmax.bf16 %v2157_v19, %v2156_v28  ;;  %v11641_v13 = vld [vmem:[#allocation37_spill] sm:$0xff] }
 0x15a   :  { %11635 = vst [vmem:[#allocation13_spill] sm:$0xff] %v8204_v59  ;;  %v2162_v18 = vsel %vm7902_vm2, %v11636_v47, 4286644096  ;;  %v11637_v16 = vld [vmem:[#allocation43_spill] sm:$0xff]  ;;  %v2165_v25 = vsel %vm7902_vm2, %v11638_v57, 4286644096  ;;  %v8226_v59 = vmax.bf16 %v2160_v45, %v2159_v29 }
 0x15b   :  { %v2163_v8 = vsel %vm7902_vm2, %v11637_v16, 4286644096  ;;  %11639 = vst [vmem:[#allocation6_spill] sm:$0xff] %v8215_v7  ;;  %v11640_v6 = vld [vmem:[#allocation44_spill] sm:$0xff]  ;;  %v2168_v41 = vsel %vm7902_vm2, %v11641_v13, 4286644096 }
 0x15c   :  { %v2166_v3 = vsel %vm7902_vm2, %v11640_v6, 4286644096  ;;  %v11642_v12 = vld [vmem:[#allocation45_spill] sm:$0xff]  ;;  %11643 = vst [vmem:[#allocation14_spill] sm:$0xff] %v8226_v59  ;;  %v11644_v16 = vld [vmem:[#allocation38_spill] sm:$0xff]  ;;  %v11646_v7 = vld [vmem:[#allocation39_spill] sm:$0xff]  ;;  %v8237_v1 = vmax.bf16 %v2163_v8, %v2162_v18 }
 0x15d   :  { %v2169_v47 = vsel %vm7902_vm2, %v11642_v12, 4286644096  ;;  %v2171_v57 = vsel %vm7902_vm2, %v11644_v16, 4286644096  ;;  %v11645_v28 = vld [vmem:[#allocation46_spill] sm:$0xff]  ;;  %v11648_v13 = vld [vmem:[#allocation47_spill] sm:$0xff]  ;;  %v8248_v10 = vmax.bf16 %v2166_v3, %v2165_v25 }
 0x15e   :  { %v2172_v19 = vsel %vm7902_vm2, %v11645_v28, 4286644096  ;;  %v2174_v6 = vsel %vm7902_vm2, %v11646_v7, 4286644096  ;;  %11647 = vst [vmem:[#allocation7_spill] sm:$0xff] %v8237_v1  ;;  %v11649_v29 = vld [vmem:[#allocation40_spill] sm:$0xff]  ;;  %v8259_v2 = vmax.bf16 %v2169_v47, %v2168_v41 }
 0x15f   :  { %v2175_v12 = vsel %vm7902_vm2, %v11648_v13, 4286644096  ;;  %v2177_v45 = vsel %vm7902_vm2, %v11649_v29, 4286644096  ;;  %v11650_v59 = vld [vmem:[#allocation48_spill] sm:$0xff]  ;;  %11651 = vst [vmem:[#allocation15_spill] sm:$0xff] %v8248_v10  ;;  %v8270_v9 = vmax.bf16 %v2172_v19, %v2171_v57 }
 0x160   :  { %v2178_v16 = vsel %vm7902_vm2, %v11650_v59, 4286644096  ;;  %v11652_v28 = vld [vmem:[#allocation49_spill] sm:$0xff]  ;;  %v11654_v1 = vld [vmem:[#allocation50_spill] sm:$0xff]  ;;  %11655 = vst [vmem:[#allocation8_spill] sm:$0xff] %v8259_v2  ;;  %v11657_v25 = vld [vmem:[#allocation51_spill] sm:$0xff] }
 0x161   :  { %v2180_v7 = vsel %vm7902_vm2, %v11652_v28, 4286644096  ;;  %v11653_v18 = vld [vmem:[#allocation57_spill] sm:$0xff]  ;;  %v2183_v13 = vsel %vm7902_vm2, %v11654_v1, 4286644096  ;;  %v11656_v29 = vld [vmem:[#allocation58_spill] sm:$0xff] }
 0x162   :  { %v2181_v8 = vsel %vm7902_vm2, %v11653_v18, 4286644096  ;;  %v2184_v59 = vsel %vm7902_vm2, %v11656_v29, 4286644096  ;;  %v2186_v3 = vsel %vm7902_vm2, %v11657_v25, 4286644096  ;;  %v8272_v18 = vmax.bf16 %v2175_v12, %v2174_v6 }
 0x163   :  { %v11658_v10 = vld [vmem:[#allocation59_spill] sm:$0xff]  ;;  %11659 = vst [vmem:[#allocation16_spill] sm:$0xff] %v8270_v9  ;;  %v11661_v4 = vld [vmem:[#allocation52_spill] sm:$0xff]  ;;  %v8280_v29 = vmax.bf16 %v2178_v16, %v2177_v45  ;;  %v8282_v2 = vmax.bf16 %v2181_v8, %v2180_v7  ;;  %v11665_v25 = vld [vmem:[#allocation53_spill] sm:$0xff]  ;;  %v8290_v6 = vmax.bf16 %v2184_v59, %v2183_v13 }
 0x164   :  { %v2187_v28 = vsel %vm7902_vm2, %v11658_v10, 4286644096  ;;  %11660 = vst [vmem:[#allocation17_spill] sm:$0xff] %v8272_v18  ;;  %v2189_v1 = vsel %vm7902_vm2, %v11661_v4, 4286644096  ;;  %v11662_v41 = vld [vmem:[#allocation60_spill] sm:$0xff] }
 0x165   :  { %v2190_v47 = vsel %vm7902_vm2, %v11662_v41, 4286644096  ;;  %11663 = vst [vmem:[#allocation25_spill] sm:$0xff] %v8280_v29  ;;  %11664 = vst [vmem:[#allocation18_spill] sm:$0xff] %v8282_v2  ;;  %v2192_v10 = vsel %vm7902_vm2, %v11665_v25, 4286644096  ;;  %v8292_v12 = vmax.bf16 %v2187_v28, %v2186_v3 }
 0x166   :  { %v11666_v57 = vld [vmem:[#allocation61_spill] sm:$0xff]  ;;  %11667 = vst [vmem:[#allocation26_spill] sm:$0xff] %v8290_v6  ;;  %v11669_v4 = vld [vmem:[#allocation54_spill] sm:$0xff]  ;;  %v8300_v7 = vmax.bf16 %v2190_v47, %v2189_v1  ;;  %v11672_v8 = vld [vmem:[#allocation55_spill] sm:$0xff] }
 0x167   :  { %v2193_v19 = vsel %vm7902_vm2, %v11666_v57, 4286644096  ;;  %11668 = vst [vmem:[#allocation19_spill] sm:$0xff] %v8292_v12  ;;  %v2195_v41 = vsel %vm7902_vm2, %v11669_v4, 4286644096  ;;  %v11670_v45 = vld [vmem:[#allocation62_spill] sm:$0xff] }
 0x168   :  { %v2196_v16 = vsel %vm7902_vm2, %v11670_v45, 4286644096  ;;  %11671 = vst [vmem:[#allocation27_spill] sm:$0xff] %v8300_v7  ;;  %v2198_v25 = vsel %vm7902_vm2, %v11672_v8, 4286644096  ;;  %v11673_v2 = vld [vmem:[#allocation63_spill] sm:$0xff]  ;;  %v8311_v28 = vmax.bf16 %v2193_v19, %v2192_v10 }
 0x169   :  { %v2199_v13 = vsel %vm7902_vm2, %v11673_v2, 4286644096  ;;  %v11674_v59 = vld [vmem:[#allocation56_spill] sm:$0xff]  ;;  %v11677_v1 = vld [vmem:[#allocation65_spill] sm:$0xff]  ;;  %v8322_v7 = vmax.bf16 %v2196_v16, %v2195_v41  ;;  %v11680_v2 = vld [vmem:[#allocation66_spill] sm:$0xff] }
 0x16a   :  { %v2201_v3 = vsel %vm7902_vm2, %v11674_v59, 4286644096  ;;  %11675 = vst [vmem:[#allocation20_spill] sm:$0xff] %v8311_v28  ;;  %v11676_v57 = vld [vmem:[#allocation64_spill] sm:$0xff]  ;;  %v2204_v47 = vsel %vm7902_vm2, %v11677_v1, 4286644096  ;;  %v8333_v12 = vmax.bf16 %v2199_v13, %v2198_v25 }
 0x16b   :  { %v2202_v4 = vsel %vm7902_vm2, %v11676_v57, 4286644096  ;;  %v11678_v45 = vld [vmem:[#allocation73_spill] sm:$0xff]  ;;  %11679 = vst [vmem:[#allocation28_spill] sm:$0xff] %v8322_v7  ;;  %v2207_v59 = vsel %vm7902_vm2, %v11680_v2, 4286644096 }
 0x16c   :  { %v2205_v8 = vsel %vm7902_vm2, %v11678_v45, 4286644096  ;;  %v11681_v10 = vld [vmem:[#allocation74_spill] sm:$0xff]  ;;  %v11682_v28 = vld [vmem:[#allocation67_spill] sm:$0xff]  ;;  %11683 = vst [vmem:[#allocation21_spill] sm:$0xff] %v8333_v12  ;;  %v11685_v41 = vld [vmem:[#allocation68_spill] sm:$0xff]  ;;  %v8344_v6 = vmax.bf16 %v2202_v4, %v2201_v3 }
 0x16d   :  { %v2208_v19 = vsel %vm7902_vm2, %v11681_v10, 4286644096  ;;  %v2210_v57 = vsel %vm7902_vm2, %v11682_v28, 4286644096  ;;  %v11684_v1 = vld [vmem:[#allocation75_spill] sm:$0xff]  ;;  %v11686_v7 = vld [vmem:[#allocation76_spill] sm:$0xff]  ;;  %v8355_v29 = vmax.bf16 %v2205_v8, %v2204_v47 }
 0x16e   :  { %v2211_v45 = vsel %vm7902_vm2, %v11684_v1, 4286644096  ;;  %v2213_v16 = vsel %vm7902_vm2, %v11685_v41, 4286644096  ;;  %v2214_v2 = vsel %vm7902_vm2, %v11686_v7, 4286644096  ;;  %v8366_v18 = vmax.bf16 %v2208_v19, %v2207_v59 }
 0x16f   :  { %11687 = vst [vmem:[#allocation29_spill] sm:$0xff] %v8344_v6  ;;  %v11688_v10 = vld [vmem:[#allocation69_spill] sm:$0xff]  ;;  %v11690_v12 = vld [vmem:[#allocation70_spill] sm:$0xff]  ;;  %11691 = vst [vmem:[#allocation22_spill] sm:$0xff] %v8355_v29 }
 0x170   :  { %v2216_v28 = vsel %vm7902_vm2, %v11688_v10, 4286644096  ;;  %v11689_v25 = vld [vmem:[#allocation77_spill] sm:$0xff]  ;;  %v2219_v1 = vsel %vm7902_vm2, %v11690_v12, 4286644096  ;;  %v11692_v41 = vld [vmem:[#allocation78_spill] sm:$0xff] }
 0x171   :  { %v2217_v13 = vsel %vm7902_vm2, %v11689_v25, 4286644096  ;;  %v2220_v7 = vsel %vm7902_vm2, %v11692_v41, 4286644096  ;;  %v11693_v3 = vld [vmem:[#allocation71_spill] sm:$0xff]  ;;  %11695 = vst [vmem:[#allocation30_spill] sm:$0xff] %v8366_v18  ;;  %v8368_v25 = vmax.bf16 %v2211_v45, %v2210_v57  ;;  %v8376_v41 = vmax.bf16 %v2214_v2, %v2213_v16 }
 0x172   :  { %v2222_v4 = vsel %vm7902_vm2, %v11693_v3, 4286644096  ;;  %v11694_v6 = vld [vmem:[#allocation79_spill] sm:$0xff]  ;;  %v11697_v9 = vld [vmem:[#allocation72_spill] sm:$0xff]  ;;  %v8378_v29 = vmax.bf16 %v2217_v13, %v2216_v28  ;;  %v11701_v3 = vld [vmem:[#allocation81_spill] sm:$0xff]  ;;  %v8386_v57 = vmax.bf16 %v2220_v7, %v2219_v1 }
 0x173   :  { %v2223_v10 = vsel %vm7902_vm2, %v11694_v6, 4286644096  ;;  %11696 = vst [vmem:[#allocation23_spill] sm:$0xff] %v8368_v25  ;;  %v2225_v12 = vsel %vm7902_vm2, %v11697_v9, 4286644096  ;;  %v11698_v47 = vld [vmem:[#allocation80_spill] sm:$0xff] }
 0x174   :  { %v2226_v8 = vsel %vm7902_vm2, %v11698_v47, 4286644096  ;;  %11699 = vst [vmem:[#allocation31_spill] sm:$0xff] %v8376_v41  ;;  %11700 = vst [vmem:[#allocation24_spill] sm:$0xff] %v8378_v29  ;;  %v2228_v6 = vsel %vm7902_vm2, %v11701_v3, 4286644096  ;;  %v8388_v45 = vmax.bf16 %v2223_v10, %v2222_v4 }
 0x175   :  { %v11702_v59 = vld [vmem:[#allocation89_spill] sm:$0xff]  ;;  %11703 = vst [vmem:[#allocation32_spill] sm:$0xff] %v8386_v57  ;;  %v11705_v9 = vld [vmem:[#allocation82_spill] sm:$0xff]  ;;  %v8396_v28 = vmax.bf16 %v2226_v8, %v2225_v12  ;;  %v11708_v13 = vld [vmem:[#allocation83_spill] sm:$0xff] }
 0x176   :  { %v2229_v19 = vsel %vm7902_vm2, %v11702_v59, 4286644096  ;;  %11704 = vst [vmem:[#allocation33_spill] sm:$0xff] %v8388_v45  ;;  %v2231_v47 = vsel %vm7902_vm2, %v11705_v9, 4286644096  ;;  %v11706_v16 = vld [vmem:[#allocation90_spill] sm:$0xff] }
 0x177   :  { %v2232_v2 = vsel %vm7902_vm2, %v11706_v16, 4286644096  ;;  %11707 = vst [vmem:[#allocation41_spill] sm:$0xff] %v8396_v28  ;;  %v2234_v3 = vsel %vm7902_vm2, %v11708_v13, 4286644096  ;;  %v11709_v29 = vld [vmem:[#allocation91_spill] sm:$0xff]  ;;  %v8407_v10 = vmax.bf16 %v2229_v19, %v2228_v6 }
 0x178   :  { %v2235_v1 = vsel %vm7902_vm2, %v11709_v29, 4286644096  ;;  %v11710_v7 = vld [vmem:[#allocation84_spill] sm:$0xff]  ;;  %v11713_v12 = vld [vmem:[#allocation85_spill] sm:$0xff]  ;;  %v8418_v28 = vmax.bf16 %v2232_v2, %v2231_v47  ;;  %v11716_v29 = vld [vmem:[#allocation86_spill] sm:$0xff] }
 0x179   :  { %v2237_v4 = vsel %vm7902_vm2, %v11710_v7, 4286644096  ;;  %11711 = vst [vmem:[#allocation34_spill] sm:$0xff] %v8407_v10  ;;  %v11712_v59 = vld [vmem:[#allocation92_spill] sm:$0xff]  ;;  %v2240_v8 = vsel %vm7902_vm2, %v11713_v12, 4286644096  ;;  %v8429_v45 = vmax.bf16 %v2235_v1, %v2234_v3 }
 0x17a   :  { %v2238_v9 = vsel %vm7902_vm2, %v11712_v59, 4286644096  ;;  %v11714_v16 = vld [vmem:[#allocation93_spill] sm:$0xff]  ;;  %11715 = vst [vmem:[#allocation42_spill] sm:$0xff] %v8418_v28  ;;  %v2243_v7 = vsel %vm7902_vm2, %v11716_v29, 4286644096 }
 0x17b   :  { %v2241_v13 = vsel %vm7902_vm2, %v11714_v16, 4286644096  ;;  %v11717_v6 = vld [vmem:[#allocation94_spill] sm:$0xff]  ;;  %v11718_v10 = vld [vmem:[#allocation87_spill] sm:$0xff]  ;;  %11719 = vst [vmem:[#allocation35_spill] sm:$0xff] %v8429_v45  ;;  %v11721_v47 = vld [vmem:[#allocation88_spill] sm:$0xff]  ;;  %v8440_v57 = vmax.bf16 %v2238_v9, %v2237_v4 }
 0x17c   :  { %v2244_v19 = vsel %vm7902_vm2, %v11717_v6, 4286644096  ;;  %v2246_v59 = vsel %vm7902_vm2, %v11718_v10, 4286644096  ;;  %v11720_v12 = vld [vmem:[#allocation95_spill] sm:$0xff]  ;;  %v11722_v28 = vld [vmem:[#allocation96_spill] sm:$0xff]  ;;  %v8451_v41 = vmax.bf16 %v2241_v13, %v2240_v8 }
 0x17d   :  { %v2247_v16 = vsel %vm7902_vm2, %v11720_v12, 4286644096  ;;  %v2249_v2 = vsel %vm7902_vm2, %v11721_v47, 4286644096  ;;  %v2250_v29 = vsel %vm7902_vm2, %v11722_v28, 4286644096  ;;  %v8462_v25 = vmax.bf16 %v2244_v19, %v2243_v7 }
 0x17e   :  { %11723 = vst [vmem:[#allocation43_spill] sm:$0xff] %v8440_v57  ;;  %v11724_v6 = vld [vmem:[#allocation97_spill] sm:$0xff]  ;;  %v11726_v45 = vld [vmem:[#allocation98_spill] sm:$0xff]  ;;  %11727 = vst [vmem:[#allocation36_spill] sm:$0xff] %v8451_v41 }
 0x17f   :  { %v2252_v10 = vsel %vm7902_vm2, %v11724_v6, 4286644096  ;;  %v11725_v3 = vld [vmem:[#allocation105_spill] sm:$0xff]  ;;  %v2255_v12 = vsel %vm7902_vm2, %v11726_v45, 4286644096  ;;  %v11728_v47 = vld [vmem:[#allocation106_spill] sm:$0xff] }
 0x180   :  { %v2253_v1 = vsel %vm7902_vm2, %v11725_v3, 4286644096  ;;  %v2256_v28 = vsel %vm7902_vm2, %v11728_v47, 4286644096  ;;  %v11729_v4 = vld [vmem:[#allocation99_spill] sm:$0xff]  ;;  %11731 = vst [vmem:[#allocation44_spill] sm:$0xff] %v8462_v25  ;;  %v8464_v3 = vmax.bf16 %v2247_v16, %v2246_v59  ;;  %v8472_v47 = vmax.bf16 %v2250_v29, %v2249_v2 }
 0x181   :  { %v2258_v9 = vsel %vm7902_vm2, %v11729_v4, 4286644096  ;;  %v11730_v57 = vld [vmem:[#allocation107_spill] sm:$0xff]  ;;  %v11733_v18 = vld [vmem:[#allocation100_spill] sm:$0xff]  ;;  %v8474_v41 = vmax.bf16 %v2253_v1, %v2252_v10  ;;  %v11737_v4 = vld [vmem:[#allocation101_spill] sm:$0xff]  ;;  %v8482_v59 = vmax.bf16 %v2256_v28, %v2255_v12 }
 0x182   :  { %v2259_v6 = vsel %vm7902_vm2, %v11730_v57, 4286644096  ;;  %11732 = vst [vmem:[#allocation37_spill] sm:$0xff] %v8464_v3  ;;  %v2261_v45 = vsel %vm7902_vm2, %v11733_v18, 4286644096  ;;  %v11734_v8 = vld [vmem:[#allocation108_spill] sm:$0xff] }
 0x183   :  { %v2262_v13 = vsel %vm7902_vm2, %v11734_v8, 4286644096  ;;  %11735 = vst [vmem:[#allocation45_spill] sm:$0xff] %v8472_v47  ;;  %11736 = vst [vmem:[#allocation38_spill] sm:$0xff] %v8474_v41  ;;  %v2264_v57 = vsel %vm7902_vm2, %v11737_v4, 4286644096  ;;  %v8484_v16 = vmax.bf16 %v2259_v6, %v2258_v9 }
 0x184   :  { %v11738_v7 = vld [vmem:[#allocation109_spill] sm:$0xff]  ;;  %11739 = vst [vmem:[#allocation46_spill] sm:$0xff] %v8482_v59  ;;  %v11741_v18 = vld [vmem:[#allocation102_spill] sm:$0xff]  ;;  %v8492_v10 = vmax.bf16 %v2262_v13, %v2261_v45  ;;  %v11744_v1 = vld [vmem:[#allocation103_spill] sm:$0xff] }
 0x185   :  { %v2265_v19 = vsel %vm7902_vm2, %v11738_v7, 4286644096  ;;  %11740 = vst [vmem:[#allocation39_spill] sm:$0xff] %v8484_v16  ;;  %v2267_v8 = vsel %vm7902_vm2, %v11741_v18, 4286644096  ;;  %v11742_v2 = vld [vmem:[#allocation110_spill] sm:$0xff] }
 0x186   :  { %v2268_v29 = vsel %vm7902_vm2, %v11742_v2, 4286644096  ;;  %11743 = vst [vmem:[#allocation47_spill] sm:$0xff] %v8492_v10  ;;  %v2270_v4 = vsel %vm7902_vm2, %v11744_v1, 4286644096  ;;  %v11745_v41 = vld [vmem:[#allocation111_spill] sm:$0xff]  ;;  %v8503_v6 = vmax.bf16 %v2265_v19, %v2264_v57 }
 0x187   :  { %v2271_v12 = vsel %vm7902_vm2, %v11745_v41, 4286644096  ;;  %v11746_v28 = vld [vmem:[#allocation104_spill] sm:$0xff]  ;;  %v11749_v45 = vld [vmem:[#allocation113_spill] sm:$0xff]  ;;  %v8514_v10 = vmax.bf16 %v2268_v29, %v2267_v8  ;;  %v11752_v41 = vld [vmem:[#allocation114_spill] sm:$0xff] }
 0x188   :  { %v2273_v9 = vsel %vm7902_vm2, %v11746_v28, 4286644096  ;;  %11747 = vst [vmem:[#allocation40_spill] sm:$0xff] %v8503_v6  ;;  %v11748_v7 = vld [vmem:[#allocation112_spill] sm:$0xff]  ;;  %v2276_v13 = vsel %vm7902_vm2, %v11749_v45, 4286644096  ;;  %v8525_v16 = vmax.bf16 %v2271_v12, %v2270_v4 }
 0x189   :  { %v2274_v18 = vsel %vm7902_vm2, %v11748_v7, 4286644096  ;;  %v11750_v2 = vld [vmem:[#allocation121_spill] sm:$0xff]  ;;  %11751 = vst [vmem:[#allocation48_spill] sm:$0xff] %v8514_v10  ;;  %v2279_v28 = vsel %vm7902_vm2, %v11752_v41, 4286644096 }
 0x18a   :  { %v2277_v1 = vsel %vm7902_vm2, %v11750_v2, 4286644096  ;;  %v11753_v57 = vld [vmem:[#allocation122_spill] sm:$0xff]  ;;  %v11754_v6 = vld [vmem:[#allocation115_spill] sm:$0xff]  ;;  %11755 = vst [vmem:[#allocation49_spill] sm:$0xff] %v8525_v16  ;;  %v11757_v8 = vld [vmem:[#allocation116_spill] sm:$0xff]  ;;  %v8536_v59 = vmax.bf16 %v2274_v18, %v2273_v9 }
 0x18b   :  { %v2280_v19 = vsel %vm7902_vm2, %v11753_v57, 4286644096  ;;  %v2282_v7 = vsel %vm7902_vm2, %v11754_v6, 4286644096  ;;  %v11756_v45 = vld [vmem:[#allocation123_spill] sm:$0xff]  ;;  %v11758_v10 = vld [vmem:[#allocation124_spill] sm:$0xff]  ;;  %v8547_v47 = vmax.bf16 %v2277_v1, %v2276_v13 }
 0x18c   :  { %v2283_v2 = vsel %vm7902_vm2, %v11756_v45, 4286644096  ;;  %v2285_v29 = vsel %vm7902_vm2, %v11757_v8, 4286644096  ;;  %v2286_v41 = vsel %vm7902_vm2, %v11758_v10, 4286644096  ;;  %v8558_v3 = vmax.bf16 %v2280_v19, %v2279_v28 }
 0x18d   :  { %11759 = vst [vmem:[#allocation57_spill] sm:$0xff] %v8536_v59  ;;  %v11760_v57 = vld [vmem:[#allocation117_spill] sm:$0xff]  ;;  %v11762_v16 = vld [vmem:[#allocation118_spill] sm:$0xff]  ;;  %11763 = vst [vmem:[#allocation50_spill] sm:$0xff] %v8547_v47 }
 0x18e   :  { %v2288_v6 = vsel %vm7902_vm2, %v11760_v57, 4286644096  ;;  %v11761_v4 = vld [vmem:[#allocation125_spill] sm:$0xff]  ;;  %v2291_v45 = vsel %vm7902_vm2, %v11762_v16, 4286644096  ;;  %v11764_v8 = vld [vmem:[#allocation126_spill] sm:$0xff] }
 0x18f   :  { %v2289_v12 = vsel %vm7902_vm2, %v11761_v4, 4286644096  ;;  %v2292_v10 = vsel %vm7902_vm2, %v11764_v8, 4286644096  ;;  %v11765_v9 = vld [vmem:[#allocation119_spill] sm:$0xff]  ;;  %11767 = vst [vmem:[#allocation58_spill] sm:$0xff] %v8558_v3  ;;  %v8560_v4 = vmax.bf16 %v2283_v2, %v2282_v7  ;;  %v8568_v8 = vmax.bf16 %v2286_v41, %v2285_v29 }
 0x190   :  { %v2294_v18 = vsel %vm7902_vm2, %v11765_v9, 4286644096  ;;  %v11766_v59 = vld [vmem:[#allocation127_spill] sm:$0xff]  ;;  %v11769_v25 = vld [vmem:[#allocation120_spill] sm:$0xff]  ;;  %v8570_v47 = vmax.bf16 %v2289_v12, %v2288_v6  ;;  %v11773_v9 = vld [vmem:[#allocation129_spill] sm:$0xff]  ;;  %v8578_v7 = vmax.bf16 %v2292_v10, %v2291_v45 }
 0x191   :  { %v2295_v57 = vsel %vm7902_vm2, %v11766_v59, 4286644096  ;;  %11768 = vst [vmem:[#allocation51_spill] sm:$0xff] %v8560_v4  ;;  %v2297_v16 = vsel %vm7902_vm2, %v11769_v25, 4286644096  ;;  %v11770_v13 = vld [vmem:[#allocation128_spill] sm:$0xff] }
 0x192   :  { %v2298_v1 = vsel %vm7902_vm2, %v11770_v13, 4286644096  ;;  %11771 = vst [vmem:[#allocation59_spill] sm:$0xff] %v8568_v8  ;;  %11772 = vst [vmem:[#allocation52_spill] sm:$0xff] %v8570_v47  ;;  %v2300_v59 = vsel %vm7902_vm2, %v11773_v9, 4286644096  ;;  %v8580_v2 = vmax.bf16 %v2295_v57, %v2294_v18 }
 0x193   :  { %v11774_v28 = vld [vmem:[#allocation137_spill] sm:$0xff]  ;;  %11775 = vst [vmem:[#allocation60_spill] sm:$0xff] %v8578_v7  ;;  %v11777_v25 = vld [vmem:[#allocation130_spill] sm:$0xff]  ;;  %v8588_v6 = vmax.bf16 %v2298_v1, %v2297_v16  ;;  %v11780_v12 = vld [vmem:[#allocation131_spill] sm:$0xff] }
 0x194   :  { %v2301_v19 = vsel %vm7902_vm2, %v11774_v28, 4286644096  ;;  %11776 = vst [vmem:[#allocation53_spill] sm:$0xff] %v8580_v2  ;;  %v2303_v13 = vsel %vm7902_vm2, %v11777_v25, 4286644096  ;;  %v11778_v29 = vld [vmem:[#allocation138_spill] sm:$0xff] }
 0x195   :  { %v2304_v41 = vsel %vm7902_vm2, %v11778_v29, 4286644096  ;;  %11779 = vst [vmem:[#allocation61_spill] sm:$0xff] %v8588_v6  ;;  %v2306_v9 = vsel %vm7902_vm2, %v11780_v12, 4286644096  ;;  %v11781_v47 = vld [vmem:[#allocation139_spill] sm:$0xff]  ;;  %v8599_v57 = vmax.bf16 %v2301_v19, %v2300_v59 }
 0x196   :  { %v2307_v45 = vsel %vm7902_vm2, %v11781_v47, 4286644096  ;;  %v11782_v10 = vld [vmem:[#allocation132_spill] sm:$0xff]  ;;  %v11785_v16 = vld [vmem:[#allocation133_spill] sm:$0xff]  ;;  %v8610_v6 = vmax.bf16 %v2304_v41, %v2303_v13  ;;  %v11788_v47 = vld [vmem:[#allocation134_spill] sm:$0xff] }
 0x197   :  { %v2309_v18 = vsel %vm7902_vm2, %v11782_v10, 4286644096  ;;  %11783 = vst [vmem:[#allocation54_spill] sm:$0xff] %v8599_v57  ;;  %v11784_v28 = vld [vmem:[#allocation140_spill] sm:$0xff]  ;;  %v2312_v1 = vsel %vm7902_vm2, %v11785_v16, 4286644096  ;;  %v8621_v2 = vmax.bf16 %v2307_v45, %v2306_v9 }
 0x198   :  { %v2310_v25 = vsel %vm7902_vm2, %v11784_v28, 4286644096  ;;  %v11786_v29 = vld [vmem:[#allocation141_spill] sm:$0xff]  ;;  %11787 = vst [vmem:[#allocation62_spill] sm:$0xff] %v8610_v6  ;;  %v2315_v10 = vsel %vm7902_vm2, %v11788_v47, 4286644096 }
 0x199   :  { %v2313_v12 = vsel %vm7902_vm2, %v11786_v29, 4286644096  ;;  %v11789_v59 = vld [vmem:[#allocation142_spill] sm:$0xff]  ;;  %v11790_v57 = vld [vmem:[#allocation135_spill] sm:$0xff]  ;;  %11791 = vst [vmem:[#allocation55_spill] sm:$0xff] %v8621_v2  ;;  %v11793_v13 = vld [vmem:[#allocation136_spill] sm:$0xff]  ;;  %v8632_v7 = vmax.bf16 %v2310_v25, %v2309_v18 }
 0x19a   :  { %v2316_v19 = vsel %vm7902_vm2, %v11789_v59, 4286644096  ;;  %v2318_v28 = vsel %vm7902_vm2, %v11790_v57, 4286644096  ;;  %v11792_v16 = vld [vmem:[#allocation143_spill] sm:$0xff]  ;;  %v11794_v6 = vld [vmem:[#allocation144_spill] sm:$0xff]  ;;  %v8643_v8 = vmax.bf16 %v2313_v12, %v2312_v1 }
 0x19b   :  { %v2319_v29 = vsel %vm7902_vm2, %v11792_v16, 4286644096  ;;  %v2321_v41 = vsel %vm7902_vm2, %v11793_v13, 4286644096  ;;  %v2322_v47 = vsel %vm7902_vm2, %v11794_v6, 4286644096  ;;  %v8654_v4 = vmax.bf16 %v2316_v19, %v2315_v10 }
 0x19c   :  { %11795 = vst [vmem:[#allocation63_spill] sm:$0xff] %v8632_v7  ;;  %v11796_v59 = vld [vmem:[#allocation145_spill] sm:$0xff]  ;;  %v11798_v2 = vld [vmem:[#allocation146_spill] sm:$0xff]  ;;  %11799 = vst [vmem:[#allocation56_spill] sm:$0xff] %v8643_v8 }
 0x19d   :  { %v2324_v57 = vsel %vm7902_vm2, %v11796_v59, 4286644096  ;;  %v11797_v9 = vld [vmem:[#allocation153_spill] sm:$0xff]  ;;  %v2327_v16 = vsel %vm7902_vm2, %v11798_v2, 4286644096  ;;  %v11800_v13 = vld [vmem:[#allocation154_spill] sm:$0xff] }
 0x19e   :  { %v2325_v45 = vsel %vm7902_vm2, %v11797_v9, 4286644096  ;;  %v2328_v6 = vsel %vm7902_vm2, %v11800_v13, 4286644096  ;;  %v11801_v18 = vld [vmem:[#allocation147_spill] sm:$0xff]  ;;  %11803 = vst [vmem:[#allocation64_spill] sm:$0xff] %v8654_v4  ;;  %v8656_v9 = vmax.bf16 %v2319_v29, %v2318_v28  ;;  %v8664_v13 = vmax.bf16 %v2322_v47, %v2321_v41 }
 0x19f   :  { %v2330_v25 = vsel %vm7902_vm2, %v11801_v18, 4286644096  ;;  %v11802_v7 = vld [vmem:[#allocation155_spill] sm:$0xff]  ;;  %v11805_v3 = vld [vmem:[#allocation148_spill] sm:$0xff]  ;;  %v8666_v8 = vmax.bf16 %v2325_v45, %v2324_v57  ;;  %v11809_v18 = vld [vmem:[#allocation149_spill] sm:$0xff]  ;;  %v8674_v28 = vmax.bf16 %v2328_v6, %v2327_v16 }
 0x1a0   :  { %v2331_v59 = vsel %vm7902_vm2, %v11802_v7, 4286644096  ;;  %11804 = vst [vmem:[#allocation65_spill] sm:$0xff] %v8656_v9  ;;  %v2333_v2 = vsel %vm7902_vm2, %v11805_v3, 4286644096  ;;  %v11806_v1 = vld [vmem:[#allocation156_spill] sm:$0xff] }
 0x1a1   :  { %v2334_v12 = vsel %vm7902_vm2, %v11806_v1, 4286644096  ;;  %11807 = vst [vmem:[#allocation73_spill] sm:$0xff] %v8664_v13  ;;  %11808 = vst [vmem:[#allocation66_spill] sm:$0xff] %v8666_v8  ;;  %v2336_v7 = vsel %vm7902_vm2, %v11809_v18, 4286644096  ;;  %v8676_v29 = vmax.bf16 %v2331_v59, %v2330_v25 }
 0x1a2   :  { %v11810_v10 = vld [vmem:[#allocation157_spill] sm:$0xff]  ;;  %11811 = vst [vmem:[#allocation74_spill] sm:$0xff] %v8674_v28  ;;  %v11813_v3 = vld [vmem:[#allocation150_spill] sm:$0xff]  ;;  %v8684_v57 = vmax.bf16 %v2334_v12, %v2333_v2  ;;  %v11816_v45 = vld [vmem:[#allocation151_spill] sm:$0xff] }
 0x1a3   :  { %v2337_v19 = vsel %vm7902_vm2, %v11810_v10, 4286644096  ;;  %11812 = vst [vmem:[#allocation67_spill] sm:$0xff] %v8676_v29  ;;  %v2339_v1 = vsel %vm7902_vm2, %v11813_v3, 4286644096  ;;  %v11814_v41 = vld [vmem:[#allocation158_spill] sm:$0xff] }
 0x1a4   :  { %v2340_v47 = vsel %vm7902_vm2, %v11814_v41, 4286644096  ;;  %11815 = vst [vmem:[#allocation75_spill] sm:$0xff] %v8684_v57  ;;  %v2342_v18 = vsel %vm7902_vm2, %v11816_v45, 4286644096  ;;  %v11817_v8 = vld [vmem:[#allocation159_spill] sm:$0xff]  ;;  %v8695_v59 = vmax.bf16 %v2337_v19, %v2336_v7 }
 0x1a5   :  { %v2343_v16 = vsel %vm7902_vm2, %v11817_v8, 4286644096  ;;  %v11818_v6 = vld [vmem:[#allocation152_spill] sm:$0xff]  ;;  %v11821_v2 = vld [vmem:[#allocation161_spill] sm:$0xff]  ;;  %v8706_v57 = vmax.bf16 %v2340_v47, %v2339_v1  ;;  %v11824_v8 = vld [vmem:[#allocation162_spill] sm:$0xff] }
 0x1a6   :  { %v2345_v25 = vsel %vm7902_vm2, %v11818_v6, 4286644096  ;;  %11819 = vst [vmem:[#allocation68_spill] sm:$0xff] %v8695_v59  ;;  %v11820_v10 = vld [vmem:[#allocation160_spill] sm:$0xff]  ;;  %v2348_v12 = vsel %vm7902_vm2, %v11821_v2, 4286644096  ;;  %v8717_v29 = vmax.bf16 %v2343_v16, %v2342_v18 }
 0x1a7   :  { %v2346_v3 = vsel %vm7902_vm2, %v11820_v10, 4286644096  ;;  %v11822_v41 = vld [vmem:[#allocation169_spill] sm:$0xff]  ;;  %11823 = vst [vmem:[#allocation76_spill] sm:$0xff] %v8706_v57  ;;  %v2351_v6 = vsel %vm7902_vm2, %v11824_v8, 4286644096 }
 0x1a8   :  { %v2349_v45 = vsel %vm7902_vm2, %v11822_v41, 4286644096  ;;  %v11825_v7 = vld [vmem:[#allocation170_spill] sm:$0xff]  ;;  %v11826_v59 = vld [vmem:[#allocation163_spill] sm:$0xff]  ;;  %11827 = vst [vmem:[#allocation69_spill] sm:$0xff] %v8717_v29  ;;  %v11829_v1 = vld [vmem:[#allocation164_spill] sm:$0xff]  ;;  %v8728_v28 = vmax.bf16 %v2346_v3, %v2345_v25 }
 0x1a9   :  { %v2352_v19 = vsel %vm7902_vm2, %v11825_v7, 4286644096  ;;  %v2354_v10 = vsel %vm7902_vm2, %v11826_v59, 4286644096  ;;  %v11828_v2 = vld [vmem:[#allocation171_spill] sm:$0xff]  ;;  %v11830_v57 = vld [vmem:[#allocation172_spill] sm:$0xff]  ;;  %v8739_v13 = vmax.bf16 %v2349_v45, %v2348_v12 }
 0x1aa   :  { %v2355_v41 = vsel %vm7902_vm2, %v11828_v2, 4286644096  ;;  %v2357_v47 = vsel %vm7902_vm2, %v11829_v1, 4286644096  ;;  %v2358_v8 = vsel %vm7902_vm2, %v11830_v57, 4286644096  ;;  %v8750_v9 = vmax.bf16 %v2352_v19, %v2351_v6 }
 0x1ab   :  { %11831 = vst [vmem:[#allocation77_spill] sm:$0xff] %v8728_v28  ;;  %v11832_v7 = vld [vmem:[#allocation165_spill] sm:$0xff]  ;;  %v11834_v29 = vld [vmem:[#allocation166_spill] sm:$0xff]  ;;  %11835 = vst [vmem:[#allocation70_spill] sm:$0xff] %v8739_v13 }
 0x1ac   :  { %v2360_v59 = vsel %vm7902_vm2, %v11832_v7, 4286644096  ;;  %v11833_v18 = vld [vmem:[#allocation173_spill] sm:$0xff]  ;;  %v2363_v2 = vsel %vm7902_vm2, %v11834_v29, 4286644096  ;;  %v11836_v1 = vld [vmem:[#allocation174_spill] sm:$0xff] }
 0x1ad   :  { %v2361_v16 = vsel %vm7902_vm2, %v11833_v18, 4286644096  ;;  %v2364_v57 = vsel %vm7902_vm2, %v11836_v1, 4286644096  ;;  %v11837_v25 = vld [vmem:[#allocation167_spill] sm:$0xff]  ;;  %v8752_v18 = vmax.bf16 %v2355_v41, %v2354_v10  ;;  %v11839_v4 = vld [vmem:[#allocation168_spill] sm:$0xff]  ;;  %v8760_v1 = vmax.bf16 %v2358_v8, %v2357_v47 }
 0x1ae   :  { %v2366_v3 = vsel %vm7902_vm2, %v11837_v25, 4286644096  ;;  %v11838_v28 = vld [vmem:[#allocation175_spill] sm:$0xff]  ;;  %v2369_v29 = vsel %vm7902_vm2, %v11839_v4, 4286644096  ;;  %v11840_v12 = vld [vmem:[#allocation176_spill] sm:$0xff]  ;;  %v8762_v13 = vmax.bf16 %v2361_v16, %v2360_v59  ;;  %v8770_v10 = vmax.bf16 %v2364_v57, %v2363_v2 }
 0x1af   :  { %v2367_v7 = vsel %vm7902_vm2, %v11838_v28, 4286644096  ;;  %v2370_v45 = vsel %vm7902_vm2, %v11840_v12, 4286644096  ;;  %v11842_v25 = vld [vmem:[#allocation177_spill] sm:$0xff]  ;;  %v11846_v4 = vld [vmem:[#allocation178_spill] sm:$0xff] }
 0x1b0   :  { %11841 = vst [vmem:[#allocation78_spill] sm:$0xff] %v8762_v13  ;;  %v2372_v28 = vsel %vm7902_vm2, %v11842_v25, 4286644096  ;;  %v11843_v6 = vld [vmem:[#allocation185_spill] sm:$0xff]  ;;  %11844 = vst [vmem:[#allocation71_spill] sm:$0xff] %v8770_v10  ;;  %v8772_v41 = vmax.bf16 %v2367_v7, %v2366_v3  ;;  %v11847_v47 = vld [vmem:[#allocation186_spill] sm:$0xff]  ;;  %v8780_v59 = vmax.bf16 %v2370_v45, %v2369_v29 }
 0x1b1   :  { %v2373_v19 = vsel %vm7902_vm2, %v11843_v6, 4286644096  ;;  %v2375_v12 = vsel %vm7902_vm2, %v11846_v4, 4286644096  ;;  %v2376_v8 = vsel %vm7902_vm2, %v11847_v47, 4286644096 }
 0x1b2   :  { %11845 = vst [vmem:[#allocation79_spill] sm:$0xff] %v8772_v41  ;;  %11848 = vst [vmem:[#allocation72_spill] sm:$0xff] %v8780_v59  ;;  %v11849_v16 = vld [vmem:[#allocation179_spill] sm:$0xff]  ;;  %v11851_v57 = vld [vmem:[#allocation180_spill] sm:$0xff]  ;;  %v8791_v7 = vmax.bf16 %v2373_v19, %v2372_v28  ;;  %v8802_v59 = vmax.bf16 %v2376_v8, %v2375_v12 }
 0x1b3   :  { %v2378_v25 = vsel %vm7902_vm2, %v11849_v16, 4286644096  ;;  %v11850_v13 = vld [vmem:[#allocation187_spill] sm:$0xff]  ;;  %v2381_v3 = vsel %vm7902_vm2, %v11851_v57, 4286644096  ;;  %v11853_v6 = vld [vmem:[#allocation188_spill] sm:$0xff] }
 0x1b4   :  { %v2379_v2 = vsel %vm7902_vm2, %v11850_v13, 4286644096  ;;  %11852 = vst [vmem:[#allocation80_spill] sm:$0xff] %v8791_v7  ;;  %v2382_v4 = vsel %vm7902_vm2, %v11853_v6, 4286644096  ;;  %v11854_v29 = vld [vmem:[#allocation181_spill] sm:$0xff] }
 0x1b5   :  { %v2384_v45 = vsel %vm7902_vm2, %v11854_v29, 4286644096  ;;  %v11855_v47 = vld [vmem:[#allocation189_spill] sm:$0xff]  ;;  %11856 = vst [vmem:[#allocation81_spill] sm:$0xff] %v8802_v59  ;;  %v11857_v13 = vld [vmem:[#allocation182_spill] sm:$0xff]  ;;  %v11859_v7 = vld [vmem:[#allocation183_spill] sm:$0xff]  ;;  %v8813_v41 = vmax.bf16 %v2379_v2, %v2378_v25  ;;  %v8824_v10 = vmax.bf16 %v2382_v4, %v2381_v3 }
 0x1b6   :  { %v2385_v16 = vsel %vm7902_vm2, %v11855_v47, 4286644096  ;;  %v2387_v57 = vsel %vm7902_vm2, %v11857_v13, 4286644096  ;;  %v11858_v28 = vld [vmem:[#allocation190_spill] sm:$0xff]  ;;  %v11861_v29 = vld [vmem:[#allocation191_spill] sm:$0xff] }
 0x1b7   :  { %v2388_v19 = vsel %vm7902_vm2, %v11858_v28, 4286644096  ;;  %v2390_v6 = vsel %vm7902_vm2, %v11859_v7, 4286644096  ;;  %11860 = vst [vmem:[#allocation89_spill] sm:$0xff] %v8813_v41  ;;  %v11862_v12 = vld [vmem:[#allocation184_spill] sm:$0xff]  ;;  %v8835_v41 = vmax.bf16 %v2385_v16, %v2384_v45 }
 0x1b8   :  { %v2391_v47 = vsel %vm7902_vm2, %v11861_v29, 4286644096  ;;  %v2393_v8 = vsel %vm7902_vm2, %v11862_v12, 4286644096  ;;  %v11863_v59 = vld [vmem:[#allocation192_spill] sm:$0xff]  ;;  %v11864_v28 = vld [vmem:[#allocation193_spill] sm:$0xff] }
 0x1b9   :  { %v2394_v13 = vsel %vm7902_vm2, %v11863_v59, 4286644096  ;;  %v2396_v7 = vsel %vm7902_vm2, %v11864_v28, 4286644096  ;;  %v2397_v25 = vsel %vm7902_vm2, %v7815_v38, 4286644096  ;;  %v8846_v28 = vmax.bf16 %v2388_v19, %v2387_v57 }
 0x1ba   :  { %v11865_v2 = vld [vmem:[#allocation194_spill] sm:$0xff]  ;;  %v2400_v59 = vsel %vm7902_vm2, %v7820_v39, 4286644096  ;;  %v11866_v3 = vld [vmem:[#allocation195_spill] sm:$0xff]  ;;  %v2403_v12 = vsel %vm7902_vm2, %v7825_v44, 4286644096  ;;  %v8857_v16 = vmax.bf16 %v2391_v47, %v2390_v6 }
 0x1bb   :  { %v2399_v29 = vsel %vm7902_vm2, %v11865_v2, 4286644096  ;;  %v2402_v4 = vsel %vm7902_vm2, %v11866_v3, 4286644096  ;;  %v2405_v38 = vsel %vm7902_vm2, %v7790_v14, 4286644096  ;;  %v8868_v2 = vmax.bf16 %v2394_v13, %v2393_v8 }
 0x1bc   :  { %v2406_v45 = vsel %vm7902_vm2, %v7830_v23, 4286644096  ;;  %v2408_v39 = vsel %vm7902_vm2, %v7795_v30, 4286644096  ;;  %v2409_v44 = vsel %vm7902_vm2, %v7835_v53, 4286644096  ;;  %v8879_v3 = vmax.bf16 %v2397_v25, %v2396_v7 }
 0x1bd   :  { %v11867_v57 = vld [vmem:[#allocation196_spill] sm:$0xff]  ;;  %v2412_v14 = vsel %vm7902_vm2, %v7840_v52, 4286644096  ;;  %v11868_v23 = vld [vmem:[#allocation197_spill] sm:$0xff]  ;;  %v2415_v6 = vsel %vm7902_vm2, %v7845_v62, 4286644096  ;;  %v8901_v25 = vmax.bf16 %v2403_v12, %v2402_v4  ;;  %v2574_v12 = vunpack.c.0.s8 %v7969_v35 }
 0x1be   :  { %v2411_v19 = vsel %vm7902_vm2, %v11867_v57, 4286644096  ;;  %v2414_v30 = vsel %vm7902_vm2, %v11868_v23, 4286644096  ;;  %v11869_v47 = vld [vmem:[#allocation198_spill] sm:$0xff]  ;;  %v8890_v57 = vmax.bf16 %v2400_v59, %v2399_v29  ;;  %v8912_v29 = vmax.bf16 %v2406_v45, %v2405_v38  ;;  %v11870_v4 = vld [vmem:[#allocation199_spill] sm:$0xff] }
 0x1bf   :  { %v2417_v53 = vsel %vm7902_vm2, %v11869_v47, 4286644096  ;;  %v2418_v52 = vsel %vm7902_vm2, %v7850_v36, 4286644096  ;;  %v2420_v8 = vsel %vm7902_vm2, %v7855_v61, 4286644096  ;;  %v8923_v59 = vmax.bf16 %v2409_v44, %v2408_v39 }
 0x1c0   :  { %v2421_v13 = vsel %vm7902_vm2, %v7895_v42, 4286644096  ;;  %v2423_v62 = vsel %vm7902_vm2, %v7860_v60, 4286644096  ;;  %v2424_v7 = vsel %vm7902_vm2, %v7900_v43, 4286644096  ;;  %v11871_v38 = vlaneseq }
 0x1c1   :  { %v2426_v36 = vsel %vm7902_vm2, %v7865_v22, 4286644096  ;;  %v2427_v61 = vsel %vm7902_vm2, %v7909_v15, 4286644096  ;;  %v2429_v42 = vsel %vm7902_vm2, %v7870_v20, 4286644096  ;;  %v8942_v45 = vmax.bf16 %v2412_v14, %v2411_v19 }
 0x1c2   :  { %v2430_v60 = vsel %vm7902_vm2, %v7914_v37, 4286644096  ;;  %v2432_v22 = vsel %vm7902_vm2, %v7875_v17, 4286644096  ;;  %v2433_v43 = vsel %vm7902_vm2, %v7919_v31, 4286644096  ;;  %v8944_v39 = vmax.bf16 %v2415_v6, %v2414_v30 }
 0x1c3   :  { %v2435_v15 = vsel %vm7902_vm2, %v7880_v21, 4286644096  ;;  %v2436_v20 = vsel %vm7902_vm2, %v7924_v50, 4286644096  ;;  %v2438_v37 = vsel %vm7902_vm2, %v7885_v56, 4286644096  ;;  %v8946_v56 = vmax.bf16 %v2418_v52, %v2417_v53 }
 0x1c4   :  { %v2439_v17 = vsel %vm7902_vm2, %v7929_v40, 4286644096  ;;  %v2441_v31 = vsel %vm7902_vm2, %v11870_v4, 4286644096  ;;  %v2442_v21 = vsel %vm7902_vm2, %v7940_v49, 4286644096  ;;  %v8948_v44 = vmax.bf16 %v2421_v13, %v2420_v8 }
 0x1c5   :  { %v2576_v50 = vshrl.u32 %v11871_v38, 7  ;;  %v8950_v40 = vmax.bf16 %v2424_v7, %v2423_v62  ;;  %v8952_v23 = vmax.bf16 %v2427_v61, %v2426_v36  ;;  %v8954_v47 = vmax.bf16 %v2430_v60, %v2429_v42  ;;  %v11875_v4 = vld [vmem:[#allocation201_spill] sm:$0xff]  ;;  %v11877_v38 = vld [vmem:[#allocation203_spill] sm:$0xff] }
 0x1c6   :  { %v8958_v49 = vmax.bf16 %v2433_v43, %v2432_v22  ;;  %v8960_v35 = vmax.bf16 %v2436_v20, %v2435_v15  ;;  %v8962_v19 = vmax.bf16 %v2439_v17, %v2438_v37  ;;  %v8964_v14 = vmax.bf16 %v2442_v21, %v2441_v31  ;;  %v11876_v21 = vld [vmem:[#allocation202_spill] sm:$0xff] }
 0x1c7   :  { %v8956_v51 = vsub.s32 %v2574_v12, %v2576_v50 }
 0x1c9   :  { %v2578_v30 = vrot.slane %v7971_v63, %v8956_v51  ;;  %v2592_v6 = vrot.slane %v7982_v26, %v8956_v51  ;;  %v2606_v53 = vrot.slane %v7984_v54, %v8956_v51  ;;  %v2620_v52 = vrot.slane %v7992_v48, %v8956_v51 }
 0x1ca   :  { %v2634_v8 = vrot.slane %v7994_v34, %v8956_v51  ;;  %v2648_v13 = vrot.slane %v8002_v27, %v8956_v51  ;;  %v2662_v62 = vrot.slane %v8004_v24, %v8956_v51  ;;  %v2676_v63 = vrot.slane %v8012_v46, %v8956_v51 }
 0x1cb   :  { %v8983_v26 = vrot.slane %v2578_v30, %v8956_v51  ;;  %v8986_v54 = vrot.slane %v2592_v6, %v8956_v51  ;;  %v8989_v48 = vrot.slane %v2606_v53, %v8956_v51  ;;  %v8992_v34 = vrot.slane %v2620_v52, %v8956_v51  ;;  %v11878_v30 = vld [vmem:[#allocation205_spill] sm:$0xff]  ;;  %v11879_v53 = vld [vmem:[#allocation204_spill] sm:$0xff] }
 0x1cc   :  { %v8995_v27 = vrot.slane %v2634_v8, %v8956_v51  ;;  %v8998_v24 = vrot.slane %v2648_v13, %v8956_v51  ;;  %v9001_v46 = vrot.slane %v2662_v62, %v8956_v51  ;;  %v9004_v7 = vrot.slane %v2676_v63, %v8956_v51  ;;  %v11880_v8 = vld [vmem:[#allocation206_spill] sm:$0xff]  ;;  %v11881_v62 = vld [vmem:[#allocation207_spill] sm:$0xff] }
 0x1cd   :  { %v2690_v36 = vrot.slane %v8023_v32, %v8956_v51  ;;  %v2704_v61 = vrot.slane %v8034_v33, %v8956_v51  ;;  %v2718_v42 = vrot.slane %v8045_v0, %v8956_v51  ;;  %v2732_v60 = vrot.slane %v8056_v58, %v8956_v51  ;;  %v11872_v32 = vld [vmem:[#allocation200_spill] sm:$0xff] }
 0x1ce   :  { %v2746_v22 = vrot.slane %v8067_v5, %v8956_v51  ;;  %v2760_v43 = vrot.slane %v8078_v11, %v8956_v51  ;;  %v2774_v15 = vrot.slane %v8080_v55, %v8956_v51  ;;  %v2788_v20 = vrot.slane %v11872_v32, %v8956_v51 }
 0x1cf   :  { %v9023_v33 = vrot.slane %v2690_v36, %v8956_v51  ;;  %v9026_v0 = vrot.slane %v2704_v61, %v8956_v51  ;;  %v9029_v58 = vrot.slane %v2718_v42, %v8956_v51  ;;  %v9032_v5 = vrot.slane %v2732_v60, %v8956_v51  ;;  %v11882_v36 = vld [vmem:[#allocation9_spill] sm:$0xff] }
 0x1d0   :  { %v9035_v11 = vrot.slane %v2746_v22, %v8956_v51  ;;  %v9038_v55 = vrot.slane %v2760_v43, %v8956_v51  ;;  %v9041_v37 = vrot.slane %v2774_v15, %v8956_v51  ;;  %v9044_v17 = vrot.slane %v2788_v20, %v8956_v51 }
 0x1d1   :  { %v2802_v31 = vrot.slane %v11875_v4, %v8956_v51  ;;  %v2816_v12 = vrot.slane %v11876_v21, %v8956_v51  ;;  %v2830_v50 = vrot.slane %v11877_v38, %v8956_v51  ;;  %v2844_v6 = vrot.slane %v11878_v30, %v8956_v51 }
 0x1d2   :  { %11873 = vst [vmem:[#allocation82_spill] sm:$0xff] %v9041_v37  ;;  %11874 = vst [vmem:[#allocation90_spill] sm:$0xff] %v9044_v17  ;;  %v2858_v52 = vrot.slane %v11879_v53, %v8956_v51  ;;  %v2872_v13 = vrot.slane %v11880_v8, %v8956_v51  ;;  %v2886_v63 = vrot.slane %v11881_v62, %v8956_v51 }
 0x1d3   :  { %v2900_v61 = vrot.slane %v11882_v36, %v8956_v51  ;;  %v9063_v42 = vrot.slane %v2802_v31, %v8956_v51  ;;  %v9066_v60 = vrot.slane %v2816_v12, %v8956_v51  ;;  %v9069_v22 = vrot.slane %v2830_v50, %v8956_v51  ;;  %v11891_v31 = vld [vmem:[#allocation2_spill] sm:$0xff]  ;;  %v11893_v50 = vld [vmem:[#allocation3_spill] sm:$0xff] }
 0x1d4   :  { %v9072_v43 = vrot.slane %v2844_v6, %v8956_v51  ;;  %v9075_v15 = vrot.slane %v2858_v52, %v8956_v51  ;;  %v9078_v32 = vrot.slane %v2872_v13, %v8956_v51  ;;  %v9081_v20 = vrot.slane %v2886_v63, %v8956_v51  ;;  %v11892_v12 = vld [vmem:[#allocation10_spill] sm:$0xff]  ;;  %v11894_v6 = vld [vmem:[#allocation11_spill] sm:$0xff]  ;;  %v11895_v52 = vld [vmem:[#allocation4_spill] sm:$0xff] }
 0x1d5   :  { %11883 = vst [vmem:[#allocation83_spill] sm:$0xff] %v9063_v42  ;;  %11884 = vst [vmem:[#allocation91_spill] sm:$0xff] %v9066_v60  ;;  %v9084_v4 = vrot.slane %v2900_v61, %v8956_v51  ;;  %v2914_v21 = vrot.slane %v11891_v31, %v8956_v51  ;;  %v2928_v38 = vrot.slane %v11892_v12, %v8956_v51  ;;  %v11896_v13 = vld [vmem:[#allocation12_spill] sm:$0xff]  ;;  %v11897_v63 = vld [vmem:[#allocation5_spill] sm:$0xff] }
 0x1d6   :  { %11885 = vst [vmem:[#allocation84_spill] sm:$0xff] %v9069_v22  ;;  %11886 = vst [vmem:[#allocation92_spill] sm:$0xff] %v9072_v43  ;;  %v2942_v30 = vrot.slane %v11893_v50, %v8956_v51  ;;  %v2956_v53 = vrot.slane %v11894_v6, %v8956_v51  ;;  %v2970_v8 = vrot.slane %v11895_v52, %v8956_v51  ;;  %v11898_v61 = vld [vmem:[#allocation13_spill] sm:$0xff] }
 0x1d7   :  { %11887 = vst [vmem:[#allocation85_spill] sm:$0xff] %v9075_v15  ;;  %11888 = vst [vmem:[#allocation93_spill] sm:$0xff] %v9078_v32  ;;  %v2984_v62 = vrot.slane %v11896_v13, %v8956_v51  ;;  %v2998_v36 = vrot.slane %v11897_v63, %v8956_v51  ;;  %v3012_v31 = vrot.slane %v11898_v61, %v8956_v51  ;;  %v12132_v32 = vunpack.c.l.b16 %v8998_v24 }
 0x1d8   :  { %11889 = vst [vmem:[#allocation86_spill] sm:$0xff] %v9081_v20  ;;  %11890 = vst [vmem:[#allocation94_spill] sm:$0xff] %v9084_v4  ;;  %v9103_v12 = vrot.slane %v2914_v21, %v8956_v51  ;;  %v9106_v50 = vrot.slane %v2928_v38, %v8956_v51  ;;  %v9109_v6 = vrot.slane %v2942_v30, %v8956_v51  ;;  %v11907_v38 = vld [vmem:[#allocation6_spill] sm:$0xff]  ;;  %v12134_v4 = vunpack.c.l.b16 %v9004_v7 }
 0x1d9   :  { %v9112_v52 = vrot.slane %v2956_v53, %v8956_v51  ;;  %v9115_v13 = vrot.slane %v2970_v8, %v8956_v51  ;;  %v9118_v63 = vrot.slane %v2984_v62, %v8956_v51  ;;  %v9121_v61 = vrot.slane %v2998_v36, %v8956_v51  ;;  %v11908_v30 = vld [vmem:[#allocation14_spill] sm:$0xff]  ;;  %v11909_v53 = vld [vmem:[#allocation7_spill] sm:$0xff]  ;;  %v11911_v62 = vld [vmem:[#allocation8_spill] sm:$0xff] }
 0x1da   :  { %11899 = vst [vmem:[#allocation87_spill] sm:$0xff] %v9103_v12  ;;  %11900 = vst [vmem:[#allocation95_spill] sm:$0xff] %v9106_v50  ;;  %v9124_v21 = vrot.slane %v3012_v31, %v8956_v51  ;;  %v3026_v50 = vrot.slane %v11907_v38, %v8956_v51  ;;  %v11910_v8 = vld [vmem:[#allocation15_spill] sm:$0xff]  ;;  %v11912_v36 = vld [vmem:[#allocation16_spill] sm:$0xff]  ;;  %v12140_v7 = vunpack.c.l.b16 %v9023_v33 }
 0x1db   :  { %11901 = vst [vmem:[#allocation88_spill] sm:$0xff] %v9109_v6  ;;  %11902 = vst [vmem:[#allocation96_spill] sm:$0xff] %v9112_v52  ;;  %v3040_v6 = vrot.slane %v11908_v30, %v8956_v51  ;;  %v3054_v52 = vrot.slane %v11909_v53, %v8956_v51  ;;  %v11913_v31 = vld [vmem:[#allocation17_spill] sm:$0xff] }
 0x1dc   :  { %11903 = vst [vmem:[#allocation97_spill] sm:$0xff] %v9115_v13  ;;  %11904 = vst [vmem:[#allocation105_spill] sm:$0xff] %v9118_v63  ;;  %v3068_v13 = vrot.slane %v11910_v8, %v8956_v51  ;;  %v3082_v63 = vrot.slane %v11911_v62, %v8956_v51  ;;  %v11914_v38 = vld [vmem:[#allocation25_spill] sm:$0xff]  ;;  %v9143_v30 = vrot.slane %v3026_v50, %v8956_v51 }
 0x1dd   :  { %11905 = vst [vmem:[#allocation98_spill] sm:$0xff] %v9121_v61  ;;  %11906 = vst [vmem:[#allocation106_spill] sm:$0xff] %v9124_v21  ;;  %v3096_v61 = vrot.slane %v11912_v36, %v8956_v51  ;;  %v3110_v21 = vrot.slane %v11913_v31, %v8956_v51  ;;  %v3124_v12 = vrot.slane %v11914_v38, %v8956_v51 }
 0x1de   :  { %11915 = vst [vmem:[#allocation99_spill] sm:$0xff] %v9143_v30  ;;  %v9146_v53 = vrot.slane %v3040_v6, %v8956_v51  ;;  %v9149_v8 = vrot.slane %v3054_v52, %v8956_v51  ;;  %v9152_v62 = vrot.slane %v3068_v13, %v8956_v51  ;;  %v9155_v36 = vrot.slane %v3082_v63, %v8956_v51  ;;  %v11923_v6 = vld [vmem:[#allocation18_spill] sm:$0xff]  ;;  %v11925_v13 = vld [vmem:[#allocation19_spill] sm:$0xff] }
 0x1df   :  { %v9158_v31 = vrot.slane %v3096_v61, %v8956_v51  ;;  %v9161_v38 = vrot.slane %v3110_v21, %v8956_v51  ;;  %v9164_v50 = vrot.slane %v3124_v12, %v8956_v51  ;;  %v11924_v52 = vld [vmem:[#allocation26_spill] sm:$0xff]  ;;  %v11926_v63 = vld [vmem:[#allocation27_spill] sm:$0xff]  ;;  %v11927_v61 = vld [vmem:[#allocation20_spill] sm:$0xff] }
 0x1e0   :  { %11916 = vst [vmem:[#allocation107_spill] sm:$0xff] %v9146_v53  ;;  %11917 = vst [vmem:[#allocation100_spill] sm:$0xff] %v9149_v8  ;;  %v3138_v53 = vrot.slane %v11923_v6, %v8956_v51  ;;  %v3152_v8 = vrot.slane %v11924_v52, %v8956_v51  ;;  %v11928_v21 = vld [vmem:[#allocation28_spill] sm:$0xff]  ;;  %v11929_v12 = vld [vmem:[#allocation21_spill] sm:$0xff] }
 0x1e1   :  { %11918 = vst [vmem:[#allocation108_spill] sm:$0xff] %v9152_v62  ;;  %11919 = vst [vmem:[#allocation101_spill] sm:$0xff] %v9155_v36  ;;  %v3166_v62 = vrot.slane %v11925_v13, %v8956_v51  ;;  %v3180_v36 = vrot.slane %v11926_v63, %v8956_v51  ;;  %v11930_v6 = vld [vmem:[#allocation29_spill] sm:$0xff] }
 0x1e2   :  { %11920 = vst [vmem:[#allocation109_spill] sm:$0xff] %v9158_v31  ;;  %11921 = vst [vmem:[#allocation102_spill] sm:$0xff] %v9161_v38  ;;  %v3194_v31 = vrot.slane %v11927_v61, %v8956_v51  ;;  %v3208_v38 = vrot.slane %v11928_v21, %v8956_v51  ;;  %v3236_v30 = vrot.slane %v11930_v6, %v8956_v51 }
 0x1e3   :  { %11922 = vst [vmem:[#allocation110_spill] sm:$0xff] %v9164_v50  ;;  %v3222_v50 = vrot.slane %v11929_v12, %v8956_v51  ;;  %v9183_v52 = vrot.slane %v3138_v53, %v8956_v51  ;;  %v9186_v13 = vrot.slane %v3152_v8, %v8956_v51  ;;  %v9189_v63 = vrot.slane %v3166_v62, %v8956_v51  ;;  %v11939_v8 = vld [vmem:[#allocation22_spill] sm:$0xff] }
 0x1e4   :  { %v9192_v61 = vrot.slane %v3180_v36, %v8956_v51  ;;  %v9195_v21 = vrot.slane %v3194_v31, %v8956_v51  ;;  %v9198_v12 = vrot.slane %v3208_v38, %v8956_v51  ;;  %v9204_v53 = vrot.slane %v3236_v30, %v8956_v51  ;;  %v11940_v62 = vld [vmem:[#allocation30_spill] sm:$0xff]  ;;  %v11941_v36 = vld [vmem:[#allocation23_spill] sm:$0xff]  ;;  %v11943_v38 = vld [vmem:[#allocation24_spill] sm:$0xff] }
 0x1e5   :  { %11931 = vst [vmem:[#allocation103_spill] sm:$0xff] %v9183_v52  ;;  %11932 = vst [vmem:[#allocation111_spill] sm:$0xff] %v9186_v13  ;;  %v9201_v6 = vrot.slane %v3222_v50, %v8956_v51  ;;  %v3250_v13 = vrot.slane %v11939_v8, %v8956_v51  ;;  %v11942_v31 = vld [vmem:[#allocation31_spill] sm:$0xff]  ;;  %v11944_v50 = vld [vmem:[#allocation32_spill] sm:$0xff] }
 0x1e6   :  { %11933 = vst [vmem:[#allocation104_spill] sm:$0xff] %v9189_v63  ;;  %11934 = vst [vmem:[#allocation112_spill] sm:$0xff] %v9192_v61  ;;  %v3264_v63 = vrot.slane %v11940_v62, %v8956_v51  ;;  %v3278_v61 = vrot.slane %v11941_v36, %v8956_v51  ;;  %v11945_v30 = vld [vmem:[#allocation33_spill] sm:$0xff] }
 0x1e7   :  { %11935 = vst [vmem:[#allocation113_spill] sm:$0xff] %v9195_v21  ;;  %11936 = vst [vmem:[#allocation121_spill] sm:$0xff] %v9198_v12  ;;  %v3292_v21 = vrot.slane %v11942_v31, %v8956_v51  ;;  %v3306_v12 = vrot.slane %v11943_v38, %v8956_v51  ;;  %v11946_v8 = vld [vmem:[#allocation41_spill] sm:$0xff]  ;;  %v9223_v62 = vrot.slane %v3250_v13, %v8956_v51 }
 0x1e8   :  { %11937 = vst [vmem:[#allocation114_spill] sm:$0xff] %v9201_v6  ;;  %11938 = vst [vmem:[#allocation122_spill] sm:$0xff] %v9204_v53  ;;  %v3320_v6 = vrot.slane %v11944_v50, %v8956_v51  ;;  %v3334_v53 = vrot.slane %v11945_v30, %v8956_v51  ;;  %v3348_v52 = vrot.slane %v11946_v8, %v8956_v51 }
 0x1e9   :  { %11947 = vst [vmem:[#allocation115_spill] sm:$0xff] %v9223_v62  ;;  %v9226_v36 = vrot.slane %v3264_v63, %v8956_v51  ;;  %v9229_v31 = vrot.slane %v3278_v61, %v8956_v51  ;;  %v9232_v38 = vrot.slane %v3292_v21, %v8956_v51  ;;  %v9235_v50 = vrot.slane %v3306_v12, %v8956_v51  ;;  %v11955_v63 = vld [vmem:[#allocation34_spill] sm:$0xff]  ;;  %v11957_v21 = vld [vmem:[#allocation35_spill] sm:$0xff] }
 0x1ea   :  { %v9238_v30 = vrot.slane %v3320_v6, %v8956_v51  ;;  %v9241_v8 = vrot.slane %v3334_v53, %v8956_v51  ;;  %v9244_v13 = vrot.slane %v3348_v52, %v8956_v51  ;;  %v11956_v61 = vld [vmem:[#allocation42_spill] sm:$0xff]  ;;  %v11958_v12 = vld [vmem:[#allocation43_spill] sm:$0xff]  ;;  %v11959_v6 = vld [vmem:[#allocation36_spill] sm:$0xff] }
 0x1eb   :  { %11948 = vst [vmem:[#allocation123_spill] sm:$0xff] %v9226_v36  ;;  %11949 = vst [vmem:[#allocation116_spill] sm:$0xff] %v9229_v31  ;;  %v3362_v36 = vrot.slane %v11955_v63, %v8956_v51  ;;  %v3376_v31 = vrot.slane %v11956_v61, %v8956_v51  ;;  %v11960_v53 = vld [vmem:[#allocation44_spill] sm:$0xff]  ;;  %v11961_v52 = vld [vmem:[#allocation37_spill] sm:$0xff] }
 0x1ec   :  { %11950 = vst [vmem:[#allocation124_spill] sm:$0xff] %v9232_v38  ;;  %11951 = vst [vmem:[#allocation117_spill] sm:$0xff] %v9235_v50  ;;  %v3390_v38 = vrot.slane %v11957_v21, %v8956_v51  ;;  %v3404_v50 = vrot.slane %v11958_v12, %v8956_v51  ;;  %v11962_v63 = vld [vmem:[#allocation45_spill] sm:$0xff] }
 0x1ed   :  { %11952 = vst [vmem:[#allocation125_spill] sm:$0xff] %v9238_v30  ;;  %11953 = vst [vmem:[#allocation118_spill] sm:$0xff] %v9241_v8  ;;  %v3418_v30 = vrot.slane %v11959_v6, %v8956_v51  ;;  %v3432_v8 = vrot.slane %v11960_v53, %v8956_v51  ;;  %v3460_v62 = vrot.slane %v11962_v63, %v8956_v51 }
 0x1ee   :  { %11954 = vst [vmem:[#allocation126_spill] sm:$0xff] %v9244_v13  ;;  %v3446_v13 = vrot.slane %v11961_v52, %v8956_v51  ;;  %v9263_v61 = vrot.slane %v3362_v36, %v8956_v51  ;;  %v9266_v21 = vrot.slane %v3376_v31, %v8956_v51  ;;  %v9269_v12 = vrot.slane %v3390_v38, %v8956_v51  ;;  %v11971_v31 = vld [vmem:[#allocation38_spill] sm:$0xff] }
 0x1ef   :  { %v9272_v6 = vrot.slane %v3404_v50, %v8956_v51  ;;  %v9275_v53 = vrot.slane %v3418_v30, %v8956_v51  ;;  %v9278_v52 = vrot.slane %v3432_v8, %v8956_v51  ;;  %v9284_v36 = vrot.slane %v3460_v62, %v8956_v51  ;;  %v11972_v38 = vld [vmem:[#allocation46_spill] sm:$0xff]  ;;  %v11973_v50 = vld [vmem:[#allocation39_spill] sm:$0xff]  ;;  %v11975_v8 = vld [vmem:[#allocation40_spill] sm:$0xff] }
 0x1f0   :  { %11963 = vst [vmem:[#allocation119_spill] sm:$0xff] %v9263_v61  ;;  %11964 = vst [vmem:[#allocation127_spill] sm:$0xff] %v9266_v21  ;;  %v9281_v63 = vrot.slane %v3446_v13, %v8956_v51  ;;  %v3474_v21 = vrot.slane %v11971_v31, %v8956_v51  ;;  %v11974_v30 = vld [vmem:[#allocation47_spill] sm:$0xff]  ;;  %v11976_v13 = vld [vmem:[#allocation48_spill] sm:$0xff] }
 0x1f1   :  { %11965 = vst [vmem:[#allocation120_spill] sm:$0xff] %v9269_v12  ;;  %11966 = vst [vmem:[#allocation128_spill] sm:$0xff] %v9272_v6  ;;  %v3488_v12 = vrot.slane %v11972_v38, %v8956_v51  ;;  %v3502_v6 = vrot.slane %v11973_v50, %v8956_v51  ;;  %v11977_v62 = vld [vmem:[#allocation49_spill] sm:$0xff] }
 0x1f2   :  { %11967 = vst [vmem:[#allocation129_spill] sm:$0xff] %v9275_v53  ;;  %11968 = vst [vmem:[#allocation137_spill] sm:$0xff] %v9278_v52  ;;  %v3516_v53 = vrot.slane %v11974_v30, %v8956_v51  ;;  %v3530_v52 = vrot.slane %v11975_v8, %v8956_v51  ;;  %v11978_v31 = vld [vmem:[#allocation57_spill] sm:$0xff]  ;;  %v9303_v38 = vrot.slane %v3474_v21, %v8956_v51 }
 0x1f3   :  { %11969 = vst [vmem:[#allocation130_spill] sm:$0xff] %v9281_v63  ;;  %11970 = vst [vmem:[#allocation138_spill] sm:$0xff] %v9284_v36  ;;  %v3544_v63 = vrot.slane %v11976_v13, %v8956_v51  ;;  %v3558_v36 = vrot.slane %v11977_v62, %v8956_v51  ;;  %v3572_v61 = vrot.slane %v11978_v31, %v8956_v51 }
 0x1f4   :  { %11979 = vst [vmem:[#allocation131_spill] sm:$0xff] %v9303_v38  ;;  %v9306_v50 = vrot.slane %v3488_v12, %v8956_v51  ;;  %v9309_v30 = vrot.slane %v3502_v6, %v8956_v51  ;;  %v9312_v8 = vrot.slane %v3516_v53, %v8956_v51  ;;  %v9315_v13 = vrot.slane %v3530_v52, %v8956_v51  ;;  %v11987_v12 = vld [vmem:[#allocation50_spill] sm:$0xff]  ;;  %v11989_v53 = vld [vmem:[#allocation51_spill] sm:$0xff] }
 0x1f5   :  { %v9318_v62 = vrot.slane %v3544_v63, %v8956_v51  ;;  %v9321_v31 = vrot.slane %v3558_v36, %v8956_v51  ;;  %v9324_v21 = vrot.slane %v3572_v61, %v8956_v51  ;;  %v11988_v6 = vld [vmem:[#allocation58_spill] sm:$0xff]  ;;  %v11990_v52 = vld [vmem:[#allocation59_spill] sm:$0xff]  ;;  %v11991_v63 = vld [vmem:[#allocation52_spill] sm:$0xff] }
 0x1f6   :  { %11980 = vst [vmem:[#allocation139_spill] sm:$0xff] %v9306_v50  ;;  %11981 = vst [vmem:[#allocation132_spill] sm:$0xff] %v9309_v30  ;;  %v3586_v50 = vrot.slane %v11987_v12, %v8956_v51  ;;  %v3600_v30 = vrot.slane %v11988_v6, %v8956_v51  ;;  %v11992_v36 = vld [vmem:[#allocation60_spill] sm:$0xff]  ;;  %v11993_v61 = vld [vmem:[#allocation53_spill] sm:$0xff] }
 0x1f7   :  { %11982 = vst [vmem:[#allocation140_spill] sm:$0xff] %v9312_v8  ;;  %11983 = vst [vmem:[#allocation133_spill] sm:$0xff] %v9315_v13  ;;  %v3614_v8 = vrot.slane %v11989_v53, %v8956_v51  ;;  %v3628_v13 = vrot.slane %v11990_v52, %v8956_v51  ;;  %v11994_v12 = vld [vmem:[#allocation61_spill] sm:$0xff] }
 0x1f8   :  { %11984 = vst [vmem:[#allocation141_spill] sm:$0xff] %v9318_v62  ;;  %11985 = vst [vmem:[#allocation134_spill] sm:$0xff] %v9321_v31  ;;  %v3642_v62 = vrot.slane %v11991_v63, %v8956_v51  ;;  %v3656_v31 = vrot.slane %v11992_v36, %v8956_v51  ;;  %v3684_v38 = vrot.slane %v11994_v12, %v8956_v51 }
 0x1f9   :  { %11986 = vst [vmem:[#allocation142_spill] sm:$0xff] %v9324_v21  ;;  %v3670_v21 = vrot.slane %v11993_v61, %v8956_v51  ;;  %v9343_v6 = vrot.slane %v3586_v50, %v8956_v51  ;;  %v9346_v53 = vrot.slane %v3600_v30, %v8956_v51  ;;  %v9349_v52 = vrot.slane %v3614_v8, %v8956_v51  ;;  %v12003_v30 = vld [vmem:[#allocation54_spill] sm:$0xff] }
 0x1fa   :  { %v9352_v63 = vrot.slane %v3628_v13, %v8956_v51  ;;  %v9355_v36 = vrot.slane %v3642_v62, %v8956_v51  ;;  %v9358_v61 = vrot.slane %v3656_v31, %v8956_v51  ;;  %v9364_v50 = vrot.slane %v3684_v38, %v8956_v51  ;;  %v12004_v8 = vld [vmem:[#allocation62_spill] sm:$0xff]  ;;  %v12005_v13 = vld [vmem:[#allocation55_spill] sm:$0xff]  ;;  %v12007_v31 = vld [vmem:[#allocation56_spill] sm:$0xff] }
 0x1fb   :  { %11995 = vst [vmem:[#allocation135_spill] sm:$0xff] %v9343_v6  ;;  %11996 = vst [vmem:[#allocation143_spill] sm:$0xff] %v9346_v53  ;;  %v9361_v12 = vrot.slane %v3670_v21, %v8956_v51  ;;  %v3698_v53 = vrot.slane %v12003_v30, %v8956_v51  ;;  %v12006_v62 = vld [vmem:[#allocation63_spill] sm:$0xff]  ;;  %v12008_v21 = vld [vmem:[#allocation64_spill] sm:$0xff] }
 0x1fc   :  { %11997 = vst [vmem:[#allocation136_spill] sm:$0xff] %v9349_v52  ;;  %11998 = vst [vmem:[#allocation144_spill] sm:$0xff] %v9352_v63  ;;  %v3712_v52 = vrot.slane %v12004_v8, %v8956_v51  ;;  %v3726_v63 = vrot.slane %v12005_v13, %v8956_v51  ;;  %v12009_v38 = vld [vmem:[#allocation65_spill] sm:$0xff] }
 0x1fd   :  { %11999 = vst [vmem:[#allocation145_spill] sm:$0xff] %v9355_v36  ;;  %12000 = vst [vmem:[#allocation153_spill] sm:$0xff] %v9358_v61  ;;  %v3740_v36 = vrot.slane %v12006_v62, %v8956_v51  ;;  %v3754_v61 = vrot.slane %v12007_v31, %v8956_v51  ;;  %v12010_v30 = vld [vmem:[#allocation73_spill] sm:$0xff]  ;;  %v9383_v8 = vrot.slane %v3698_v53, %v8956_v51 }
 0x1fe   :  { %12001 = vst [vmem:[#allocation146_spill] sm:$0xff] %v9361_v12  ;;  %12002 = vst [vmem:[#allocation154_spill] sm:$0xff] %v9364_v50  ;;  %v3768_v12 = vrot.slane %v12008_v21, %v8956_v51  ;;  %v3782_v50 = vrot.slane %v12009_v38, %v8956_v51  ;;  %v3796_v6 = vrot.slane %v12010_v30, %v8956_v51 }
 0x1ff   :  { %12011 = vst [vmem:[#allocation147_spill] sm:$0xff] %v9383_v8  ;;  %v9386_v13 = vrot.slane %v3712_v52, %v8956_v51  ;;  %v9389_v62 = vrot.slane %v3726_v63, %v8956_v51  ;;  %v9392_v31 = vrot.slane %v3740_v36, %v8956_v51  ;;  %v9395_v21 = vrot.slane %v3754_v61, %v8956_v51  ;;  %v12019_v52 = vld [vmem:[#allocation66_spill] sm:$0xff]  ;;  %v12021_v36 = vld [vmem:[#allocation67_spill] sm:$0xff] }
 0x200   :  { %v9398_v38 = vrot.slane %v3768_v12, %v8956_v51  ;;  %v9401_v30 = vrot.slane %v3782_v50, %v8956_v51  ;;  %v9404_v53 = vrot.slane %v3796_v6, %v8956_v51  ;;  %v12020_v63 = vld [vmem:[#allocation74_spill] sm:$0xff]  ;;  %v12022_v61 = vld [vmem:[#allocation75_spill] sm:$0xff]  ;;  %v12023_v12 = vld [vmem:[#allocation68_spill] sm:$0xff] }
 0x201   :  { %12012 = vst [vmem:[#allocation155_spill] sm:$0xff] %v9386_v13  ;;  %12013 = vst [vmem:[#allocation148_spill] sm:$0xff] %v9389_v62  ;;  %v3810_v13 = vrot.slane %v12019_v52, %v8956_v51  ;;  %v3824_v62 = vrot.slane %v12020_v63, %v8956_v51  ;;  %v12024_v50 = vld [vmem:[#allocation76_spill] sm:$0xff]  ;;  %v12025_v6 = vld [vmem:[#allocation69_spill] sm:$0xff] }
 0x202   :  { %12014 = vst [vmem:[#allocation156_spill] sm:$0xff] %v9392_v31  ;;  %12015 = vst [vmem:[#allocation149_spill] sm:$0xff] %v9395_v21  ;;  %v3838_v31 = vrot.slane %v12021_v36, %v8956_v51  ;;  %v3852_v21 = vrot.slane %v12022_v61, %v8956_v51  ;;  %v12026_v52 = vld [vmem:[#allocation77_spill] sm:$0xff] }
 0x203   :  { %12016 = vst [vmem:[#allocation157_spill] sm:$0xff] %v9398_v38  ;;  %12017 = vst [vmem:[#allocation150_spill] sm:$0xff] %v9401_v30  ;;  %v3866_v38 = vrot.slane %v12023_v12, %v8956_v51  ;;  %v3880_v30 = vrot.slane %v12024_v50, %v8956_v51  ;;  %v3908_v8 = vrot.slane %v12026_v52, %v8956_v51 }
 0x204   :  { %12018 = vst [vmem:[#allocation158_spill] sm:$0xff] %v9404_v53  ;;  %v3894_v53 = vrot.slane %v12025_v6, %v8956_v51  ;;  %v9423_v63 = vrot.slane %v3810_v13, %v8956_v51  ;;  %v9426_v36 = vrot.slane %v3824_v62, %v8956_v51  ;;  %v9429_v61 = vrot.slane %v3838_v31, %v8956_v51  ;;  %v12033_v62 = vld [vmem:[#allocation70_spill] sm:$0xff]  ;;  %v12106_v20 = vld [vmem:[#allocation153_spill] sm:$0xff] }
 0x205   :  { %v9432_v12 = vrot.slane %v3852_v21, %v8956_v51  ;;  %v9435_v50 = vrot.slane %v3866_v38, %v8956_v51  ;;  %v9438_v6 = vrot.slane %v3880_v30, %v8956_v51  ;;  %v9444_v13 = vrot.slane %v3908_v8, %v8956_v51  ;;  %v12034_v30 = vld [vmem:[#allocation78_spill] sm:$0xff]  ;;  %v12036_v8 = vld [vmem:[#allocation79_spill] sm:$0xff] }
 0x206   :  { %12027 = vst [vmem:[#allocation151_spill] sm:$0xff] %v9423_v63  ;;  %12028 = vst [vmem:[#allocation159_spill] sm:$0xff] %v9426_v36  ;;  %v9441_v52 = vrot.slane %v3894_v53, %v8956_v51  ;;  %v3922_v36 = vrot.slane %v12033_v62, %v8956_v51  ;;  %v3936_v31 = vrot.slane %v8750_v9, %v8956_v51  ;;  %v12035_v53 = vld [vmem:[#allocation71_spill] sm:$0xff]  ;;  %v12037_v62 = vld [vmem:[#allocation72_spill] sm:$0xff] }
 0x207   :  { %12029 = vst [vmem:[#allocation152_spill] sm:$0xff] %v9435_v50  ;;  %12030 = vst [vmem:[#allocation160_spill] sm:$0xff] %v9438_v6  ;;  %v3950_v21 = vrot.slane %v8752_v18, %v8956_v51  ;;  %v3964_v38 = vrot.slane %v8760_v1, %v8956_v51  ;;  %v3978_v6 = vrot.slane %v12034_v30, %v8956_v51 }
 0x208   :  { %12031 = vst [vmem:[#allocation161_spill] sm:$0xff] %v9441_v52  ;;  %12032 = vst [vmem:[#allocation169_spill] sm:$0xff] %v9444_v13  ;;  %v3992_v52 = vrot.slane %v12035_v53, %v8956_v51  ;;  %v4006_v13 = vrot.slane %v12036_v8, %v8956_v51  ;;  %v4020_v50 = vrot.slane %v12037_v62, %v8956_v51  ;;  %v12110_v17 = vld [vmem:[#allocation155_spill] sm:$0xff] }
 0x209   :  { %v9463_v9 = vrot.slane %v3922_v36, %v8956_v51  ;;  %v9466_v18 = vrot.slane %v3936_v31, %v8956_v51  ;;  %v9469_v1 = vrot.slane %v3950_v21, %v8956_v51  ;;  %v9472_v30 = vrot.slane %v3964_v38, %v8956_v51  ;;  %v12041_v31 = vld [vmem:[#allocation80_spill] sm:$0xff]  ;;  %v12042_v21 = vld [vmem:[#allocation81_spill] sm:$0xff] }
 0x20a   :  { %v9475_v53 = vrot.slane %v3978_v6, %v8956_v51  ;;  %v9478_v8 = vrot.slane %v3992_v52, %v8956_v51  ;;  %v9481_v62 = vrot.slane %v4006_v13, %v8956_v51  ;;  %v9484_v36 = vrot.slane %v4020_v50, %v8956_v51  ;;  %v12043_v38 = vld [vmem:[#allocation89_spill] sm:$0xff]  ;;  %v12115_v15 = vld [vmem:[#allocation150_spill] sm:$0xff] }
 0x20b   :  { %12038 = vst [vmem:[#allocation162_spill] sm:$0xff] %v9466_v18  ;;  %12039 = vst [vmem:[#allocation170_spill] sm:$0xff] %v9469_v1  ;;  %v4034_v18 = vrot.slane %v12041_v31, %v8956_v51  ;;  %v4048_v1 = vrot.slane %v12042_v21, %v8956_v51  ;;  %v4076_v6 = vrot.slane %v8824_v10, %v8956_v51  ;;  %v12114_v43 = vld [vmem:[#allocation157_spill] sm:$0xff] }
 0x20c   :  { %12040 = vst [vmem:[#allocation163_spill] sm:$0xff] %v9472_v30  ;;  %v4062_v30 = vrot.slane %v12043_v38, %v8956_v51  ;;  %v4090_v52 = vrot.slane %v8835_v41, %v8956_v51  ;;  %v4104_v13 = vrot.slane %v8846_v28, %v8956_v51  ;;  %v4118_v50 = vrot.slane %v8857_v16, %v8956_v51 }
 0x20d   :  { %v4132_v31 = vrot.slane %v8868_v2, %v8956_v51  ;;  %v9503_v21 = vrot.slane %v4034_v18, %v8956_v51  ;;  %v9506_v38 = vrot.slane %v4048_v1, %v8956_v51  ;;  %v9512_v41 = vrot.slane %v4076_v6, %v8956_v51 }
 0x20e   :  { %v9509_v10 = vrot.slane %v4062_v30, %v8956_v51  ;;  %v9515_v28 = vrot.slane %v4090_v52, %v8956_v51  ;;  %v9518_v16 = vrot.slane %v4104_v13, %v8956_v51  ;;  %v9521_v2 = vrot.slane %v4118_v50, %v8956_v51  ;;  %v12118_v37 = vld [vmem:[#allocation152_spill] sm:$0xff] }
 0x20f   :  { %v9524_v18 = vrot.slane %v4132_v31, %v8956_v51  ;;  %v4146_v1 = vrot.slane %v8879_v3, %v8956_v51  ;;  %v4160_v30 = vrot.slane %v8890_v57, %v8956_v51  ;;  %v4174_v6 = vrot.slane %v8901_v25, %v8956_v51  ;;  %v12119_v42 = vld [vmem:[#allocation160_spill] sm:$0xff]  ;;  %v12120_v60 = vld [vmem:[#allocation161_spill] sm:$0xff] }
 0x210   :  { %v4188_v52 = vrot.slane %v8912_v29, %v8956_v51  ;;  %v4202_v13 = vrot.slane %v8923_v59, %v8956_v51  ;;  %v4216_v50 = vrot.slane %v8942_v45, %v8956_v51  ;;  %v4230_v31 = vrot.slane %v8944_v39, %v8956_v51  ;;  %v12121_v22 = vld [vmem:[#allocation169_spill] sm:$0xff] }
 0x211   :  { %v4244_v3 = vrot.slane %v8946_v56, %v8956_v51  ;;  %v9543_v57 = vrot.slane %v4146_v1, %v8956_v51  ;;  %v9546_v25 = vrot.slane %v4160_v30, %v8956_v51  ;;  %v9549_v29 = vrot.slane %v4174_v6, %v8956_v51 }
 0x212   :  { %v9552_v59 = vrot.slane %v4188_v52, %v8956_v51  ;;  %v9555_v45 = vrot.slane %v4202_v13, %v8956_v51  ;;  %v9558_v39 = vrot.slane %v4216_v50, %v8956_v51  ;;  %v9561_v56 = vrot.slane %v4230_v31, %v8956_v51 }
 0x213   :  { %12044 = vst [vmem:[#allocation171_spill] sm:$0xff] %v9543_v57  ;;  %v9564_v1 = vrot.slane %v4244_v3, %v8956_v51  ;;  %v4258_v30 = vrot.slane %v8948_v44, %v8956_v51  ;;  %v4272_v6 = vrot.slane %v8950_v40, %v8956_v51  ;;  %v4286_v52 = vrot.slane %v8952_v23, %v8956_v51 }
 0x214   :  { %12045 = vst [vmem:[#allocation164_spill] sm:$0xff] %v9552_v59  ;;  %12046 = vst [vmem:[#allocation172_spill] sm:$0xff] %v9555_v45  ;;  %v4300_v13 = vrot.slane %v8954_v47, %v8956_v51  ;;  %v4314_v50 = vrot.slane %v8958_v49, %v8956_v51  ;;  %v4328_v31 = vrot.slane %v8960_v35, %v8956_v51  ;;  %v4504_v57 = vrot.slane %v12132_v32, 3 }
 0x215   :  { %12047 = vst [vmem:[#allocation165_spill] sm:$0xff] %v9564_v1  ;;  %v4342_v3 = vrot.slane %v8962_v19, %v8956_v51  ;;  %v4356_v44 = vrot.slane %v8964_v14, %v8956_v51  ;;  %v9583_v40 = vrot.slane %v4258_v30, %v8956_v51  ;;  %v9586_v23 = vrot.slane %v4272_v6, %v8956_v51 }
 0x216   :  { %v9589_v47 = vrot.slane %v4286_v52, %v8956_v51  ;;  %v9592_v49 = vrot.slane %v4300_v13, %v8956_v51  ;;  %v9595_v35 = vrot.slane %v4314_v50, %v8956_v51  ;;  %v9598_v19 = vrot.slane %v4328_v31, %v8956_v51  ;;  %v12108_v52 = vld [vmem:[#allocation154_spill] sm:$0xff] }
 0x217   :  { %12048 = vst [vmem:[#allocation173_spill] sm:$0xff] %v9583_v40  ;;  %v9601_v14 = vrot.slane %v4342_v3, %v8956_v51  ;;  %v9604_v30 = vrot.slane %v4356_v44, %v8956_v51  ;;  %v12122_v3 = vld [vmem:[#allocation162_spill] sm:$0xff]  ;;  %v12124_v51 = vld [vmem:[#allocation163_spill] sm:$0xff]  ;;  %v12128_v6 = vunpack.c.l.b16 %v8986_v54  ;;  %v12129_v1 = vunpack.c.l.b16 %v8989_v48 }
 0x218   :  { %12049 = vst [vmem:[#allocation166_spill] sm:$0xff] %v9589_v47  ;;  %12050 = vst [vmem:[#allocation174_spill] sm:$0xff] %v9595_v35  ;;  %v12125_v44 = vmov %v9589_v47  ;;  %v12130_v50 = vunpack.c.l.b16 %v8992_v34  ;;  %v12131_v35 = vunpack.c.l.b16 %v8995_v27  ;;  %v12133_v59 = vunpack.c.l.b16 %v9001_v46 }
 0x219   :  { %12051 = vst [vmem:[#allocation167_spill] sm:$0xff] %v9601_v14  ;;  %12052 = vst [vmem:[#allocation175_spill] sm:$0xff] %v9604_v30  ;;  %v12123_v14 = vld [vmem:[#allocation170_spill] sm:$0xff]  ;;  %v4492_v47 = vrot.slane %v12128_v6, 7  ;;  %v4495_v13 = vrot.slane %v12129_v1, 6  ;;  %v4510_v30 = vrot.slane %v12134_v4, 1  ;;  %v12135_v54 = vunpack.c.l.b16 %v9026_v0 }
 0x21a   :  { %v4498_v40 = vrot.slane %v12130_v50, 5  ;;  %v4501_v31 = vrot.slane %v12131_v35, 4  ;;  %v4507_v45 = vrot.slane %v12133_v59, 2  ;;  %v12136_v48 = vunpack.c.l.b16 %v8983_v26  ;;  %v12142_v50 = vld [vmem:[#allocation82_spill] sm:$0xff] }
 0x21b   :  { %v4513_v6 = vrot.slane %v12135_v54, 7  ;;  %v12137_v1 = vunpack.c.l.b16 %v9029_v58  ;;  %v12138_v35 = vunpack.c.l.b16 %v9032_v5  ;;  %v12139_v32 = vunpack.c.l.b16 %v9035_v11 }
 0x21c   :  { %v4494_v34 = vsel %vm4493_vm3, %v4492_v47, %v12136_v48  ;;  %v12141_v4 = vunpack.c.l.b16 %v9038_v55  ;;  %v12143_v47 = vunpack.c.l.b16 %v12142_v50  ;;  %v12144_v48 = vld [vmem:[#allocation90_spill] sm:$0xff] }
 0x21d   :  { %v4515_v27 = vrot.slane %v12137_v1, 6  ;;  %v4517_v24 = vrot.slane %v12138_v35, 5  ;;  %v4519_v46 = vrot.slane %v12139_v32, 4  ;;  %v4497_v59 = vsel %vm4496_vm4, %v4495_v13, %v4494_v34  ;;  %v12146_v35 = vld [vmem:[#allocation91_spill] sm:$0xff]  ;;  %v12148_v34 = vld [vmem:[#allocation84_spill] sm:$0xff] }
 0x21e   :  { %v4514_v0 = vsel %vm4493_vm3, %v4513_v6, %v12140_v7  ;;  %v4521_v26 = vrot.slane %v12141_v4, 3  ;;  %v4523_v54 = vrot.slane %v12143_v47, 2  ;;  %v4500_v58 = vsel %vm4499_vm5, %v4498_v40, %v4497_v59  ;;  %v12150_v4 = vld [vmem:[#allocation92_spill] sm:$0xff]  ;;  %v12152_v59 = vld [vmem:[#allocation83_spill] sm:$0xff] }
 0x21f   :  { %v4516_v5 = vsel %vm4496_vm4, %v4515_v27, %v4514_v0  ;;  %v12145_v1 = vunpack.c.l.b16 %v12144_v48  ;;  %v12147_v32 = vunpack.c.l.b16 %v12146_v35  ;;  %v4503_v33 = vsel %vm4502_vm6, %v4501_v31, %v4500_v58 }
 0x220   :  { %v12127_v63 = vld [vmem:[#allocation167_spill] sm:$0xff]  ;;  %v4518_v6 = vsel %vm4499_vm5, %v4517_v24, %v4516_v5  ;;  %v12149_v55 = vunpack.c.l.b16 %v12148_v34  ;;  %v12151_v50 = vunpack.c.l.b16 %v12150_v4  ;;  %v4506_v40 = vsel %vm4505_vm7, %v4504_v57, %v4503_v33  ;;  %v12156_v5 = vld [vmem:[#allocation93_spill] sm:$0xff] }
 0x221   :  { %v4525_v11 = vrot.slane %v12145_v1, 1  ;;  %v4527_v13 = vrot.slane %v12147_v32, 7  ;;  %v4520_v27 = vsel %vm4502_vm6, %v4519_v46, %v4518_v6  ;;  %v12153_v0 = vunpack.c.l.b16 %v12152_v59  ;;  %v12154_v1 = vld [vmem:[#allocation85_spill] sm:$0xff] }
 0x222   :  { %v4529_v7 = vrot.slane %v12149_v55, 6  ;;  %v4531_v47 = vrot.slane %v12151_v50, 5  ;;  %v12155_v35 = vunpack.c.l.b16 %v12154_v1  ;;  %v4509_v31 = vsel %vm4508_vm8, %v4507_v45, %v4506_v40 }
 0x223   :  { %v4528_v48 = vsel %vm4493_vm3, %v4527_v13, %v12153_v0  ;;  %v4522_v24 = vsel %vm4505_vm7, %v4521_v26, %v4520_v27  ;;  %v12157_v34 = vunpack.c.l.b16 %v12156_v5  ;;  %v9792_v57 = vsel %vm4511_vm9, %v4510_v30, %v4509_v31  ;;  %v12158_v13 = vld [vmem:[#allocation86_spill] sm:$0xff]  ;;  %v12162_v27 = vld [vmem:[#allocation95_spill] sm:$0xff] }
 0x224   :  { %v4533_v32 = vrot.slane %v12155_v35, 4  ;;  %v4530_v58 = vsel %vm4496_vm4, %v4529_v7, %v4528_v48  ;;  %v4524_v46 = vsel %vm4508_vm8, %v4523_v54, %v4522_v24  ;;  %v12159_v6 = vunpack.c.l.b16 %v12158_v13  ;;  %v12160_v26 = vld [vmem:[#allocation94_spill] sm:$0xff]  ;;  %v12164_v48 = vld [vmem:[#allocation88_spill] sm:$0xff]  ;;  %v12168_v24 = vld [vmem:[#allocation97_spill] sm:$0xff] }
 0x225   :  { %v4535_v55 = vrot.slane %v12157_v34, 3  ;;  %v4532_v33 = vsel %vm4499_vm5, %v4531_v47, %v4530_v58  ;;  %v9799_v50 = vsel %vm4511_vm9, %v4525_v11, %v4524_v46  ;;  %v12161_v7 = vunpack.c.l.b16 %v12160_v26  ;;  %v12166_v47 = vld [vmem:[#allocation96_spill] sm:$0xff]  ;;  %v12174_v26 = vld [vmem:[#allocation98_spill] sm:$0xff] }
 0x226   :  { %v4537_v4 = vrot.slane %v12159_v6, 2  ;;  %v4534_v45 = vsel %vm4502_vm6, %v4533_v32, %v4532_v33  ;;  %v12163_v59 = vunpack.c.l.b16 %v12162_v27  ;;  %v12165_v54 = vunpack.c.l.b16 %v12164_v48  ;;  %v12170_v32 = vld [vmem:[#allocation87_spill] sm:$0xff]  ;;  %v12172_v33 = vld [vmem:[#allocation105_spill] sm:$0xff] }
 0x227   :  { %v4539_v40 = vrot.slane %v12161_v7, 1  ;;  %v4536_v30 = vsel %vm4505_vm7, %v4535_v55, %v4534_v45  ;;  %v12167_v35 = vunpack.c.l.b16 %v12166_v47  ;;  %v12169_v58 = vunpack.c.l.b16 %v12168_v24  ;;  %v12179_v47 = vld [vmem:[#allocation107_spill] sm:$0xff] }
 0x228   :  { %v4541_v0 = vrot.slane %v12163_v59, 7  ;;  %v4543_v1 = vrot.slane %v12165_v54, 6  ;;  %v4538_v5 = vsel %vm4508_vm8, %v4537_v4, %v4536_v30  ;;  %v12171_v34 = vunpack.c.l.b16 %v12170_v32  ;;  %v12177_v59 = vld [vmem:[#allocation106_spill] sm:$0xff]  ;;  %v12183_v32 = vld [vmem:[#allocation108_spill] sm:$0xff] }
 0x229   :  { %v4545_v31 = vrot.slane %v12167_v35, 5  ;;  %v4547_v11 = vrot.slane %v12169_v58, 4  ;;  %v12173_v13 = vunpack.c.l.b16 %v12172_v33  ;;  %v12175_v55 = vunpack.c.l.b16 %v12174_v26 }
 0x22a   :  { %v4542_v46 = vsel %vm4493_vm3, %v4541_v0, %v12171_v34  ;;  %v9822_v7 = vsel %vm4511_vm9, %v4539_v40, %v4538_v5  ;;  %v12178_v48 = vunpack.c.l.b16 %v12177_v59  ;;  %v12180_v4 = vunpack.c.l.b16 %v12179_v47  ;;  %v12181_v0 = vld [vmem:[#allocation100_spill] sm:$0xff]  ;;  %v12189_v59 = vld [vmem:[#allocation109_spill] sm:$0xff] }
 0x22b   :  { %v4549_v6 = vrot.slane %v12173_v13, 3  ;;  %v4551_v45 = vrot.slane %v12175_v55, 2  ;;  %12176 = vst [vmem:[#allocation168_spill] sm:$0xff] %v9822_v7  ;;  %v4544_v27 = vsel %vm4496_vm4, %v4543_v1, %v4542_v46  ;;  %v12182_v24 = vunpack.c.l.b16 %v12181_v0  ;;  %v12185_v13 = vld [vmem:[#allocation101_spill] sm:$0xff]  ;;  %v12187_v1 = vld [vmem:[#allocation99_spill] sm:$0xff] }
 0x22c   :  { %v4553_v54 = vrot.slane %v12178_v48, 1  ;;  %v4555_v30 = vrot.slane %v12180_v4, 7  ;;  %v4546_v35 = vsel %vm4499_vm5, %v4545_v31, %v4544_v27  ;;  %v12184_v34 = vunpack.c.l.b16 %v12183_v32  ;;  %v12191_v4 = vld [vmem:[#allocation102_spill] sm:$0xff] }
 0x22d   :  { %v4557_v58 = vrot.slane %v12182_v24, 6  ;;  %v12186_v26 = vunpack.c.l.b16 %v12185_v13  ;;  %v4548_v5 = vsel %vm4502_vm6, %v4547_v11, %v4546_v35  ;;  %v12188_v46 = vunpack.c.l.b16 %v12187_v1  ;;  %v12193_v32 = vld [vmem:[#allocation110_spill] sm:$0xff]  ;;  %v12197_v1 = vld [vmem:[#allocation104_spill] sm:$0xff] }
 0x22e   :  { %v4559_v33 = vrot.slane %v12184_v34, 5  ;;  %v12190_v48 = vunpack.c.l.b16 %v12189_v59  ;;  %v12192_v31 = vunpack.c.l.b16 %v12191_v4  ;;  %v4550_v0 = vsel %vm4505_vm7, %v4549_v6, %v4548_v5  ;;  %v12202_v5 = vld [vmem:[#allocation103_spill] sm:$0xff] }
 0x22f   :  { %v4561_v40 = vrot.slane %v12186_v26, 4  ;;  %v4556_v55 = vsel %vm4493_vm3, %v4555_v30, %v12188_v46  ;;  %v12194_v34 = vunpack.c.l.b16 %v12193_v32  ;;  %v12195_v26 = vld [vmem:[#allocation111_spill] sm:$0xff]  ;;  %v4552_v35 = vsel %vm4508_vm8, %v4551_v45, %v4550_v0 }
 0x230   :  { %v4563_v47 = vrot.slane %v12190_v48, 3  ;;  %v4565_v27 = vrot.slane %v12192_v31, 2  ;;  %v4558_v24 = vsel %vm4496_vm4, %v4557_v58, %v4556_v55  ;;  %v12196_v7 = vunpack.c.l.b16 %v12195_v26  ;;  %v12199_v48 = vld [vmem:[#allocation112_spill] sm:$0xff] }
 0x231   :  { %v4567_v13 = vrot.slane %v12194_v34, 1  ;;  %v4560_v30 = vsel %vm4499_vm5, %v4559_v33, %v4558_v24  ;;  %v12198_v46 = vunpack.c.l.b16 %v12197_v1  ;;  %v12200_v4 = vunpack.c.l.b16 %v12199_v48  ;;  %v12206_v24 = vld [vmem:[#allocation121_spill] sm:$0xff] }
 0x232   :  { %v4569_v11 = vrot.slane %v12196_v7, 7  ;;  %v9857_v6 = vsel %vm4511_vm9, %v4553_v54, %v4552_v35  ;;  %v4562_v58 = vsel %vm4502_vm6, %v4561_v40, %v4560_v30  ;;  %v12203_v55 = vunpack.c.l.b16 %v12202_v5  ;;  %v12204_v7 = vld [vmem:[#allocation113_spill] sm:$0xff]  ;;  %v12210_v30 = vld [vmem:[#allocation122_spill] sm:$0xff]  ;;  %v12212_v5 = vld [vmem:[#allocation123_spill] sm:$0xff] }
 0x233   :  { %v4571_v59 = vrot.slane %v12198_v46, 6  ;;  %v4573_v31 = vrot.slane %v12200_v4, 5  ;;  %12201 = vst [vmem:[#allocation176_spill] sm:$0xff] %v9857_v6  ;;  %v12205_v34 = vunpack.c.l.b16 %v12204_v7  ;;  %v4564_v33 = vsel %vm4505_vm7, %v4563_v47, %v4562_v58  ;;  %v12208_v46 = vld [vmem:[#allocation114_spill] sm:$0xff]  ;;  %v12215_v58 = vld [vmem:[#allocation116_spill] sm:$0xff] }
 0x234   :  { %v4570_v32 = vsel %vm4493_vm3, %v4569_v11, %v12203_v55  ;;  %v12207_v26 = vunpack.c.l.b16 %v12206_v24  ;;  %v12209_v48 = vunpack.c.l.b16 %v12208_v46  ;;  %v4566_v35 = vsel %vm4508_vm8, %v4565_v27, %v4564_v33  ;;  %v12217_v24 = vld [vmem:[#allocation124_spill] sm:$0xff] }
 0x235   :  { %v4575_v45 = vrot.slane %v12205_v34, 4  ;;  %v4572_v0 = vsel %vm4496_vm4, %v4571_v59, %v4570_v32  ;;  %v12211_v4 = vunpack.c.l.b16 %v12210_v30  ;;  %v12213_v55 = vunpack.c.l.b16 %v12212_v5  ;;  %v12223_v5 = vld [vmem:[#allocation125_spill] sm:$0xff] }
 0x236   :  { %v4577_v1 = vrot.slane %v12207_v26, 3  ;;  %v4579_v54 = vrot.slane %v12209_v48, 2  ;;  %v4574_v40 = vsel %vm4499_vm5, %v4573_v31, %v4572_v0  ;;  %v9878_v47 = vsel %vm4511_vm9, %v4567_v13, %v4566_v35  ;;  %v12219_v31 = vld [vmem:[#allocation115_spill] sm:$0xff]  ;;  %v12221_v48 = vld [vmem:[#allocation117_spill] sm:$0xff] }
 0x237   :  { %v4581_v11 = vrot.slane %v12211_v4, 1  ;;  %v4583_v7 = vrot.slane %v12213_v55, 7  ;;  %12214 = vst [vmem:[#allocation177_spill] sm:$0xff] %v9878_v47  ;;  %v4576_v59 = vsel %vm4502_vm6, %v4575_v45, %v4574_v40  ;;  %v12216_v32 = vunpack.c.l.b16 %v12215_v58  ;;  %v12225_v55 = vld [vmem:[#allocation118_spill] sm:$0xff] }
 0x238   :  { %v12218_v26 = vunpack.c.l.b16 %v12217_v24  ;;  %v4578_v27 = vsel %vm4505_vm7, %v4577_v1, %v4576_v59  ;;  %v12220_v33 = vunpack.c.l.b16 %v12219_v31  ;;  %v12222_v30 = vunpack.c.l.b16 %v12221_v48  ;;  %v12227_v24 = vld [vmem:[#allocation126_spill] sm:$0xff]  ;;  %v12230_v31 = vld [vmem:[#allocation127_spill] sm:$0xff] }
 0x239   :  { %v4585_v34 = vrot.slane %v12216_v32, 6  ;;  %v12224_v13 = vunpack.c.l.b16 %v12223_v5  ;;  %v4580_v45 = vsel %vm4508_vm8, %v4579_v54, %v4578_v27  ;;  %v12226_v58 = vunpack.c.l.b16 %v12225_v55  ;;  %v12236_v55 = vld [vmem:[#allocation129_spill] sm:$0xff] }
 0x23a   :  { %v4587_v46 = vrot.slane %v12218_v26, 5  ;;  %v4584_v0 = vsel %vm4493_vm3, %v4583_v7, %v12220_v33  ;;  %v4589_v4 = vrot.slane %v12222_v30, 4  ;;  %v12228_v26 = vunpack.c.l.b16 %v12227_v24  ;;  %v12232_v30 = vld [vmem:[#allocation120_spill] sm:$0xff] }
 0x23b   :  { %v4591_v35 = vrot.slane %v12224_v13, 3  ;;  %v4586_v40 = vsel %vm4496_vm4, %v4585_v34, %v4584_v0  ;;  %v4593_v32 = vrot.slane %v12226_v58, 2  ;;  %v9900_v59 = vsel %vm4511_vm9, %v4581_v11, %v4580_v45  ;;  %v12234_v34 = vld [vmem:[#allocation128_spill] sm:$0xff] }
 0x23c   :  { %v4595_v1 = vrot.slane %v12228_v26, 1  ;;  %12229 = vst [vmem:[#allocation185_spill] sm:$0xff] %v9900_v59  ;;  %v4588_v7 = vsel %vm4499_vm5, %v4587_v46, %v4586_v40  ;;  %v12231_v33 = vunpack.c.l.b16 %v12230_v31  ;;  %v12233_v5 = vunpack.c.l.b16 %v12232_v30  ;;  %v12238_v26 = vld [vmem:[#allocation137_spill] sm:$0xff]  ;;  %v12240_v46 = vld [vmem:[#allocation119_spill] sm:$0xff]  ;;  %v12244_v59 = vld [vmem:[#allocation138_spill] sm:$0xff] }
 0x23d   :  { %v4590_v54 = vsel %vm4502_vm6, %v4589_v4, %v4588_v7  ;;  %v12235_v27 = vunpack.c.l.b16 %v12234_v34  ;;  %v12237_v58 = vunpack.c.l.b16 %v12236_v55  ;;  %v12239_v47 = vunpack.c.l.b16 %v12238_v26  ;;  %v12246_v55 = vld [vmem:[#allocation139_spill] sm:$0xff] }
 0x23e   :  { %v4597_v48 = vrot.slane %v12231_v33, 7  ;;  %v4599_v13 = vrot.slane %v12233_v5, 6  ;;  %v4592_v45 = vsel %vm4505_vm7, %v4591_v35, %v4590_v54  ;;  %v12241_v40 = vunpack.c.l.b16 %v12240_v46  ;;  %v12242_v33 = vld [vmem:[#allocation130_spill] sm:$0xff]  ;;  %v12251_v46 = vld [vmem:[#allocation140_spill] sm:$0xff] }
 0x23f   :  { %v4601_v0 = vrot.slane %v12235_v27, 5  ;;  %v4603_v24 = vrot.slane %v12237_v58, 4  ;;  %v4605_v11 = vrot.slane %v12239_v47, 3  ;;  %v12243_v30 = vunpack.c.l.b16 %v12242_v33  ;;  %v12248_v47 = vld [vmem:[#allocation132_spill] sm:$0xff] }
 0x240   :  { %v4598_v31 = vsel %vm4493_vm3, %v4597_v48, %v12241_v40  ;;  %v12245_v4 = vunpack.c.l.b16 %v12244_v59  ;;  %v4594_v34 = vsel %vm4508_vm8, %v4593_v32, %v4592_v45  ;;  %v12247_v58 = vunpack.c.l.b16 %v12246_v55  ;;  %v12253_v59 = vld [vmem:[#allocation133_spill] sm:$0xff] }
 0x241   :  { %v4607_v5 = vrot.slane %v12243_v30, 2  ;;  %v4600_v27 = vsel %vm4496_vm4, %v4599_v13, %v4598_v31  ;;  %v12249_v6 = vunpack.c.l.b16 %v12248_v47  ;;  %v9929_v54 = vsel %vm4511_vm9, %v4595_v1, %v4594_v34  ;;  %v12255_v13 = vld [vmem:[#allocation131_spill] sm:$0xff]  ;;  %v12257_v55 = vld [vmem:[#allocation141_spill] sm:$0xff]  ;;  %v12259_v47 = vld [vmem:[#allocation134_spill] sm:$0xff] }
 0x242   :  { %v4609_v7 = vrot.slane %v12245_v4, 1  ;;  %v4611_v26 = vrot.slane %v12247_v58, 7  ;;  %12250 = vst [vmem:[#allocation178_spill] sm:$0xff] %v9929_v54  ;;  %v4602_v48 = vsel %vm4499_vm5, %v4601_v0, %v4600_v27  ;;  %v12252_v40 = vunpack.c.l.b16 %v12251_v46  ;;  %v12261_v46 = vld [vmem:[#allocation142_spill] sm:$0xff] }
 0x243   :  { %v4613_v35 = vrot.slane %v12249_v6, 6  ;;  %v12254_v30 = vunpack.c.l.b16 %v12253_v59  ;;  %v4604_v32 = vsel %vm4502_vm6, %v4603_v24, %v4602_v48  ;;  %v12256_v45 = vunpack.c.l.b16 %v12255_v13  ;;  %v12265_v13 = vld [vmem:[#allocation136_spill] sm:$0xff] }
 0x244   :  { %v4615_v33 = vrot.slane %v12252_v40, 5  ;;  %v12258_v58 = vunpack.c.l.b16 %v12257_v55  ;;  %v12260_v1 = vunpack.c.l.b16 %v12259_v47  ;;  %v4606_v0 = vsel %vm4505_vm7, %v4605_v11, %v4604_v32  ;;  %v12269_v32 = vld [vmem:[#allocation135_spill] sm:$0xff] }
 0x245   :  { %v4617_v4 = vrot.slane %v12254_v30, 4  ;;  %v4612_v31 = vsel %vm4493_vm3, %v4611_v26, %v12256_v45  ;;  %v12262_v40 = vunpack.c.l.b16 %v12261_v46  ;;  %v12263_v30 = vld [vmem:[#allocation143_spill] sm:$0xff]  ;;  %v4608_v48 = vsel %vm4508_vm8, %v4607_v5, %v4606_v0 }
 0x246   :  { %v4619_v6 = vrot.slane %v12258_v58, 3  ;;  %v4621_v34 = vrot.slane %v12260_v1, 2  ;;  %v4614_v27 = vsel %vm4496_vm4, %v4613_v35, %v4612_v31  ;;  %v12264_v54 = vunpack.c.l.b16 %v12263_v30  ;;  %v12267_v58 = vld [vmem:[#allocation144_spill] sm:$0xff] }
 0x247   :  { %v4623_v59 = vrot.slane %v12262_v40, 1  ;;  %v4616_v26 = vsel %vm4499_vm5, %v4615_v33, %v4614_v27  ;;  %v12266_v45 = vunpack.c.l.b16 %v12265_v13  ;;  %v12268_v47 = vunpack.c.l.b16 %v12267_v58  ;;  %v12274_v13 = vld [vmem:[#allocation146_spill] sm:$0xff] }
 0x248   :  { %v4625_v24 = vrot.slane %v12264_v54, 7  ;;  %v9957_v11 = vsel %vm4511_vm9, %v4609_v7, %v4608_v48  ;;  %v4618_v35 = vsel %vm4502_vm6, %v4617_v4, %v4616_v26  ;;  %v12270_v31 = vunpack.c.l.b16 %v12269_v32  ;;  %v12271_v54 = vld [vmem:[#allocation145_spill] sm:$0xff] }
 0x249   :  { %v4627_v55 = vrot.slane %v12266_v45, 6  ;;  %v4629_v1 = vrot.slane %v12268_v47, 5  ;;  %v12272_v40 = vunpack.c.l.b16 %v12271_v54  ;;  %v4620_v33 = vsel %vm4505_vm7, %v4619_v6, %v4618_v35 }
 0x24a   :  { %v4626_v46 = vsel %vm4493_vm3, %v4625_v24, %v12270_v31  ;;  %v12273_v27 = vunpack.c.l.b16 %v12106_v20  ;;  %v12275_v45 = vunpack.c.l.b16 %v12274_v13  ;;  %v4622_v48 = vsel %vm4508_vm8, %v4621_v34, %v4620_v33  ;;  %v12278_v20 = vld [vmem:[#allocation148_spill] sm:$0xff]  ;;  %v12284_v33 = vld [vmem:[#allocation149_spill] sm:$0xff] }
 0x24b   :  { %v4631_v5 = vrot.slane %v12272_v40, 4  ;;  %v4628_v0 = vsel %vm4496_vm4, %v4627_v55, %v4626_v46  ;;  %v12276_v26 = vunpack.c.l.b16 %v12108_v52  ;;  %v12277_v58 = vunpack.c.l.b16 %v12110_v17  ;;  %v12280_v31 = vld [vmem:[#allocation156_spill] sm:$0xff] }
 0x24c   :  { %v4633_v30 = vrot.slane %v12273_v27, 3  ;;  %v4635_v7 = vrot.slane %v12275_v45, 2  ;;  %v4630_v4 = vsel %vm4499_vm5, %v4629_v1, %v4628_v0  ;;  %v9978_v6 = vsel %vm4511_vm9, %v4623_v59, %v4622_v48  ;;  %v12282_v1 = vld [vmem:[#allocation147_spill] sm:$0xff] }
 0x24d   :  { %v4637_v24 = vrot.slane %v12276_v26, 1  ;;  %v4639_v47 = vrot.slane %v12277_v58, 7  ;;  %v4632_v55 = vsel %vm4502_vm6, %v4631_v5, %v4630_v4  ;;  %v12279_v35 = vunpack.c.l.b16 %v12278_v20  ;;  %v12288_v4 = vld [vmem:[#allocation158_spill] sm:$0xff] }
 0x24e   :  { %v12281_v46 = vunpack.c.l.b16 %v12280_v31  ;;  %v4634_v34 = vsel %vm4505_vm7, %v4633_v30, %v4632_v55  ;;  %v12283_v40 = vunpack.c.l.b16 %v12282_v1  ;;  %v12285_v17 = vunpack.c.l.b16 %v12284_v33  ;;  %v12290_v55 = vld [vmem:[#allocation159_spill] sm:$0xff] }
 0x24f   :  { %v4641_v32 = vrot.slane %v12279_v35, 6  ;;  %v12286_v59 = vunpack.c.l.b16 %v12114_v43  ;;  %v4636_v5 = vsel %vm4508_vm8, %v4635_v7, %v4634_v34  ;;  %v12287_v45 = vunpack.c.l.b16 %v12115_v15 }
 0x250   :  { %v4643_v54 = vrot.slane %v12281_v46, 5  ;;  %v4640_v52 = vsel %vm4493_vm3, %v4639_v47, %v12283_v40  ;;  %v4645_v0 = vrot.slane %v12285_v17, 4  ;;  %v12289_v26 = vunpack.c.l.b16 %v12288_v4 }
 0x251   :  { %v4647_v27 = vrot.slane %v12286_v59, 3  ;;  %v4642_v13 = vsel %vm4496_vm4, %v4641_v32, %v4640_v52  ;;  %v4649_v48 = vrot.slane %v12287_v45, 2  ;;  %v10000_v58 = vsel %vm4511_vm9, %v4637_v24, %v4636_v5 }
 0x252   :  { %v4651_v30 = vrot.slane %v12289_v26, 1  ;;  %v4644_v47 = vsel %vm4499_vm5, %v4643_v54, %v4642_v13  ;;  %v12291_v20 = vunpack.c.l.b16 %v12290_v55  ;;  %v12292_v43 = vunpack.c.l.b16 %v9429_v61  ;;  %v12296_v54 = vld [vmem:[#allocation151_spill] sm:$0xff] }
 0x253   :  { %v4646_v7 = vsel %vm4502_vm6, %v4645_v0, %v4644_v47  ;;  %v12293_v32 = vunpack.c.l.b16 %v9432_v12  ;;  %v12294_v46 = vunpack.c.l.b16 %v12118_v37  ;;  %v12295_v1 = vunpack.c.l.b16 %v12119_v42 }
 0x254   :  { %v4653_v35 = vrot.slane %v12291_v20, 7  ;;  %v4655_v31 = vrot.slane %v12292_v43, 6  ;;  %v4648_v40 = vsel %vm4505_vm7, %v4647_v27, %v4646_v7  ;;  %v12297_v52 = vunpack.c.l.b16 %v12296_v54 }
 0x255   :  { %v4657_v15 = vrot.slane %v12293_v32, 5  ;;  %v4659_v34 = vrot.slane %v12294_v46, 4  ;;  %v4661_v24 = vrot.slane %v12295_v1, 3  ;;  %v12298_v61 = vunpack.c.l.b16 %v12120_v60 }
 0x256   :  { %v4654_v33 = vsel %vm4493_vm3, %v4653_v35, %v12297_v52  ;;  %v12299_v0 = vunpack.c.l.b16 %v12121_v22  ;;  %v4650_v12 = vsel %vm4508_vm8, %v4649_v48, %v4648_v40  ;;  %v12300_v5 = vunpack.c.l.b16 %v12122_v3 }
 0x257   :  { %v4663_v17 = vrot.slane %v12298_v61, 2  ;;  %v4656_v37 = vsel %vm4496_vm4, %v4655_v31, %v4654_v33  ;;  %v12301_v13 = vunpack.c.l.b16 %v12123_v14  ;;  %v10029_v45 = vsel %vm4511_vm9, %v4651_v30, %v4650_v12 }
 0x258   :  { %v4665_v59 = vrot.slane %v12299_v0, 1  ;;  %v4667_v42 = vrot.slane %v12300_v5, 7  ;;  %v4658_v4 = vsel %vm4499_vm5, %v4657_v15, %v4656_v37  ;;  %v12302_v60 = vunpack.c.l.b16 %v12124_v51 }
 0x259   :  { %v4669_v27 = vrot.slane %v12301_v13, 6  ;;  %v12303_v22 = vunpack.c.l.b16 %v9475_v53  ;;  %v4660_v48 = vsel %vm4502_vm6, %v4659_v34, %v4658_v4  ;;  %v12304_v55 = vunpack.c.l.b16 %v9463_v9 }
 0x25a   :  { %v4671_v26 = vrot.slane %v12302_v60, 5  ;;  %v12305_v14 = vunpack.c.l.b16 %v9478_v8  ;;  %v12306_v30 = vunpack.c.l.b16 %v9481_v62  ;;  %v4662_v43 = vsel %vm4505_vm7, %v4661_v24, %v4660_v48 }
 0x25b   :  { %v4673_v47 = vrot.slane %v12303_v22, 4  ;;  %v4668_v3 = vsel %vm4493_vm3, %v4667_v42, %v12304_v55  ;;  %v12307_v31 = vunpack.c.l.b16 %v9484_v36  ;;  %v12308_v7 = vunpack.c.l.b16 %v9506_v38 }
 0x25c   :  { %v4675_v20 = vrot.slane %v12305_v14, 3  ;;  %v4677_v35 = vrot.slane %v12306_v30, 2  ;;  %v4670_v51 = vsel %vm4496_vm4, %v4669_v27, %v4668_v3  ;;  %v4664_v9 = vsel %vm4508_vm8, %v4663_v17, %v4662_v43 }
 0x25d   :  { %v4679_v53 = vrot.slane %v12307_v31, 1  ;;  %v4681_v32 = vrot.slane %v12308_v7, 7  ;;  %v4672_v15 = vsel %vm4499_vm5, %v4671_v26, %v4670_v51  ;;  %v12309_v8 = vunpack.c.l.b16 %v9509_v10  ;;  %v12320_v26 = vld [vmem:[#allocation171_spill] sm:$0xff] }
 0x25e   :  { %v12310_v62 = vunpack.c.l.b16 %v9512_v41  ;;  %v10057_v1 = vsel %vm4511_vm9, %v4665_v59, %v4664_v9  ;;  %v4674_v24 = vsel %vm4502_vm6, %v4673_v47, %v4672_v15  ;;  %v12311_v36 = vunpack.c.l.b16 %v9503_v21  ;;  %v12322_v47 = vld [vmem:[#allocation172_spill] sm:$0xff] }
 0x25f   :  { %v4683_v46 = vrot.slane %v12309_v8, 6  ;;  %v12312_v40 = vunpack.c.l.b16 %v9515_v28  ;;  %v4676_v52 = vsel %vm4505_vm7, %v4675_v20, %v4674_v24  ;;  %v12313_v33 = vunpack.c.l.b16 %v9518_v16 }
 0x260   :  { %v4685_v34 = vrot.slane %v12310_v62, 5  ;;  %v4682_v38 = vsel %vm4493_vm3, %v4681_v32, %v12311_v36  ;;  %v12314_v61 = vunpack.c.l.b16 %v9521_v2  ;;  %v4678_v0 = vsel %vm4508_vm8, %v4677_v35, %v4676_v52  ;;  %v12318_v2 = vld [vmem:[#allocation164_spill] sm:$0xff]  ;;  %v12326_v35 = vld [vmem:[#allocation165_spill] sm:$0xff] }
 0x261   :  { %v4687_v54 = vrot.slane %v12312_v40, 4  ;;  %v4684_v10 = vsel %vm4496_vm4, %v4683_v46, %v4682_v38  ;;  %v4689_v41 = vrot.slane %v12313_v33, 3  ;;  %v12315_v21 = vunpack.c.l.b16 %v9524_v18  ;;  %v12334_v40 = vld [vmem:[#allocation173_spill] sm:$0xff] }
 0x262   :  { %v4691_v17 = vrot.slane %v12314_v61, 2  ;;  %v4686_v59 = vsel %vm4499_vm5, %v4685_v34, %v4684_v10  ;;  %v12316_v28 = vunpack.c.l.b16 %v9546_v25  ;;  %v10078_v5 = vsel %vm4511_vm9, %v4679_v53, %v4678_v0  ;;  %v12337_v10 = vld [vmem:[#allocation175_spill] sm:$0xff] }
 0x263   :  { %v4693_v12 = vrot.slane %v12315_v21, 1  ;;  %v4688_v42 = vsel %vm4502_vm6, %v4687_v54, %v4686_v59  ;;  %v12317_v16 = vunpack.c.l.b16 %v9549_v29  ;;  %v12319_v27 = vunpack.c.l.b16 %v12318_v2  ;;  %v12339_v21 = vld [vmem:[#allocation168_spill] sm:$0xff]  ;;  %v12343_v2 = vld [vmem:[#allocation178_spill] sm:$0xff] }
 0x264   :  { %v4695_v37 = vrot.slane %v12316_v28, 7  ;;  %v4690_v60 = vsel %vm4505_vm7, %v4689_v41, %v4688_v42  ;;  %v12321_v22 = vunpack.c.l.b16 %v12320_v26  ;;  %v12323_v25 = vunpack.c.l.b16 %v12322_v47  ;;  %v12341_v42 = vld [vmem:[#allocation177_spill] sm:$0xff] }
 0x265   :  { %v4697_v13 = vrot.slane %v12317_v16, 6  ;;  %v4699_v4 = vrot.slane %v12319_v27, 5  ;;  %v12324_v55 = vunpack.c.l.b16 %v9558_v39  ;;  %v4692_v14 = vsel %vm4508_vm8, %v4691_v17, %v4690_v60 }
 0x266   :  { %v4696_v18 = vsel %vm4493_vm3, %v4695_v37, %v12321_v22  ;;  %v4701_v48 = vrot.slane %v12323_v25, 4  ;;  %v12325_v20 = vunpack.c.l.b16 %v9561_v56  ;;  %v12327_v43 = vunpack.c.l.b16 %v12326_v35  ;;  %v12331_v56 = vld [vmem:[#allocation174_spill] sm:$0xff] }
 0x267   :  { %v4703_v3 = vrot.slane %v12324_v55, 3  ;;  %v4698_v29 = vsel %vm4496_vm4, %v4697_v13, %v4696_v18  ;;  %v4694_v31 = vsel %vm4511_vm9, %v4693_v12, %v4692_v14  ;;  %v12328_v7 = vunpack.c.l.b16 %v9586_v23  ;;  %v12340_v12 = vld [vmem:[#allocation176_spill] sm:$0xff]  ;;  %v12342_v13 = vld [vmem:[#allocation185_spill] sm:$0xff] }
 0x268   :  { %v4705_v30 = vrot.slane %v12325_v20, 2  ;;  %v4707_v51 = vrot.slane %v12327_v43, 1  ;;  %v4700_v53 = vsel %vm4499_vm5, %v4699_v4, %v4698_v29  ;;  %v12329_v39 = vunpack.c.l.b16 %v12125_v44 }
 0x269   :  { %v4709_v32 = vrot.slane %v12328_v7, 7  ;;  %v4702_v15 = vsel %vm4502_vm6, %v4701_v48, %v4700_v53  ;;  %v12330_v8 = vunpack.c.l.b16 %v9592_v49  ;;  %v12332_v62 = vunpack.c.l.b16 %v12331_v56 }
 0x26a   :  { %v4711_v9 = vrot.slane %v12329_v39, 6  ;;  %v12333_v24 = vunpack.c.l.b16 %v9598_v19  ;;  %v4704_v38 = vsel %vm4505_vm7, %v4703_v3, %v4702_v15  ;;  %v12335_v54 = vunpack.c.l.b16 %v12334_v40 }
 0x26b   :  { %v4713_v46 = vrot.slane %v12330_v8, 5  ;;  %v4715_v34 = vrot.slane %v12332_v62, 4  ;;  %v12336_v44 = vunpack.c.l.b16 %v12127_v63  ;;  %v12338_v33 = vunpack.c.l.b16 %v12337_v10 }
 0x26c   :  { %v4717_v36 = vrot.slane %v12333_v24, 3  ;;  %v4710_v23 = vsel %vm4493_vm3, %v4709_v32, %v12335_v54  ;;  %v4706_v49 = vsel %vm4508_vm8, %v4705_v30, %v4704_v38  ;;  %v4723_v19 = vpack.c.b16 %v9792_v57, %v9792_v57 }
 0x26d   :  { %v4719_v52 = vrot.slane %v12336_v44, 2  ;;  %v4721_v41 = vrot.slane %v12338_v33, 1  ;;  %v4712_v61 = vsel %vm4496_vm4, %v4711_v9, %v4710_v23  ;;  %v4724_v17 = vpack.c.b16 %v9799_v50, %v9799_v50 }
 0x26e   :  { %v4708_v0 = vsel %vm4511_vm9, %v4707_v51, %v4706_v49  ;;  %v4714_v59 = vsel %vm4499_vm5, %v4713_v46, %v4712_v61  ;;  %v4725_v63 = vpack.c.b16 %v12339_v21, %v12339_v21  ;;  %v4726_v28 = vpack.c.b16 %v12340_v12, %v12340_v12  ;;  %4756 = vst.msk [vmem:[%s10219_s1] sm:$0xf] %vm4755_vm10, %v4723_v19 }
 0x26f   :  { %v4716_v37 = vsel %vm4502_vm6, %v4715_v34, %v4714_v59  ;;  %v4727_v16 = vpack.c.b16 %v12341_v42, %v12341_v42  ;;  %v4728_v57 = vpack.c.b16 %v12342_v13, %v12342_v13  ;;  %v4729_v50 = vpack.c.b16 %v12343_v2, %v12343_v2  ;;  %4757 = vst.msk [vmem:[%s10219_s1 + $0x4] sm:$0xf] %vm4755_vm10, %v4724_v17 }
 0x270   :  { %v4718_v27 = vsel %vm4505_vm7, %v4717_v36, %v4716_v37  ;;  %v4730_v4 = vpack.c.b16 %v9957_v11, %v9957_v11  ;;  %v4731_v60 = vpack.c.b16 %v9978_v6, %v9978_v6  ;;  %v4732_v26 = vpack.c.b16 %v10000_v58, %v10000_v58  ;;  %4758 = vst.msk [vmem:[%s10219_s1 + $0x8] sm:$0xf] %vm4755_vm10, %v4725_v63 }
 0x271   :  { %v4720_v22 = vsel %vm4508_vm8, %v4719_v52, %v4718_v27  ;;  %v4733_v18 = vpack.c.b16 %v10029_v45, %v10029_v45  ;;  %v4734_v47 = vpack.c.b16 %v10057_v1, %v10057_v1  ;;  %v4735_v25 = vpack.c.b16 %v10078_v5, %v10078_v5  ;;  %4759 = vst.msk [vmem:[%s10219_s1 + $0xc] sm:$0xf] %vm4755_vm10, %v4726_v28 }
 0x272   :  { %v4722_v48 = vsel %vm4511_vm9, %v4721_v41, %v4720_v22  ;;  %v4736_v11 = vpack.c.b16 %v4694_v31, %v4694_v31  ;;  %v4737_v55 = vpack.c.b16 %v4708_v0, %v4708_v0  ;;  %4760 = vst.msk [vmem:[%s10219_s1 + $0x10] sm:$0xf] %vm4755_vm10, %v4727_v16  ;;  %4761 = vst.msk [vmem:[%s10219_s1 + $0x14] sm:$0xf] %vm4755_vm10, %v4728_v57 }
 0x273   :  { %v4738_v6 = vpack.c.b16 %v4722_v48, %v4722_v48  ;;  %4762 = vst.msk [vmem:[%s10219_s1 + $0x18] sm:$0xf] %vm4755_vm10, %v4729_v50  ;;  %4763 = vst.msk [vmem:[%s10219_s1 + $0x1c] sm:$0xf] %vm4755_vm10, %v4730_v4 }
 0x274   :  { %4764 = vst.msk [vmem:[%s10219_s1 + $0x20] sm:$0xf] %vm4755_vm10, %v4731_v60  ;;  %4765 = vst.msk [vmem:[%s10219_s1 + $0x24] sm:$0xf] %vm4755_vm10, %v4732_v26 }
 0x275   :  { %4766 = vst.msk [vmem:[%s10219_s1 + $0x28] sm:$0xf] %vm4755_vm10, %v4733_v18  ;;  %4767 = vst.msk [vmem:[%s10219_s1 + $0x2c] sm:$0xf] %vm4755_vm10, %v4734_v47 }
 0x276   :  { %4768 = vst.msk [vmem:[%s10219_s1 + $0x30] sm:$0xf] %vm4755_vm10, %v4735_v25  ;;  %4769 = vst.msk [vmem:[%s10219_s1 + $0x34] sm:$0xf] %vm4755_vm10, %v4736_v11 }
 0x277   :  { %4770 = vst.msk [vmem:[%s10219_s1 + $0x38] sm:$0xf] %vm4755_vm10, %v4737_v55  ;;  %4771 = vst.msk [vmem:[%s10219_s1 + $0x3c] sm:$0xf] %vm4755_vm10, %v4738_v6 }

// kernel: vae_forward.27
= control target key start
LH: loop header
LB: loop body
LE: loop exit
PB: predicated region body
PF: predicated region fallthrough
CT: control target
= control target key end

     0   :  { %s2442_s1 = inlined_call_operand.vmem [shape: bf16[896,128], index: 1, kind: input, shape index: {}]   ;;  %s2443_s0 = inlined_call_operand.vmem [shape: bf16[128,896], index: 0, kind: input, shape index: {}]   ;;  %s2444_s2 = inlined_call_operand.vmem [shape: f32[1,128], index: 2, kind: input, shape index: {}]   ;;  %s2445_s3 = inlined_call_operand.vmem [shape: bf16[128,128], index: 3, kind: output, shape index: {}]  }
   0x1   :  { %v1845_v0 = vld [vmem:[%s2442_s1 + $0x40] sm:$0xff]   ;;  %v1849_v4 = vld [vmem:[%s2442_s1 + $0x48] sm:$0xff]   ;;  %v1853_v8 = vld [vmem:[%s2442_s1 + $0x50] sm:$0xff]  }
   0x2   :  { %v1846_v1 = vld [vmem:[%s2442_s1 + $0xc0] sm:$0xff]   ;;  %1605 = vmatprep.subr.bf16.mxu0 %v1845_v0  ;;  %v1850_v5 = vld [vmem:[%s2442_s1 + $0xc8] sm:$0xff]   ;;  %v1854_v9 = vld [vmem:[%s2442_s1 + $0xd0] sm:$0xff]  }
   0x3   :  { %v1847_v2 = vld [vmem:[%s2442_s1] sm:$0xff]   ;;  %1669 = vmatprep.subr.bf16.mxu1 %v1846_v1  ;;  %v1851_v6 = vld [vmem:[%s2442_s1 + $0x8] sm:$0xff]   ;;  %v1855_v10 = vld [vmem:[%s2442_s1 + $0x10] sm:$0xff]  }
   0x4   :  { %v1848_v3 = vld [vmem:[%s2442_s1 + $0x80] sm:$0xff]   ;;  %1606 = vmatpush3.bf16.msra.mxu0 %v1847_v2  ;;  %v1852_v7 = vld [vmem:[%s2442_s1 + $0x88] sm:$0xff]   ;;  %v1856_v11 = vld [vmem:[%s2442_s1 + $0x90] sm:$0xff]  }
   0x5   :  { %1670 = vmatpush3.bf16.msra.mxu1 %v1848_v3  ;;  %1607 = vmatprep.subr.bf16.mxu0 %v1849_v4  ;;  %v1857_v12 = vld [vmem:[%s2442_s1 + $0x58] sm:$0xff]   ;;  %v1861_v16 = vld [vmem:[%s2442_s1 + $0x60] sm:$0xff]   ;;  %v1865_v20 = vld [vmem:[%s2442_s1 + $0x68] sm:$0xff]  }
   0x6   :  { %1671 = vmatprep.subr.bf16.mxu1 %v1850_v5  ;;  %v1858_v13 = vld [vmem:[%s2442_s1 + $0xd8] sm:$0xff]   ;;  %v1862_v17 = vld [vmem:[%s2442_s1 + $0xe0] sm:$0xff]   ;;  %v1866_v21 = vld [vmem:[%s2442_s1 + $0xe8] sm:$0xff]  }
   0x7   :  { %v1859_v14 = vld [vmem:[%s2442_s1 + $0x18] sm:$0xff]   ;;  %v1863_v18 = vld [vmem:[%s2442_s1 + $0x20] sm:$0xff]   ;;  %v1867_v22 = vld [vmem:[%s2442_s1 + $0x28] sm:$0xff]  }
   0x8   :  { %1608 = vmatpush3.bf16.msra.mxu0 %v1851_v6  ;;  %v1860_v15 = vld [vmem:[%s2442_s1 + $0x98] sm:$0xff]   ;;  %v1864_v19 = vld [vmem:[%s2442_s1 + $0xa0] sm:$0xff]   ;;  %v1868_v23 = vld [vmem:[%s2442_s1 + $0xa8] sm:$0xff]  }
   0x9   :  { %1672 = vmatpush3.bf16.msra.mxu1 %v1852_v7  ;;  %1609 = vmatprep.subr.bf16.mxu0 %v1853_v8  ;;  %v1869_v24 = vld [vmem:[%s2442_s1 + $0x70] sm:$0xff]   ;;  %v1873_v28 = vld [vmem:[%s2442_s1 + $0x78] sm:$0xff]   ;;  %v1879_v33 = vld [vmem:[%s2443_s0 + $0x4] ss:$28 sps:$4 sm:$0xff]  }
   0xa   :  { %1673 = vmatprep.subr.bf16.mxu1 %v1854_v9  ;;  %v1870_v25 = vld [vmem:[%s2442_s1 + $0xf0] sm:$0xff]   ;;  %v1874_v29 = vld [vmem:[%s2442_s1 + $0xf8] sm:$0xff]   ;;  %v1880_v34 = vld [vmem:[%s2443_s0 + $0x8] ss:$28 sps:$4 sm:$0xff]   ;;  %883 = vmatprep.mubr.bf16.mxu0 %v1879_v33 }
   0xb   :  { %v1871_v26 = vld [vmem:[%s2442_s1 + $0x30] sm:$0xff]   ;;  %v1875_v30 = vld [vmem:[%s2442_s1 + $0x38] sm:$0xff]   ;;  %v1882_v35 = vld [vmem:[%s2443_s0 + $0xc] ss:$28 sps:$4 sm:$0xff]  }
   0xc   :  { %1610 = vmatpush3.bf16.msra.mxu0 %v1855_v10  ;;  %v1872_v27 = vld [vmem:[%s2442_s1 + $0xb0] sm:$0xff]   ;;  %v1876_v31 = vld [vmem:[%s2442_s1 + $0xb8] sm:$0xff]   ;;  %v1883_v36 = vld [vmem:[%s2442_s1 + $0x140] sm:$0xff]   ;;  %980 = vmatprep.mubr.bf16.mxu1 %v1882_v35 }
   0xd   :  { %1674 = vmatpush3.bf16.msra.mxu1 %v1856_v11  ;;  %1611 = vmatprep.subr.bf16.mxu0 %v1857_v12  ;;  %v1877_v32 = vld [vmem:[%s2443_s0] ss:$28 sps:$4 sm:$0xff]   ;;  %v1889_v40 = vld [vmem:[%s2443_s0 + $0x38] ss:$28 sps:$4 sm:$0xff]   ;;  %v1891_v42 = vld [vmem:[%s2442_s1 + $0x148] sm:$0xff]  }
   0xe   :  { %1675 = vmatprep.subr.bf16.mxu1 %v1858_v13  ;;  %v1884_v37 = vld [vmem:[%s2442_s1 + $0x100] sm:$0xff]   ;;  %v1885_v38 = vld [vmem:[%s2443_s0 + $0x3c] ss:$28 sps:$4 sm:$0xff]   ;;  %v1892_v43 = vld [vmem:[%s2442_s1 + $0x108] sm:$0xff]  }
   0xf   :  { %v1887_v39 = vld [vmem:[%s2443_s0 + $0x44] ss:$28 sps:$4 sm:$0xff]   ;;  %v1893_v44 = vld [vmem:[%s2443_s0 + $0x74] ss:$28 sps:$4 sm:$0xff]   ;;  %v1895_v45 = vld [vmem:[%s2443_s0 + $0x7c] ss:$28 sps:$4 sm:$0xff]  }
  0x10   :  { %1612 = vmatpush3.bf16.msra.mxu0 %v1859_v14  ;;  %v1890_v41 = vld [vmem:[%s2443_s0 + $0x40] ss:$28 sps:$4 sm:$0xff]   ;;  %v1899_v46 = vld [vmem:[%s2442_s1 + $0x150] sm:$0xff]   ;;  %v1901_v50 = vld [vmem:[%s2443_s0 + $0xac] ss:$28 sps:$4 sm:$0xff]  }
  0x11   :  { %1676 = vmatpush3.bf16.msra.mxu1 %v1860_v15  ;;  %1613 = vmatprep.subr.bf16.mxu0 %v1861_v16  ;;  %v1900_v47 = vld [vmem:[%s2442_s1 + $0x110] sm:$0xff]   ;;  %v1907_v52 = vld [vmem:[%s2442_s1 + $0x158] sm:$0xff]   ;;  %v1905_v54 = vld [vmem:[%s2443_s0 + $0xa8] ss:$28 sps:$4 sm:$0xff]  }
  0x12   :  { %1677 = vmatprep.subr.bf16.mxu1 %v1862_v17  ;;  %v1897_v48 = vld [vmem:[%s2443_s0 + $0x70] ss:$28 sps:$4 sm:$0xff]   ;;  %v1898_v49 = vld [vmem:[%s2443_s0 + $0x78] ss:$28 sps:$4 sm:$0xff]   ;;  %v1915_v55 = vld [vmem:[%s2442_s1 + $0x160] sm:$0xff]  }
  0x13   :  { %v1903_v51 = vld [vmem:[%s2443_s0 + $0xb4] ss:$28 sps:$4 sm:$0xff]   ;;  %v1908_v53 = vld [vmem:[%s2442_s1 + $0x118] sm:$0xff]   ;;  %v1916_v57 = vld [vmem:[%s2442_s1 + $0x120] sm:$0xff]  }
  0x14   :  { %1614 = vmatpush3.bf16.msra.mxu0 %v1863_v18  ;;  %v1906_v56 = vld [vmem:[%s2443_s0 + $0xb0] ss:$28 sps:$4 sm:$0xff]   ;;  %v1917_v58 = vld [vmem:[%s2442_s1 + $0x180] sm:$0xff]   ;;  %v1918_v3 = vld [vmem:[%s2443_s0 + $0x11c] ss:$28 sps:$4 sm:$0xff]  }
  0x15   :  { %1678 = vmatpush3.bf16.msra.mxu1 %v1864_v19  ;;  %1615 = vmatprep.subr.bf16.mxu0 %v1865_v20  ;;  %v1909_v59 = vld [vmem:[%s2443_s0 + $0xe4] ss:$28 sps:$4 sm:$0xff]   ;;  %v1911_v60 = vld [vmem:[%s2443_s0 + $0xec] ss:$28 sps:$4 sm:$0xff]   ;;  %v1927_v0 = vld [vmem:[%s2442_s1 + $0x190] sm:$0xff]  }
  0x16   :  { %1679 = vmatprep.subr.bf16.mxu1 %v1866_v21  ;;  %v1924_v61 = vld [vmem:[%s2442_s1 + $0x168] sm:$0xff]   ;;  %v1913_v1 = vld [vmem:[%s2443_s0 + $0xe0] ss:$28 sps:$4 sm:$0xff]   ;;  %v1934_v5 = vld [vmem:[%s2442_s1 + $0x170] sm:$0xff]  }
  0x17   :  { %v1925_v62 = vld [vmem:[%s2442_s1 + $0x188] sm:$0xff]   ;;  %v1920_v4 = vld [vmem:[%s2443_s0 + $0x124] ss:$28 sps:$4 sm:$0xff]   ;;  %v1935_v6 = vld [vmem:[%s2442_s1 + $0x198] sm:$0xff]  }
  0x18   :  { %1616 = vmatpush3.bf16.msra.mxu0 %v1867_v22  ;;  %v1926_v63 = vld [vmem:[%s2442_s1 + $0x128] sm:$0xff]   ;;  %v1936_v7 = vld [vmem:[%s2442_s1 + $0x130] sm:$0xff]   ;;  %v1937_v8 = vld [vmem:[%s2442_s1 + $0x1a0] sm:$0xff]  }
  0x19   :  { %1680 = vmatpush3.bf16.msra.mxu1 %v1868_v23  ;;  %1617 = vmatprep.subr.bf16.mxu0 %v1869_v24  ;;  %v1914_v2 = vld [vmem:[%s2443_s0 + $0xe8] ss:$28 sps:$4 sm:$0xff]   ;;  %v1922_v9 = vld [vmem:[%s2443_s0 + $0x118] ss:$28 sps:$4 sm:$0xff]   ;;  %v1923_v10 = vld [vmem:[%s2443_s0 + $0x120] ss:$28 sps:$4 sm:$0xff]  }
  0x1a   :  { %1681 = vmatprep.subr.bf16.mxu1 %v1870_v25  ;;  %v1928_v11 = vld [vmem:[%s2443_s0 + $0x154] ss:$28 sps:$4 sm:$0xff]   ;;  %v1930_v12 = vld [vmem:[%s2443_s0 + $0x15c] ss:$28 sps:$4 sm:$0xff]   ;;  %v1945_v14 = vld [vmem:[%s2442_s1 + $0x1a8] sm:$0xff]  }
  0x1b   :  { %v1944_v13 = vld [vmem:[%s2442_s1 + $0x178] sm:$0xff]   ;;  %v1947_v16 = vld [vmem:[%s2442_s1 + $0x1b0] sm:$0xff]   ;;  %v1938_v19 = vld [vmem:[%s2443_s0 + $0x18c] ss:$28 sps:$4 sm:$0xff]  }
  0x1c   :  { %1618 = vmatpush3.bf16.msra.mxu0 %v1871_v26  ;;  %v1946_v15 = vld [vmem:[%s2442_s1 + $0x138] sm:$0xff]   ;;  %v1932_v17 = vld [vmem:[%s2443_s0 + $0x150] ss:$28 sps:$4 sm:$0xff]   ;;  %v1942_v22 = vld [vmem:[%s2443_s0 + $0x188] ss:$28 sps:$4 sm:$0xff]  }
  0x1d   :  { %1682 = vmatpush3.bf16.msra.mxu1 %v1872_v27  ;;  %1619 = vmatprep.subr.bf16.mxu0 %v1873_v28  ;;  %v1933_v18 = vld [vmem:[%s2443_s0 + $0x158] ss:$28 sps:$4 sm:$0xff]   ;;  %v1943_v23 = vld [vmem:[%s2443_s0 + $0x190] ss:$28 sps:$4 sm:$0xff]  }
  0x1e   :  { %1683 = vmatprep.subr.bf16.mxu1 %v1874_v29  ;;  %v1940_v20 = vld [vmem:[%s2443_s0 + $0x194] ss:$28 sps:$4 sm:$0xff]   ;;  %v1951_v21 = vld [vmem:[%s2442_s1 + $0x1b8] sm:$0xff]   ;;  %v1954_v28 = vld [vmem:[%s2443_s0 + $0x4c] ss:$28 sps:$4 sm:$0xff]  }
  0x1f   :  { %v1950_v24 = vld [vmem:[%s2443_s0 + $0x14] ss:$28 sps:$4 sm:$0xff]   ;;  %v1960_v29 = vld [vmem:[%s2443_s0 + $0x88] ss:$28 sps:$4 sm:$0xff]   ;;  %v1962_v35 = vld [vmem:[%s2443_s0 + $0xbc] ss:$28 sps:$4 sm:$0xff]  }
  0x20   :  { %1620 = vmatpush3.bf16.msra.mxu0 %v1875_v30  ;;  %v1952_v25 = vld [vmem:[%s2443_s0 + $0x18] ss:$28 sps:$4 sm:$0xff]   ;;  %v1948_v26 = vld [vmem:[%s2443_s0 + $0x10] ss:$28 sps:$4 sm:$0xff]   ;;  %v1956_v30 = vld [vmem:[%s2443_s0 + $0x48] ss:$28 sps:$4 sm:$0xff]  }
  0x21   :  { %1684 = vmatpush3.bf16.msra.mxu1 %v1876_v31  ;;  %1733 = vmatprep.subr.bf16.mxu0 %v1883_v36  ;;  %v1953_v27 = vld [vmem:[%s2443_s0 + $0x50] ss:$28 sps:$4 sm:$0xff]   ;;  %v1957_v31 = vld [vmem:[%s2443_s0 + $0x84] ss:$28 sps:$4 sm:$0xff]   ;;  %v1968_v33 = vld [vmem:[%s2443_s0 + $0xf8] ss:$28 sps:$4 sm:$0xff]  }
  0x22   :  { %1813 = vmatprep.subr.bf16.mxu1 %v1917_v58  ;;  %v1969_v36 = vld [vmem:[%s2443_s0 + $0x130] ss:$28 sps:$4 sm:$0xff]  }
  0x23   :  { %884 = vmatmul.mubr.bf16.vlgmr.msra.gmra.mrb[0].mxu0 %v1877_v32  ;;  %v1961_v32 = vld [vmem:[%s2443_s0 + $0xc0] ss:$28 sps:$4 sm:$0xff]  }
  0x24   :  { %981 = vmatmul.mubr.bf16.vlgmr.msra.gmra.mrb[0].mxu1 %v1880_v34  ;;  %1734 = vmatpush3.bf16.msra.mxu0 %v1884_v37  ;;  %v1959_v34 = vld [vmem:[%s2443_s0 + $0x80] ss:$28 sps:$4 sm:$0xff]   ;;  %v1976_v37 = vld [vmem:[%s2443_s0 + $0x168] ss:$28 sps:$4 sm:$0xff]  }
  0x25   :  { %891 = vmatprep.mubr.bf16.mxu0 %v1885_v38  ;;  %988 = vmatprep.mubr.bf16.mxu1 %v1887_v39  ;;  %v1964_v38 = vld [vmem:[%s2443_s0 + $0xb8] ss:$28 sps:$4 sm:$0xff]  }
  0x26   :  { %1735 = vmatprep.subr.bf16.mxu0 %v1891_v42  ;;  %1814 = vmatpush3.bf16.msra.mxu1 %v1917_v58  ;;  %v1965_v39 = vld [vmem:[%s2443_s0 + $0xf4] ss:$28 sps:$4 sm:$0xff]   ;;  %v1970_v42 = vld [vmem:[%s2443_s0 + $0x12c] ss:$28 sps:$4 sm:$0xff]  }
  0x27   :  { %1815 = vmatprep.subr.bf16.mxu1 %v1925_v62 }
  0x28   :  { %1736 = vmatpush3.bf16.msra.mxu0 %v1892_v43  ;;  %v1972_v43 = vld [vmem:[%s2443_s0 + $0x128] ss:$28 sps:$4 sm:$0xff]  }
  0x29   :  { %1737 = vmatprep.subr.bf16.mxu0 %v1899_v46  ;;  %v1978_v46 = vld [vmem:[%s2443_s0 + $0x19c] ss:$28 sps:$4 sm:$0xff]  }
  0x2a   :  { %1816 = vmatpush3.bf16.msra.mxu1 %v1925_v62 }
  0x2b   :  { %892 = vmatmul.mubr.bf16.gmra.mrb[4].mxu0 %v1889_v40  ;;  %1817 = vmatprep.subr.bf16.mxu1 %v1927_v0  ;;  %v1977_v40 = vld [vmem:[%s2443_s0 + $0x1a0] ss:$28 sps:$4 sm:$0xff]  }
  0x2c   :  { %989 = vmatmul.mubr.bf16.gmra.mrb[4].mxu1 %v1890_v41  ;;  %899 = vmatprep.mubr.bf16.mxu0 %v1893_v44  ;;  %v1967_v41 = vld [vmem:[%s2443_s0 + $0xf0] ss:$28 sps:$4 sm:$0xff]   ;;  %v1973_v44 = vld [vmem:[%s2443_s0 + $0x164] ss:$28 sps:$4 sm:$0xff]  }
  0x2d   :  { %996 = vmatprep.mubr.bf16.mxu1 %v1895_v45  ;;  %1738 = vmatpush3.bf16.msra.mxu0 %v1900_v47  ;;  %v1975_v45 = vld [vmem:[%s2443_s0 + $0x160] ss:$28 sps:$4 sm:$0xff]   ;;  %v1980_v47 = vld [vmem:[%s2443_s0 + $0x198] ss:$28 sps:$4 sm:$0xff]  }
  0x2e   :  { %1739 = vmatprep.subr.bf16.mxu0 %v1907_v52  ;;  %1818 = vmatpush3.bf16.msra.mxu1 %v1927_v0 }
  0x2f   :  { %1819 = vmatprep.subr.bf16.mxu1 %v1935_v6 }
  0x31   :  { %1740 = vmatpush3.bf16.msra.mxu0 %v1908_v53 }
  0x32   :  { %1741 = vmatprep.subr.bf16.mxu0 %v1915_v55  ;;  %1820 = vmatpush3.bf16.msra.mxu1 %v1935_v6 }
  0x33   :  { %900 = vmatmul.mubr.bf16.gmra.mrb[8].mxu0 %v1897_v48  ;;  %1821 = vmatprep.subr.bf16.mxu1 %v1937_v8 }
  0x34   :  { %997 = vmatmul.mubr.bf16.gmra.mrb[8].mxu1 %v1898_v49  ;;  %907 = vmatprep.mubr.bf16.mxu0 %v1901_v50 }
  0x35   :  { %1004 = vmatprep.mubr.bf16.mxu1 %v1903_v51  ;;  %1742 = vmatpush3.bf16.msra.mxu0 %v1916_v57 }
  0x36   :  { %1743 = vmatprep.subr.bf16.mxu0 %v1924_v61  ;;  %1822 = vmatpush3.bf16.msra.mxu1 %v1937_v8 }
  0x37   :  { %1823 = vmatprep.subr.bf16.mxu1 %v1945_v14 }
  0x39   :  { %1744 = vmatpush3.bf16.msra.mxu0 %v1926_v63 }
  0x3a   :  { %1745 = vmatprep.subr.bf16.mxu0 %v1934_v5  ;;  %1824 = vmatpush3.bf16.msra.mxu1 %v1945_v14 }
  0x3b   :  { %908 = vmatmul.mubr.bf16.gmra.mrb[12].mxu0 %v1905_v54  ;;  %1825 = vmatprep.subr.bf16.mxu1 %v1947_v16 }
  0x3c   :  { %1005 = vmatmul.mubr.bf16.gmra.mrb[12].mxu1 %v1906_v56  ;;  %915 = vmatprep.mubr.bf16.mxu0 %v1909_v59 }
  0x3d   :  { %1012 = vmatprep.mubr.bf16.mxu1 %v1911_v60  ;;  %1746 = vmatpush3.bf16.msra.mxu0 %v1936_v7 }
  0x3e   :  { %1747 = vmatprep.subr.bf16.mxu0 %v1944_v13  ;;  %1826 = vmatpush3.bf16.msra.mxu1 %v1947_v16 }
  0x3f   :  { %1827 = vmatprep.subr.bf16.mxu1 %v1951_v21 }
  0x41   :  { %1748 = vmatpush3.bf16.msra.mxu0 %v1946_v15 }
  0x42   :  { %1828 = vmatpush3.bf16.msra.mxu1 %v1951_v21 }
  0x43   :  { %916 = vmatmul.mubr.bf16.gmra.mrb[16].mxu0 %v1913_v1 }
  0x44   :  { %1013 = vmatmul.mubr.bf16.gmra.mrb[16].mxu1 %v1914_v2  ;;  %923 = vmatprep.mubr.bf16.mxu0 %v1918_v3 }
  0x45   :  { %1020 = vmatprep.mubr.bf16.mxu1 %v1920_v4 }
  0x4b   :  { %924 = vmatmul.mubr.bf16.gmra.mrb[20].mxu0 %v1922_v9 }
  0x4c   :  { %1021 = vmatmul.mubr.bf16.gmra.mrb[20].mxu1 %v1923_v10  ;;  %931 = vmatprep.mubr.bf16.mxu0 %v1928_v11 }
  0x4d   :  { %1028 = vmatprep.mubr.bf16.mxu1 %v1930_v12 }
  0x53   :  { %932 = vmatmul.mubr.bf16.gmra.mrb[24].mxu0 %v1932_v17 }
  0x54   :  { %1029 = vmatmul.mubr.bf16.gmra.mrb[24].mxu1 %v1933_v18  ;;  %939 = vmatprep.mubr.bf16.mxu0 %v1938_v19 }
  0x55   :  { %1036 = vmatprep.mubr.bf16.mxu1 %v1940_v20 }
  0x5b   :  { %940 = vmatmul.mubr.bf16.gmra.mrb[28].mxu0 %v1942_v22 }
  0x5c   :  { %1037 = vmatmul.mubr.bf16.gmra.mrb[28].mxu1 %v1943_v23  ;;  %1077 = vmatprep.mubr.bf16.mxu0 %v1950_v24 }
  0x5d   :  { %1829 = vmatprep.mubr.bf16.mxu1 %v1952_v25 }
  0x63   :  { %1078 = vmatmul.mubr.bf16.vlgmr.msra.gmra.mrb[32].mxu0 %v1948_v26 }
  0x64   :  { %1830 = vmatmul.mubr.bf16.vlgmr.msra.gmra.mrb[32].mxu1 %v1953_v27  ;;  %1085 = vmatprep.mubr.bf16.mxu0 %v1954_v28 }
  0x65   :  { %1833 = vmatprep.mubr.bf16.mxu1 %v1960_v29 }
  0x6b   :  { %1086 = vmatmul.mubr.bf16.gmra.mrb[36].mxu0 %v1956_v30 }
  0x6c   :  { %1093 = vmatprep.mubr.bf16.mxu0 %v1957_v31  ;;  %1834 = vmatmul.mubr.bf16.gmra.mrb[36].mxu1 %v1961_v32 }
  0x6d   :  { %1837 = vmatprep.mubr.bf16.mxu1 %v1968_v33 }
  0x73   :  { %1094 = vmatmul.mubr.bf16.gmra.mrb[40].mxu0 %v1959_v34 }
  0x74   :  { %1101 = vmatprep.mubr.bf16.mxu0 %v1962_v35  ;;  %1838 = vmatmul.mubr.bf16.gmra.mrb[40].mxu1 %v1969_v36 }
  0x75   :  { %1841 = vmatprep.mubr.bf16.mxu1 %v1976_v37 }
  0x7b   :  { %1102 = vmatmul.mubr.bf16.gmra.mrb[44].mxu0 %v1964_v38 }
  0x7c   :  { %1109 = vmatprep.mubr.bf16.mxu0 %v1965_v39  ;;  %1842 = vmatmul.mubr.bf16.gmra.mrb[44].mxu1 %v1977_v40 }
  0x83   :  { %1110 = vmatmul.mubr.bf16.gmra.mrb[48].mxu0 %v1967_v41 }
  0x84   :  { %1117 = vmatprep.mubr.bf16.mxu0 %v1970_v42 }
  0x8b   :  { %1118 = vmatmul.mubr.bf16.gmra.mrb[52].mxu0 %v1972_v43 }
  0x8c   :  { %1125 = vmatprep.mubr.bf16.mxu0 %v1973_v44 }
  0x93   :  { %1126 = vmatmul.mubr.bf16.gmra.mrb[56].mxu0 %v1975_v45 }
  0x94   :  { %1133 = vmatprep.mubr.bf16.mxu0 %v1978_v46 }
  0x9b   :  { %1134 = vmatmul.mubr.bf16.gmra.mrb[60].mxu0 %v1980_v47 }
  0xf6   :  { %v1621_v48 = vpop.f32.mrb[0].mxu0 }
  0xf7   :  { %v1685_v49 = vpop.f32.mrb[0].mxu1  ;;  %v1622_v50 = vpop.f32.mrb[1].mxu0 }
  0xf8   :  { %v1623_v51 = vadd.f32 %v1622_v50, %v1621_v48  ;;  %v1686_v52 = vpop.f32.mrb[1].mxu1  ;;  %v1624_v53 = vpop.f32.mrb[2].mxu0 }
  0xf9   :  { %v1687_v54 = vadd.f32 %v1686_v52, %v1685_v49  ;;  %v1688_v55 = vpop.f32.mrb[2].mxu1  ;;  %v1625_v56 = vpop.f32.mrb[3].mxu0 }
  0xfa   :  { %v1626_v57 = vadd.f32 %v1625_v56, %v1624_v53  ;;  %v1689_v58 = vpop.f32.mrb[3].mxu1 }
  0xfb   :  { %v2337_v59 = vadd.f32 %v1687_v54, %v1623_v51  ;;  %v1690_v60 = vadd.f32 %v1689_v58, %v1688_v55 }
  0xfd   :  { %v2339_v61 = vadd.f32 %v1690_v60, %v1626_v57 }
  0xfe   :  { %v1627_v62 = vpop.f32.mrb[4].mxu0 }
  0xff   :  { %v1691_v63 = vpop.f32.mrb[4].mxu1  ;;  %v1628_v0 = vpop.f32.mrb[5].mxu0 }
 0x100   :  { %v1629_v1 = vadd.f32 %v1628_v0, %v1627_v62  ;;  %v1692_v2 = vpop.f32.mrb[5].mxu1  ;;  %v1630_v3 = vpop.f32.mrb[6].mxu0 }
 0x101   :  { %v1693_v4 = vadd.f32 %v1692_v2, %v1691_v63  ;;  %v1694_v5 = vpop.f32.mrb[6].mxu1  ;;  %v1631_v6 = vpop.f32.mrb[7].mxu0 }
 0x102   :  { %v1632_v7 = vadd.f32 %v1631_v6, %v1630_v3  ;;  %v1695_v8 = vpop.f32.mrb[7].mxu1 }
 0x103   :  { %v2341_v9 = vadd.f32 %v1693_v4, %v1629_v1  ;;  %v1696_v10 = vadd.f32 %v1695_v8, %v1694_v5 }
 0x105   :  { %v2343_v11 = vadd.f32 %v1696_v10, %v1632_v7 }
 0x106   :  { %v1633_v12 = vpop.f32.mrb[8].mxu0 }
 0x107   :  { %v1697_v13 = vpop.f32.mrb[8].mxu1  ;;  %v1634_v14 = vpop.f32.mrb[9].mxu0 }
 0x108   :  { %v1635_v15 = vadd.f32 %v1634_v14, %v1633_v12  ;;  %v1698_v16 = vpop.f32.mrb[9].mxu1  ;;  %v1636_v17 = vpop.f32.mrb[10].mxu0 }
 0x109   :  { %v1699_v18 = vadd.f32 %v1698_v16, %v1697_v13  ;;  %v1700_v19 = vpop.f32.mrb[10].mxu1  ;;  %v1637_v20 = vpop.f32.mrb[11].mxu0 }
 0x10a   :  { %v1638_v21 = vadd.f32 %v1637_v20, %v1636_v17  ;;  %v1701_v22 = vpop.f32.mrb[11].mxu1 }
 0x10b   :  { %v2345_v23 = vadd.f32 %v1699_v18, %v1635_v15  ;;  %v1702_v24 = vadd.f32 %v1701_v22, %v1700_v19 }
 0x10d   :  { %v2347_v25 = vadd.f32 %v1702_v24, %v1638_v21 }
 0x10e   :  { %v1639_v26 = vpop.f32.mrb[12].mxu0 }
 0x10f   :  { %v1703_v27 = vpop.f32.mrb[12].mxu1  ;;  %v1640_v28 = vpop.f32.mrb[13].mxu0 }
 0x110   :  { %v1641_v29 = vadd.f32 %v1640_v28, %v1639_v26  ;;  %v1704_v30 = vpop.f32.mrb[13].mxu1  ;;  %v1642_v31 = vpop.f32.mrb[14].mxu0 }
 0x111   :  { %v1705_v32 = vadd.f32 %v1704_v30, %v1703_v27  ;;  %v1706_v33 = vpop.f32.mrb[14].mxu1  ;;  %v1643_v34 = vpop.f32.mrb[15].mxu0 }
 0x112   :  { %v1644_v35 = vadd.f32 %v1643_v34, %v1642_v31  ;;  %v1707_v36 = vpop.f32.mrb[15].mxu1 }
 0x113   :  { %v2349_v37 = vadd.f32 %v1705_v32, %v1641_v29  ;;  %v1708_v38 = vadd.f32 %v1707_v36, %v1706_v33 }
 0x115   :  { %v2351_v39 = vadd.f32 %v1708_v38, %v1644_v35 }
 0x116   :  { %v1645_v40 = vpop.f32.mrb[16].mxu0 }
 0x117   :  { %v1709_v41 = vpop.f32.mrb[16].mxu1  ;;  %v1646_v42 = vpop.f32.mrb[17].mxu0 }
 0x118   :  { %v1647_v43 = vadd.f32 %v1646_v42, %v1645_v40  ;;  %v1710_v44 = vpop.f32.mrb[17].mxu1  ;;  %v1648_v45 = vpop.f32.mrb[18].mxu0 }
 0x119   :  { %v1711_v46 = vadd.f32 %v1710_v44, %v1709_v41  ;;  %v1712_v47 = vpop.f32.mrb[18].mxu1  ;;  %v1649_v48 = vpop.f32.mrb[19].mxu0 }
 0x11a   :  { %v1650_v49 = vadd.f32 %v1649_v48, %v1648_v45  ;;  %v1713_v50 = vpop.f32.mrb[19].mxu1 }
 0x11b   :  { %v2353_v51 = vadd.f32 %v1711_v46, %v1647_v43  ;;  %v1714_v52 = vadd.f32 %v1713_v50, %v1712_v47 }
 0x11d   :  { %v2355_v53 = vadd.f32 %v1714_v52, %v1650_v49  ;;  %v2373_v52 = vld [vmem:[%s2444_s2] ss:$0 sm:$0xff] }
 0x11e   :  { %v1651_v54 = vpop.f32.mrb[20].mxu0 }
 0x11f   :  { %v1715_v55 = vpop.f32.mrb[20].mxu1  ;;  %v1652_v56 = vpop.f32.mrb[21].mxu0 }
 0x120   :  { %v1653_v57 = vadd.f32 %v1652_v56, %v1651_v54  ;;  %v1716_v58 = vpop.f32.mrb[21].mxu1  ;;  %v1654_v60 = vpop.f32.mrb[22].mxu0 }
 0x121   :  { %v1717_v62 = vadd.f32 %v1716_v58, %v1715_v55  ;;  %v1718_v63 = vpop.f32.mrb[22].mxu1  ;;  %v1655_v0 = vpop.f32.mrb[23].mxu0 }
 0x122   :  { %v1656_v1 = vadd.f32 %v1655_v0, %v1654_v60  ;;  %v1719_v2 = vpop.f32.mrb[23].mxu1 }
 0x123   :  { %v2357_v3 = vadd.f32 %v1717_v62, %v1653_v57  ;;  %v1720_v4 = vadd.f32 %v1719_v2, %v1718_v63 }
 0x125   :  { %v2359_v5 = vadd.f32 %v1720_v4, %v1656_v1 }
 0x126   :  { %v1657_v6 = vpop.f32.mrb[24].mxu0 }
 0x127   :  { %v1721_v7 = vpop.f32.mrb[24].mxu1  ;;  %v1658_v8 = vpop.f32.mrb[25].mxu0 }
 0x128   :  { %v1659_v10 = vadd.f32 %v1658_v8, %v1657_v6  ;;  %v1722_v12 = vpop.f32.mrb[25].mxu1  ;;  %v1660_v13 = vpop.f32.mrb[26].mxu0 }
 0x129   :  { %v1723_v14 = vadd.f32 %v1722_v12, %v1721_v7  ;;  %v1724_v15 = vpop.f32.mrb[26].mxu1  ;;  %v1661_v16 = vpop.f32.mrb[27].mxu0 }
 0x12a   :  { %v1662_v17 = vadd.f32 %v1661_v16, %v1660_v13  ;;  %v1725_v18 = vpop.f32.mrb[27].mxu1 }
 0x12b   :  { %v2361_v19 = vadd.f32 %v1723_v14, %v1659_v10  ;;  %v1726_v20 = vadd.f32 %v1725_v18, %v1724_v15 }
 0x12d   :  { %v2363_v21 = vadd.f32 %v1726_v20, %v1662_v17 }
 0x12e   :  { %v1663_v22 = vpop.f32.mrb[28].mxu0 }
 0x12f   :  { %v1727_v24 = vpop.f32.mrb[28].mxu1  ;;  %v1664_v26 = vpop.f32.mrb[29].mxu0 }
 0x130   :  { %v1665_v27 = vadd.f32 %v1664_v26, %v1663_v22  ;;  %v1728_v28 = vpop.f32.mrb[29].mxu1  ;;  %v1666_v29 = vpop.f32.mrb[30].mxu0 }
 0x131   :  { %v1729_v30 = vadd.f32 %v1728_v28, %v1727_v24  ;;  %v1730_v31 = vpop.f32.mrb[30].mxu1  ;;  %v1667_v32 = vpop.f32.mrb[31].mxu0 }
 0x132   :  { %v1668_v33 = vadd.f32 %v1667_v32, %v1666_v29  ;;  %v1731_v34 = vpop.f32.mrb[31].mxu1 }
 0x133   :  { %v2365_v35 = vadd.f32 %v1729_v30, %v1665_v27  ;;  %v1732_v36 = vadd.f32 %v1731_v34, %v1730_v31 }
 0x135   :  { %v2367_v38 = vadd.f32 %v1732_v36, %v1668_v33 }
 0x136   :  { %v1749_v40 = vpop.f32.mrb[32].mxu0 }
 0x137   :  { %v1750_v41 = vpop.f32.mrb[33].mxu0  ;;  %v1831_v42 = vpop.f32.mrb[32].mxu1 }
 0x138   :  { %v1751_v43 = vadd.f32 %v1750_v41, %v1749_v40  ;;  %v1752_v44 = vpop.f32.mrb[34].mxu0  ;;  %v1176_v45 = vpop.f32.mrb[33].mxu1 }
 0x139   :  { %v1753_v46 = vpop.f32.mrb[35].mxu0  ;;  %v1832_v47 = vpop.f32.mrb[34].mxu1 }
 0x13a   :  { %v1754_v48 = vadd.f32 %v1753_v46, %v1752_v44  ;;  %v1080_v49 = vadd.f32 %v1751_v43, %v2337_v59  ;;  %v1179_v50 = vpop.f32.mrb[35].mxu1 }
 0x13c   :  { %v1177_v54 = vadd.f32 %v1176_v45, %v1080_v49  ;;  %v1083_v55 = vadd.f32 %v1754_v48, %v2339_v61 }
 0x13e   :  { %v1297_v56 = vadd.f32 %v2373_v52, %v1177_v54  ;;  %v1180_v57 = vadd.f32 %v1179_v50, %v1083_v55  ;;  %v1755_v58 = vpop.f32.mrb[36].mxu0 }
 0x13f   :  { %v1756_v60 = vpop.f32.mrb[37].mxu0  ;;  %v1835_v62 = vpop.f32.mrb[36].mxu1 }
 0x140   :  { %v1298_v63 = vadd.f32 %v2373_v52, %v1180_v57  ;;  %v1757_v0 = vadd.f32 %v1756_v60, %v1755_v58  ;;  %v1758_v1 = vpop.f32.mrb[38].mxu0  ;;  %v1192_v59 = vpop.f32.mrb[37].mxu1  ;;  %v1313_v6 = vmax.f32 %v1297_v56, 0.0 }
 0x141   :  { %v1759_v2 = vpop.f32.mrb[39].mxu0  ;;  %v1836_v4 = vpop.f32.mrb[38].mxu1 }
 0x142   :  { %v1314_v7 = vmax.f32 %v1298_v63, 0.0  ;;  %v1088_v8 = vadd.f32 %v1757_v0, %v2341_v9  ;;  %v1760_v10 = vadd.f32 %v1759_v2, %v1758_v1  ;;  %v1195_v12 = vpop.f32.mrb[39].mxu1 }
 0x144   :  { %v1561_v61 = vpack.c.bf16 %v1314_v7, %v1313_v6  ;;  %v1185_v13 = vadd.f32 %v1831_v42, %v1088_v8  ;;  %v1091_v14 = vadd.f32 %v1760_v10, %v2343_v11 }
 0x146   :  { %1562 = vst [vmem:[%s2445_s3] sm:$0xff] %v1561_v61   ;;  %v1299_v15 = vadd.f32 %v2373_v52, %v1185_v13  ;;  %v1188_v16 = vadd.f32 %v1832_v47, %v1091_v14  ;;  %v1761_v17 = vpop.f32.mrb[40].mxu0 }
 0x147   :  { %v1762_v18 = vpop.f32.mrb[41].mxu0  ;;  %v2384_v20 = vpop.f32.mrb[40].mxu1 }
 0x148   :  { %v1300_v22 = vadd.f32 %v2373_v52, %v1188_v16  ;;  %v1763_v9 = vadd.f32 %v1762_v18, %v1761_v17  ;;  %v1764_v24 = vpop.f32.mrb[42].mxu0  ;;  %v1208_v26 = vpop.f32.mrb[41].mxu1  ;;  %v1315_v11 = vmax.f32 %v1299_v15, 0.0 }
 0x149   :  { %v1765_v27 = vpop.f32.mrb[43].mxu0  ;;  %v2387_v28 = vpop.f32.mrb[42].mxu1 }
 0x14a   :  { %v1316_v29 = vmax.f32 %v1300_v22, 0.0  ;;  %v1766_v30 = vadd.f32 %v1765_v27, %v1764_v24  ;;  %v1096_v31 = vadd.f32 %v1763_v9, %v2345_v23  ;;  %v1211_v32 = vpop.f32.mrb[43].mxu1 }
 0x14c   :  { %v1566_v33 = vpack.c.bf16 %v1316_v29, %v1315_v11  ;;  %v1193_v34 = vadd.f32 %v1192_v59, %v1096_v31  ;;  %v1099_v36 = vadd.f32 %v1766_v30, %v2347_v25 }
 0x14e   :  { %1598 = vst [vmem:[%s2445_s3 + $0x8] sm:$0xff] %v1566_v33   ;;  %v1301_v40 = vadd.f32 %v2373_v52, %v1193_v34  ;;  %v1196_v41 = vadd.f32 %v1195_v12, %v1099_v36  ;;  %v1767_v42 = vpop.f32.mrb[44].mxu0 }
 0x14f   :  { %v1768_v43 = vpop.f32.mrb[45].mxu0  ;;  %v2395_v44 = vpop.f32.mrb[44].mxu1 }
 0x150   :  { %v1302_v45 = vadd.f32 %v2373_v52, %v1196_v41  ;;  %v1769_v46 = vadd.f32 %v1768_v43, %v1767_v42  ;;  %v1770_v23 = vpop.f32.mrb[46].mxu0  ;;  %v1224_v47 = vpop.f32.mrb[45].mxu1  ;;  %v1317_v25 = vmax.f32 %v1301_v40, 0.0 }
 0x151   :  { %v1771_v48 = vpop.f32.mrb[47].mxu0  ;;  %v2398_v49 = vpop.f32.mrb[46].mxu1 }
 0x152   :  { %v1318_v50 = vmax.f32 %v1302_v45, 0.0  ;;  %v1104_v54 = vadd.f32 %v1769_v46, %v2349_v37  ;;  %v1772_v55 = vadd.f32 %v1771_v48, %v1770_v23  ;;  %v1227_v56 = vpop.f32.mrb[47].mxu1 }
 0x154   :  { %v1571_v57 = vpack.c.bf16 %v1318_v50, %v1317_v25  ;;  %v1201_v58 = vadd.f32 %v1835_v62, %v1104_v54  ;;  %v1107_v60 = vadd.f32 %v1772_v55, %v2351_v39 }
 0x156   :  { %1599 = vst [vmem:[%s2445_s3 + $0x10] sm:$0xff] %v1571_v57   ;;  %v1303_v63 = vadd.f32 %v2373_v52, %v1201_v58  ;;  %v1204_v0 = vadd.f32 %v1836_v4, %v1107_v60  ;;  %v1773_v1 = vpop.f32.mrb[48].mxu0 }
 0x157   :  { %v1774_v59 = vpop.f32.mrb[49].mxu0 }
 0x158   :  { %v1304_v2 = vadd.f32 %v2373_v52, %v1204_v0  ;;  %v1775_v6 = vadd.f32 %v1774_v59, %v1773_v1  ;;  %v1776_v7 = vpop.f32.mrb[50].mxu0  ;;  %v1319_v8 = vmax.f32 %v1303_v63, 0.0 }
 0x159   :  { %v1777_v37 = vpop.f32.mrb[51].mxu0 }
 0x15a   :  { %v1320_v10 = vmax.f32 %v1304_v2, 0.0  ;;  %v1778_v12 = vadd.f32 %v1777_v37, %v1776_v7  ;;  %v1112_v62 = vadd.f32 %v1775_v6, %v2353_v51 }
 0x15c   :  { %v1576_v39 = vpack.c.bf16 %v1320_v10, %v1319_v8  ;;  %v1209_v61 = vadd.f32 %v1208_v26, %v1112_v62  ;;  %v1115_v13 = vadd.f32 %v1778_v12, %v2355_v53 }
 0x15e   :  { %1600 = vst [vmem:[%s2445_s3 + $0x18] sm:$0xff] %v1576_v39   ;;  %v1305_v4 = vadd.f32 %v2373_v52, %v1209_v61  ;;  %v1212_v14 = vadd.f32 %v1211_v32, %v1115_v13  ;;  %v1779_v15 = vpop.f32.mrb[52].mxu0 }
 0x15f   :  { %v1780_v16 = vpop.f32.mrb[53].mxu0 }
 0x160   :  { %v1306_v17 = vadd.f32 %v2373_v52, %v1212_v14  ;;  %v1781_v18 = vadd.f32 %v1780_v16, %v1779_v15  ;;  %v1782_v22 = vpop.f32.mrb[54].mxu0  ;;  %v1321_v24 = vmax.f32 %v1305_v4, 0.0 }
 0x161   :  { %v1783_v9 = vpop.f32.mrb[55].mxu0 }
 0x162   :  { %v1322_v51 = vmax.f32 %v1306_v17, 0.0  ;;  %v1120_v26 = vadd.f32 %v1781_v18, %v2357_v3  ;;  %v1784_v27 = vadd.f32 %v1783_v9, %v1782_v22 }
 0x164   :  { %v1581_v53 = vpack.c.bf16 %v1322_v51, %v1321_v24  ;;  %v1217_v11 = vadd.f32 %v2384_v20, %v1120_v26  ;;  %v1123_v29 = vadd.f32 %v1784_v27, %v2359_v5 }
 0x166   :  { %1601 = vst [vmem:[%s2445_s3 + $0x20] sm:$0xff] %v1581_v53   ;;  %v1307_v30 = vadd.f32 %v2373_v52, %v1217_v11  ;;  %v1220_v31 = vadd.f32 %v2387_v28, %v1123_v29  ;;  %v1785_v32 = vpop.f32.mrb[56].mxu0 }
 0x167   :  { %v1786_v33 = vpop.f32.mrb[57].mxu0 }
 0x168   :  { %v1308_v34 = vadd.f32 %v2373_v52, %v1220_v31  ;;  %v1787_v36 = vadd.f32 %v1786_v33, %v1785_v32  ;;  %v1788_v3 = vpop.f32.mrb[58].mxu0  ;;  %v1323_v41 = vmax.f32 %v1307_v30, 0.0 }
 0x169   :  { %v1789_v40 = vpop.f32.mrb[59].mxu0 }
 0x16a   :  { %v1324_v42 = vmax.f32 %v1308_v34, 0.0  ;;  %v1790_v20 = vadd.f32 %v1789_v40, %v1788_v3  ;;  %v1128_v5 = vadd.f32 %v1787_v36, %v2361_v19 }
 0x16c   :  { %v1586_v43 = vpack.c.bf16 %v1324_v42, %v1323_v41  ;;  %v1225_v45 = vadd.f32 %v1224_v47, %v1128_v5  ;;  %v1131_v46 = vadd.f32 %v1790_v20, %v2363_v21 }
 0x16e   :  { %1602 = vst [vmem:[%s2445_s3 + $0x28] sm:$0xff] %v1586_v43   ;;  %v1309_v28 = vadd.f32 %v2373_v52, %v1225_v45  ;;  %v1228_v23 = vadd.f32 %v1227_v56, %v1131_v46  ;;  %v1791_v48 = vpop.f32.mrb[60].mxu0 }
 0x16f   :  { %v1792_v25 = vpop.f32.mrb[61].mxu0 }
 0x170   :  { %v1310_v50 = vadd.f32 %v2373_v52, %v1228_v23  ;;  %v1793_v54 = vadd.f32 %v1792_v25, %v1791_v48  ;;  %v1794_v55 = vpop.f32.mrb[62].mxu0  ;;  %v1325_v58 = vmax.f32 %v1309_v28, 0.0 }
 0x171   :  { %v1795_v57 = vpop.f32.mrb[63].mxu0 }
 0x172   :  { %v1326_v19 = vmax.f32 %v1310_v50, 0.0  ;;  %v1136_v47 = vadd.f32 %v1793_v54, %v2365_v35  ;;  %v1796_v60 = vadd.f32 %v1795_v57, %v1794_v55 }
 0x174   :  { %v1591_v21 = vpack.c.bf16 %v1326_v19, %v1325_v58  ;;  %v1233_v63 = vadd.f32 %v2395_v44, %v1136_v47  ;;  %v1139_v0 = vadd.f32 %v1796_v60, %v2367_v38 }
 0x176   :  { %1603 = vst [vmem:[%s2445_s3 + $0x30] sm:$0xff] %v1591_v21   ;;  %v1311_v56 = vadd.f32 %v2373_v52, %v1233_v63  ;;  %v1236_v1 = vadd.f32 %v2398_v49, %v1139_v0 }
 0x178   :  { %v1312_v59 = vadd.f32 %v2373_v52, %v1236_v1  ;;  %v1327_v2 = vmax.f32 %v1311_v56, 0.0 }
 0x17a   :  { %v1328_v6 = vmax.f32 %v1312_v59, 0.0 }
 0x17c   :  { %v1596_v7 = vpack.c.bf16 %v1328_v6, %v1327_v2 }
 0x17e   :  { %1604 = vst [vmem:[%s2445_s3 + $0x38] sm:$0xff] %v1596_v7  }

// kernel: vae_forward.28
= control target key start
LH: loop header
LB: loop body
LE: loop exit
PB: predicated region body
PF: predicated region fallthrough
CT: control target
= control target key end

     0   :  { %vm521_vm0 = vcmask 253952   ;;  %vm522_vm1 = vsmask.f32 256  ;;  %v1334_v10 = vmov 1935823168   ;;  %v655_v12 = vlaneseq  ;;  %s1804_s0 = inlined_call_operand.vmem [shape: bf16[16,4,2,32], index: 0, kind: input, shape index: {}]   ;;  %s1805_s1 = inlined_call_operand.vmem [shape: bf16[8,4,32], index: 1, kind: output, shape index: {}]  }
   0x1   :  { %v9_v0 = vld [vmem:[%s1804_s0] sm:$0x1]  ;;  %v10_v1 = vld [vmem:[%s1804_s0 + $0x1] sm:$0x1]  ;;  %v11_v2 = vld [vmem:[%s1804_s0 + $0x2] sm:$0x1]  ;;  %v653_v11 = vunpack.c.l.s4 %v1334_v10 }
   0x2   :  { %v12_v3 = vld [vmem:[%s1804_s0 + $0x3] sm:$0x1]  ;;  %v13_v4 = vld [vmem:[%s1804_s0 + $0x4] sm:$0x1]  ;;  %v14_v5 = vld [vmem:[%s1804_s0 + $0x5] sm:$0x1] }
   0x3   :  { %v15_v6 = vld [vmem:[%s1804_s0 + $0x6] sm:$0x1]  ;;  %v16_v7 = vld [vmem:[%s1804_s0 + $0x7] sm:$0x1]  ;;  %v74_v8 = vshrl.u32 %v9_v0, 16  ;;  %v79_v9 = vshrl.u32 %v10_v1, 16  ;;  %vm1372_vm2 = vmand %vm521_vm0, %vm522_vm1  ;;  %v654_v34 = vunpack.c.0.s8 %v653_v11 }
   0x4   :  { %v84_v13 = vshrl.u32 %v11_v2, 16  ;;  %v89_v14 = vshrl.u32 %v12_v3, 16  ;;  %v94_v15 = vshrl.u32 %v13_v4, 16  ;;  %v99_v16 = vshrl.u32 %v14_v5, 16  ;;  %v17_v30 = vld [vmem:[%s1804_s0 + $0x8] sm:$0x1] }
   0x5   :  { %v104_v18 = vshrl.u32 %v15_v6, 16  ;;  %v109_v19 = vshrl.u32 %v16_v7, 16  ;;  %v457_v20 = vmax.bf16 %v74_v8, %v9_v0  ;;  %v458_v21 = vmax.bf16 %v79_v9, %v10_v1  ;;  %v18_v35 = vld [vmem:[%s1804_s0 + $0x9] sm:$0x1]  ;;  %v19_v36 = vld [vmem:[%s1804_s0 + $0xa] sm:$0x1] }
   0x6   :  { %v459_v22 = vmax.bf16 %v84_v13, %v11_v2  ;;  %v460_v23 = vmax.bf16 %v89_v14, %v12_v3  ;;  %v461_v24 = vmax.bf16 %v94_v15, %v13_v4  ;;  %v462_v25 = vmax.bf16 %v99_v16, %v14_v5  ;;  %v20_v41 = vld [vmem:[%s1804_s0 + $0xb] sm:$0x1]  ;;  %v21_v48 = vld [vmem:[%s1804_s0 + $0xc] sm:$0x1]  ;;  %v22_v50 = vld [vmem:[%s1804_s0 + $0xd] sm:$0x1] }
   0x7   :  { %v463_v26 = vmax.bf16 %v104_v18, %v15_v6  ;;  %v464_v27 = vmax.bf16 %v109_v19, %v16_v7  ;;  %v524_v28 = vsel %vm1372_vm2, %v457_v20, 4286644096  ;;  %v527_v29 = vsel %vm1372_vm2, %v458_v21, 4286644096  ;;  %v23_v51 = vld [vmem:[%s1804_s0 + $0xe] sm:$0x1] }
   0x8   :  { %v525_v31 = vsel %vm1372_vm2, %v461_v24, 4286644096  ;;  %v528_v32 = vsel %vm1372_vm2, %v462_v25, 4286644096  ;;  %v530_v33 = vsel %vm1372_vm2, %v459_v22, 4286644096 }
   0x9   :  { %v526_v37 = vmax.bf16 %v525_v31, %v524_v28  ;;  %v529_v38 = vmax.bf16 %v528_v32, %v527_v29  ;;  %v531_v39 = vsel %vm1372_vm2, %v463_v26, 4286644096  ;;  %v533_v40 = vsel %vm1372_vm2, %v460_v23, 4286644096  ;;  %v24_v54 = vld [vmem:[%s1804_s0 + $0xf] sm:$0x1] }
   0xa   :  { %v532_v42 = vmax.bf16 %v531_v39, %v530_v33  ;;  %v534_v43 = vsel %vm1372_vm2, %v464_v27, 4286644096  ;;  %v656_v44 = vshrl.u32 %v655_v12, 7  ;;  %v1335_v46 = vmov 1983009808  }
   0xb   :  { %v535_v45 = vmax.bf16 %v534_v43, %v533_v40  ;;  %v877_v47 = vunpack.c.l.s4 %v1335_v46  ;;  %vm1133_vm3 = vcmask 1041409   ;;  %v114_v52 = vshrl.u32 %v17_v30, 16  ;;  %v25_v27 = vld [vmem:[%s1804_s0 + $0x10] sm:$0x1]  ;;  %v28_v40 = vld [vmem:[%s1804_s0 + $0x13] sm:$0x1] }
   0xc   :  { %v1407_v49 = vsub.s32 %v654_v34, %v656_v44  ;;  %vm1136_vm4 = vcmask 1042434   ;;  %v119_v55 = vshrl.u32 %v18_v35, 16  ;;  %v124_v56 = vshrl.u32 %v19_v36, 16  ;;  %v29_v46 = vld [vmem:[%s1804_s0 + $0x14] sm:$0x1] }
   0xd   :  { %v878_v53 = vunpack.c.0.s8 %v877_v47  ;;  %v129_v57 = vshrl.u32 %v20_v41, 16  ;;  %vm1139_vm5 = vcmask 1043459   ;;  %v134_v63 = vshrl.u32 %v21_v48, 16  ;;  %v30_v47 = vld [vmem:[%s1804_s0 + $0x15] sm:$0x1] }
   0xe   :  { %v658_v58 = vrot.slane %v526_v37, %v1407_v49  ;;  %v665_v59 = vrot.slane %v529_v38, %v1407_v49  ;;  %v672_v60 = vrot.slane %v532_v42, %v1407_v49  ;;  %v679_v61 = vrot.slane %v535_v45, %v1407_v49 }
   0xf   :  { %v1422_v62 = vsub.s32 %v878_v53, %v656_v44  ;;  %v139_v0 = vshrl.u32 %v22_v50, 16  ;;  %v144_v1 = vshrl.u32 %v23_v51, 16  ;;  %v149_v2 = vshrl.u32 %v24_v54, 16 }
  0x10   :  { %v465_v3 = vmax.bf16 %v114_v52, %v17_v30  ;;  %v466_v4 = vmax.bf16 %v119_v55, %v18_v35  ;;  %v467_v5 = vmax.bf16 %v124_v56, %v19_v36  ;;  %v468_v10 = vmax.bf16 %v129_v57, %v20_v41  ;;  %v26_v35 = vld [vmem:[%s1804_s0 + $0x11] sm:$0x1]  ;;  %v27_v36 = vld [vmem:[%s1804_s0 + $0x12] sm:$0x1]  ;;  %v32_v57 = vld [vmem:[%s1804_s0 + $0x17] sm:$0x1] }
  0x11   :  { %v882_v6 = vrot.slane %v658_v58, %v1422_v62  ;;  %v889_v7 = vrot.slane %v665_v59, %v1422_v62  ;;  %v896_v8 = vrot.slane %v672_v60, %v1422_v62  ;;  %v903_v9 = vrot.slane %v679_v61, %v1422_v62 }
  0x12   :  { %v469_v11 = vmax.bf16 %v134_v63, %v21_v48  ;;  %v470_v12 = vmax.bf16 %v139_v0, %v22_v50  ;;  %v471_v13 = vmax.bf16 %v144_v1, %v23_v51  ;;  %vm1255_vm6 = vcmask 254976   ;;  %v31_v51 = vld [vmem:[%s1804_s0 + $0x16] sm:$0x1] }
  0x13   :  { %v1100_v14 = vunpack.c.l.b16 %v882_v6  ;;  %v1101_v15 = vunpack.c.l.b16 %v889_v7  ;;  %v1102_v16 = vunpack.c.l.b16 %v896_v8  ;;  %v1103_v18 = vunpack.c.l.b16 %v903_v9 }
  0x14   :  { %v472_v19 = vmax.bf16 %v149_v2, %v24_v54  ;;  %v536_v20 = vsel %vm1372_vm2, %v465_v3, 4286644096  ;;  %v537_v21 = vsel %vm1372_vm2, %v469_v11, 4286644096  ;;  %v539_v22 = vsel %vm1372_vm2, %v466_v4, 4286644096 }
  0x15   :  { %v1132_v23 = vrot.slane %v1101_v15, 7  ;;  %v1135_v24 = vrot.slane %v1102_v16, 6  ;;  %v1138_v25 = vrot.slane %v1103_v18, 5  ;;  %v538_v26 = vmax.bf16 %v537_v21, %v536_v20  ;;  %v33_v16 = vld [vmem:[%s1804_s0 + $0x18] sm:$0x1] }
  0x16   :  { %v540_v28 = vsel %vm1372_vm2, %v470_v12, 4286644096  ;;  %v542_v29 = vsel %vm1372_vm2, %v467_v5, 4286644096  ;;  %v543_v30 = vsel %vm1372_vm2, %v471_v13, 4286644096 }
  0x17   :  { %v1134_v31 = vsel %vm1133_vm3, %v1132_v23, %v1100_v14  ;;  %v541_v32 = vmax.bf16 %v540_v28, %v539_v22  ;;  %v544_v33 = vmax.bf16 %v543_v30, %v542_v29  ;;  %v545_v34 = vsel %vm1372_vm2, %v468_v10, 4286644096  ;;  %v34_v22 = vld [vmem:[%s1804_s0 + $0x19] sm:$0x1] }
  0x18   :  { %v1137_v37 = vsel %vm1136_vm4, %v1135_v24, %v1134_v31  ;;  %v546_v38 = vsel %vm1372_vm2, %v472_v19, 4286644096  ;;  %v686_v39 = vrot.slane %v538_v26, %v1407_v49  ;;  %v154_v41 = vshrl.u32 %v25_v27, 16  ;;  %v35_v31 = vld [vmem:[%s1804_s0 + $0x1a] sm:$0x1] }
  0x19   :  { %v1140_v42 = vsel %vm1139_vm5, %v1138_v25, %v1137_v37  ;;  %v547_v43 = vmax.bf16 %v546_v38, %v545_v34  ;;  %v693_v44 = vrot.slane %v541_v32, %v1407_v49  ;;  %v700_v45 = vrot.slane %v544_v33, %v1407_v49  ;;  %v36_v32 = vld [vmem:[%s1804_s0 + $0x1b] sm:$0x1]  ;;  %v37_v37 = vld [vmem:[%s1804_s0 + $0x1c] sm:$0x1] }
  0x1a   :  { %v1183_v48 = vpack.c.b16 %v1140_v42, %v1140_v42  ;;  %v910_v50 = vrot.slane %v686_v39, %v1422_v62  ;;  %v159_v52 = vshrl.u32 %v26_v35, 16  ;;  %v164_v53 = vshrl.u32 %v27_v36, 16  ;;  %v39_v42 = vld [vmem:[%s1804_s0 + $0x1e] sm:$0x1] }
  0x1b   :  { %v707_v54 = vrot.slane %v547_v43, %v1407_v49  ;;  %v917_v55 = vrot.slane %v693_v44, %v1422_v62  ;;  %v924_v56 = vrot.slane %v700_v45, %v1422_v62  ;;  %v169_v58 = vshrl.u32 %v28_v40, 16 }
  0x1c   :  { %v1197_v59 = vrot.slane %v1183_v48, %v1422_v62  ;;  %v1104_v60 = vunpack.c.l.b16 %v910_v50  ;;  %v174_v61 = vshrl.u32 %v29_v46, 16  ;;  %v179_v63 = vshrl.u32 %v30_v47, 16 }
  0x1d   :  { %v931_v0 = vrot.slane %v707_v54, %v1422_v62  ;;  %v1105_v1 = vunpack.c.l.b16 %v917_v55  ;;  %v1106_v2 = vunpack.c.l.b16 %v924_v56  ;;  %v184_v3 = vshrl.u32 %v31_v51, 16 }
  0x1e   :  { %1256 = vst.msk [vmem:[%s1805_s1] sm:$0x3] %vm1255_vm6, %v1197_v59  ;;  %v189_v4 = vshrl.u32 %v32_v57, 16  ;;  %v473_v5 = vmax.bf16 %v154_v41, %v25_v27  ;;  %v474_v6 = vmax.bf16 %v159_v52, %v26_v35  ;;  %v475_v7 = vmax.bf16 %v164_v53, %v27_v36  ;;  %v38_v41 = vld [vmem:[%s1804_s0 + $0x1d] sm:$0x1] }
  0x1f   :  { %v1107_v8 = vunpack.c.l.b16 %v931_v0  ;;  %v1141_v9 = vrot.slane %v1105_v1, 7  ;;  %v1143_v10 = vrot.slane %v1106_v2, 6  ;;  %v476_v11 = vmax.bf16 %v169_v58, %v28_v40 }
  0x20   :  { %v477_v12 = vmax.bf16 %v174_v61, %v29_v46  ;;  %v478_v13 = vmax.bf16 %v179_v63, %v30_v47  ;;  %v479_v14 = vmax.bf16 %v184_v3, %v31_v51  ;;  %v480_v15 = vmax.bf16 %v189_v4, %v32_v57  ;;  %v40_v46 = vld [vmem:[%s1804_s0 + $0x1f] sm:$0x1] }
  0x21   :  { %v1142_v18 = vsel %vm1133_vm3, %v1141_v9, %v1104_v60  ;;  %v1145_v19 = vrot.slane %v1107_v8, 5  ;;  %v548_v20 = vsel %vm1372_vm2, %v473_v5, 4286644096  ;;  %v551_v21 = vsel %vm1372_vm2, %v474_v6, 4286644096 }
  0x22   :  { %v1144_v23 = vsel %vm1136_vm4, %v1143_v10, %v1142_v18  ;;  %v549_v24 = vsel %vm1372_vm2, %v477_v12, 4286644096  ;;  %v552_v25 = vsel %vm1372_vm2, %v478_v13, 4286644096  ;;  %v554_v26 = vsel %vm1372_vm2, %v475_v7, 4286644096 }
  0x23   :  { %v1146_v27 = vsel %vm1139_vm5, %v1145_v19, %v1144_v23  ;;  %v550_v28 = vmax.bf16 %v549_v24, %v548_v20  ;;  %v553_v29 = vmax.bf16 %v552_v25, %v551_v21  ;;  %v555_v30 = vsel %vm1372_vm2, %v479_v14, 4286644096 }
  0x24   :  { %v1184_v33 = vpack.c.b16 %v1146_v27, %v1146_v27  ;;  %v556_v34 = vmax.bf16 %v555_v30, %v554_v26  ;;  %v557_v35 = vsel %vm1372_vm2, %v476_v11, 4286644096  ;;  %v558_v36 = vsel %vm1372_vm2, %v480_v15, 4286644096  ;;  %v41_v11 = vld [vmem:[%s1804_s0 + $0x20] sm:$0x1] }
  0x25   :  { %v559_v38 = vmax.bf16 %v558_v36, %v557_v35  ;;  %v714_v39 = vrot.slane %v550_v28, %v1407_v49  ;;  %v721_v40 = vrot.slane %v553_v29, %v1407_v49  ;;  %v194_v43 = vshrl.u32 %v33_v16, 16  ;;  %v44_v27 = vld [vmem:[%s1804_s0 + $0x23] sm:$0x1]  ;;  %v46_v36 = vld [vmem:[%s1804_s0 + $0x25] sm:$0x1] }
  0x26   :  { %v1204_v44 = vrot.slane %v1184_v33, %v1422_v62  ;;  %v728_v45 = vrot.slane %v556_v34, %v1407_v49  ;;  %v199_v47 = vshrl.u32 %v34_v22, 16  ;;  %v204_v48 = vshrl.u32 %v35_v31, 16 }
  0x27   :  { %v735_v50 = vrot.slane %v559_v38, %v1407_v49  ;;  %v938_v51 = vrot.slane %v714_v39, %v1422_v62  ;;  %v945_v52 = vrot.slane %v721_v40, %v1422_v62  ;;  %v209_v53 = vshrl.u32 %v36_v32, 16 }
  0x28   :  { %1257 = vst.msk [vmem:[%s1805_s1 + $0x2] sm:$0x3] %vm1255_vm6, %v1204_v44  ;;  %v952_v54 = vrot.slane %v728_v45, %v1422_v62  ;;  %v214_v55 = vshrl.u32 %v37_v37, 16  ;;  %v219_v56 = vshrl.u32 %v38_v41, 16  ;;  %v224_v57 = vshrl.u32 %v39_v42, 16 }
  0x29   :  { %v959_v58 = vrot.slane %v735_v50, %v1422_v62  ;;  %v1108_v59 = vunpack.c.l.b16 %v938_v51  ;;  %v1109_v60 = vunpack.c.l.b16 %v945_v52  ;;  %v229_v61 = vshrl.u32 %v40_v46, 16 }
  0x2a   :  { %v1110_v63 = vunpack.c.l.b16 %v952_v54  ;;  %v481_v0 = vmax.bf16 %v194_v43, %v33_v16  ;;  %v482_v1 = vmax.bf16 %v199_v47, %v34_v22  ;;  %v483_v2 = vmax.bf16 %v204_v48, %v35_v31  ;;  %v42_v16 = vld [vmem:[%s1804_s0 + $0x21] sm:$0x1]  ;;  %v43_v22 = vld [vmem:[%s1804_s0 + $0x22] sm:$0x1] }
  0x2b   :  { %v1111_v3 = vunpack.c.l.b16 %v959_v58  ;;  %v1147_v4 = vrot.slane %v1109_v60, 7  ;;  %v484_v5 = vmax.bf16 %v209_v53, %v36_v32  ;;  %v485_v6 = vmax.bf16 %v214_v55, %v37_v37  ;;  %v45_v32 = vld [vmem:[%s1804_s0 + $0x24] sm:$0x1]  ;;  %v47_v37 = vld [vmem:[%s1804_s0 + $0x26] sm:$0x1] }
  0x2c   :  { %v1149_v7 = vrot.slane %v1110_v63, 6  ;;  %v486_v8 = vmax.bf16 %v219_v56, %v38_v41  ;;  %v487_v9 = vmax.bf16 %v224_v57, %v39_v42  ;;  %v488_v10 = vmax.bf16 %v229_v61, %v40_v46  ;;  %v48_v41 = vld [vmem:[%s1804_s0 + $0x27] sm:$0x1] }
  0x2d   :  { %v1148_v12 = vsel %vm1133_vm3, %v1147_v4, %v1108_v59  ;;  %v1151_v13 = vrot.slane %v1111_v3, 5  ;;  %v560_v14 = vsel %vm1372_vm2, %v481_v0, 4286644096  ;;  %v561_v15 = vsel %vm1372_vm2, %v485_v6, 4286644096 }
  0x2e   :  { %v1150_v18 = vsel %vm1136_vm4, %v1149_v7, %v1148_v12  ;;  %v562_v19 = vmax.bf16 %v561_v15, %v560_v14  ;;  %v563_v20 = vsel %vm1372_vm2, %v482_v1, 4286644096  ;;  %v564_v21 = vsel %vm1372_vm2, %v486_v8, 4286644096  ;;  %v49_v6 = vld [vmem:[%s1804_s0 + $0x28] sm:$0x1] }
  0x2f   :  { %v1152_v23 = vsel %vm1139_vm5, %v1151_v13, %v1150_v18  ;;  %v565_v24 = vmax.bf16 %v564_v21, %v563_v20  ;;  %v566_v25 = vsel %vm1372_vm2, %v483_v2, 4286644096  ;;  %v567_v26 = vsel %vm1372_vm2, %v487_v9, 4286644096 }
  0x30   :  { %v1185_v28 = vpack.c.b16 %v1152_v23, %v1152_v23  ;;  %v568_v29 = vmax.bf16 %v567_v26, %v566_v25  ;;  %v569_v30 = vsel %vm1372_vm2, %v484_v5, 4286644096  ;;  %v570_v31 = vsel %vm1372_vm2, %v488_v10, 4286644096 }
  0x31   :  { %v571_v33 = vmax.bf16 %v570_v31, %v569_v30  ;;  %v742_v34 = vrot.slane %v562_v19, %v1407_v49  ;;  %v749_v35 = vrot.slane %v565_v24, %v1407_v49  ;;  %v234_v38 = vshrl.u32 %v41_v11, 16  ;;  %v54_v31 = vld [vmem:[%s1804_s0 + $0x2d] sm:$0x1] }
  0x32   :  { %v1211_v39 = vrot.slane %v1185_v28, %v1422_v62  ;;  %v756_v40 = vrot.slane %v568_v29, %v1407_v49  ;;  %v239_v42 = vshrl.u32 %v42_v16, 16  ;;  %v244_v43 = vshrl.u32 %v43_v22, 16 }
  0x33   :  { %v763_v44 = vrot.slane %v571_v33, %v1407_v49  ;;  %v966_v45 = vrot.slane %v742_v34, %v1422_v62  ;;  %v973_v46 = vrot.slane %v749_v35, %v1422_v62  ;;  %v249_v47 = vshrl.u32 %v44_v27, 16 }
  0x34   :  { %1258 = vst.msk [vmem:[%s1805_s1 + $0x4] sm:$0x3] %vm1255_vm6, %v1211_v39  ;;  %v980_v48 = vrot.slane %v756_v40, %v1422_v62  ;;  %v254_v50 = vshrl.u32 %v45_v32, 16  ;;  %v259_v51 = vshrl.u32 %v46_v36, 16  ;;  %v264_v52 = vshrl.u32 %v47_v37, 16 }
  0x35   :  { %v987_v53 = vrot.slane %v763_v44, %v1422_v62  ;;  %v1112_v54 = vunpack.c.l.b16 %v966_v45  ;;  %v1113_v55 = vunpack.c.l.b16 %v973_v46  ;;  %v269_v56 = vshrl.u32 %v48_v41, 16 }
  0x36   :  { %v1114_v57 = vunpack.c.l.b16 %v980_v48  ;;  %v489_v58 = vmax.bf16 %v234_v38, %v41_v11  ;;  %v490_v59 = vmax.bf16 %v239_v42, %v42_v16  ;;  %v491_v60 = vmax.bf16 %v244_v43, %v43_v22  ;;  %v50_v11 = vld [vmem:[%s1804_s0 + $0x29] sm:$0x1]  ;;  %v51_v16 = vld [vmem:[%s1804_s0 + $0x2a] sm:$0x1]  ;;  %v52_v22 = vld [vmem:[%s1804_s0 + $0x2b] sm:$0x1] }
  0x37   :  { %v1115_v61 = vunpack.c.l.b16 %v987_v53  ;;  %v1153_v63 = vrot.slane %v1113_v55, 7  ;;  %v492_v0 = vmax.bf16 %v249_v47, %v44_v27  ;;  %v493_v1 = vmax.bf16 %v254_v50, %v45_v32  ;;  %v53_v27 = vld [vmem:[%s1804_s0 + $0x2c] sm:$0x1]  ;;  %v55_v32 = vld [vmem:[%s1804_s0 + $0x2e] sm:$0x1] }
  0x38   :  { %v1155_v2 = vrot.slane %v1114_v57, 6  ;;  %v494_v3 = vmax.bf16 %v259_v51, %v46_v36  ;;  %v495_v4 = vmax.bf16 %v264_v52, %v47_v37  ;;  %v496_v5 = vmax.bf16 %v269_v56, %v48_v41  ;;  %v56_v36 = vld [vmem:[%s1804_s0 + $0x2f] sm:$0x1] }
  0x39   :  { %v1154_v7 = vsel %vm1133_vm3, %v1153_v63, %v1112_v54  ;;  %v1157_v8 = vrot.slane %v1115_v61, 5  ;;  %v572_v9 = vsel %vm1372_vm2, %v489_v58, 4286644096  ;;  %v573_v10 = vsel %vm1372_vm2, %v493_v1, 4286644096 }
  0x3a   :  { %v1156_v12 = vsel %vm1136_vm4, %v1155_v2, %v1154_v7  ;;  %v574_v13 = vmax.bf16 %v573_v10, %v572_v9  ;;  %v575_v14 = vsel %vm1372_vm2, %v490_v59, 4286644096  ;;  %v576_v15 = vsel %vm1372_vm2, %v494_v3, 4286644096  ;;  %v57_v1 = vld [vmem:[%s1804_s0 + $0x30] sm:$0x1] }
  0x3b   :  { %v1158_v18 = vsel %vm1139_vm5, %v1157_v8, %v1156_v12  ;;  %v577_v19 = vmax.bf16 %v576_v15, %v575_v14  ;;  %v578_v20 = vsel %vm1372_vm2, %v491_v60, 4286644096  ;;  %v579_v21 = vsel %vm1372_vm2, %v495_v4, 4286644096 }
  0x3c   :  { %v1186_v23 = vpack.c.b16 %v1158_v18, %v1158_v18  ;;  %v580_v24 = vmax.bf16 %v579_v21, %v578_v20  ;;  %v581_v25 = vsel %vm1372_vm2, %v492_v0, 4286644096  ;;  %v582_v26 = vsel %vm1372_vm2, %v496_v5, 4286644096 }
  0x3d   :  { %v583_v28 = vmax.bf16 %v582_v26, %v581_v25  ;;  %v770_v29 = vrot.slane %v574_v13, %v1407_v49  ;;  %v777_v30 = vrot.slane %v577_v19, %v1407_v49  ;;  %v274_v33 = vshrl.u32 %v49_v6, 16  ;;  %v62_v26 = vld [vmem:[%s1804_s0 + $0x35] sm:$0x1] }
  0x3e   :  { %v1218_v34 = vrot.slane %v1186_v23, %v1422_v62  ;;  %v784_v35 = vrot.slane %v580_v24, %v1407_v49  ;;  %v279_v37 = vshrl.u32 %v50_v11, 16  ;;  %v284_v38 = vshrl.u32 %v51_v16, 16 }
  0x3f   :  { %v791_v39 = vrot.slane %v583_v28, %v1407_v49  ;;  %v994_v40 = vrot.slane %v770_v29, %v1422_v62  ;;  %v1001_v41 = vrot.slane %v777_v30, %v1422_v62  ;;  %v289_v42 = vshrl.u32 %v52_v22, 16 }
  0x40   :  { %1259 = vst.msk [vmem:[%s1805_s1 + $0x6] sm:$0x3] %vm1255_vm6, %v1218_v34  ;;  %v1008_v43 = vrot.slane %v784_v35, %v1422_v62  ;;  %v294_v44 = vshrl.u32 %v53_v27, 16  ;;  %v299_v45 = vshrl.u32 %v54_v31, 16  ;;  %v304_v46 = vshrl.u32 %v55_v32, 16 }
  0x41   :  { %v1015_v47 = vrot.slane %v791_v39, %v1422_v62  ;;  %v1116_v48 = vunpack.c.l.b16 %v994_v40  ;;  %v1117_v50 = vunpack.c.l.b16 %v1001_v41  ;;  %v309_v51 = vshrl.u32 %v56_v36, 16 }
  0x42   :  { %v1118_v52 = vunpack.c.l.b16 %v1008_v43  ;;  %v497_v53 = vmax.bf16 %v274_v33, %v49_v6  ;;  %v498_v54 = vmax.bf16 %v279_v37, %v50_v11  ;;  %v499_v55 = vmax.bf16 %v284_v38, %v51_v16  ;;  %v58_v6 = vld [vmem:[%s1804_s0 + $0x31] sm:$0x1]  ;;  %v59_v11 = vld [vmem:[%s1804_s0 + $0x32] sm:$0x1]  ;;  %v60_v16 = vld [vmem:[%s1804_s0 + $0x33] sm:$0x1] }
  0x43   :  { %v1119_v56 = vunpack.c.l.b16 %v1015_v47  ;;  %v1159_v57 = vrot.slane %v1117_v50, 7  ;;  %v500_v58 = vmax.bf16 %v289_v42, %v52_v22  ;;  %v501_v59 = vmax.bf16 %v294_v44, %v53_v27  ;;  %v61_v22 = vld [vmem:[%s1804_s0 + $0x34] sm:$0x1]  ;;  %v63_v27 = vld [vmem:[%s1804_s0 + $0x36] sm:$0x1] }
  0x44   :  { %v1161_v60 = vrot.slane %v1118_v52, 6  ;;  %v502_v61 = vmax.bf16 %v299_v45, %v54_v31  ;;  %v503_v63 = vmax.bf16 %v304_v46, %v55_v32  ;;  %v504_v0 = vmax.bf16 %v309_v51, %v56_v36  ;;  %v64_v31 = vld [vmem:[%s1804_s0 + $0x37] sm:$0x1] }
  0x45   :  { %v1160_v2 = vsel %vm1133_vm3, %v1159_v57, %v1116_v48  ;;  %v1163_v3 = vrot.slane %v1119_v56, 5  ;;  %v584_v4 = vsel %vm1372_vm2, %v497_v53, 4286644096  ;;  %v585_v5 = vsel %vm1372_vm2, %v501_v59, 4286644096 }
  0x46   :  { %v1162_v7 = vsel %vm1136_vm4, %v1161_v60, %v1160_v2  ;;  %v586_v8 = vmax.bf16 %v585_v5, %v584_v4  ;;  %v587_v9 = vsel %vm1372_vm2, %v498_v54, 4286644096  ;;  %v588_v10 = vsel %vm1372_vm2, %v502_v61, 4286644096  ;;  %v65_v59 = vld [vmem:[%s1804_s0 + $0x38] sm:$0x1] }
  0x47   :  { %v1164_v12 = vsel %vm1139_vm5, %v1163_v3, %v1162_v7  ;;  %v589_v13 = vmax.bf16 %v588_v10, %v587_v9  ;;  %v590_v14 = vsel %vm1372_vm2, %v499_v55, 4286644096  ;;  %v591_v15 = vsel %vm1372_vm2, %v503_v63, 4286644096 }
  0x48   :  { %v1187_v18 = vpack.c.b16 %v1164_v12, %v1164_v12  ;;  %v592_v19 = vmax.bf16 %v591_v15, %v590_v14  ;;  %v593_v20 = vsel %vm1372_vm2, %v500_v58, 4286644096  ;;  %v594_v21 = vsel %vm1372_vm2, %v504_v0, 4286644096 }
  0x49   :  { %v595_v23 = vmax.bf16 %v594_v21, %v593_v20  ;;  %v798_v24 = vrot.slane %v586_v8, %v1407_v49  ;;  %v805_v25 = vrot.slane %v589_v13, %v1407_v49  ;;  %v314_v28 = vshrl.u32 %v57_v1, 16  ;;  %v70_v21 = vld [vmem:[%s1804_s0 + $0x3d] sm:$0x1] }
  0x4a   :  { %v1225_v29 = vrot.slane %v1187_v18, %v1422_v62  ;;  %v812_v30 = vrot.slane %v592_v19, %v1407_v49  ;;  %v319_v32 = vshrl.u32 %v58_v6, 16  ;;  %v324_v33 = vshrl.u32 %v59_v11, 16 }
  0x4b   :  { %v819_v34 = vrot.slane %v595_v23, %v1407_v49  ;;  %v1022_v35 = vrot.slane %v798_v24, %v1422_v62  ;;  %v1029_v36 = vrot.slane %v805_v25, %v1422_v62  ;;  %v329_v37 = vshrl.u32 %v60_v16, 16 }
  0x4c   :  { %1260 = vst.msk [vmem:[%s1805_s1 + $0x8] sm:$0x3] %vm1255_vm6, %v1225_v29  ;;  %v1036_v38 = vrot.slane %v812_v30, %v1422_v62  ;;  %v334_v39 = vshrl.u32 %v61_v22, 16  ;;  %v339_v40 = vshrl.u32 %v62_v26, 16  ;;  %v344_v41 = vshrl.u32 %v63_v27, 16 }
  0x4d   :  { %v1043_v42 = vrot.slane %v819_v34, %v1422_v62  ;;  %v1120_v43 = vunpack.c.l.b16 %v1022_v35  ;;  %v1121_v44 = vunpack.c.l.b16 %v1029_v36  ;;  %v349_v45 = vshrl.u32 %v64_v31, 16 }
  0x4e   :  { %v1122_v46 = vunpack.c.l.b16 %v1036_v38  ;;  %v505_v47 = vmax.bf16 %v314_v28, %v57_v1  ;;  %v506_v48 = vmax.bf16 %v319_v32, %v58_v6  ;;  %v507_v50 = vmax.bf16 %v324_v33, %v59_v11  ;;  %v66_v1 = vld [vmem:[%s1804_s0 + $0x39] sm:$0x1]  ;;  %v67_v6 = vld [vmem:[%s1804_s0 + $0x3a] sm:$0x1]  ;;  %v68_v11 = vld [vmem:[%s1804_s0 + $0x3b] sm:$0x1] }
  0x4f   :  { %v1123_v51 = vunpack.c.l.b16 %v1043_v42  ;;  %v1165_v52 = vrot.slane %v1121_v44, 7  ;;  %v508_v53 = vmax.bf16 %v329_v37, %v60_v16  ;;  %v509_v54 = vmax.bf16 %v334_v39, %v61_v22  ;;  %v69_v16 = vld [vmem:[%s1804_s0 + $0x3c] sm:$0x1]  ;;  %v71_v22 = vld [vmem:[%s1804_s0 + $0x3e] sm:$0x1] }
  0x50   :  { %v1167_v55 = vrot.slane %v1122_v46, 6  ;;  %v510_v56 = vmax.bf16 %v339_v40, %v62_v26  ;;  %v511_v57 = vmax.bf16 %v344_v41, %v63_v27  ;;  %v512_v58 = vmax.bf16 %v349_v45, %v64_v31  ;;  %v72_v26 = vld [vmem:[%s1804_s0 + $0x3f] sm:$0x1] }
  0x51   :  { %v1166_v60 = vsel %vm1133_vm3, %v1165_v52, %v1120_v43  ;;  %v1169_v61 = vrot.slane %v1123_v51, 5  ;;  %v596_v63 = vsel %vm1372_vm2, %v505_v47, 4286644096  ;;  %v597_v0 = vsel %vm1372_vm2, %v509_v54, 4286644096 }
  0x52   :  { %v1168_v2 = vsel %vm1136_vm4, %v1167_v55, %v1166_v60  ;;  %v598_v3 = vmax.bf16 %v597_v0, %v596_v63  ;;  %v599_v4 = vsel %vm1372_vm2, %v506_v48, 4286644096  ;;  %v600_v5 = vsel %vm1372_vm2, %v510_v56, 4286644096 }
  0x53   :  { %v1170_v7 = vsel %vm1139_vm5, %v1169_v61, %v1168_v2  ;;  %v601_v8 = vmax.bf16 %v600_v5, %v599_v4  ;;  %v602_v9 = vsel %vm1372_vm2, %v507_v50, 4286644096  ;;  %v603_v10 = vsel %vm1372_vm2, %v511_v57, 4286644096 }
  0x54   :  { %v1188_v12 = vpack.c.b16 %v1170_v7, %v1170_v7  ;;  %v604_v13 = vmax.bf16 %v603_v10, %v602_v9  ;;  %v605_v14 = vsel %vm1372_vm2, %v508_v53, 4286644096  ;;  %v606_v15 = vsel %vm1372_vm2, %v512_v58, 4286644096 }
  0x55   :  { %v607_v18 = vmax.bf16 %v606_v15, %v605_v14  ;;  %v826_v19 = vrot.slane %v598_v3, %v1407_v49  ;;  %v833_v20 = vrot.slane %v601_v8, %v1407_v49  ;;  %v354_v23 = vshrl.u32 %v65_v59, 16 }
  0x56   :  { %v1232_v24 = vrot.slane %v1188_v12, %v1422_v62  ;;  %v840_v25 = vrot.slane %v604_v13, %v1407_v49  ;;  %v359_v27 = vshrl.u32 %v66_v1, 16  ;;  %v364_v28 = vshrl.u32 %v67_v6, 16 }
  0x57   :  { %v847_v29 = vrot.slane %v607_v18, %v1407_v49  ;;  %v1050_v30 = vrot.slane %v826_v19, %v1422_v62  ;;  %v1057_v31 = vrot.slane %v833_v20, %v1422_v62  ;;  %v369_v32 = vshrl.u32 %v68_v11, 16 }
  0x58   :  { %1261 = vst.msk [vmem:[%s1805_s1 + $0xa] sm:$0x3] %vm1255_vm6, %v1232_v24  ;;  %v1064_v33 = vrot.slane %v840_v25, %v1422_v62  ;;  %v374_v34 = vshrl.u32 %v69_v16, 16  ;;  %v379_v35 = vshrl.u32 %v70_v21, 16  ;;  %v384_v36 = vshrl.u32 %v71_v22, 16 }
  0x59   :  { %v1071_v37 = vrot.slane %v847_v29, %v1422_v62  ;;  %v1124_v38 = vunpack.c.l.b16 %v1050_v30  ;;  %v1125_v39 = vunpack.c.l.b16 %v1057_v31  ;;  %v389_v40 = vshrl.u32 %v72_v26, 16 }
  0x5a   :  { %v1126_v41 = vunpack.c.l.b16 %v1064_v33  ;;  %v513_v42 = vmax.bf16 %v354_v23, %v65_v59  ;;  %v514_v43 = vmax.bf16 %v359_v27, %v66_v1  ;;  %v515_v44 = vmax.bf16 %v364_v28, %v67_v6 }
  0x5b   :  { %v1127_v45 = vunpack.c.l.b16 %v1071_v37  ;;  %v1171_v46 = vrot.slane %v1125_v39, 7  ;;  %v516_v47 = vmax.bf16 %v369_v32, %v68_v11  ;;  %v517_v48 = vmax.bf16 %v374_v34, %v69_v16 }
  0x5c   :  { %v1173_v50 = vrot.slane %v1126_v41, 6  ;;  %v518_v51 = vmax.bf16 %v379_v35, %v70_v21  ;;  %v519_v52 = vmax.bf16 %v384_v36, %v71_v22  ;;  %v520_v53 = vmax.bf16 %v389_v40, %v72_v26 }
  0x5d   :  { %v1172_v54 = vsel %vm1133_vm3, %v1171_v46, %v1124_v38  ;;  %v1175_v55 = vrot.slane %v1127_v45, 5  ;;  %v608_v56 = vsel %vm1372_vm2, %v513_v42, 4286644096  ;;  %v609_v57 = vsel %vm1372_vm2, %v517_v48, 4286644096 }
  0x5e   :  { %v1174_v58 = vsel %vm1136_vm4, %v1173_v50, %v1172_v54  ;;  %v610_v59 = vmax.bf16 %v609_v57, %v608_v56  ;;  %v611_v60 = vsel %vm1372_vm2, %v514_v43, 4286644096  ;;  %v612_v61 = vsel %vm1372_vm2, %v518_v51, 4286644096 }
  0x5f   :  { %v1176_v63 = vsel %vm1139_vm5, %v1175_v55, %v1174_v58  ;;  %v613_v0 = vmax.bf16 %v612_v61, %v611_v60  ;;  %v614_v1 = vsel %vm1372_vm2, %v515_v44, 4286644096  ;;  %v615_v2 = vsel %vm1372_vm2, %v519_v52, 4286644096 }
  0x60   :  { %v1189_v3 = vpack.c.b16 %v1176_v63, %v1176_v63  ;;  %v616_v4 = vmax.bf16 %v615_v2, %v614_v1  ;;  %v617_v5 = vsel %vm1372_vm2, %v516_v47, 4286644096  ;;  %v618_v6 = vsel %vm1372_vm2, %v520_v53, 4286644096 }
  0x61   :  { %v619_v7 = vmax.bf16 %v618_v6, %v617_v5  ;;  %v854_v8 = vrot.slane %v610_v59, %v1407_v49  ;;  %v861_v9 = vrot.slane %v613_v0, %v1407_v49 }
  0x62   :  { %v1239_v10 = vrot.slane %v1189_v3, %v1422_v62  ;;  %v868_v11 = vrot.slane %v616_v4, %v1407_v49 }
  0x63   :  { %v875_v12 = vrot.slane %v619_v7, %v1407_v49  ;;  %v1078_v13 = vrot.slane %v854_v8, %v1422_v62  ;;  %v1085_v14 = vrot.slane %v861_v9, %v1422_v62 }
  0x64   :  { %1262 = vst.msk [vmem:[%s1805_s1 + $0xc] sm:$0x3] %vm1255_vm6, %v1239_v10  ;;  %v1092_v17 = vrot.slane %v868_v11, %v1422_v62 }
  0x65   :  { %v1099_v15 = vrot.slane %v875_v12, %v1422_v62  ;;  %v1128_v16 = vunpack.c.l.b16 %v1078_v13  ;;  %v1129_v18 = vunpack.c.l.b16 %v1085_v14 }
  0x66   :  { %v1130_v19 = vunpack.c.l.b16 %v1092_v17 }
  0x67   :  { %v1131_v20 = vunpack.c.l.b16 %v1099_v15  ;;  %v1177_v21 = vrot.slane %v1129_v18, 7 }
  0x68   :  { %v1179_v22 = vrot.slane %v1130_v19, 6 }
  0x69   :  { %v1178_v49 = vsel %vm1133_vm3, %v1177_v21, %v1128_v16  ;;  %v1181_v23 = vrot.slane %v1131_v20, 5 }
  0x6a   :  { %v1180_v24 = vsel %vm1136_vm4, %v1179_v22, %v1178_v49 }
  0x6b   :  { %v1182_v25 = vsel %vm1139_vm5, %v1181_v23, %v1180_v24 }
  0x6c   :  { %v1190_v26 = vpack.c.b16 %v1182_v25, %v1182_v25 }
  0x6e   :  { %v1246_v27 = vrot.slane %v1190_v26, %v1422_v62 }
  0x70   :  { %1263 = vst.msk [vmem:[%s1805_s1 + $0xe] sm:$0x3] %vm1255_vm6, %v1246_v27 }

// kernel: vae_forward.29
= control target key start
LH: loop header
LB: loop body
LE: loop exit
PB: predicated region body
PF: predicated region fallthrough
CT: control target
= control target key end

     0   :  { %s1332_s1 = inlined_call_operand.vmem [shape: bf16[896,128], index: 1, kind: input, shape index: {}]   ;;  %s1333_s0 = inlined_call_operand.vmem [shape: bf16[32,896], index: 0, kind: input, shape index: {}]   ;;  %s1334_s2 = inlined_call_operand.vmem [shape: f32[1,128], index: 2, kind: input, shape index: {}]   ;;  %s1335_s3 = inlined_call_operand.vmem [shape: bf16[32,128], index: 3, kind: output, shape index: {}]  }
   0x1   :  { %v1017_v0 = vld [vmem:[%s1332_s1 + $0x40] sm:$0xff]   ;;  %v1021_v4 = vld [vmem:[%s1332_s1 + $0x48] sm:$0xff]   ;;  %v1025_v8 = vld [vmem:[%s1332_s1 + $0x50] sm:$0xff]  }
   0x2   :  { %v1018_v1 = vld [vmem:[%s1332_s1 + $0xc0] sm:$0xff]   ;;  %903 = vmatprep.subr.bf16.mxu0 %v1017_v0  ;;  %v1022_v5 = vld [vmem:[%s1332_s1 + $0xc8] sm:$0xff]   ;;  %v1026_v9 = vld [vmem:[%s1332_s1 + $0xd0] sm:$0xff]  }
   0x3   :  { %v1019_v2 = vld [vmem:[%s1332_s1] sm:$0xff]   ;;  %931 = vmatprep.subr.bf16.mxu1 %v1018_v1  ;;  %v1023_v6 = vld [vmem:[%s1332_s1 + $0x8] sm:$0xff]   ;;  %v1027_v10 = vld [vmem:[%s1332_s1 + $0x10] sm:$0xff]  }
   0x4   :  { %v1020_v3 = vld [vmem:[%s1332_s1 + $0x80] sm:$0xff]   ;;  %904 = vmatpush3.bf16.msra.mxu0 %v1019_v2  ;;  %v1024_v7 = vld [vmem:[%s1332_s1 + $0x88] sm:$0xff]   ;;  %v1028_v11 = vld [vmem:[%s1332_s1 + $0x90] sm:$0xff]  }
   0x5   :  { %932 = vmatpush3.bf16.msra.mxu1 %v1020_v3  ;;  %905 = vmatprep.subr.bf16.mxu0 %v1021_v4  ;;  %v1029_v12 = vld [vmem:[%s1332_s1 + $0x58] sm:$0xff]   ;;  %v1033_v16 = vld [vmem:[%s1332_s1 + $0x60] sm:$0xff]   ;;  %v1037_v20 = vld [vmem:[%s1332_s1 + $0x68] sm:$0xff]  }
   0x6   :  { %933 = vmatprep.subr.bf16.mxu1 %v1022_v5  ;;  %v1030_v13 = vld [vmem:[%s1332_s1 + $0xd8] sm:$0xff]   ;;  %v1034_v17 = vld [vmem:[%s1332_s1 + $0xe0] sm:$0xff]   ;;  %v1038_v21 = vld [vmem:[%s1332_s1 + $0xe8] sm:$0xff]  }
   0x7   :  { %v1031_v14 = vld [vmem:[%s1332_s1 + $0x18] sm:$0xff]   ;;  %v1035_v18 = vld [vmem:[%s1332_s1 + $0x20] sm:$0xff]   ;;  %v1039_v22 = vld [vmem:[%s1332_s1 + $0x28] sm:$0xff]  }
   0x8   :  { %906 = vmatpush3.bf16.msra.mxu0 %v1023_v6  ;;  %v1032_v15 = vld [vmem:[%s1332_s1 + $0x98] sm:$0xff]   ;;  %v1036_v19 = vld [vmem:[%s1332_s1 + $0xa0] sm:$0xff]   ;;  %v1040_v23 = vld [vmem:[%s1332_s1 + $0xa8] sm:$0xff]  }
   0x9   :  { %934 = vmatpush3.bf16.msra.mxu1 %v1024_v7  ;;  %907 = vmatprep.subr.bf16.mxu0 %v1025_v8  ;;  %v1041_v24 = vld [vmem:[%s1332_s1 + $0x70] sm:$0xff]   ;;  %v1045_v28 = vld [vmem:[%s1332_s1 + $0x78] sm:$0xff]   ;;  %v1051_v33 = vld [vmem:[%s1333_s0 + $0x4] ss:$28 sps:$4 sm:$0xff]  }
   0xa   :  { %935 = vmatprep.subr.bf16.mxu1 %v1026_v9  ;;  %v1042_v25 = vld [vmem:[%s1332_s1 + $0xf0] sm:$0xff]   ;;  %v1046_v29 = vld [vmem:[%s1332_s1 + $0xf8] sm:$0xff]   ;;  %v1052_v34 = vld [vmem:[%s1333_s0 + $0x8] ss:$28 sps:$4 sm:$0xff]   ;;  %595 = vmatprep.mubr.bf16.mxu0 %v1051_v33 }
   0xb   :  { %v1043_v26 = vld [vmem:[%s1332_s1 + $0x30] sm:$0xff]   ;;  %v1047_v30 = vld [vmem:[%s1332_s1 + $0x38] sm:$0xff]   ;;  %v1054_v35 = vld [vmem:[%s1333_s0 + $0xc] ss:$28 sps:$4 sm:$0xff]  }
   0xc   :  { %908 = vmatpush3.bf16.msra.mxu0 %v1027_v10  ;;  %v1044_v27 = vld [vmem:[%s1332_s1 + $0xb0] sm:$0xff]   ;;  %v1048_v31 = vld [vmem:[%s1332_s1 + $0xb8] sm:$0xff]   ;;  %v1055_v36 = vld [vmem:[%s1332_s1 + $0x140] sm:$0xff]   ;;  %644 = vmatprep.mubr.bf16.mxu1 %v1054_v35 }
   0xd   :  { %936 = vmatpush3.bf16.msra.mxu1 %v1028_v11  ;;  %909 = vmatprep.subr.bf16.mxu0 %v1029_v12  ;;  %v1049_v32 = vld [vmem:[%s1333_s0] ss:$28 sps:$4 sm:$0xff]   ;;  %v1057_v38 = vld [vmem:[%s1332_s1 + $0x148] sm:$0xff]   ;;  %v1060_v41 = vld [vmem:[%s1332_s1 + $0x150] sm:$0xff]  }
   0xe   :  { %937 = vmatprep.subr.bf16.mxu1 %v1030_v13  ;;  %v1056_v37 = vld [vmem:[%s1332_s1 + $0x100] sm:$0xff]   ;;  %v1059_v40 = vld [vmem:[%s1332_s1 + $0x108] sm:$0xff]   ;;  %v1062_v43 = vld [vmem:[%s1332_s1 + $0x110] sm:$0xff]  }
   0xf   :  { %v1058_v39 = vld [vmem:[%s1332_s1 + $0x180] sm:$0xff]   ;;  %v1061_v42 = vld [vmem:[%s1332_s1 + $0x188] sm:$0xff]   ;;  %v1063_v44 = vld [vmem:[%s1332_s1 + $0x158] sm:$0xff]  }
  0x10   :  { %910 = vmatpush3.bf16.msra.mxu0 %v1031_v14  ;;  %v1064_v45 = vld [vmem:[%s1332_s1 + $0x190] sm:$0xff]   ;;  %v1065_v46 = vld [vmem:[%s1332_s1 + $0x118] sm:$0xff]   ;;  %v1066_v47 = vld [vmem:[%s1332_s1 + $0x160] sm:$0xff]  }
  0x11   :  { %938 = vmatpush3.bf16.msra.mxu1 %v1032_v15  ;;  %911 = vmatprep.subr.bf16.mxu0 %v1033_v16  ;;  %v1067_v48 = vld [vmem:[%s1332_s1 + $0x198] sm:$0xff]   ;;  %v1068_v49 = vld [vmem:[%s1332_s1 + $0x120] sm:$0xff]   ;;  %v1073_v52 = vld [vmem:[%s1332_s1 + $0x168] sm:$0xff]  }
  0x12   :  { %939 = vmatprep.subr.bf16.mxu1 %v1034_v17  ;;  %v1069_v50 = vld [vmem:[%s1333_s0 + $0x3c] ss:$28 sps:$4 sm:$0xff]   ;;  %v1071_v51 = vld [vmem:[%s1333_s0 + $0x44] ss:$28 sps:$4 sm:$0xff]   ;;  %v1077_v56 = vld [vmem:[%s1332_s1 + $0x128] sm:$0xff]  }
  0x13   :  { %v1074_v53 = vld [vmem:[%s1332_s1 + $0x1a0] sm:$0xff]   ;;  %v1075_v54 = vld [vmem:[%s1333_s0 + $0x38] ss:$28 sps:$4 sm:$0xff]   ;;  %v1079_v58 = vld [vmem:[%s1332_s1 + $0x1a8] sm:$0xff]  }
  0x14   :  { %912 = vmatpush3.bf16.msra.mxu0 %v1035_v18  ;;  %v1076_v55 = vld [vmem:[%s1333_s0 + $0x40] ss:$28 sps:$4 sm:$0xff]   ;;  %v1078_v57 = vld [vmem:[%s1332_s1 + $0x170] sm:$0xff]   ;;  %v1090_v3 = vld [vmem:[%s1333_s0 + $0x4c] ss:$28 sps:$4 sm:$0xff]  }
  0x15   :  { %940 = vmatpush3.bf16.msra.mxu1 %v1036_v19  ;;  %913 = vmatprep.subr.bf16.mxu0 %v1037_v20  ;;  %v1080_v59 = vld [vmem:[%s1332_s1 + $0x130] sm:$0xff]   ;;  %v1081_v60 = vld [vmem:[%s1332_s1 + $0x178] sm:$0xff]   ;;  %v1092_v5 = vld [vmem:[%s1333_s0 + $0x48] ss:$28 sps:$4 sm:$0xff]  }
  0x16   :  { %941 = vmatprep.subr.bf16.mxu1 %v1038_v21  ;;  %v1082_v61 = vld [vmem:[%s1332_s1 + $0x1b0] sm:$0xff]   ;;  %v1083_v62 = vld [vmem:[%s1332_s1 + $0x138] sm:$0xff]  }
  0x17   :  { %v1086_v63 = vld [vmem:[%s1333_s0 + $0x14] ss:$28 sps:$4 sm:$0xff]   ;;  %v1087_v0 = vld [vmem:[%s1332_s1 + $0x1b8] sm:$0xff]  }
  0x18   :  { %914 = vmatpush3.bf16.msra.mxu0 %v1039_v22  ;;  %v1088_v1 = vld [vmem:[%s1333_s0 + $0x18] ss:$28 sps:$4 sm:$0xff]   ;;  %v1084_v2 = vld [vmem:[%s1333_s0 + $0x10] ss:$28 sps:$4 sm:$0xff]  }
  0x19   :  { %942 = vmatpush3.bf16.msra.mxu1 %v1040_v23  ;;  %915 = vmatprep.subr.bf16.mxu0 %v1041_v24  ;;  %v1089_v4 = vld [vmem:[%s1333_s0 + $0x50] ss:$28 sps:$4 sm:$0xff]  }
  0x1a   :  { %943 = vmatprep.subr.bf16.mxu1 %v1042_v25 }
  0x1c   :  { %916 = vmatpush3.bf16.msra.mxu0 %v1043_v26 }
  0x1d   :  { %944 = vmatpush3.bf16.msra.mxu1 %v1044_v27  ;;  %917 = vmatprep.subr.bf16.mxu0 %v1045_v28 }
  0x1e   :  { %945 = vmatprep.subr.bf16.mxu1 %v1046_v29 }
  0x20   :  { %918 = vmatpush3.bf16.msra.mxu0 %v1047_v30 }
  0x21   :  { %946 = vmatpush3.bf16.msra.mxu1 %v1048_v31  ;;  %959 = vmatprep.subr.bf16.mxu0 %v1055_v36 }
  0x22   :  { %997 = vmatprep.subr.bf16.mxu1 %v1058_v39 }
  0x23   :  { %596 = vmatmul.mubr.bf16.vlgmr.msra.gmra.mrb[0].mxu0 %v1049_v32 }
  0x24   :  { %645 = vmatmul.mubr.bf16.vlgmr.msra.gmra.mrb[0].mxu1 %v1052_v34  ;;  %960 = vmatpush3.bf16.msra.mxu0 %v1056_v37 }
  0x25   :  { %961 = vmatprep.subr.bf16.mxu0 %v1057_v38  ;;  %998 = vmatpush3.bf16.msra.mxu1 %v1058_v39 }
  0x26   :  { %999 = vmatprep.subr.bf16.mxu1 %v1061_v42  ;;  %603 = vmatprep.mubr.bf16.mxu0 %v1069_v50 }
  0x27   :  { %652 = vmatprep.mubr.bf16.mxu1 %v1071_v51 }
  0x28   :  { %962 = vmatpush3.bf16.msra.mxu0 %v1059_v40 }
  0x29   :  { %963 = vmatprep.subr.bf16.mxu0 %v1060_v41  ;;  %1000 = vmatpush3.bf16.msra.mxu1 %v1061_v42 }
  0x2a   :  { %1001 = vmatprep.subr.bf16.mxu1 %v1064_v45 }
  0x2b   :  { %604 = vmatmul.mubr.bf16.gmra.mrb[4].mxu0 %v1075_v54 }
  0x2c   :  { %964 = vmatpush3.bf16.msra.mxu0 %v1062_v43  ;;  %653 = vmatmul.mubr.bf16.gmra.mrb[4].mxu1 %v1076_v55  ;;  %v883_v43 = vld [vmem:[%s1334_s2] ss:$0 sm:$0xff] }
  0x2d   :  { %965 = vmatprep.subr.bf16.mxu0 %v1063_v44  ;;  %1002 = vmatpush3.bf16.msra.mxu1 %v1064_v45 }
  0x2e   :  { %1003 = vmatprep.subr.bf16.mxu1 %v1067_v48  ;;  %693 = vmatprep.mubr.bf16.mxu0 %v1086_v63 }
  0x2f   :  { %1013 = vmatprep.mubr.bf16.mxu1 %v1088_v1 }
  0x30   :  { %966 = vmatpush3.bf16.msra.mxu0 %v1065_v46 }
  0x31   :  { %967 = vmatprep.subr.bf16.mxu0 %v1066_v47  ;;  %1004 = vmatpush3.bf16.msra.mxu1 %v1067_v48 }
  0x32   :  { %1005 = vmatprep.subr.bf16.mxu1 %v1074_v53 }
  0x34   :  { %968 = vmatpush3.bf16.msra.mxu0 %v1068_v49 }
  0x35   :  { %969 = vmatprep.subr.bf16.mxu0 %v1073_v52  ;;  %1006 = vmatpush3.bf16.msra.mxu1 %v1074_v53 }
  0x36   :  { %1007 = vmatprep.subr.bf16.mxu1 %v1079_v58 }
  0x38   :  { %970 = vmatpush3.bf16.msra.mxu0 %v1077_v56 }
  0x39   :  { %971 = vmatprep.subr.bf16.mxu0 %v1078_v57  ;;  %1008 = vmatpush3.bf16.msra.mxu1 %v1079_v58 }
  0x3a   :  { %1009 = vmatprep.subr.bf16.mxu1 %v1082_v61 }
  0x3c   :  { %972 = vmatpush3.bf16.msra.mxu0 %v1080_v59 }
  0x3d   :  { %973 = vmatprep.subr.bf16.mxu0 %v1081_v60  ;;  %1010 = vmatpush3.bf16.msra.mxu1 %v1082_v61 }
  0x3e   :  { %1011 = vmatprep.subr.bf16.mxu1 %v1087_v0 }
  0x40   :  { %974 = vmatpush3.bf16.msra.mxu0 %v1083_v62 }
  0x41   :  { %1012 = vmatpush3.bf16.msra.mxu1 %v1087_v0 }
  0x43   :  { %694 = vmatmul.mubr.bf16.vlgmr.msra.gmra.mrb[8].mxu0 %v1084_v2 }
  0x44   :  { %701 = vmatprep.mubr.bf16.mxu0 %v1090_v3  ;;  %1014 = vmatmul.mubr.bf16.vlgmr.msra.gmra.mrb[8].mxu1 %v1089_v4 }
  0x4b   :  { %702 = vmatmul.mubr.bf16.gmra.mrb[12].mxu0 %v1092_v5 }
  0xf6   :  { %v919_v6 = vpop.f32.mrb[0].mxu0 }
  0xf7   :  { %v947_v7 = vpop.f32.mrb[0].mxu1  ;;  %v920_v8 = vpop.f32.mrb[1].mxu0 }
  0xf8   :  { %v921_v9 = vadd.f32 %v920_v8, %v919_v6  ;;  %v948_v10 = vpop.f32.mrb[1].mxu1  ;;  %v922_v11 = vpop.f32.mrb[2].mxu0 }
  0xf9   :  { %v949_v12 = vadd.f32 %v948_v10, %v947_v7  ;;  %v950_v13 = vpop.f32.mrb[2].mxu1  ;;  %v923_v14 = vpop.f32.mrb[3].mxu0 }
  0xfa   :  { %v924_v15 = vadd.f32 %v923_v14, %v922_v11  ;;  %v951_v16 = vpop.f32.mrb[3].mxu1 }
  0xfb   :  { %v647_v17 = vadd.f32 %v949_v12, %v921_v9  ;;  %v952_v18 = vadd.f32 %v951_v16, %v950_v13 }
  0xfd   :  { %v650_v19 = vadd.f32 %v952_v18, %v924_v15 }
  0xfe   :  { %v925_v20 = vpop.f32.mrb[4].mxu0 }
  0xff   :  { %v953_v21 = vpop.f32.mrb[4].mxu1  ;;  %v926_v22 = vpop.f32.mrb[5].mxu0 }
 0x100   :  { %v927_v23 = vadd.f32 %v926_v22, %v925_v20  ;;  %v954_v24 = vpop.f32.mrb[5].mxu1  ;;  %v928_v25 = vpop.f32.mrb[6].mxu0 }
 0x101   :  { %v955_v26 = vadd.f32 %v954_v24, %v953_v21  ;;  %v956_v27 = vpop.f32.mrb[6].mxu1  ;;  %v929_v28 = vpop.f32.mrb[7].mxu0 }
 0x102   :  { %v930_v29 = vadd.f32 %v929_v28, %v928_v25  ;;  %v957_v30 = vpop.f32.mrb[7].mxu1 }
 0x103   :  { %v655_v31 = vadd.f32 %v955_v26, %v927_v23  ;;  %v958_v32 = vadd.f32 %v957_v30, %v956_v27 }
 0x105   :  { %v658_v33 = vadd.f32 %v958_v32, %v930_v29 }
 0x116   :  { %v975_v34 = vpop.f32.mrb[8].mxu0 }
 0x117   :  { %v976_v35 = vpop.f32.mrb[9].mxu0  ;;  %v1015_v39 = vpop.f32.mrb[8].mxu1 }
 0x118   :  { %v977_v36 = vadd.f32 %v976_v35, %v975_v34  ;;  %v978_v37 = vpop.f32.mrb[10].mxu0  ;;  %v744_v42 = vpop.f32.mrb[9].mxu1 }
 0x119   :  { %v979_v38 = vpop.f32.mrb[11].mxu0  ;;  %v1016_v44 = vpop.f32.mrb[10].mxu1 }
 0x11a   :  { %v980_v40 = vadd.f32 %v979_v38, %v978_v37  ;;  %v696_v41 = vadd.f32 %v977_v36, %v647_v17  ;;  %v747_v47 = vpop.f32.mrb[11].mxu1 }
 0x11c   :  { %v745_v45 = vadd.f32 %v744_v42, %v696_v41  ;;  %v699_v46 = vadd.f32 %v980_v40, %v650_v19 }
 0x11e   :  { %v781_v48 = vadd.f32 %v883_v43, %v745_v45  ;;  %v748_v49 = vadd.f32 %v747_v47, %v699_v46  ;;  %v981_v50 = vpop.f32.mrb[12].mxu0 }
 0x11f   :  { %v982_v51 = vpop.f32.mrb[13].mxu0 }
 0x120   :  { %v782_v52 = vadd.f32 %v883_v43, %v748_v49  ;;  %v983_v53 = vadd.f32 %v982_v51, %v981_v50  ;;  %v984_v54 = vpop.f32.mrb[14].mxu0  ;;  %v785_v56 = vmax.f32 %v781_v48, 0.0 }
 0x121   :  { %v985_v55 = vpop.f32.mrb[15].mxu0 }
 0x122   :  { %v786_v57 = vmax.f32 %v782_v52, 0.0  ;;  %v704_v58 = vadd.f32 %v983_v53, %v655_v31  ;;  %v986_v59 = vadd.f32 %v985_v55, %v984_v54 }
 0x124   :  { %v895_v60 = vpack.c.bf16 %v786_v57, %v785_v56  ;;  %v753_v61 = vadd.f32 %v1015_v39, %v704_v58  ;;  %v707_v62 = vadd.f32 %v986_v59, %v658_v33 }
 0x126   :  { %896 = vst [vmem:[%s1335_s3] sm:$0xff] %v895_v60   ;;  %v783_v63 = vadd.f32 %v883_v43, %v753_v61  ;;  %v756_v0 = vadd.f32 %v1016_v44, %v707_v62 }
 0x128   :  { %v784_v1 = vadd.f32 %v883_v43, %v756_v0  ;;  %v787_v2 = vmax.f32 %v783_v63, 0.0 }
 0x12a   :  { %v788_v3 = vmax.f32 %v784_v1, 0.0 }
 0x12c   :  { %v900_v4 = vpack.c.bf16 %v788_v3, %v787_v2 }
 0x12e   :  { %902 = vst [vmem:[%s1335_s3 + $0x8] sm:$0xff] %v900_v4  }

// kernel: vae_forward.31
= control target key start
LH: loop header
LB: loop body
LE: loop exit
PB: predicated region body
PF: predicated region fallthrough
CT: control target
= control target key end

     0   :  { %vm137_vm0 = vcmask 516096   ;;  %vm138_vm1 = vsmask.f32 256  ;;  %v175_v0 = vlaneseq  ;;  %v392_v4 = vmov 1935823168   ;;  %s537_s0 = inlined_call_operand.vmem [shape: bf16[8,2,2,64], index: 0, kind: input, shape index: {}]   ;;  %s538_s1 = inlined_call_operand.vmem [shape: bf16[4,2,64], index: 1, kind: output, shape index: {}]  }
   0x1   :  { %v9_v1 = vld [vmem:[%s537_s0] sm:$0x1]  ;;  %v10_v2 = vld [vmem:[%s537_s0 + $0x1] sm:$0x1]  ;;  %v11_v3 = vld [vmem:[%s537_s0 + $0x2] sm:$0x1]  ;;  %v173_v5 = vunpack.c.l.s4 %v392_v4 }
   0x2   :  { %v12_v6 = vld [vmem:[%s537_s0 + $0x3] sm:$0x1]  ;;  %v26_v7 = vshrl.u32 %v9_v1, 16  ;;  %v31_v8 = vshrl.u32 %v10_v2, 16  ;;  %v36_v9 = vshrl.u32 %v11_v3, 16  ;;  %v176_v10 = vshrl.u32 %v175_v0, 7  ;;  %vm417_vm2 = vmand %vm137_vm0, %vm138_vm1 }
   0x3   :  { %v41_v11 = vshrl.u32 %v12_v6, 16  ;;  %v174_v13 = vunpack.c.0.s8 %v173_v5  ;;  %v13_v14 = vld [vmem:[%s537_s0 + $0x4] sm:$0x1]  ;;  %v393_v18 = vmov 1966171168   ;;  %vm293_vm3 = vcmask 1041409  }
   0x4   :  { %v121_v15 = vmax.bf16 %v26_v7, %v9_v1  ;;  %v122_v16 = vmax.bf16 %v31_v8, %v10_v2  ;;  %v123_v17 = vmax.bf16 %v36_v9, %v11_v3  ;;  %v306_v19 = vunpack.c.l.s4 %v393_v18  ;;  %v14_v20 = vld [vmem:[%s537_s0 + $0x5] sm:$0x1]  ;;  %v15_v21 = vld [vmem:[%s537_s0 + $0x6] sm:$0x1]  ;;  %v16_v22 = vld [vmem:[%s537_s0 + $0x7] sm:$0x1] }
   0x5   :  { %v124_v23 = vmax.bf16 %v41_v11, %v12_v6  ;;  %v46_v24 = vshrl.u32 %v13_v14, 16  ;;  %v51_v25 = vshrl.u32 %v14_v20, 16  ;;  %v17_v26 = vld [vmem:[%s537_s0 + $0x8] sm:$0x1]  ;;  %v442_v30 = vsub.s32 %v174_v13, %v176_v10  ;;  %v18_v35 = vld [vmem:[%s537_s0 + $0x9] sm:$0x1] }
   0x6   :  { %v140_v27 = vsel %vm417_vm2, %v121_v15, 4286644096  ;;  %v141_v28 = vsel %vm417_vm2, %v123_v17, 4286644096  ;;  %v143_v29 = vsel %vm417_vm2, %v122_v16, 4286644096  ;;  %v307_v37 = vunpack.c.0.s8 %v306_v19 }
   0x7   :  { %v142_v31 = vmax.bf16 %v141_v28, %v140_v27  ;;  %v144_v32 = vsel %vm417_vm2, %v124_v23, 4286644096  ;;  %v56_v33 = vshrl.u32 %v15_v21, 16  ;;  %v61_v34 = vshrl.u32 %v16_v22, 16  ;;  %v19_v40 = vld [vmem:[%s537_s0 + $0xa] sm:$0x1] }
   0x8   :  { %v145_v36 = vmax.bf16 %v144_v32, %v143_v29  ;;  %v125_v38 = vmax.bf16 %v46_v24, %v13_v14  ;;  %v126_v39 = vmax.bf16 %v51_v25, %v14_v20  ;;  %v20_v44 = vld [vmem:[%s537_s0 + $0xb] sm:$0x1]  ;;  %v66_v45 = vshrl.u32 %v17_v26, 16  ;;  %v21_v2 = vld [vmem:[%s537_s0 + $0xc] sm:$0x1] }
   0x9   :  { %v178_v41 = vrot.slane %v142_v31, %v442_v30  ;;  %v127_v42 = vmax.bf16 %v56_v33, %v15_v21  ;;  %v128_v43 = vmax.bf16 %v61_v34, %v16_v22  ;;  %v71_v49 = vshrl.u32 %v18_v35, 16  ;;  %v22_v3 = vld [vmem:[%s537_s0 + $0xd] sm:$0x1]  ;;  %v23_v4 = vld [vmem:[%s537_s0 + $0xe] sm:$0x1] }
   0xa   :  { %v192_v46 = vrot.slane %v145_v36, %v442_v30  ;;  %v146_v47 = vsel %vm417_vm2, %v125_v38, 4286644096  ;;  %v149_v48 = vsel %vm417_vm2, %v126_v39, 4286644096  ;;  %v76_v53 = vshrl.u32 %v19_v40, 16 }
   0xb   :  { %v185_v50 = vrot.slane %v178_v41, %v442_v30  ;;  %v147_v51 = vsel %vm417_vm2, %v127_v42, 4286644096  ;;  %v150_v52 = vsel %vm417_vm2, %v128_v43, 4286644096  ;;  %v81_v57 = vshrl.u32 %v20_v44, 16 }
   0xc   :  { %v199_v54 = vrot.slane %v192_v46, %v442_v30  ;;  %v148_v55 = vmax.bf16 %v147_v51, %v146_v47  ;;  %v151_v56 = vmax.bf16 %v150_v52, %v149_v48  ;;  %v129_v59 = vmax.bf16 %v66_v45, %v17_v26 }
   0xd   :  { %v284_v58 = vunpack.c.l.b16 %v185_v50  ;;  %v130_v60 = vmax.bf16 %v71_v49, %v18_v35  ;;  %v131_v61 = vmax.bf16 %v76_v53, %v19_v40  ;;  %v132_v1 = vmax.bf16 %v81_v57, %v20_v44 }
   0xe   :  { %v285_v62 = vunpack.c.l.b16 %v199_v54  ;;  %v206_v63 = vrot.slane %v148_v55, %v442_v30  ;;  %v220_v0 = vrot.slane %v151_v56, %v442_v30  ;;  %v478_v5 = vsub.s32 %v307_v37, %v176_v10  ;;  %v24_v10 = vld [vmem:[%s537_s0 + $0xf] sm:$0x1] }
   0xf   :  { %v152_v6 = vsel %vm417_vm2, %v129_v59, 4286644096  ;;  %v153_v7 = vsel %vm417_vm2, %v131_v61, 4286644096  ;;  %v155_v8 = vsel %vm417_vm2, %v130_v60, 4286644096 }
  0x10   :  { %v292_v9 = vrot.slane %v285_v62, 7  ;;  %v213_v11 = vrot.slane %v206_v63, %v442_v30  ;;  %v227_v13 = vrot.slane %v220_v0, %v442_v30  ;;  %v154_v14 = vmax.bf16 %v153_v7, %v152_v6 }
  0x11   :  { %v156_v15 = vsel %vm417_vm2, %v132_v1, 4286644096  ;;  %v86_v16 = vshrl.u32 %v21_v2, 16  ;;  %v91_v17 = vshrl.u32 %v22_v3, 16  ;;  %v96_v18 = vshrl.u32 %v23_v4, 16 }
  0x12   :  { %v294_v19 = vsel %vm293_vm3, %v292_v9, %v284_v58  ;;  %v286_v20 = vunpack.c.l.b16 %v213_v11  ;;  %v287_v21 = vunpack.c.l.b16 %v227_v13  ;;  %v157_v22 = vmax.bf16 %v156_v15, %v155_v8 }
  0x13   :  { %v301_v23 = vpack.c.b16 %v294_v19, %v294_v19  ;;  %v234_v24 = vrot.slane %v154_v14, %v442_v30  ;;  %v101_v25 = vshrl.u32 %v24_v10, 16  ;;  %v133_v26 = vmax.bf16 %v86_v16, %v21_v2 }
  0x14   :  { %v295_v27 = vrot.slane %v287_v21, 7  ;;  %v248_v28 = vrot.slane %v157_v22, %v442_v30  ;;  %v134_v29 = vmax.bf16 %v91_v17, %v22_v3  ;;  %v135_v31 = vmax.bf16 %v96_v18, %v23_v4 }
  0x15   :  { %v311_v32 = vrot.slane %v301_v23, %v478_v5  ;;  %v241_v33 = vrot.slane %v234_v24, %v442_v30  ;;  %v136_v34 = vmax.bf16 %v101_v25, %v24_v10  ;;  %v158_v35 = vsel %vm417_vm2, %v133_v26, 4286644096 }
  0x16   :  { %v296_v36 = vsel %vm293_vm3, %v295_v27, %v286_v20  ;;  %v255_v37 = vrot.slane %v248_v28, %v442_v30  ;;  %v159_v38 = vsel %vm417_vm2, %v135_v31, 4286644096  ;;  %v161_v39 = vsel %vm417_vm2, %v134_v29, 4286644096 }
  0x17   :  { %v318_v40 = vrot.slane %v311_v32, %v478_v5  ;;  %v302_v41 = vpack.c.b16 %v296_v36, %v296_v36  ;;  %v160_v42 = vmax.bf16 %v159_v38, %v158_v35  ;;  %v288_v43 = vunpack.c.l.b16 %v241_v33 }
  0x18   :  { %v289_v44 = vunpack.c.l.b16 %v255_v37  ;;  %v162_v45 = vsel %vm417_vm2, %v136_v34, 4286644096 }
  0x19   :  { %366 = vst.msk [vmem:[%s538_s1] sm:$0x1] %vm137_vm0, %v318_v40  ;;  %v325_v46 = vrot.slane %v302_v41, %v478_v5  ;;  %v163_v47 = vmax.bf16 %v162_v45, %v161_v39  ;;  %v262_v48 = vrot.slane %v160_v42, %v442_v30 }
  0x1a   :  { %v297_v49 = vrot.slane %v289_v44, 7 }
  0x1b   :  { %v332_v50 = vrot.slane %v325_v46, %v478_v5  ;;  %v269_v51 = vrot.slane %v262_v48, %v442_v30  ;;  %v276_v52 = vrot.slane %v163_v47, %v442_v30 }
  0x1c   :  { %v298_v12 = vsel %vm293_vm3, %v297_v49, %v288_v43 }
  0x1d   :  { %367 = vst.msk [vmem:[%s538_s1 + $0x1] sm:$0x1] %vm137_vm0, %v332_v50  ;;  %v303_v53 = vpack.c.b16 %v298_v12, %v298_v12  ;;  %v283_v54 = vrot.slane %v276_v52, %v442_v30  ;;  %v290_v56 = vunpack.c.l.b16 %v269_v51 }
  0x1f   :  { %v339_v55 = vrot.slane %v303_v53, %v478_v5  ;;  %v291_v57 = vunpack.c.l.b16 %v283_v54 }
  0x21   :  { %v346_v58 = vrot.slane %v339_v55, %v478_v5  ;;  %v299_v59 = vrot.slane %v291_v57, 7 }
  0x23   :  { %368 = vst.msk [vmem:[%s538_s1 + $0x2] sm:$0x1] %vm137_vm0, %v346_v58  ;;  %v300_v60 = vsel %vm293_vm3, %v299_v59, %v290_v56 }
  0x24   :  { %v304_v61 = vpack.c.b16 %v300_v60, %v300_v60 }
  0x26   :  { %v353_v62 = vrot.slane %v304_v61, %v478_v5 }
  0x28   :  { %v360_v63 = vrot.slane %v353_v62, %v478_v5 }
  0x2a   :  { %369 = vst.msk [vmem:[%s538_s1 + $0x3] sm:$0x1] %vm137_vm0, %v360_v63 }

// kernel: vae_forward.33
= control target key start
LH: loop header
LB: loop body
LE: loop exit
PB: predicated region body
PF: predicated region fallthrough
CT: control target
= control target key end

     0   :  { %v240_v1 = vmov 0   ;;  %v172_v18 = vlaneseq  ;;  %s318_s1 = inlined_call_operand.vmem [shape: bf16[128,256], index: 1, kind: input, shape index: {}]   ;;  %s319_s0 = inlined_call_operand.vmem [shape: bf16[8,128], index: 0, kind: input, shape index: {}]   ;;  %s320_s2 = inlined_call_operand.vmem [shape: f32[1,256], index: 2, kind: input, shape index: {}]   ;;  %s321_s3 = inlined_call_operand.vmem [shape: bf16[8,256], index: 3, kind: output, shape index: {}]  }
   0x1   :  { %v216_v0 = vld [vmem:[%s318_s1 + $0x4] ss:$8 sps:$4 sm:$0xff]   ;;  %152 = vmatprep.mubr.bf16.mxu0 %v240_v1  ;;  %v218_v2 = vld [vmem:[%s318_s1] ss:$8 sps:$4 sm:$0xff]   ;;  %v219_v3 = vld [vmem:[%s318_s1 + $0x14] ss:$8 sps:$4 sm:$0xff]  }
   0x2   :  { %120 = vmatprep.subr.bf16.mxu0 %v216_v0  ;;  %v221_v4 = vld [vmem:[%s318_s1 + $0x10] ss:$8 sps:$4 sm:$0xff]   ;;  %v222_v5 = vld [vmem:[%s318_s1 + $0x24] ss:$8 sps:$4 sm:$0xff]   ;;  %v224_v6 = vld [vmem:[%s318_s1 + $0x20] ss:$8 sps:$4 sm:$0xff]  }
   0x3   :  { %121 = vmatpush1.bf16.msra.mxu0 %v218_v2  ;;  %v225_v7 = vld [vmem:[%s318_s1 + $0x34] ss:$8 sps:$4 sm:$0xff]   ;;  %v227_v8 = vld [vmem:[%s318_s1 + $0x30] ss:$8 sps:$4 sm:$0xff]   ;;  %v228_v9 = vld [vmem:[%s318_s1 + $0x44] ss:$8 sps:$4 sm:$0xff]  }
   0x4   :  { %122 = vmatprep.subr.bf16.mxu0 %v219_v3  ;;  %v230_v10 = vld [vmem:[%s318_s1 + $0x40] ss:$8 sps:$4 sm:$0xff]   ;;  %v231_v11 = vld [vmem:[%s318_s1 + $0x54] ss:$8 sps:$4 sm:$0xff]   ;;  %v233_v12 = vld [vmem:[%s318_s1 + $0x50] ss:$8 sps:$4 sm:$0xff]  }
   0x5   :  { %v234_v13 = vld [vmem:[%s318_s1 + $0x64] ss:$8 sps:$4 sm:$0xff]   ;;  %v236_v14 = vld [vmem:[%s318_s1 + $0x60] ss:$8 sps:$4 sm:$0xff]   ;;  %v237_v15 = vld [vmem:[%s318_s1 + $0x74] ss:$8 sps:$4 sm:$0xff]  }
   0x6   :  { %v239_v16 = vld [vmem:[%s318_s1 + $0x70] ss:$8 sps:$4 sm:$0xff]   ;;  %v23_v17 = vld [vmem:[%s319_s0] sm:$0xf]  ;;  %v173_v19 = vshrl.u32 %v172_v18, 7 }
   0x7   :  { %123 = vmatpush1.bf16.msra.mxu0 %v221_v4  ;;  %v170_v21 = vld [vmem:[%s320_s2] sm:$0x3] }
   0x8   :  { %124 = vmatprep.subr.bf16.mxu0 %v222_v5  ;;  %v174_v20 = vsub.s32 0, %v173_v19  ;;  %v178_v22 = vsub.s32 1, %v173_v19 }
   0xa   :  { %v175_v23 = vrot.slane %v170_v21, %v174_v20  ;;  %v179_v24 = vrot.slane %v170_v21, %v178_v22 }
   0xb   :  { %125 = vmatpush1.bf16.msra.mxu0 %v224_v6 }
   0xc   :  { %126 = vmatprep.subr.bf16.mxu0 %v225_v7 }
   0xf   :  { %127 = vmatpush1.bf16.msra.mxu0 %v227_v8 }
  0x10   :  { %128 = vmatprep.subr.bf16.mxu0 %v228_v9 }
  0x13   :  { %129 = vmatpush1.bf16.msra.mxu0 %v230_v10 }
  0x14   :  { %130 = vmatprep.subr.bf16.mxu0 %v231_v11 }
  0x17   :  { %131 = vmatpush1.bf16.msra.mxu0 %v233_v12 }
  0x18   :  { %132 = vmatprep.subr.bf16.mxu0 %v234_v13 }
  0x1b   :  { %133 = vmatpush1.bf16.msra.mxu0 %v236_v14 }
  0x1c   :  { %134 = vmatprep.subr.bf16.mxu0 %v237_v15 }
  0x1f   :  { %135 = vmatpush1.bf16.msra.mxu0 %v239_v16 }
  0x22   :  { %153 = vmatmul.mubr.bf16.vlgmr.msra.gmra.mrb[0].mxu0 %v23_v17 }
  0xf5   :  { %v154_v25 = vpop.f32.mrb[0].mxu0 }
  0xf6   :  { %v182_v26 = vadd.f32 %v175_v23, %v154_v25  ;;  %v156_v27 = vpop.f32.mrb[1].mxu0 }
  0xf7   :  { %v183_v28 = vadd.f32 %v179_v24, %v156_v27  ;;  %v158_v29 = vpop.f32.mrb[2].mxu0 }
  0xf8   :  { %v159_v30 = vpop.f32.mrb[3].mxu0 }
  0xf9   :  { %v214_v31 = vpack.c.bf16 %v183_v28, %v182_v26 }
  0xfb   :  { %192 = vst [vmem:[%s321_s3] sm:$0xff] %v214_v31 }

// kernel: vae_forward.30
= control target key start
LH: loop header
LB: loop body
LE: loop exit
PB: predicated region body
PF: predicated region fallthrough
CT: control target
= control target key end

     0   :  { %s2325_s1 = inlined_call_operand.vmem [shape: bf16[1664,128], index: 1, kind: input, shape index: {}]   ;;  %s2326_s0 = inlined_call_operand.vmem [shape: bf16[32,1664], index: 0, kind: input, shape index: {}]   ;;  %s2327_s2 = inlined_call_operand.vmem [shape: f32[1,128], index: 2, kind: input, shape index: {}]   ;;  %s2328_s3 = inlined_call_operand.vmem [shape: bf16[32,128], index: 3, kind: output, shape index: {}]  }
   0x1   :  { %v1764_v0 = vld [vmem:[%s2325_s1 + $0x40] sm:$0xff]   ;;  %v1768_v4 = vld [vmem:[%s2325_s1 + $0x48] sm:$0xff]   ;;  %v1772_v8 = vld [vmem:[%s2325_s1 + $0x50] sm:$0xff]  }
   0x2   :  { %v1765_v1 = vld [vmem:[%s2325_s1 + $0xc0] sm:$0xff]   ;;  %1566 = vmatprep.subr.bf16.mxu0 %v1764_v0  ;;  %v1769_v5 = vld [vmem:[%s2325_s1 + $0xc8] sm:$0xff]   ;;  %v1773_v9 = vld [vmem:[%s2325_s1 + $0xd0] sm:$0xff]  }
   0x3   :  { %v1766_v2 = vld [vmem:[%s2325_s1] sm:$0xff]   ;;  %1594 = vmatprep.subr.bf16.mxu1 %v1765_v1  ;;  %v1770_v6 = vld [vmem:[%s2325_s1 + $0x8] sm:$0xff]   ;;  %v1774_v10 = vld [vmem:[%s2325_s1 + $0x10] sm:$0xff]  }
   0x4   :  { %v1767_v3 = vld [vmem:[%s2325_s1 + $0x80] sm:$0xff]   ;;  %1567 = vmatpush3.bf16.msra.mxu0 %v1766_v2  ;;  %v1771_v7 = vld [vmem:[%s2325_s1 + $0x88] sm:$0xff]   ;;  %v1775_v11 = vld [vmem:[%s2325_s1 + $0x90] sm:$0xff]  }
   0x5   :  { %1595 = vmatpush3.bf16.msra.mxu1 %v1767_v3  ;;  %1568 = vmatprep.subr.bf16.mxu0 %v1768_v4  ;;  %v1776_v12 = vld [vmem:[%s2325_s1 + $0x58] sm:$0xff]   ;;  %v1780_v16 = vld [vmem:[%s2325_s1 + $0x60] sm:$0xff]   ;;  %v1784_v20 = vld [vmem:[%s2325_s1 + $0x68] sm:$0xff]  }
   0x6   :  { %1596 = vmatprep.subr.bf16.mxu1 %v1769_v5  ;;  %v1777_v13 = vld [vmem:[%s2325_s1 + $0xd8] sm:$0xff]   ;;  %v1781_v17 = vld [vmem:[%s2325_s1 + $0xe0] sm:$0xff]   ;;  %v1785_v21 = vld [vmem:[%s2325_s1 + $0xe8] sm:$0xff]  }
   0x7   :  { %v1778_v14 = vld [vmem:[%s2325_s1 + $0x18] sm:$0xff]   ;;  %v1782_v18 = vld [vmem:[%s2325_s1 + $0x20] sm:$0xff]   ;;  %v1786_v22 = vld [vmem:[%s2325_s1 + $0x28] sm:$0xff]  }
   0x8   :  { %1569 = vmatpush3.bf16.msra.mxu0 %v1770_v6  ;;  %v1779_v15 = vld [vmem:[%s2325_s1 + $0x98] sm:$0xff]   ;;  %v1783_v19 = vld [vmem:[%s2325_s1 + $0xa0] sm:$0xff]   ;;  %v1787_v23 = vld [vmem:[%s2325_s1 + $0xa8] sm:$0xff]  }
   0x9   :  { %1597 = vmatpush3.bf16.msra.mxu1 %v1771_v7  ;;  %1570 = vmatprep.subr.bf16.mxu0 %v1772_v8  ;;  %v1788_v24 = vld [vmem:[%s2325_s1 + $0x70] sm:$0xff]   ;;  %v1792_v28 = vld [vmem:[%s2325_s1 + $0x78] sm:$0xff]   ;;  %v1801_v35 = vld [vmem:[%s2326_s0 + $0xc] ss:$52 sps:$4 sm:$0xff]  }
   0xa   :  { %1598 = vmatprep.subr.bf16.mxu1 %v1773_v9  ;;  %v1789_v25 = vld [vmem:[%s2325_s1 + $0xf0] sm:$0xff]   ;;  %v1793_v29 = vld [vmem:[%s2325_s1 + $0xf8] sm:$0xff]   ;;  %v1802_v36 = vld [vmem:[%s2325_s1 + $0x140] sm:$0xff]   ;;  %1100 = vmatprep.mubr.bf16.mxu1 %v1801_v35 }
   0xb   :  { %v1790_v26 = vld [vmem:[%s2325_s1 + $0x30] sm:$0xff]   ;;  %v1794_v30 = vld [vmem:[%s2325_s1 + $0x38] sm:$0xff]   ;;  %v1803_v37 = vld [vmem:[%s2325_s1 + $0x100] sm:$0xff]  }
   0xc   :  { %1571 = vmatpush3.bf16.msra.mxu0 %v1774_v10  ;;  %v1791_v27 = vld [vmem:[%s2325_s1 + $0xb0] sm:$0xff]   ;;  %v1795_v31 = vld [vmem:[%s2325_s1 + $0xb8] sm:$0xff]   ;;  %v1804_v38 = vld [vmem:[%s2325_s1 + $0x1c0] sm:$0xff]  }
   0xd   :  { %1599 = vmatpush3.bf16.msra.mxu1 %v1775_v11  ;;  %1572 = vmatprep.subr.bf16.mxu0 %v1776_v12  ;;  %v1796_v32 = vld [vmem:[%s2326_s0] ss:$52 sps:$4 sm:$0xff]   ;;  %v1798_v33 = vld [vmem:[%s2326_s0 + $0x4] ss:$52 sps:$4 sm:$0xff]   ;;  %v1799_v34 = vld [vmem:[%s2326_s0 + $0x8] ss:$52 sps:$4 sm:$0xff]  }
   0xe   :  { %1600 = vmatprep.subr.bf16.mxu1 %v1777_v13  ;;  %1051 = vmatprep.mubr.bf16.mxu0 %v1798_v33  ;;  %v1805_v39 = vld [vmem:[%s2325_s1 + $0x180] sm:$0xff]   ;;  %v1806_v40 = vld [vmem:[%s2325_s1 + $0x148] sm:$0xff]   ;;  %v1810_v44 = vld [vmem:[%s2325_s1 + $0x150] sm:$0xff]  }
   0xf   :  { %v1807_v41 = vld [vmem:[%s2325_s1 + $0x108] sm:$0xff]   ;;  %v1811_v45 = vld [vmem:[%s2325_s1 + $0x110] sm:$0xff]   ;;  %v1814_v48 = vld [vmem:[%s2325_s1 + $0x158] sm:$0xff]  }
  0x10   :  { %1573 = vmatpush3.bf16.msra.mxu0 %v1778_v14  ;;  %v1808_v42 = vld [vmem:[%s2325_s1 + $0x1c8] sm:$0xff]   ;;  %v1812_v46 = vld [vmem:[%s2325_s1 + $0x1d0] sm:$0xff]   ;;  %v1815_v49 = vld [vmem:[%s2325_s1 + $0x118] sm:$0xff]  }
  0x11   :  { %1601 = vmatpush3.bf16.msra.mxu1 %v1779_v15  ;;  %1574 = vmatprep.subr.bf16.mxu0 %v1780_v16  ;;  %v1809_v43 = vld [vmem:[%s2325_s1 + $0x188] sm:$0xff]   ;;  %v1813_v47 = vld [vmem:[%s2325_s1 + $0x190] sm:$0xff]   ;;  %v1816_v50 = vld [vmem:[%s2325_s1 + $0x1d8] sm:$0xff]  }
  0x12   :  { %1602 = vmatprep.subr.bf16.mxu1 %v1781_v17  ;;  %v1817_v51 = vld [vmem:[%s2325_s1 + $0x198] sm:$0xff]   ;;  %v1818_v52 = vld [vmem:[%s2325_s1 + $0x160] sm:$0xff]   ;;  %v1822_v56 = vld [vmem:[%s2325_s1 + $0x168] sm:$0xff]  }
  0x13   :  { %v1819_v53 = vld [vmem:[%s2325_s1 + $0x120] sm:$0xff]   ;;  %v1825_v58 = vld [vmem:[%s2326_s0 + $0x74] ss:$52 sps:$4 sm:$0xff]   ;;  %v1836_v4 = vld [vmem:[%s2325_s1 + $0x178] sm:$0xff]  }
  0x14   :  { %1575 = vmatpush3.bf16.msra.mxu0 %v1782_v18  ;;  %v1820_v54 = vld [vmem:[%s2325_s1 + $0x1e0] sm:$0xff]   ;;  %v1827_v59 = vld [vmem:[%s2325_s1 + $0x128] sm:$0xff]   ;;  %v1832_v0 = vld [vmem:[%s2325_s1 + $0x170] sm:$0xff]  }
  0x15   :  { %1603 = vmatpush3.bf16.msra.mxu1 %v1783_v19  ;;  %1576 = vmatprep.subr.bf16.mxu0 %v1784_v20  ;;  %v1821_v55 = vld [vmem:[%s2325_s1 + $0x1a0] sm:$0xff]   ;;  %v1828_v60 = vld [vmem:[%s2326_s0 + $0x68] ss:$52 sps:$4 sm:$0xff]   ;;  %v1833_v1 = vld [vmem:[%s2325_s1 + $0x130] sm:$0xff]  }
  0x16   :  { %1604 = vmatprep.subr.bf16.mxu1 %v1785_v21  ;;  %v1823_v57 = vld [vmem:[%s2326_s0 + $0x6c] ss:$52 sps:$4 sm:$0xff]   ;;  %v1829_v61 = vld [vmem:[%s2326_s0 + $0x70] ss:$52 sps:$4 sm:$0xff]   ;;  %v1837_v5 = vld [vmem:[%s2325_s1 + $0x138] sm:$0xff]  }
  0x17   :  { %v1830_v62 = vld [vmem:[%s2325_s1 + $0x1e8] sm:$0xff]   ;;  %v1834_v2 = vld [vmem:[%s2325_s1 + $0x1f0] sm:$0xff]   ;;  %v1838_v6 = vld [vmem:[%s2325_s1 + $0x1f8] sm:$0xff]  }
  0x18   :  { %1577 = vmatpush3.bf16.msra.mxu0 %v1786_v22  ;;  %v1831_v63 = vld [vmem:[%s2325_s1 + $0x1a8] sm:$0xff]   ;;  %v1835_v3 = vld [vmem:[%s2325_s1 + $0x1b0] sm:$0xff]   ;;  %v1842_v9 = vld [vmem:[%s2325_s1 + $0x1b8] sm:$0xff]  }
  0x19   :  { %1605 = vmatpush3.bf16.msra.mxu1 %v1787_v23  ;;  %1578 = vmatprep.subr.bf16.mxu0 %v1788_v24  ;;  %v1839_v7 = vld [vmem:[%s2326_s0 + $0x10] ss:$52 sps:$4 sm:$0xff]   ;;  %v1841_v8 = vld [vmem:[%s2326_s0 + $0x14] ss:$52 sps:$4 sm:$0xff]   ;;  %v1844_v11 = vld [vmem:[%s2326_s0 + $0x18] ss:$52 sps:$4 sm:$0xff]  }
  0x1a   :  { %1606 = vmatprep.subr.bf16.mxu1 %v1789_v25  ;;  %v1843_v10 = vld [vmem:[%s2325_s1 + $0x240] sm:$0xff]   ;;  %v1846_v12 = vld [vmem:[%s2326_s0 + $0x1c] ss:$52 sps:$4 sm:$0xff]   ;;  %v1850_v16 = vld [vmem:[%s2325_s1 + $0x248] sm:$0xff]  }
  0x1b   :  { %v1847_v13 = vld [vmem:[%s2325_s1 + $0x200] sm:$0xff]   ;;  %v1851_v17 = vld [vmem:[%s2325_s1 + $0x208] sm:$0xff]   ;;  %v1853_v19 = vld [vmem:[%s2326_s0 + $0x7c] ss:$52 sps:$4 sm:$0xff]  }
  0x1c   :  { %1579 = vmatpush3.bf16.msra.mxu0 %v1790_v26  ;;  %v1848_v14 = vld [vmem:[%s2325_s1 + $0x2c0] sm:$0xff]   ;;  %v1852_v18 = vld [vmem:[%s2325_s1 + $0x2c8] sm:$0xff]   ;;  %v1857_v22 = vld [vmem:[%s2325_s1 + $0x250] sm:$0xff]  }
  0x1d   :  { %1607 = vmatpush3.bf16.msra.mxu1 %v1791_v27  ;;  %1580 = vmatprep.subr.bf16.mxu0 %v1792_v28  ;;  %v1849_v15 = vld [vmem:[%s2325_s1 + $0x280] sm:$0xff]   ;;  %v1855_v20 = vld [vmem:[%s2325_s1 + $0x288] sm:$0xff]   ;;  %v1860_v24 = vld [vmem:[%s2325_s1 + $0x210] sm:$0xff]  }
  0x1e   :  { %1608 = vmatprep.subr.bf16.mxu1 %v1793_v29  ;;  %v1856_v21 = vld [vmem:[%s2326_s0 + $0x78] ss:$52 sps:$4 sm:$0xff]   ;;  %v1861_v25 = vld [vmem:[%s2326_s0 + $0x80] ss:$52 sps:$4 sm:$0xff]  }
  0x1f   :  { %v1858_v23 = vld [vmem:[%s2326_s0 + $0x84] ss:$52 sps:$4 sm:$0xff]   ;;  %v1862_v26 = vld [vmem:[%s2325_s1 + $0x2d0] sm:$0xff]  }
  0x20   :  { %1581 = vmatpush3.bf16.msra.mxu0 %v1794_v30  ;;  %v1863_v27 = vld [vmem:[%s2325_s1 + $0x290] sm:$0xff]   ;;  %v1864_v28 = vld [vmem:[%s2325_s1 + $0x258] sm:$0xff]   ;;  %v1869_v33 = vld [vmem:[%s2325_s1 + $0x220] sm:$0xff]  }
  0x21   :  { %1609 = vmatpush3.bf16.msra.mxu1 %v1795_v31  ;;  %1622 = vmatprep.subr.bf16.mxu0 %v1802_v36  ;;  %v1865_v29 = vld [vmem:[%s2325_s1 + $0x218] sm:$0xff]   ;;  %v1871_v35 = vld [vmem:[%s2325_s1 + $0x2a0] sm:$0xff]   ;;  %v1872_v36 = vld [vmem:[%s2325_s1 + $0x268] sm:$0xff]  }
  0x22   :  { %1650 = vmatprep.subr.bf16.mxu1 %v1804_v38  ;;  %v1866_v30 = vld [vmem:[%s2325_s1 + $0x2d8] sm:$0xff]   ;;  %v1874_v38 = vld [vmem:[%s2325_s1 + $0x2e8] sm:$0xff]  }
  0x23   :  { %1052 = vmatmul.mubr.bf16.vlgmr.msra.gmra.mrb[0].mxu0 %v1796_v32  ;;  %v1867_v31 = vld [vmem:[%s2325_s1 + $0x298] sm:$0xff]   ;;  %v1868_v32 = vld [vmem:[%s2325_s1 + $0x260] sm:$0xff]  }
  0x24   :  { %1101 = vmatmul.mubr.bf16.vlgmr.msra.gmra.mrb[0].mxu1 %v1799_v34  ;;  %1623 = vmatpush3.bf16.msra.mxu0 %v1803_v37  ;;  %v1870_v34 = vld [vmem:[%s2325_s1 + $0x2e0] sm:$0xff]   ;;  %v1873_v37 = vld [vmem:[%s2325_s1 + $0x228] sm:$0xff]  }
  0x25   :  { %1651 = vmatpush3.bf16.msra.mxu1 %v1805_v39  ;;  %1624 = vmatprep.subr.bf16.mxu0 %v1806_v40  ;;  %v1875_v39 = vld [vmem:[%s2325_s1 + $0x2a8] sm:$0xff]   ;;  %v1876_v40 = vld [vmem:[%s2325_s1 + $0x270] sm:$0xff]  }
  0x26   :  { %1652 = vmatprep.subr.bf16.mxu1 %v1808_v42  ;;  %1059 = vmatprep.mubr.bf16.mxu0 %v1823_v57  ;;  %v1878_v42 = vld [vmem:[%s2325_s1 + $0x2f0] sm:$0xff]  }
  0x27   :  { %1108 = vmatprep.mubr.bf16.mxu1 %v1825_v58  ;;  %v1896_v57 = vld [vmem:[%s2326_s0 + $0x94] ss:$52 sps:$4 sm:$0xff]   ;;  %v1899_v58 = vld [vmem:[%s2325_s1 + $0x318] sm:$0xff]  }
  0x28   :  { %1625 = vmatpush3.bf16.msra.mxu0 %v1807_v41  ;;  %v1877_v41 = vld [vmem:[%s2325_s1 + $0x230] sm:$0xff]  }
  0x29   :  { %1653 = vmatpush3.bf16.msra.mxu1 %v1809_v43  ;;  %1626 = vmatprep.subr.bf16.mxu0 %v1810_v44  ;;  %v1879_v43 = vld [vmem:[%s2325_s1 + $0x2b0] sm:$0xff]   ;;  %v1880_v44 = vld [vmem:[%s2325_s1 + $0x278] sm:$0xff]  }
  0x2a   :  { %1654 = vmatprep.subr.bf16.mxu1 %v1812_v46  ;;  %v1882_v46 = vld [vmem:[%s2325_s1 + $0x2f8] sm:$0xff]  }
  0x2b   :  { %1060 = vmatmul.mubr.bf16.gmra.mrb[4].mxu0 %v1828_v60  ;;  %v1900_v60 = vld [vmem:[%s2325_s1 + $0x320] sm:$0xff]  }
  0x2c   :  { %1627 = vmatpush3.bf16.msra.mxu0 %v1811_v45  ;;  %1109 = vmatmul.mubr.bf16.gmra.mrb[4].mxu1 %v1829_v61  ;;  %v1881_v45 = vld [vmem:[%s2325_s1 + $0x238] sm:$0xff]   ;;  %v1904_v61 = vld [vmem:[%s2326_s0 + $0x30] ss:$52 sps:$4 sm:$0xff]  }
  0x2d   :  { %1655 = vmatpush3.bf16.msra.mxu1 %v1813_v47  ;;  %1628 = vmatprep.subr.bf16.mxu0 %v1814_v48  ;;  %v1883_v47 = vld [vmem:[%s2326_s0 + $0x20] ss:$52 sps:$4 sm:$0xff]   ;;  %v1885_v48 = vld [vmem:[%s2326_s0 + $0x24] ss:$52 sps:$4 sm:$0xff]  }
  0x2e   :  { %1656 = vmatprep.subr.bf16.mxu1 %v1816_v50  ;;  %1149 = vmatprep.mubr.bf16.mxu0 %v1841_v8  ;;  %v1887_v50 = vld [vmem:[%s2325_s1 + $0x300] sm:$0xff]  }
  0x2f   :  { %1198 = vmatprep.mubr.bf16.mxu1 %v1846_v12 }
  0x30   :  { %1629 = vmatpush3.bf16.msra.mxu0 %v1815_v49  ;;  %v1886_v49 = vld [vmem:[%s2325_s1 + $0x2b8] sm:$0xff]  }
  0x31   :  { %1657 = vmatpush3.bf16.msra.mxu1 %v1817_v51  ;;  %1630 = vmatprep.subr.bf16.mxu0 %v1818_v52  ;;  %v1888_v51 = vld [vmem:[%s2326_s0 + $0x28] ss:$52 sps:$4 sm:$0xff]   ;;  %v1890_v52 = vld [vmem:[%s2326_s0 + $0x2c] ss:$52 sps:$4 sm:$0xff]  }
  0x32   :  { %1658 = vmatprep.subr.bf16.mxu1 %v1820_v54  ;;  %v1892_v54 = vld [vmem:[%s2326_s0 + $0x8c] ss:$52 sps:$4 sm:$0xff]  }
  0x34   :  { %1631 = vmatpush3.bf16.msra.mxu0 %v1819_v53  ;;  %v1891_v53 = vld [vmem:[%s2325_s1 + $0x308] sm:$0xff]  }
  0x35   :  { %1659 = vmatpush3.bf16.msra.mxu1 %v1821_v55  ;;  %1632 = vmatprep.subr.bf16.mxu0 %v1822_v56  ;;  %v1894_v55 = vld [vmem:[%s2326_s0 + $0x88] ss:$52 sps:$4 sm:$0xff]   ;;  %v1895_v56 = vld [vmem:[%s2325_s1 + $0x310] sm:$0xff]  }
  0x36   :  { %1660 = vmatprep.subr.bf16.mxu1 %v1830_v62  ;;  %v1901_v62 = vld [vmem:[%s2325_s1 + $0x328] sm:$0xff]  }
  0x38   :  { %1633 = vmatpush3.bf16.msra.mxu0 %v1827_v59  ;;  %v1898_v59 = vld [vmem:[%s2326_s0 + $0x90] ss:$52 sps:$4 sm:$0xff]  }
  0x39   :  { %1661 = vmatpush3.bf16.msra.mxu1 %v1831_v63  ;;  %1634 = vmatprep.subr.bf16.mxu0 %v1832_v0  ;;  %v1902_v63 = vld [vmem:[%s2325_s1 + $0x330] sm:$0xff]   ;;  %v1903_v0 = vld [vmem:[%s2325_s1 + $0x338] sm:$0xff]  }
  0x3a   :  { %1662 = vmatprep.subr.bf16.mxu1 %v1834_v2 }
  0x3c   :  { %1635 = vmatpush3.bf16.msra.mxu0 %v1833_v1  ;;  %v1905_v1 = vld [vmem:[%s2326_s0 + $0x98] ss:$52 sps:$4 sm:$0xff]  }
  0x3d   :  { %1663 = vmatpush3.bf16.msra.mxu1 %v1835_v3  ;;  %1636 = vmatprep.subr.bf16.mxu0 %v1836_v4 }
  0x3e   :  { %1664 = vmatprep.subr.bf16.mxu1 %v1838_v6 }
  0x40   :  { %1637 = vmatpush3.bf16.msra.mxu0 %v1837_v5 }
  0x41   :  { %1665 = vmatpush3.bf16.msra.mxu1 %v1842_v9  ;;  %1678 = vmatprep.subr.bf16.mxu0 %v1843_v10 }
  0x42   :  { %1706 = vmatprep.subr.bf16.mxu1 %v1848_v14 }
  0x43   :  { %1150 = vmatmul.mubr.bf16.vlgmr.msra.gmra.mrb[8].mxu0 %v1839_v7 }
  0x44   :  { %1679 = vmatpush3.bf16.msra.mxu0 %v1847_v13  ;;  %1199 = vmatmul.mubr.bf16.vlgmr.msra.gmra.mrb[8].mxu1 %v1844_v11 }
  0x45   :  { %1707 = vmatpush3.bf16.msra.mxu1 %v1849_v15  ;;  %1680 = vmatprep.subr.bf16.mxu0 %v1850_v16 }
  0x46   :  { %1708 = vmatprep.subr.bf16.mxu1 %v1852_v18  ;;  %1157 = vmatprep.mubr.bf16.mxu0 %v1853_v19 }
  0x47   :  { %1206 = vmatprep.mubr.bf16.mxu1 %v1858_v23 }
  0x48   :  { %1681 = vmatpush3.bf16.msra.mxu0 %v1851_v17 }
  0x49   :  { %1709 = vmatpush3.bf16.msra.mxu1 %v1855_v20  ;;  %1682 = vmatprep.subr.bf16.mxu0 %v1857_v22 }
  0x4a   :  { %1710 = vmatprep.subr.bf16.mxu1 %v1862_v26 }
  0x4b   :  { %1158 = vmatmul.mubr.bf16.gmra.mrb[12].mxu0 %v1856_v21 }
  0x4c   :  { %1683 = vmatpush3.bf16.msra.mxu0 %v1860_v24  ;;  %1207 = vmatmul.mubr.bf16.gmra.mrb[12].mxu1 %v1861_v25 }
  0x4d   :  { %1711 = vmatpush3.bf16.msra.mxu1 %v1863_v27  ;;  %1684 = vmatprep.subr.bf16.mxu0 %v1864_v28 }
  0x4e   :  { %1712 = vmatprep.subr.bf16.mxu1 %v1866_v30  ;;  %1247 = vmatprep.mubr.bf16.mxu0 %v1885_v48 }
  0x4f   :  { %1296 = vmatprep.mubr.bf16.mxu1 %v1890_v52 }
  0x50   :  { %1685 = vmatpush3.bf16.msra.mxu0 %v1865_v29 }
  0x51   :  { %1713 = vmatpush3.bf16.msra.mxu1 %v1867_v31  ;;  %1686 = vmatprep.subr.bf16.mxu0 %v1868_v32 }
  0x52   :  { %1714 = vmatprep.subr.bf16.mxu1 %v1870_v34 }
  0x54   :  { %1687 = vmatpush3.bf16.msra.mxu0 %v1869_v33 }
  0x55   :  { %1715 = vmatpush3.bf16.msra.mxu1 %v1871_v35  ;;  %1688 = vmatprep.subr.bf16.mxu0 %v1872_v36 }
  0x56   :  { %1716 = vmatprep.subr.bf16.mxu1 %v1874_v38 }
  0x58   :  { %1689 = vmatpush3.bf16.msra.mxu0 %v1873_v37 }
  0x59   :  { %1717 = vmatpush3.bf16.msra.mxu1 %v1875_v39  ;;  %1690 = vmatprep.subr.bf16.mxu0 %v1876_v40 }
  0x5a   :  { %1718 = vmatprep.subr.bf16.mxu1 %v1878_v42 }
  0x5c   :  { %1691 = vmatpush3.bf16.msra.mxu0 %v1877_v41 }
  0x5d   :  { %1719 = vmatpush3.bf16.msra.mxu1 %v1879_v43  ;;  %1692 = vmatprep.subr.bf16.mxu0 %v1880_v44 }
  0x5e   :  { %1720 = vmatprep.subr.bf16.mxu1 %v1882_v46 }
  0x60   :  { %1693 = vmatpush3.bf16.msra.mxu0 %v1881_v45 }
  0x61   :  { %1721 = vmatpush3.bf16.msra.mxu1 %v1886_v49  ;;  %1744 = vmatprep.subr.bf16.mxu0 %v1887_v50 }
  0x63   :  { %1248 = vmatmul.mubr.bf16.vlgmr.msra.gmra.mrb[16].mxu0 %v1883_v47 }
  0x64   :  { %1745 = vmatpush3.bf16.msra.mxu0 %v1887_v50  ;;  %1297 = vmatmul.mubr.bf16.vlgmr.msra.gmra.mrb[16].mxu1 %v1888_v51 }
  0x65   :  { %1746 = vmatprep.subr.bf16.mxu0 %v1891_v53  ;;  %1255 = vmatprep.mubr.bf16.mxu0 %v1892_v54 }
  0x66   :  { %1304 = vmatprep.mubr.bf16.mxu1 %v1896_v57 }
  0x68   :  { %1747 = vmatpush3.bf16.msra.mxu0 %v1891_v53 }
  0x69   :  { %1748 = vmatprep.subr.bf16.mxu0 %v1895_v56 }
  0x6b   :  { %1256 = vmatmul.mubr.bf16.gmra.mrb[20].mxu0 %v1894_v55 }
  0x6c   :  { %1749 = vmatpush3.bf16.msra.mxu0 %v1895_v56  ;;  %1305 = vmatmul.mubr.bf16.gmra.mrb[20].mxu1 %v1898_v59 }
  0x6d   :  { %1750 = vmatprep.subr.bf16.mxu0 %v1899_v58  ;;  %1760 = vmatprep.mubr.bf16.mxu0 %v1904_v61 }
  0x70   :  { %1751 = vmatpush3.bf16.msra.mxu0 %v1899_v58 }
  0x71   :  { %1752 = vmatprep.subr.bf16.mxu0 %v1900_v60 }
  0x74   :  { %1753 = vmatpush3.bf16.msra.mxu0 %v1900_v60 }
  0x75   :  { %1754 = vmatprep.subr.bf16.mxu0 %v1901_v62 }
  0x78   :  { %1755 = vmatpush3.bf16.msra.mxu0 %v1901_v62 }
  0x79   :  { %1756 = vmatprep.subr.bf16.mxu0 %v1902_v63 }
  0x7c   :  { %1757 = vmatpush3.bf16.msra.mxu0 %v1902_v63 }
  0x7d   :  { %1758 = vmatprep.subr.bf16.mxu0 %v1903_v0 }
  0x80   :  { %1759 = vmatpush3.bf16.msra.mxu0 %v1903_v0 }
  0x83   :  { %1761 = vmatmul.mubr.bf16.vlgmr.msra.gmra.mrb[24].mxu0 %v1905_v1 }
  0xf6   :  { %v1582_v2 = vpop.f32.mrb[0].mxu0 }
  0xf7   :  { %v1610_v3 = vpop.f32.mrb[0].mxu1  ;;  %v1583_v4 = vpop.f32.mrb[1].mxu0 }
  0xf8   :  { %v1584_v5 = vadd.f32 %v1583_v4, %v1582_v2  ;;  %v1611_v6 = vpop.f32.mrb[1].mxu1  ;;  %v1585_v7 = vpop.f32.mrb[2].mxu0 }
  0xf9   :  { %v1612_v8 = vadd.f32 %v1611_v6, %v1610_v3  ;;  %v1613_v9 = vpop.f32.mrb[2].mxu1  ;;  %v1586_v10 = vpop.f32.mrb[3].mxu0 }
  0xfa   :  { %v1587_v11 = vadd.f32 %v1586_v10, %v1585_v7  ;;  %v1614_v12 = vpop.f32.mrb[3].mxu1 }
  0xfb   :  { %v1103_v13 = vadd.f32 %v1612_v8, %v1584_v5  ;;  %v1615_v14 = vadd.f32 %v1614_v12, %v1613_v9 }
  0xfd   :  { %v1106_v15 = vadd.f32 %v1615_v14, %v1587_v11 }
  0xfe   :  { %v1588_v16 = vpop.f32.mrb[4].mxu0 }
  0xff   :  { %v1616_v17 = vpop.f32.mrb[4].mxu1  ;;  %v1589_v18 = vpop.f32.mrb[5].mxu0 }
 0x100   :  { %v1617_v19 = vpop.f32.mrb[5].mxu1  ;;  %v1590_v20 = vadd.f32 %v1589_v18, %v1588_v16  ;;  %v1591_v22 = vpop.f32.mrb[6].mxu0 }
 0x101   :  { %v1618_v21 = vadd.f32 %v1617_v19, %v1616_v17  ;;  %v1619_v23 = vpop.f32.mrb[6].mxu1  ;;  %v1592_v24 = vpop.f32.mrb[7].mxu0 }
 0x102   :  { %v1620_v25 = vpop.f32.mrb[7].mxu1  ;;  %v1593_v27 = vadd.f32 %v1592_v24, %v1591_v22 }
 0x103   :  { %v1111_v26 = vadd.f32 %v1618_v21, %v1590_v20  ;;  %v1621_v28 = vadd.f32 %v1620_v25, %v1619_v23 }
 0x105   :  { %v1114_v29 = vadd.f32 %v1621_v28, %v1593_v27 }
 0x116   :  { %v1638_v30 = vpop.f32.mrb[8].mxu0 }
 0x117   :  { %v1639_v31 = vpop.f32.mrb[9].mxu0  ;;  %v1666_v34 = vpop.f32.mrb[8].mxu1 }
 0x118   :  { %v1640_v32 = vadd.f32 %v1639_v31, %v1638_v30  ;;  %v1641_v33 = vpop.f32.mrb[10].mxu0  ;;  %v1667_v38 = vpop.f32.mrb[9].mxu1  ;;  %v1546_v31 = vld [vmem:[%s2327_s2] ss:$0 sm:$0xff] }
 0x119   :  { %v1642_v35 = vpop.f32.mrb[11].mxu0  ;;  %v1668_v39 = vadd.f32 %v1667_v38, %v1666_v34  ;;  %v1669_v40 = vpop.f32.mrb[10].mxu1 }
 0x11a   :  { %v1152_v36 = vadd.f32 %v1640_v32, %v1103_v13  ;;  %v1643_v37 = vadd.f32 %v1642_v35, %v1641_v33  ;;  %v1670_v42 = vpop.f32.mrb[11].mxu1 }
 0x11b   :  { %v1671_v44 = vadd.f32 %v1670_v42, %v1669_v40 }
 0x11c   :  { %v1155_v41 = vadd.f32 %v1643_v37, %v1106_v15  ;;  %v1201_v43 = vadd.f32 %v1668_v39, %v1152_v36 }
 0x11e   :  { %v1204_v45 = vadd.f32 %v1671_v44, %v1155_v41  ;;  %v1644_v46 = vpop.f32.mrb[12].mxu0 }
 0x11f   :  { %v1645_v47 = vpop.f32.mrb[13].mxu0  ;;  %v1672_v50 = vpop.f32.mrb[12].mxu1 }
 0x120   :  { %v1646_v48 = vadd.f32 %v1645_v47, %v1644_v46  ;;  %v1647_v49 = vpop.f32.mrb[14].mxu0  ;;  %v1673_v54 = vpop.f32.mrb[13].mxu1 }
 0x121   :  { %v1648_v51 = vpop.f32.mrb[15].mxu0  ;;  %v1674_v55 = vadd.f32 %v1673_v54, %v1672_v50  ;;  %v1675_v56 = vpop.f32.mrb[14].mxu1 }
 0x122   :  { %v1160_v52 = vadd.f32 %v1646_v48, %v1111_v26  ;;  %v1649_v53 = vadd.f32 %v1648_v51, %v1647_v49  ;;  %v1676_v58 = vpop.f32.mrb[15].mxu1 }
 0x123   :  { %v1677_v60 = vadd.f32 %v1676_v58, %v1675_v56 }
 0x124   :  { %v1163_v57 = vadd.f32 %v1649_v53, %v1114_v29  ;;  %v1209_v59 = vadd.f32 %v1674_v55, %v1160_v52 }
 0x126   :  { %v1212_v61 = vadd.f32 %v1677_v60, %v1163_v57 }
 0x136   :  { %v1694_v62 = vpop.f32.mrb[16].mxu0 }
 0x137   :  { %v1695_v63 = vpop.f32.mrb[17].mxu0  ;;  %v1722_v4 = vpop.f32.mrb[16].mxu1 }
 0x138   :  { %v1696_v0 = vadd.f32 %v1695_v63, %v1694_v62  ;;  %v1697_v1 = vpop.f32.mrb[18].mxu0  ;;  %v1723_v6 = vpop.f32.mrb[17].mxu1 }
 0x139   :  { %v1698_v2 = vpop.f32.mrb[19].mxu0  ;;  %v1724_v8 = vadd.f32 %v1723_v6, %v1722_v4  ;;  %v1725_v9 = vpop.f32.mrb[18].mxu1 }
 0x13a   :  { %v1250_v3 = vadd.f32 %v1696_v0, %v1201_v43  ;;  %v1699_v5 = vadd.f32 %v1698_v2, %v1697_v1  ;;  %v1726_v10 = vpop.f32.mrb[19].mxu1 }
 0x13b   :  { %v1727_v11 = vadd.f32 %v1726_v10, %v1725_v9 }
 0x13c   :  { %v1253_v7 = vadd.f32 %v1699_v5, %v1204_v45  ;;  %v1299_v13 = vadd.f32 %v1724_v8, %v1250_v3 }
 0x13e   :  { %v1700_v12 = vpop.f32.mrb[20].mxu0  ;;  %v1302_v17 = vadd.f32 %v1727_v11, %v1253_v7 }
 0x13f   :  { %v1701_v14 = vpop.f32.mrb[21].mxu0  ;;  %v1728_v20 = vpop.f32.mrb[20].mxu1 }
 0x140   :  { %v1702_v15 = vadd.f32 %v1701_v14, %v1700_v12  ;;  %v1703_v16 = vpop.f32.mrb[22].mxu0  ;;  %v1729_v22 = vpop.f32.mrb[21].mxu1 }
 0x141   :  { %v1704_v18 = vpop.f32.mrb[23].mxu0  ;;  %v1730_v24 = vadd.f32 %v1729_v22, %v1728_v20  ;;  %v1731_v25 = vpop.f32.mrb[22].mxu1 }
 0x142   :  { %v1258_v19 = vadd.f32 %v1702_v15, %v1209_v59  ;;  %v1705_v21 = vadd.f32 %v1704_v18, %v1703_v16  ;;  %v1732_v26 = vpop.f32.mrb[23].mxu1 }
 0x143   :  { %v1733_v27 = vadd.f32 %v1732_v26, %v1731_v25 }
 0x144   :  { %v1261_v23 = vadd.f32 %v1705_v21, %v1212_v61  ;;  %v1307_v28 = vadd.f32 %v1730_v24, %v1258_v19 }
 0x146   :  { %v1310_v29 = vadd.f32 %v1733_v27, %v1261_v23 }
 0x156   :  { %v1762_v30 = vpop.f32.mrb[24].mxu0 }
 0x157   :  { %v1356_v32 = vadd.f32 %v1762_v30, %v1307_v28  ;;  %v1347_v33 = vpop.f32.mrb[25].mxu0 }
 0x158   :  { %v1348_v34 = vadd.f32 %v1347_v33, %v1299_v13  ;;  %v1763_v35 = vpop.f32.mrb[26].mxu0 }
 0x159   :  { %v1386_v36 = vadd.f32 %v1546_v31, %v1356_v32  ;;  %v1359_v37 = vadd.f32 %v1763_v35, %v1310_v29  ;;  %v1350_v38 = vpop.f32.mrb[27].mxu0 }
 0x15a   :  { %v1384_v39 = vadd.f32 %v1546_v31, %v1348_v34  ;;  %v1351_v40 = vadd.f32 %v1350_v38, %v1302_v17 }
 0x15b   :  { %v1387_v41 = vadd.f32 %v1546_v31, %v1359_v37  ;;  %v1390_v43 = vmax.f32 %v1386_v36, 0.0 }
 0x15c   :  { %v1385_v42 = vadd.f32 %v1546_v31, %v1351_v40  ;;  %v1388_v45 = vmax.f32 %v1384_v39, 0.0 }
 0x15d   :  { %v1391_v44 = vmax.f32 %v1387_v41, 0.0 }
 0x15e   :  { %v1389_v46 = vmax.f32 %v1385_v42, 0.0 }
 0x15f   :  { %v1563_v47 = vpack.c.bf16 %v1391_v44, %v1390_v43 }
 0x160   :  { %v1558_v48 = vpack.c.bf16 %v1389_v46, %v1388_v45 }
 0x161   :  { %1565 = vst [vmem:[%s2328_s3 + $0x8] sm:$0xff] %v1563_v47  }
 0x162   :  { %1559 = vst [vmem:[%s2328_s3] sm:$0xff] %v1558_v48  }

// kernel: vae_forward.32
= control target key start
LH: loop header
LB: loop body
LE: loop exit
PB: predicated region body
PF: predicated region fallthrough
CT: control target
= control target key end

     0   :  { %v274_v35 = vlaneseq  ;;  %s504_s1 = inlined_call_operand.vmem [shape: bf16[256,256], index: 1, kind: input, shape index: {}]   ;;  %s505_s0 = inlined_call_operand.vmem [shape: bf16[8,256], index: 0, kind: input, shape index: {}]   ;;  %s506_s2 = inlined_call_operand.vmem [shape: f32[1,256], index: 2, kind: input, shape index: {}]   ;;  %s507_s3 = inlined_call_operand.vmem [shape: f32[8,256], index: 3, kind: output, shape index: {}]  }
   0x1   :  { %v326_v0 = vld [vmem:[%s504_s1 + $0x4] ss:$8 sps:$4 sm:$0xff]   ;;  %v328_v1 = vld [vmem:[%s504_s1] ss:$8 sps:$4 sm:$0xff]   ;;  %v329_v2 = vld [vmem:[%s504_s1 + $0x14] ss:$8 sps:$4 sm:$0xff]  }
   0x2   :  { %222 = vmatprep.subr.bf16.mxu0 %v326_v0  ;;  %v331_v3 = vld [vmem:[%s504_s1 + $0x10] ss:$8 sps:$4 sm:$0xff]   ;;  %v332_v4 = vld [vmem:[%s504_s1 + $0x24] ss:$8 sps:$4 sm:$0xff]   ;;  %v334_v5 = vld [vmem:[%s504_s1 + $0x20] ss:$8 sps:$4 sm:$0xff]  }
   0x3   :  { %223 = vmatpush1.bf16.msra.mxu0 %v328_v1  ;;  %v335_v6 = vld [vmem:[%s504_s1 + $0x34] ss:$8 sps:$4 sm:$0xff]   ;;  %v337_v7 = vld [vmem:[%s504_s1 + $0x30] ss:$8 sps:$4 sm:$0xff]   ;;  %v338_v8 = vld [vmem:[%s504_s1 + $0x44] ss:$8 sps:$4 sm:$0xff]  }
   0x4   :  { %224 = vmatprep.subr.bf16.mxu0 %v329_v2  ;;  %v340_v9 = vld [vmem:[%s504_s1 + $0x40] ss:$8 sps:$4 sm:$0xff]   ;;  %v341_v10 = vld [vmem:[%s504_s1 + $0x54] ss:$8 sps:$4 sm:$0xff]   ;;  %v343_v11 = vld [vmem:[%s504_s1 + $0x50] ss:$8 sps:$4 sm:$0xff]  }
   0x5   :  { %v344_v12 = vld [vmem:[%s504_s1 + $0x64] ss:$8 sps:$4 sm:$0xff]   ;;  %v346_v15 = vld [vmem:[%s504_s1 + $0x60] ss:$8 sps:$4 sm:$0xff]   ;;  %v347_v16 = vld [vmem:[%s504_s1 + $0x74] ss:$8 sps:$4 sm:$0xff]  }
   0x6   :  { %v22_v13 = vld [vmem:[%s505_s0] sm:$0xff]  ;;  %v349_v17 = vld [vmem:[%s504_s1 + $0x70] ss:$8 sps:$4 sm:$0xff]   ;;  %v353_v20 = vld [vmem:[%s504_s1 + $0x94] ss:$8 sps:$4 sm:$0xff]   ;;  %v275_v36 = vshrl.u32 %v274_v35, 7 }
   0x7   :  { %225 = vmatpush1.bf16.msra.mxu0 %v331_v3  ;;  %v293_v14 = vcombine.high %v22_v13, %v22_v13  ;;  %v350_v18 = vld [vmem:[%s504_s1 + $0x84] ss:$8 sps:$4 sm:$0xff]   ;;  %v352_v19 = vld [vmem:[%s504_s1 + $0x80] ss:$8 sps:$4 sm:$0xff]   ;;  %v355_v21 = vld [vmem:[%s504_s1 + $0x90] ss:$8 sps:$4 sm:$0xff]   ;;  %v292_v34 = vcombine.low %v22_v13, %v22_v13 }
   0x8   :  { %226 = vmatprep.subr.bf16.mxu0 %v332_v4  ;;  %v356_v22 = vld [vmem:[%s504_s1 + $0xa4] ss:$8 sps:$4 sm:$0xff]   ;;  %v358_v23 = vld [vmem:[%s504_s1 + $0xa0] ss:$8 sps:$4 sm:$0xff]   ;;  %v359_v24 = vld [vmem:[%s504_s1 + $0xb4] ss:$8 sps:$4 sm:$0xff]  }
   0x9   :  { %254 = vmatprep.mubr.bf16.mxu0 %v293_v14  ;;  %v361_v25 = vld [vmem:[%s504_s1 + $0xb0] ss:$8 sps:$4 sm:$0xff]   ;;  %v362_v26 = vld [vmem:[%s504_s1 + $0xc4] ss:$8 sps:$4 sm:$0xff]   ;;  %v364_v27 = vld [vmem:[%s504_s1 + $0xc0] ss:$8 sps:$4 sm:$0xff]  }
   0xa   :  { %v365_v28 = vld [vmem:[%s504_s1 + $0xd4] ss:$8 sps:$4 sm:$0xff]   ;;  %v367_v29 = vld [vmem:[%s504_s1 + $0xd0] ss:$8 sps:$4 sm:$0xff]   ;;  %v368_v30 = vld [vmem:[%s504_s1 + $0xe4] ss:$8 sps:$4 sm:$0xff]  }
   0xb   :  { %227 = vmatpush1.bf16.msra.mxu0 %v334_v5  ;;  %v370_v31 = vld [vmem:[%s504_s1 + $0xe0] ss:$8 sps:$4 sm:$0xff]   ;;  %v371_v32 = vld [vmem:[%s504_s1 + $0xf4] ss:$8 sps:$4 sm:$0xff]   ;;  %v373_v33 = vld [vmem:[%s504_s1 + $0xf0] ss:$8 sps:$4 sm:$0xff]  }
   0xc   :  { %228 = vmatprep.subr.bf16.mxu0 %v335_v6  ;;  %v276_v37 = vsub.s32 0, %v275_v36  ;;  %v272_v38 = vld [vmem:[%s506_s2] sm:$0x3]  ;;  %v280_v39 = vsub.s32 1, %v275_v36 }
   0xe   :  { %v277_v40 = vrot.slane %v272_v38, %v276_v37  ;;  %v281_v41 = vrot.slane %v272_v38, %v280_v39 }
   0xf   :  { %229 = vmatpush1.bf16.msra.mxu0 %v337_v7 }
  0x10   :  { %230 = vmatprep.subr.bf16.mxu0 %v338_v8 }
  0x13   :  { %231 = vmatpush1.bf16.msra.mxu0 %v340_v9 }
  0x14   :  { %232 = vmatprep.subr.bf16.mxu0 %v341_v10 }
  0x17   :  { %233 = vmatpush1.bf16.msra.mxu0 %v343_v11 }
  0x18   :  { %234 = vmatprep.subr.bf16.mxu0 %v344_v12 }
  0x1b   :  { %235 = vmatpush1.bf16.msra.mxu0 %v346_v15 }
  0x1c   :  { %236 = vmatprep.subr.bf16.mxu0 %v347_v16 }
  0x1f   :  { %237 = vmatpush1.bf16.msra.mxu0 %v349_v17 }
  0x20   :  { %238 = vmatprep.subr.bf16.mxu0 %v350_v18 }
  0x23   :  { %239 = vmatpush1.bf16.msra.mxu0 %v352_v19 }
  0x24   :  { %240 = vmatprep.subr.bf16.mxu0 %v353_v20 }
  0x27   :  { %241 = vmatpush1.bf16.msra.mxu0 %v355_v21 }
  0x28   :  { %242 = vmatprep.subr.bf16.mxu0 %v356_v22 }
  0x2b   :  { %243 = vmatpush1.bf16.msra.mxu0 %v358_v23 }
  0x2c   :  { %244 = vmatprep.subr.bf16.mxu0 %v359_v24 }
  0x2f   :  { %245 = vmatpush1.bf16.msra.mxu0 %v361_v25 }
  0x30   :  { %246 = vmatprep.subr.bf16.mxu0 %v362_v26 }
  0x33   :  { %247 = vmatpush1.bf16.msra.mxu0 %v364_v27 }
  0x34   :  { %248 = vmatprep.subr.bf16.mxu0 %v365_v28 }
  0x37   :  { %249 = vmatpush1.bf16.msra.mxu0 %v367_v29 }
  0x38   :  { %250 = vmatprep.subr.bf16.mxu0 %v368_v30 }
  0x3b   :  { %251 = vmatpush1.bf16.msra.mxu0 %v370_v31 }
  0x3c   :  { %252 = vmatprep.subr.bf16.mxu0 %v371_v32 }
  0x3f   :  { %253 = vmatpush1.bf16.msra.mxu0 %v373_v33 }
  0x42   :  { %255 = vmatmul.mubr.bf16.vlgmr.msra.gmra.mrb[0].mxu0 %v292_v34 }
 0x115   :  { %v256_v42 = vpop.f32.mrb[0].mxu0 }
 0x116   :  { %v284_v43 = vadd.f32 %v277_v40, %v256_v42  ;;  %v258_v44 = vpop.f32.mrb[1].mxu0 }
 0x117   :  { %v285_v45 = vadd.f32 %v281_v41, %v258_v44  ;;  %v260_v46 = vpop.f32.mrb[2].mxu0 }
 0x118   :  { %286 = vst [vmem:[%s507_s3] sm:$0xff] %v284_v43  ;;  %v261_v47 = vpop.f32.mrb[3].mxu0 }
 0x119   :  { %287 = vst [vmem:[%s507_s3 + $0x8] sm:$0xff] %v285_v45 }

// kernel: vae_forward.34
= control target key start
LH: loop header
LB: loop body
LE: loop exit
PB: predicated region body
PF: predicated region fallthrough
CT: control target
= control target key end

     0   :  { %s354_s1 = inlined_call_operand.vmem [shape: bf16[256,128], index: 1, kind: input, shape index: {}]   ;;  %s355_s0 = inlined_call_operand.vmem [shape: bf16[8,256], index: 0, kind: input, shape index: {}]   ;;  %s356_s2 = inlined_call_operand.vmem [shape: f32[1,128], index: 2, kind: input, shape index: {}]   ;;  %s357_s3 = inlined_call_operand.vmem [shape: bf16[8,128], index: 3, kind: output, shape index: {}]  }
   0x1   :  { %v259_v0 = vld [vmem:[%s354_s1 + $0x40] sm:$0xff]   ;;  %v261_v2 = vld [vmem:[%s354_s1 + $0x48] sm:$0xff]   ;;  %v263_v4 = vld [vmem:[%s354_s1 + $0x50] sm:$0xff]  }
   0x2   :  { %v260_v1 = vld [vmem:[%s354_s1] sm:$0xff]   ;;  %237 = vmatprep.subr.bf16.mxu0 %v259_v0  ;;  %v262_v3 = vld [vmem:[%s354_s1 + $0x8] sm:$0xff]   ;;  %v264_v5 = vld [vmem:[%s354_s1 + $0x10] sm:$0xff]  }
   0x3   :  { %238 = vmatpush3.bf16.msra.mxu0 %v260_v1  ;;  %v265_v6 = vld [vmem:[%s354_s1 + $0x58] sm:$0xff]   ;;  %v267_v8 = vld [vmem:[%s354_s1 + $0x60] sm:$0xff]   ;;  %v269_v10 = vld [vmem:[%s354_s1 + $0x68] sm:$0xff]  }
   0x4   :  { %239 = vmatprep.subr.bf16.mxu0 %v261_v2  ;;  %v266_v7 = vld [vmem:[%s354_s1 + $0x18] sm:$0xff]   ;;  %v268_v9 = vld [vmem:[%s354_s1 + $0x20] sm:$0xff]   ;;  %v270_v13 = vld [vmem:[%s354_s1 + $0x28] sm:$0xff]  }
   0x5   :  { %v21_v11 = vld [vmem:[%s355_s0] sm:$0xff]  ;;  %v271_v14 = vld [vmem:[%s354_s1 + $0x70] sm:$0xff]   ;;  %v273_v16 = vld [vmem:[%s354_s1 + $0x78] sm:$0xff]  }
   0x6   :  { %v219_v12 = vcombine.high %v21_v11, %v21_v11  ;;  %v272_v15 = vld [vmem:[%s354_s1 + $0x30] sm:$0xff]   ;;  %v274_v17 = vld [vmem:[%s354_s1 + $0x38] sm:$0xff]   ;;  %v218_v18 = vcombine.low %v21_v11, %v21_v11  ;;  %v236_v21 = vld [vmem:[%s356_s2] ss:$0 sm:$0xff] }
   0x7   :  { %240 = vmatpush3.bf16.msra.mxu0 %v262_v3 }
   0x8   :  { %241 = vmatprep.subr.bf16.mxu0 %v263_v4  ;;  %189 = vmatprep.mubr.bf16.mxu0 %v219_v12 }
   0xb   :  { %242 = vmatpush3.bf16.msra.mxu0 %v264_v5 }
   0xc   :  { %243 = vmatprep.subr.bf16.mxu0 %v265_v6 }
   0xf   :  { %244 = vmatpush3.bf16.msra.mxu0 %v266_v7 }
  0x10   :  { %245 = vmatprep.subr.bf16.mxu0 %v267_v8 }
  0x13   :  { %246 = vmatpush3.bf16.msra.mxu0 %v268_v9 }
  0x14   :  { %247 = vmatprep.subr.bf16.mxu0 %v269_v10 }
  0x17   :  { %248 = vmatpush3.bf16.msra.mxu0 %v270_v13 }
  0x18   :  { %249 = vmatprep.subr.bf16.mxu0 %v271_v14 }
  0x1b   :  { %250 = vmatpush3.bf16.msra.mxu0 %v272_v15 }
  0x1c   :  { %251 = vmatprep.subr.bf16.mxu0 %v273_v16 }
  0x1f   :  { %252 = vmatpush3.bf16.msra.mxu0 %v274_v17 }
  0x22   :  { %190 = vmatmul.mubr.bf16.vlgmr.msra.gmra.mrb[0].mxu0 %v218_v18 }
  0xf5   :  { %v253_v19 = vpop.f32.mrb[0].mxu0 }
  0xf6   :  { %v254_v20 = vpop.f32.mrb[1].mxu0 }
  0xf7   :  { %v255_v22 = vadd.f32 %v254_v20, %v253_v19  ;;  %v256_v23 = vpop.f32.mrb[2].mxu0 }
  0xf8   :  { %v257_v24 = vpop.f32.mrb[3].mxu0 }
  0xf9   :  { %v210_v25 = vadd.f32 %v255_v22, %v236_v21 }
  0xfb   :  { %v211_v26 = vmax.f32 %v210_v25, 0.0 }
  0xfd   :  { %v212_v27 = vpack.c.bf16 %v211_v26, %v211_v26 }
  0xff   :  { %213 = vst [vmem:[%s357_s3] sm:$0xf] %v212_v27 }

// kernel: vae_forward.38
= control target key start
LH: loop header
LB: loop body
LE: loop exit
PB: predicated region body
PF: predicated region fallthrough
CT: control target
= control target key end

     0   :  { %s477_s1 = inlined_call_operand.vmem [shape: bf16[256,128], index: 1, kind: input, shape index: {}]   ;;  %s478_s0 = inlined_call_operand.vmem [shape: bf16[32,256], index: 0, kind: input, shape index: {}]   ;;  %s479_s2 = inlined_call_operand.vmem [shape: f32[1,128], index: 2, kind: input, shape index: {}]   ;;  %s480_s3 = inlined_call_operand.vmem [shape: bf16[32,128], index: 3, kind: output, shape index: {}]  }
   0x1   :  { %v366_v0 = vld [vmem:[%s477_s1 + $0x40] sm:$0xff]   ;;  %v368_v2 = vld [vmem:[%s477_s1 + $0x48] sm:$0xff]   ;;  %v370_v4 = vld [vmem:[%s477_s1 + $0x50] sm:$0xff]  }
   0x2   :  { %v367_v1 = vld [vmem:[%s477_s1] sm:$0xff]   ;;  %322 = vmatprep.subr.bf16.mxu0 %v366_v0  ;;  %350 = vmatprep.subr.bf16.mxu1 %v366_v0  ;;  %v369_v3 = vld [vmem:[%s477_s1 + $0x8] sm:$0xff]   ;;  %v371_v5 = vld [vmem:[%s477_s1 + $0x10] sm:$0xff]  }
   0x3   :  { %323 = vmatpush3.bf16.msra.mxu0 %v367_v1  ;;  %358 = vmatpush3.bf16.msra.mxu1 %v367_v1  ;;  %v372_v6 = vld [vmem:[%s477_s1 + $0x58] sm:$0xff]   ;;  %v374_v8 = vld [vmem:[%s477_s1 + $0x60] sm:$0xff]   ;;  %v376_v10 = vld [vmem:[%s477_s1 + $0x68] sm:$0xff]  }
   0x4   :  { %324 = vmatprep.subr.bf16.mxu0 %v368_v2  ;;  %351 = vmatprep.subr.bf16.mxu1 %v368_v2  ;;  %v373_v7 = vld [vmem:[%s477_s1 + $0x18] sm:$0xff]   ;;  %v375_v9 = vld [vmem:[%s477_s1 + $0x20] sm:$0xff]   ;;  %v377_v13 = vld [vmem:[%s477_s1 + $0x28] sm:$0xff]  }
   0x5   :  { %v384_v11 = vld [vmem:[%s478_s0 + $0x4] ss:$8 sps:$4 sm:$0xff]   ;;  %v387_v12 = vld [vmem:[%s478_s0 + $0x14] ss:$8 sps:$4 sm:$0xff]   ;;  %v382_v18 = vld [vmem:[%s478_s0] ss:$8 sps:$4 sm:$0xff]  }
   0x6   :  { %v378_v14 = vld [vmem:[%s477_s1 + $0x70] sm:$0xff]   ;;  %211 = vmatprep.mubr.bf16.mxu0 %v384_v11  ;;  %219 = vmatprep.mubr.bf16.mxu1 %v387_v12  ;;  %v380_v16 = vld [vmem:[%s477_s1 + $0x78] sm:$0xff]   ;;  %v302_v23 = vld [vmem:[%s479_s2] ss:$0 sm:$0xff] }
   0x7   :  { %325 = vmatpush3.bf16.msra.mxu0 %v369_v3  ;;  %359 = vmatpush3.bf16.msra.mxu1 %v369_v3  ;;  %v379_v15 = vld [vmem:[%s477_s1 + $0x30] sm:$0xff]   ;;  %v381_v17 = vld [vmem:[%s477_s1 + $0x38] sm:$0xff]  }
   0x8   :  { %326 = vmatprep.subr.bf16.mxu0 %v370_v4  ;;  %352 = vmatprep.subr.bf16.mxu1 %v370_v4  ;;  %v385_v19 = vld [vmem:[%s478_s0 + $0x10] ss:$8 sps:$4 sm:$0xff]  }
   0xb   :  { %327 = vmatpush3.bf16.msra.mxu0 %v371_v5  ;;  %360 = vmatpush3.bf16.msra.mxu1 %v371_v5 }
   0xc   :  { %328 = vmatprep.subr.bf16.mxu0 %v372_v6  ;;  %353 = vmatprep.subr.bf16.mxu1 %v372_v6 }
   0xf   :  { %329 = vmatpush3.bf16.msra.mxu0 %v373_v7  ;;  %361 = vmatpush3.bf16.msra.mxu1 %v373_v7 }
  0x10   :  { %330 = vmatprep.subr.bf16.mxu0 %v374_v8  ;;  %354 = vmatprep.subr.bf16.mxu1 %v374_v8 }
  0x13   :  { %331 = vmatpush3.bf16.msra.mxu0 %v375_v9  ;;  %362 = vmatpush3.bf16.msra.mxu1 %v375_v9 }
  0x14   :  { %332 = vmatprep.subr.bf16.mxu0 %v376_v10  ;;  %355 = vmatprep.subr.bf16.mxu1 %v376_v10 }
  0x17   :  { %333 = vmatpush3.bf16.msra.mxu0 %v377_v13  ;;  %363 = vmatpush3.bf16.msra.mxu1 %v377_v13 }
  0x18   :  { %334 = vmatprep.subr.bf16.mxu0 %v378_v14  ;;  %356 = vmatprep.subr.bf16.mxu1 %v378_v14 }
  0x1b   :  { %335 = vmatpush3.bf16.msra.mxu0 %v379_v15  ;;  %364 = vmatpush3.bf16.msra.mxu1 %v379_v15 }
  0x1c   :  { %336 = vmatprep.subr.bf16.mxu0 %v380_v16  ;;  %357 = vmatprep.subr.bf16.mxu1 %v380_v16 }
  0x1f   :  { %337 = vmatpush3.bf16.msra.mxu0 %v381_v17  ;;  %365 = vmatpush3.bf16.msra.mxu1 %v381_v17 }
  0x22   :  { %212 = vmatmul.mubr.bf16.vlgmr.msra.gmra.mrb[0].mxu0 %v382_v18  ;;  %220 = vmatmul.mubr.bf16.vlgmr.msra.gmra.mrb[0].mxu1 %v385_v19 }
  0xf5   :  { %v338_v20 = vpop.f32.mrb[0].mxu0  ;;  %v344_v21 = vpop.f32.mrb[0].mxu1 }
  0xf6   :  { %v339_v22 = vpop.f32.mrb[1].mxu0  ;;  %v345_v24 = vpop.f32.mrb[1].mxu1 }
  0xf7   :  { %v340_v25 = vadd.f32 %v339_v22, %v338_v20  ;;  %v346_v26 = vadd.f32 %v345_v24, %v344_v21  ;;  %v341_v27 = vpop.f32.mrb[2].mxu0  ;;  %v347_v28 = vpop.f32.mrb[2].mxu1 }
  0xf8   :  { %v342_v29 = vpop.f32.mrb[3].mxu0  ;;  %v348_v30 = vpop.f32.mrb[3].mxu1 }
  0xf9   :  { %v250_v31 = vadd.f32 %v340_v25, %v302_v23  ;;  %v252_v32 = vadd.f32 %v346_v26, %v302_v23  ;;  %v343_v33 = vadd.f32 %v342_v29, %v341_v27  ;;  %v349_v34 = vadd.f32 %v348_v30, %v347_v28 }
  0xfb   :  { %v251_v35 = vadd.f32 %v343_v33, %v302_v23  ;;  %v253_v36 = vadd.f32 %v349_v34, %v302_v23  ;;  %v254_v37 = vmax.f32 %v250_v31, 0.0  ;;  %v256_v38 = vmax.f32 %v252_v32, 0.0 }
  0xfd   :  { %v255_v39 = vmax.f32 %v251_v35, 0.0  ;;  %v257_v40 = vmax.f32 %v253_v36, 0.0 }
  0xff   :  { %v314_v41 = vpack.c.bf16 %v255_v39, %v254_v37  ;;  %v319_v42 = vpack.c.bf16 %v257_v40, %v256_v38 }
 0x101   :  { %315 = vst [vmem:[%s480_s3] sm:$0xff] %v314_v41   ;;  %321 = vst [vmem:[%s480_s3 + $0x8] sm:$0xff] %v319_v42  }

// kernel: vae_forward.42
= control target key start
LH: loop header
LB: loop body
LE: loop exit
PB: predicated region body
PF: predicated region fallthrough
CT: control target
= control target key end

     0   :  { %s980_s1 = inlined_call_operand.vmem [shape: bf16[256,128], index: 1, kind: input, shape index: {}]   ;;  %s981_s0 = inlined_call_operand.vmem [shape: bf16[128,256], index: 0, kind: input, shape index: {}]   ;;  %s982_s2 = inlined_call_operand.vmem [shape: f32[1,128], index: 2, kind: input, shape index: {}]   ;;  %s983_s3 = inlined_call_operand.vmem [shape: f32[128,128], index: 3, kind: output, shape index: {}]  }
   0x1   :  { %v691_v0 = vld [vmem:[%s980_s1 + $0x40] sm:$0xff]   ;;  %v693_v2 = vld [vmem:[%s980_s1 + $0x48] sm:$0xff]   ;;  %v695_v4 = vld [vmem:[%s980_s1 + $0x50] sm:$0xff]  }
   0x2   :  { %v692_v1 = vld [vmem:[%s980_s1] sm:$0xff]   ;;  %611 = vmatprep.subr.bf16.mxu0 %v691_v0  ;;  %675 = vmatprep.subr.bf16.mxu1 %v691_v0  ;;  %v694_v3 = vld [vmem:[%s980_s1 + $0x8] sm:$0xff]   ;;  %v696_v5 = vld [vmem:[%s980_s1 + $0x10] sm:$0xff]  }
   0x3   :  { %612 = vmatpush3.bf16.msra.mxu0 %v692_v1  ;;  %683 = vmatpush3.bf16.msra.mxu1 %v692_v1  ;;  %v697_v6 = vld [vmem:[%s980_s1 + $0x58] sm:$0xff]   ;;  %v699_v8 = vld [vmem:[%s980_s1 + $0x60] sm:$0xff]   ;;  %v701_v10 = vld [vmem:[%s980_s1 + $0x68] sm:$0xff]  }
   0x4   :  { %613 = vmatprep.subr.bf16.mxu0 %v693_v2  ;;  %676 = vmatprep.subr.bf16.mxu1 %v693_v2  ;;  %v698_v7 = vld [vmem:[%s980_s1 + $0x18] sm:$0xff]   ;;  %v700_v9 = vld [vmem:[%s980_s1 + $0x20] sm:$0xff]   ;;  %v702_v13 = vld [vmem:[%s980_s1 + $0x28] sm:$0xff]  }
   0x5   :  { %v709_v11 = vld [vmem:[%s981_s0 + $0x4] ss:$8 sps:$4 sm:$0xff]   ;;  %v703_v14 = vld [vmem:[%s980_s1 + $0x70] sm:$0xff]   ;;  %v705_v16 = vld [vmem:[%s980_s1 + $0x78] sm:$0xff]  }
   0x6   :  { %v712_v12 = vld [vmem:[%s981_s0 + $0x44] ss:$8 sps:$4 sm:$0xff]   ;;  %307 = vmatprep.mubr.bf16.mxu0 %v709_v11  ;;  %v704_v15 = vld [vmem:[%s980_s1 + $0x30] sm:$0xff]   ;;  %v706_v17 = vld [vmem:[%s980_s1 + $0x38] sm:$0xff]  }
   0x7   :  { %614 = vmatpush3.bf16.msra.mxu0 %v694_v3  ;;  %684 = vmatpush3.bf16.msra.mxu1 %v694_v3  ;;  %v707_v18 = vld [vmem:[%s981_s0] ss:$8 sps:$4 sm:$0xff]   ;;  %v713_v20 = vld [vmem:[%s981_s0 + $0x14] ss:$8 sps:$4 sm:$0xff]   ;;  %v717_v22 = vld [vmem:[%s981_s0 + $0x10] ss:$8 sps:$4 sm:$0xff]  }
   0x8   :  { %615 = vmatprep.subr.bf16.mxu0 %v695_v4  ;;  %677 = vmatprep.subr.bf16.mxu1 %v695_v4  ;;  %v710_v19 = vld [vmem:[%s981_s0 + $0x40] ss:$8 sps:$4 sm:$0xff]   ;;  %v715_v21 = vld [vmem:[%s981_s0 + $0x54] ss:$8 sps:$4 sm:$0xff]   ;;  %v718_v23 = vld [vmem:[%s981_s0 + $0x50] ss:$8 sps:$4 sm:$0xff]  }
   0x9   :  { %339 = vmatprep.mubr.bf16.mxu1 %v712_v12  ;;  %v719_v24 = vld [vmem:[%s981_s0 + $0x24] ss:$8 sps:$4 sm:$0xff]   ;;  %v723_v26 = vld [vmem:[%s981_s0 + $0x20] ss:$8 sps:$4 sm:$0xff]   ;;  %v725_v28 = vld [vmem:[%s981_s0 + $0x34] ss:$8 sps:$4 sm:$0xff]  }
   0xa   :  { %v721_v25 = vld [vmem:[%s981_s0 + $0x64] ss:$8 sps:$4 sm:$0xff]   ;;  %v724_v27 = vld [vmem:[%s981_s0 + $0x60] ss:$8 sps:$4 sm:$0xff]   ;;  %v727_v29 = vld [vmem:[%s981_s0 + $0x74] ss:$8 sps:$4 sm:$0xff]  }
   0xb   :  { %616 = vmatpush3.bf16.msra.mxu0 %v696_v5  ;;  %685 = vmatpush3.bf16.msra.mxu1 %v696_v5  ;;  %v729_v30 = vld [vmem:[%s981_s0 + $0x30] ss:$8 sps:$4 sm:$0xff]   ;;  %v914_v35 = vld [vmem:[%s982_s2] ss:$0 sm:$0xff] }
   0xc   :  { %617 = vmatprep.subr.bf16.mxu0 %v697_v6  ;;  %678 = vmatprep.subr.bf16.mxu1 %v697_v6  ;;  %v730_v31 = vld [vmem:[%s981_s0 + $0x70] ss:$8 sps:$4 sm:$0xff]  }
   0xf   :  { %618 = vmatpush3.bf16.msra.mxu0 %v698_v7  ;;  %686 = vmatpush3.bf16.msra.mxu1 %v698_v7 }
  0x10   :  { %619 = vmatprep.subr.bf16.mxu0 %v699_v8  ;;  %679 = vmatprep.subr.bf16.mxu1 %v699_v8 }
  0x13   :  { %620 = vmatpush3.bf16.msra.mxu0 %v700_v9  ;;  %687 = vmatpush3.bf16.msra.mxu1 %v700_v9 }
  0x14   :  { %621 = vmatprep.subr.bf16.mxu0 %v701_v10  ;;  %680 = vmatprep.subr.bf16.mxu1 %v701_v10 }
  0x17   :  { %622 = vmatpush3.bf16.msra.mxu0 %v702_v13  ;;  %688 = vmatpush3.bf16.msra.mxu1 %v702_v13 }
  0x18   :  { %623 = vmatprep.subr.bf16.mxu0 %v703_v14  ;;  %681 = vmatprep.subr.bf16.mxu1 %v703_v14 }
  0x1b   :  { %624 = vmatpush3.bf16.msra.mxu0 %v704_v15  ;;  %689 = vmatpush3.bf16.msra.mxu1 %v704_v15 }
  0x1c   :  { %625 = vmatprep.subr.bf16.mxu0 %v705_v16  ;;  %682 = vmatprep.subr.bf16.mxu1 %v705_v16 }
  0x1f   :  { %626 = vmatpush3.bf16.msra.mxu0 %v706_v17  ;;  %690 = vmatpush3.bf16.msra.mxu1 %v706_v17 }
  0x22   :  { %308 = vmatmul.mubr.bf16.vlgmr.msra.gmra.mrb[0].mxu0 %v707_v18  ;;  %340 = vmatmul.mubr.bf16.vlgmr.msra.gmra.mrb[0].mxu1 %v710_v19 }
  0x23   :  { %315 = vmatprep.mubr.bf16.mxu0 %v713_v20  ;;  %347 = vmatprep.mubr.bf16.mxu1 %v715_v21 }
  0x2a   :  { %316 = vmatmul.mubr.bf16.gmra.mrb[4].mxu0 %v717_v22  ;;  %348 = vmatmul.mubr.bf16.gmra.mrb[4].mxu1 %v718_v23 }
  0x2b   :  { %323 = vmatprep.mubr.bf16.mxu0 %v719_v24  ;;  %355 = vmatprep.mubr.bf16.mxu1 %v721_v25 }
  0x32   :  { %324 = vmatmul.mubr.bf16.gmra.mrb[8].mxu0 %v723_v26  ;;  %356 = vmatmul.mubr.bf16.gmra.mrb[8].mxu1 %v724_v27 }
  0x33   :  { %331 = vmatprep.mubr.bf16.mxu0 %v725_v28  ;;  %363 = vmatprep.mubr.bf16.mxu1 %v727_v29 }
  0x3a   :  { %332 = vmatmul.mubr.bf16.gmra.mrb[12].mxu0 %v729_v30  ;;  %364 = vmatmul.mubr.bf16.gmra.mrb[12].mxu1 %v730_v31 }
  0xf5   :  { %v627_v32 = vpop.f32.mrb[0].mxu0  ;;  %v651_v33 = vpop.f32.mrb[0].mxu1 }
  0xf6   :  { %v628_v34 = vpop.f32.mrb[1].mxu0  ;;  %v652_v36 = vpop.f32.mrb[1].mxu1 }
  0xf7   :  { %v629_v37 = vadd.f32 %v628_v34, %v627_v32  ;;  %v653_v38 = vadd.f32 %v652_v36, %v651_v33  ;;  %v630_v39 = vpop.f32.mrb[2].mxu0  ;;  %v654_v40 = vpop.f32.mrb[2].mxu1 }
  0xf8   :  { %v631_v41 = vpop.f32.mrb[3].mxu0  ;;  %v655_v42 = vpop.f32.mrb[3].mxu1 }
  0xf9   :  { %v430_v43 = vadd.f32 %v629_v37, %v914_v35  ;;  %v438_v44 = vadd.f32 %v653_v38, %v914_v35  ;;  %v632_v45 = vadd.f32 %v631_v41, %v630_v39  ;;  %v656_v46 = vadd.f32 %v655_v42, %v654_v40 }
  0xfb   :  { %v595_v47 = vmul.f32 -1.442695, %v430_v43  ;;  %v603_v48 = vmul.f32 -1.442695, %v438_v44  ;;  %v431_v49 = vadd.f32 %v632_v45, %v914_v35  ;;  %v439_v50 = vadd.f32 %v656_v46, %v914_v35 }
  0xfd   :  { %731 = vpow2.f32 %v595_v47  ;;  %v596_v51 = vmul.f32 -1.442695, %v431_v49  ;;  %v604_v52 = vmul.f32 -1.442695, %v439_v50  ;;  %v633_v53 = vpop.f32.mrb[4].mxu0  ;;  %v657_v54 = vpop.f32.mrb[4].mxu1 }
  0xfe   :  { %733 = vpow2.f32 %v603_v48  ;;  %v634_v55 = vpop.f32.mrb[5].mxu0  ;;  %v658_v56 = vpop.f32.mrb[5].mxu1 }
  0xff   :  { %735 = vpow2.f32 %v596_v51  ;;  %v635_v57 = vadd.f32 %v634_v55, %v633_v53  ;;  %v659_v58 = vadd.f32 %v658_v56, %v657_v54  ;;  %v636_v59 = vpop.f32.mrb[6].mxu0  ;;  %v660_v60 = vpop.f32.mrb[6].mxu1 }
 0x100   :  { %737 = vpow2.f32 %v604_v52  ;;  %v637_v61 = vpop.f32.mrb[7].mxu0  ;;  %v661_v62 = vpop.f32.mrb[7].mxu1 }
 0x101   :  { %v432_v63 = vadd.f32 %v635_v57, %v914_v35  ;;  %v440_v0 = vadd.f32 %v659_v58, %v914_v35  ;;  %v638_v1 = vadd.f32 %v637_v61, %v636_v59  ;;  %v662_v2 = vadd.f32 %v661_v62, %v660_v60 }
 0x103   :  { %v597_v3 = vmul.f32 -1.442695, %v432_v63  ;;  %v605_v4 = vmul.f32 -1.442695, %v440_v0  ;;  %v433_v5 = vadd.f32 %v638_v1, %v914_v35  ;;  %v441_v6 = vadd.f32 %v662_v2, %v914_v35 }
 0x105   :  { %739 = vpow2.f32 %v597_v3  ;;  %v598_v7 = vmul.f32 -1.442695, %v433_v5  ;;  %v606_v8 = vmul.f32 -1.442695, %v441_v6  ;;  %v639_v9 = vpop.f32.mrb[8].mxu0  ;;  %v663_v10 = vpop.f32.mrb[8].mxu1 }
 0x106   :  { %741 = vpow2.f32 %v605_v4  ;;  %v640_v11 = vpop.f32.mrb[9].mxu0  ;;  %v664_v12 = vpop.f32.mrb[9].mxu1 }
 0x107   :  { %v732_v13 = vpop.eup %731  ;;  %743 = vpow2.f32 %v598_v7  ;;  %v641_v14 = vadd.f32 %v640_v11, %v639_v9  ;;  %v665_v15 = vadd.f32 %v664_v12, %v663_v10  ;;  %v642_v16 = vpop.f32.mrb[10].mxu0 }
 0x108   :  { %v666_v17 = vpop.f32.mrb[10].mxu1  ;;  %v734_v18 = vpop.eup %733  ;;  %v494_v19 = vadd.f32 1.0, %v732_v13  ;;  %745 = vpow2.f32 %v606_v8 }
 0x109   :  { %v643_v20 = vpop.f32.mrb[11].mxu0  ;;  %v667_v21 = vpop.f32.mrb[11].mxu1  ;;  %v502_v23 = vadd.f32 1.0, %v734_v18  ;;  %v434_v24 = vadd.f32 %v641_v14, %v914_v35  ;;  %v442_v25 = vadd.f32 %v665_v15, %v914_v35 }
 0x10a   :  { %v736_v22 = vpop.eup %735  ;;  %v644_v26 = vadd.f32 %v643_v20, %v642_v16  ;;  %747 = vrcp.f32 %v494_v19  ;;  %v668_v29 = vadd.f32 %v667_v21, %v666_v17 }
 0x10b   :  { %v738_v27 = vpop.eup %737  ;;  %v495_v28 = vadd.f32 1.0, %v736_v22  ;;  %749 = vrcp.f32 %v502_v23  ;;  %v599_v31 = vmul.f32 -1.442695, %v434_v24  ;;  %v607_v32 = vmul.f32 -1.442695, %v442_v25 }
 0x10c   :  { %v503_v30 = vadd.f32 1.0, %v738_v27  ;;  %v435_v33 = vadd.f32 %v644_v26, %v914_v35  ;;  %v443_v34 = vadd.f32 %v668_v29, %v914_v35 }
 0x10d   :  { %751 = vrcp.f32 %v495_v28  ;;  %v645_v36 = vpop.f32.mrb[12].mxu0  ;;  %v669_v37 = vpop.f32.mrb[12].mxu1 }
 0x10e   :  { %753 = vrcp.f32 %v503_v30  ;;  %v600_v38 = vmul.f32 -1.442695, %v435_v33  ;;  %v608_v39 = vmul.f32 -1.442695, %v443_v34  ;;  %v646_v40 = vpop.f32.mrb[13].mxu0  ;;  %v670_v41 = vpop.f32.mrb[13].mxu1 }
 0x10f   :  { %755 = vpow2.f32 %v599_v31  ;;  %v740_v42 = vpop.eup %739  ;;  %v647_v43 = vadd.f32 %v646_v40, %v645_v36  ;;  %v671_v44 = vadd.f32 %v670_v41, %v669_v37  ;;  %v648_v45 = vpop.f32.mrb[14].mxu0 }
 0x110   :  { %757 = vpow2.f32 %v607_v32  ;;  %v672_v46 = vpop.f32.mrb[14].mxu1  ;;  %v742_v47 = vpop.eup %741  ;;  %v496_v48 = vadd.f32 1.0, %v740_v42 }
 0x111   :  { %759 = vpow2.f32 %v600_v38  ;;  %v649_v49 = vpop.f32.mrb[15].mxu0  ;;  %v673_v50 = vpop.f32.mrb[15].mxu1  ;;  %v504_v52 = vadd.f32 1.0, %v742_v47  ;;  %v436_v53 = vadd.f32 %v647_v43, %v914_v35  ;;  %v444_v54 = vadd.f32 %v671_v44, %v914_v35 }
 0x112   :  { %v744_v51 = vpop.eup %743  ;;  %761 = vpow2.f32 %v608_v39  ;;  %v650_v57 = vadd.f32 %v649_v49, %v648_v45  ;;  %v674_v58 = vadd.f32 %v673_v50, %v672_v46 }
 0x113   :  { %v746_v55 = vpop.eup %745  ;;  %763 = vrcp.f32 %v496_v48  ;;  %v497_v56 = vadd.f32 1.0, %v744_v51  ;;  %v601_v60 = vmul.f32 -1.442695, %v436_v53  ;;  %v609_v61 = vmul.f32 -1.442695, %v444_v54 }
 0x114   :  { %765 = vrcp.f32 %v504_v52  ;;  %v505_v59 = vadd.f32 1.0, %v746_v55  ;;  %v748_v62 = vpop.eup %747  ;;  %v437_v63 = vadd.f32 %v650_v57, %v914_v35  ;;  %v445_v0 = vadd.f32 %v674_v58, %v914_v35 }
 0x115   :  { %767 = vrcp.f32 %v497_v56  ;;  %v750_v1 = vpop.eup %749  ;;  %542 = vst [vmem:[%s983_s3] sm:$0xff] %v748_v62 }
 0x116   :  { %769 = vrcp.f32 %v505_v59  ;;  %550 = vst [vmem:[%s983_s3 + $0x40] sm:$0xff] %v750_v1  ;;  %v602_v3 = vmul.f32 -1.442695, %v437_v63  ;;  %v610_v4 = vmul.f32 -1.442695, %v445_v0 }
 0x117   :  { %v752_v2 = vpop.eup %751  ;;  %771 = vpow2.f32 %v601_v60 }
 0x118   :  { %v754_v5 = vpop.eup %753  ;;  %543 = vst [vmem:[%s983_s3 + $0x8] sm:$0xff] %v752_v2  ;;  %773 = vpow2.f32 %v609_v61 }
 0x119   :  { %v756_v35 = vpop.eup %755  ;;  %551 = vst [vmem:[%s983_s3 + $0x48] sm:$0xff] %v754_v5  ;;  %775 = vpow2.f32 %v602_v3 }
 0x11a   :  { %v758_v6 = vpop.eup %757  ;;  %v498_v7 = vadd.f32 1.0, %v756_v35  ;;  %777 = vpow2.f32 %v610_v4 }
 0x11b   :  { %v760_v8 = vpop.eup %759  ;;  %v506_v9 = vadd.f32 1.0, %v758_v6 }
 0x11c   :  { %v762_v10 = vpop.eup %761  ;;  %779 = vrcp.f32 %v498_v7  ;;  %v499_v11 = vadd.f32 1.0, %v760_v8 }
 0x11d   :  { %v764_v12 = vpop.eup %763  ;;  %781 = vrcp.f32 %v506_v9  ;;  %v507_v13 = vadd.f32 1.0, %v762_v10 }
 0x11e   :  { %v766_v14 = vpop.eup %765  ;;  %544 = vst [vmem:[%s983_s3 + $0x10] sm:$0xff] %v764_v12  ;;  %783 = vrcp.f32 %v499_v11 }
 0x11f   :  { %v768_v15 = vpop.eup %767  ;;  %552 = vst [vmem:[%s983_s3 + $0x50] sm:$0xff] %v766_v14  ;;  %785 = vrcp.f32 %v507_v13 }
 0x120   :  { %v770_v16 = vpop.eup %769  ;;  %545 = vst [vmem:[%s983_s3 + $0x18] sm:$0xff] %v768_v15 }
 0x121   :  { %v772_v17 = vpop.eup %771  ;;  %553 = vst [vmem:[%s983_s3 + $0x58] sm:$0xff] %v770_v16 }
 0x122   :  { %v774_v18 = vpop.eup %773  ;;  %v500_v19 = vadd.f32 1.0, %v772_v17 }
 0x123   :  { %v776_v20 = vpop.eup %775  ;;  %v508_v21 = vadd.f32 1.0, %v774_v18 }
 0x124   :  { %v778_v22 = vpop.eup %777  ;;  %787 = vrcp.f32 %v500_v19  ;;  %v501_v23 = vadd.f32 1.0, %v776_v20 }
 0x125   :  { %789 = vrcp.f32 %v508_v21  ;;  %v509_v24 = vadd.f32 1.0, %v778_v22 }
 0x126   :  { %v780_v25 = vpop.eup %779  ;;  %791 = vrcp.f32 %v501_v23 }
 0x127   :  { %v782_v26 = vpop.eup %781  ;;  %546 = vst [vmem:[%s983_s3 + $0x20] sm:$0xff] %v780_v25  ;;  %793 = vrcp.f32 %v509_v24 }
 0x128   :  { %v784_v27 = vpop.eup %783  ;;  %554 = vst [vmem:[%s983_s3 + $0x60] sm:$0xff] %v782_v26 }
 0x129   :  { %v786_v28 = vpop.eup %785  ;;  %547 = vst [vmem:[%s983_s3 + $0x28] sm:$0xff] %v784_v27 }
 0x12a   :  { %555 = vst [vmem:[%s983_s3 + $0x68] sm:$0xff] %v786_v28 }
 0x12e   :  { %v788_v29 = vpop.eup %787 }
 0x12f   :  { %v790_v30 = vpop.eup %789  ;;  %548 = vst [vmem:[%s983_s3 + $0x30] sm:$0xff] %v788_v29 }
 0x130   :  { %v792_v31 = vpop.eup %791  ;;  %556 = vst [vmem:[%s983_s3 + $0x70] sm:$0xff] %v790_v30 }
 0x131   :  { %v794_v32 = vpop.eup %793  ;;  %549 = vst [vmem:[%s983_s3 + $0x38] sm:$0xff] %v792_v31 }
 0x132   :  { %557 = vst [vmem:[%s983_s3 + $0x78] sm:$0xff] %v794_v32 }

</bundles_post_ra>
